<compile_context>
chip_gen: v6e
topology: v6e:2x2x1
jax: 0.10.0
libtpu: 0.0.40
codegen_flags: <defaults>
</compile_context>

<pallas_src>
import jax
import jax.numpy as jnp
from jax import lax
from jax.experimental import pallas as pl
from jax.experimental.pallas import tpu as pltpu


NUM_CLASSES = 15
BATCH_TILE = 64   # images per grid step; padded VMEM footprint ~6 MiB per kernel.


# ---------------------------------------------------------------------------
# Pallas kernels
# ---------------------------------------------------------------------------

def _conv1_pool_kernel(p_ref, w_ref, b_ref, out_ref):
    """conv1 + 2x2/2 max-pool + bias + ReLU, channel-major / lane-dense.

    p_ref:   (4, 25, bt*144) bf16; [offset, tap=ki*5+kj, b*144 + p*12 + q]
    w_ref:   (6, 25) bf16, b_ref: (6, 1) f32
    out_ref: (6, bt*144) bf16; rows = channel, lanes = b*144 + p*12 + q
    """
    w = w_ref[...]
    h = jnp.dot(w, p_ref[0], preferred_element_type=jnp.float32)
    for o in range(1, 4):                       # max over the 4 pooling offsets
        h = jnp.maximum(h, jnp.dot(w, p_ref[o], preferred_element_type=jnp.float32))
    out_ref[...] = jnp.maximum(h + b_ref[...], 0.0).astype(out_ref.dtype)


def _conv2_mlp_kernel(p_ref, w2_ref, b2_ref, fw1_ref, fb1_ref, fw2_ref, fb2_ref,
                      fw3_ref, fb3_ref, out_ref):
    """conv2 + pool2 + fc1/fc2/fc3 fused, for one batch tile.

    p_ref:   (4, bt, 2400) bf16; K index = pos*150 + c*25 + tap  (pos = p*4+q)
    w2_ref:  (2400, 256) bf16 = kron(I16, conv2_w(150,16)); output col = pos*16 + co
    b2_ref:  (1, 256) f32 (conv2 bias tiled per position)
    fw1_ref: (256, 120) bf16 with the PyTorch flatten order folded in,
             fw1[pos*16 + c, j] = fc1_w[j, c*16 + pos]
    out_ref: (bt, NUM_CLASSES) f32
    """
    w2 = w2_ref[...]
    h = jnp.dot(p_ref[0], w2, preferred_element_type=jnp.float32)
    for o in range(1, 4):                       # max over the 4 pooling offsets
        h = jnp.maximum(h, jnp.dot(p_ref[o], w2, preferred_element_type=jnp.float32))
    pooled = jnp.maximum(h + b2_ref[...], 0.0)                       # (bt, 256)

    z = jnp.dot(pooled.astype(jnp.bfloat16), fw1_ref[...],
                preferred_element_type=jnp.float32)
    z = jnp.maximum(z + fb1_ref[...], 0.0)
    z = jnp.dot(z.astype(jnp.bfloat16), fw2_ref[...],
                preferred_element_type=jnp.float32)
    z = jnp.maximum(z + fb2_ref[...], 0.0)
    out = jnp.dot(z.astype(jnp.bfloat16), fw3_ref[...],
                  preferred_element_type=jnp.float32) + fb3_ref[...]
    out_ref[...] = out.astype(out_ref.dtype)


# ---------------------------------------------------------------------------
# pallas_call wrappers
# ---------------------------------------------------------------------------

def conv1_pool(p1, w1, b1, bt):
    m = p1.shape[2]                               # n_pad * 144
    grid = m // (bt * 144)
    return pl.pallas_call(
        _conv1_pool_kernel,
        out_shape=jax.ShapeDtypeStruct((6, m), jnp.bfloat16),
        grid=(grid,),
        in_specs=[pl.BlockSpec((4, 25, bt * 144), lambda i: (0, 0, i)),
                  pl.BlockSpec((6, 25), lambda i: (0, 0)),
                  pl.BlockSpec((6, 1), lambda i: (0, 0))],
        out_specs=pl.BlockSpec((6, bt * 144), lambda i: (0, i)),
        compiler_params=pltpu.CompilerParams(
            dimension_semantics=("parallel",),
            vmem_limit_bytes=32 * 1024 * 1024),
    )(p1, w1, b1)


def conv2_mlp(p2, w2big, b2big, fw1, fb1, fw2, fb2, fw3, fb3, bt):
    n_pad = p2.shape[1]
    grid = n_pad // bt
    return pl.pallas_call(
        _conv2_mlp_kernel,
        out_shape=jax.ShapeDtypeStruct((n_pad, NUM_CLASSES), jnp.float32),
        grid=(grid,),
        in_specs=[pl.BlockSpec((4, bt, 2400), lambda i: (0, i, 0)),
                  pl.BlockSpec((2400, 256), lambda i: (0, 0)),
                  pl.BlockSpec((1, 256), lambda i: (0, 0)),
                  pl.BlockSpec((256, 120), lambda i: (0, 0)),
                  pl.BlockSpec((1, 120), lambda i: (0, 0)),
                  pl.BlockSpec((120, 84), lambda i: (0, 0)),
                  pl.BlockSpec((1, 84), lambda i: (0, 0)),
                  pl.BlockSpec((84, NUM_CLASSES), lambda i: (0, 0)),
                  pl.BlockSpec((1, NUM_CLASSES), lambda i: (0, 0))],
        out_specs=pl.BlockSpec((bt, NUM_CLASSES), lambda i: (i, 0)),
        compiler_params=pltpu.CompilerParams(
            dimension_semantics=("parallel",),
            vmem_limit_bytes=32 * 1024 * 1024),
    )(p2, w2big, b2big, fw1, fb1, fw2, fb2, fw3, fb3)


# ---------------------------------------------------------------------------
# Glue: im2col via static strided slices only (no gathers), bf16 patches
# ---------------------------------------------------------------------------

def _im2col_conv1(img):
    """img (N, 28, 28) bf16 -> (4, 25, N*144).

    [o, t, b*144 + p*12 + q] = img[b, 2p + di + ki, 2q + dj + kj],
    with o = di*2 + dj (pool offset) and t = ki*5 + kj (conv tap).
    """
    n = img.shape[0]
    offsets = []
    for di in (0, 1):
        for dj in (0, 1):
            taps = []
            for ki in range(5):
                for kj in range(5):
                    sl = lax.slice(img, (0, di + ki, dj + kj),
                                   (n, di + ki + 23, dj + kj + 23), (1, 2, 2))
                    taps.append(sl.reshape(n * 144))
            offsets.append(jnp.stack(taps, axis=0))          # (25, N*144)
    return jnp.stack(offsets, axis=0)                        # (4, 25, N*144)


def _im2col_conv2(pooled1, n):
    """pooled1 (6, N*144) bf16 -> (4, N, 2400).

    [o, b, pos*150 + c*25 + t] = pooled1 NCHW[b, c, 2p + di + ki, 2q + dj + kj],
    matching w2big = kron(I16, conv2_w.reshape(16,150).T).
    """
    h1 = pooled1.reshape(6, n, 12, 12).transpose(1, 2, 3, 0)  # (N,12,12,6) NHWC
    offsets = []
    for di in (0, 1):
        for dj in (0, 1):
            taps = []
            for ki in range(5):
                for kj in range(5):
                    sl = lax.slice(h1, (0, di + ki, dj + kj, 0),
                                   (n, di + ki + 7, dj + kj + 7, 6), (1, 2, 2, 1))
                    taps.append(sl)                           # (N,4,4,6)
            t = jnp.stack(taps, axis=-1)                      # (N,4,4,6,25)
            offsets.append(t.reshape(n, 2400))                # flat = pos*150 + c*25 + t
    return jnp.stack(offsets, axis=0)                         # (4, N, 2400)


# ---------------------------------------------------------------------------
# Model: parameter init + forward
# ---------------------------------------------------------------------------

def init_params(key):
    """Deterministic LeNet-style params (PyTorch-shaped: conv (O,I,kh,kw), fc (out,in))."""
    ks = jax.random.split(key, 10)

    def u(k, shape, fan_in):
        bound = 1.0 / jnp.sqrt(jnp.float32(fan_in))
        return jax.random.uniform(k, shape, jnp.float32, -bound, bound)

    return {
        "conv1_w": u(ks[0], (6, 1, 5, 5), 1 * 5 * 5),
        "conv1_b": u(ks[1], (6,), 1 * 5 * 5),
        "conv2_w": u(ks[2], (16, 6, 5, 5), 6 * 5 * 5),
        "conv2_b": u(ks[3], (16,), 6 * 5 * 5),
        "fc1_w": u(ks[4], (120, 256), 256),
        "fc1_b": u(ks[5], (120,), 256),
        "fc2_w": u(ks[6], (84, 120), 120),
        "fc2_b": u(ks[7], (84,), 120),
        "fc3_w": u(ks[8], (NUM_CLASSES, 84), 84),
        "fc3_b": u(ks[9], (NUM_CLASSES,), 84),
    }


def _round_up(n, m):
    return ((n + m - 1) // m) * m


@jax.jit
def chinese_number_cnn_forward(x, params):
    """x: (N, 1, 28, 28) float32 NCHW -> logits (N, NUM_CLASSES) float32."""
    n = x.shape[0]
    img = x[:, 0].astype(jnp.bfloat16)                         # (N, 28, 28)

    # Pad batch so every block is a multiple of 8 sublanes (keeps all reshapes/DMAs
    # tile-aligned) and a multiple of the batch tile.
    n8 = _round_up(n, 8)
    bt = min(BATCH_TILE, n8)
    n_pad = _round_up(n8, bt)
    if n_pad != n:
        img = jnp.pad(img, ((0, n_pad - n), (0, 0), (0, 0)))

    # --- conv1 (1->6, 5x5) + relu + 2x2 maxpool, channel-major / lane-dense ---
    w1 = params["conv1_w"].reshape(6, 25).astype(jnp.bfloat16)          # cols = ki*5+kj
    b1 = params["conv1_b"].reshape(6, 1)
    p1 = _im2col_conv1(img)                                             # (4, 25, n_pad*144)
    pooled1 = conv1_pool(p1, w1, b1, bt)                                # (6, n_pad*144) bf16

    # --- conv2 (6->16, 5x5) + relu + 2x2 maxpool + FC stack, fused in one kernel ---
    w2 = params["conv2_w"].reshape(16, 150).T                           # (150,16), rows c*25+t
    w2big = jnp.kron(jnp.eye(16, dtype=w2.dtype), w2).astype(jnp.bfloat16)  # (2400, 256)
    b2big = jnp.tile(params["conv2_b"], 16).reshape(1, 256)             # [pos*16 + co]
    # fc1 weight with the PyTorch flatten order (c*16 + pos) folded in (trace-time).
    fw1 = (params["fc1_w"].reshape(120, 16, 16).transpose(2, 1, 0)
           .reshape(256, 120).astype(jnp.bfloat16))                     # row = pos*16 + c
    fb1 = params["fc1_b"].reshape(1, -1)
    fw2 = params["fc2_w"].T.astype(jnp.bfloat16)
    fb2 = params["fc2_b"].reshape(1, -1)
    fw3 = params["fc3_w"].T.astype(jnp.bfloat16)
    fb3 = params["fc3_b"].reshape(1, -1)

    p2 = _im2col_conv2(pooled1, n_pad)                                  # (4, n_pad, 2400)
    logits = conv2_mlp(p2, w2big, b2big, fw1, fb1, fw2, fb2, fw3, fb3, bt)
    return logits[:n]


def reference_forward(x, params):
    """Pure-JAX f32 reference matching the PyTorch forward semantics (NCHW)."""
    dn = ("NCHW", "OIHW", "NCHW")
    y = lax.conv_general_dilated(x, params["conv1_w"], (1, 1), "VALID",
                                 dimension_numbers=dn,
                                 precision=lax.Precision.HIGHEST)
    y = jnp.maximum(y + params["conv1_b"][None, :, None, None], 0.0)
    y = lax.reduce_window(y, -jnp.inf, lax.max, (1, 1, 2, 2), (1, 1, 2, 2), "VALID")
    y = lax.conv_general_dilated(y, params["conv2_w"], (1, 1), "VALID",
                                 dimension_numbers=dn,
                                 precision=lax.Precision.HIGHEST)
    y = jnp.maximum(y + params["conv2_b"][None, :, None, None], 0.0)
    y = lax.reduce_window(y, -jnp.inf, lax.max, (1, 1, 2, 2), (1, 1, 2, 2), "VALID")
    y = y.reshape(y.shape[0], -1)
    y = jnp.maximum(y @ params["fc1_w"].T + params["fc1_b"], 0.0)
    y = jnp.maximum(y @ params["fc2_w"].T + params["fc2_b"], 0.0)
    return y @ params["fc3_w"].T + params["fc3_b"]


if __name__ == "__main__":
    key = jax.random.PRNGKey(0)
    k_x, k_x2, k_p = jax.random.split(key, 3)
    params = init_params(k_p)

    # Small demo batch (matches the PyTorch module's (N, 1, 28, 28) input).
    x = jax.random.normal(k_x, (2, 1, 28, 28), jnp.float32)
    out = jax.block_until_ready(chinese_number_cnn_forward(x, params))
    assert out.shape == (2, NUM_CLASSES), out.shape
    ref = reference_forward(x, params)
    assert jnp.allclose(out, ref, rtol=5e-2, atol=5e-2), (
        f"max abs err = {float(jnp.max(jnp.abs(out - ref)))}")

    # Exercise the multi-step batch-tiled grid + batch padding path (72 -> 2 tiles of 64).
    x2 = jax.random.normal(k_x2, (72, 1, 28, 28), jnp.float32)
    out2 = jax.block_until_ready(chinese_number_cnn_forward(x2, params))
    assert out2.shape == (72, NUM_CLASSES), out2.shape
    ref2 = reference_forward(x2, params)
    assert jnp.allclose(out2, ref2, rtol=5e-2, atol=5e-2), (
        f"max abs err = {float(jnp.max(jnp.abs(out2 - ref2)))}")

    print("KERNEL_OK")
</pallas_src>

<mosaic_0001>
module attributes {stable_mosaic.version = 11 : i64} {
  func.func @_conv1_pool_kernel(%arg0: i32, %arg1: memref<4x25x1152xbf16, #tpu.memory_space<vmem>>, %arg2: memref<6x25xbf16, #tpu.memory_space<vmem>>, %arg3: memref<6x1xf32, #tpu.memory_space<vmem>>, %arg4: memref<6x1152xbf16, #tpu.memory_space<vmem>>) attributes {dimension_semantics = [#tpu.dimension_semantics<parallel>], iteration_bounds = array<i64: 1>, scalar_prefetch = 0 : i64, scratch_operands = 0 : i64, tpu.core_type = #tpu.core_type<tc>, window_params = [{transform_indices = @transform_0, window_bounds = array<i64: 4, 25, 1152>}, {pipeline_mode = #tpu.pipeline_mode<synchronous>, transform_indices = @transform_1, window_bounds = array<i64: 6, 25>}, {pipeline_mode = #tpu.pipeline_mode<synchronous>, transform_indices = @transform_2, window_bounds = array<i64: 6, 1>}, {transform_indices = @transform_3, window_bounds = array<i64: 6, 1152>}]} {
    %c0 = arith.constant 0 : index
    %c0_0 = arith.constant 0 : index
    %0 = vector.load %arg2[%c0, %c0_0] : memref<6x25xbf16, #tpu.memory_space<vmem>>, vector<6x25xbf16>
    %c0_1 = arith.constant 0 : index
    %c0_2 = arith.constant 0 : index
    %c0_3 = arith.constant 0 : index
    %1 = vector.load %arg1[%c0_1, %c0_2, %c0_3] : memref<4x25x1152xbf16, #tpu.memory_space<vmem>>, vector<1x25x1152xbf16>
    %2 = vector.shape_cast %1 : vector<1x25x1152xbf16> to vector<25x1152xbf16>
    %cst = arith.constant dense<0.000000e+00> : vector<6x1152xf32>
    %3 = tpu.matmul %0, %2, %cst {dimension_numbers = #tpu.dot_dimension_numbers<[1], [0], [0], [1], [0, 0, 1, 1], [], []>} : vector<6x25xbf16>, vector<25x1152xbf16>, vector<6x1152xf32> -> vector<6x1152xf32>
    %c1 = arith.constant 1 : index
    %c0_4 = arith.constant 0 : index
    %c0_5 = arith.constant 0 : index
    %4 = vector.load %arg1[%c1, %c0_4, %c0_5] : memref<4x25x1152xbf16, #tpu.memory_space<vmem>>, vector<1x25x1152xbf16>
    %5 = vector.shape_cast %4 : vector<1x25x1152xbf16> to vector<25x1152xbf16>
    %cst_6 = arith.constant dense<0.000000e+00> : vector<6x1152xf32>
    %6 = tpu.matmul %0, %5, %cst_6 {dimension_numbers = #tpu.dot_dimension_numbers<[1], [0], [0], [1], [0, 0, 1, 1], [], []>} : vector<6x25xbf16>, vector<25x1152xbf16>, vector<6x1152xf32> -> vector<6x1152xf32>
    %7 = arith.maximumf %3, %6 : vector<6x1152xf32>
    %c2 = arith.constant 2 : index
    %c0_7 = arith.constant 0 : index
    %c0_8 = arith.constant 0 : index
    %8 = vector.load %arg1[%c2, %c0_7, %c0_8] : memref<4x25x1152xbf16, #tpu.memory_space<vmem>>, vector<1x25x1152xbf16>
    %9 = vector.shape_cast %8 : vector<1x25x1152xbf16> to vector<25x1152xbf16>
    %cst_9 = arith.constant dense<0.000000e+00> : vector<6x1152xf32>
    %10 = tpu.matmul %0, %9, %cst_9 {dimension_numbers = #tpu.dot_dimension_numbers<[1], [0], [0], [1], [0, 0, 1, 1], [], []>} : vector<6x25xbf16>, vector<25x1152xbf16>, vector<6x1152xf32> -> vector<6x1152xf32>
    %11 = arith.maximumf %7, %10 : vector<6x1152xf32>
    %c3 = arith.constant 3 : index
    %c0_10 = arith.constant 0 : index
    %c0_11 = arith.constant 0 : index
    %12 = vector.load %arg1[%c3, %c0_10, %c0_11] : memref<4x25x1152xbf16, #tpu.memory_space<vmem>>, vector<1x25x1152xbf16>
    %13 = vector.shape_cast %12 : vector<1x25x1152xbf16> to vector<25x1152xbf16>
    %cst_12 = arith.constant dense<0.000000e+00> : vector<6x1152xf32>
    %14 = tpu.matmul %0, %13, %cst_12 {dimension_numbers = #tpu.dot_dimension_numbers<[1], [0], [0], [1], [0, 0, 1, 1], [], []>} : vector<6x25xbf16>, vector<25x1152xbf16>, vector<6x1152xf32> -> vector<6x1152xf32>
    %15 = arith.maximumf %11, %14 : vector<6x1152xf32>
    %c0_13 = arith.constant 0 : index
    %c0_14 = arith.constant 0 : index
    %16 = vector.load %arg3[%c0_13, %c0_14] : memref<6x1xf32, #tpu.memory_space<vmem>>, vector<6x1xf32>
    %17 = vector.broadcast %16 : vector<6x1xf32> to vector<6x1152xf32>
    %18 = arith.addf %15, %17 : vector<6x1152xf32>
    %cst_15 = arith.constant 0.000000e+00 : f32
    %19 = vector.broadcast %cst_15 : f32 to vector<6x1152xf32>
    %20 = arith.maximumf %18, %19 : vector<6x1152xf32>
    %21 = arith.truncf %20 : vector<6x1152xf32> to vector<6x1152xbf16>
    %c0_16 = arith.constant 0 : index
    %c0_17 = arith.constant 0 : index
    %22 = vector.load %arg4[%c0_16, %c0_17] : memref<6x1152xbf16, #tpu.memory_space<vmem>>, vector<6x1152xbf16>
    tpu.vector_store %arg4[%c0_16, %c0_17], %21 {strides = array<i32>} : memref<6x1152xbf16, #tpu.memory_space<vmem>>, vector<6x1152xbf16>,
    return
  }
  func.func @transform_0(%arg0: i32) -> (i32, i32, i32) {
    %c0_i32 = arith.constant 0 : i32
    %c0_i32_0 = arith.constant 0 : i32
    %c0_i32_1 = arith.constant 0 : i32
    return %c0_i32, %c0_i32_0, %arg0 : i32, i32, i32
  }
  func.func @transform_1(%arg0: i32) -> (i32, i32) {
    %c0_i32 = arith.constant 0 : i32
    %c0_i32_0 = arith.constant 0 : i32
    %c0_i32_1 = arith.constant 0 : i32
    return %c0_i32, %c0_i32_0 : i32, i32
  }
  func.func @transform_2(%arg0: i32) -> (i32, i32) {
    %c0_i32 = arith.constant 0 : i32
    %c0_i32_0 = arith.constant 0 : i32
    %c0_i32_1 = arith.constant 0 : i32
    return %c0_i32, %c0_i32_0 : i32, i32
  }
  func.func @transform_3(%arg0: i32) -> (i32, i32) {
    %c0_i32 = arith.constant 0 : i32
    %c0_i32_0 = arith.constant 0 : i32
    return %c0_i32, %arg0 : i32, i32
  }
}

module attributes {stable_mosaic.version = 11 : i64} {
  func.func @_conv2_mlp_kernel(%arg0: i32, %arg1: memref<4x8x2400xbf16, #tpu.memory_space<vmem>>, %arg2: memref<2400x256xbf16, #tpu.memory_space<vmem>>, %arg3: memref<1x256xf32, #tpu.memory_space<vmem>>, %arg4: memref<256x120xbf16, #tpu.memory_space<vmem>>, %arg5: memref<1x120xf32, #tpu.memory_space<vmem>>, %arg6: memref<120x84xbf16, #tpu.memory_space<vmem>>, %arg7: memref<1x84xf32, #tpu.memory_space<vmem>>, %arg8: memref<84x15xbf16, #tpu.memory_space<vmem>>, %arg9: memref<1x15xf32, #tpu.memory_space<vmem>>, %arg10: memref<8x15xf32, #tpu.memory_space<vmem>>) attributes {dimension_semantics = [#tpu.dimension_semantics<parallel>], iteration_bounds = array<i64: 1>, scalar_prefetch = 0 : i64, scratch_operands = 0 : i64, tpu.core_type = #tpu.core_type<tc>, window_params = [{transform_indices = @transform_0, window_bounds = array<i64: 4, 8, 2400>}, {pipeline_mode = #tpu.pipeline_mode<synchronous>, transform_indices = @transform_1, window_bounds = array<i64: 2400, 256>}, {pipeline_mode = #tpu.pipeline_mode<synchronous>, transform_indices = @transform_2, window_bounds = array<i64: 1, 256>}, {pipeline_mode = #tpu.pipeline_mode<synchronous>, transform_indices = @transform_3, window_bounds = array<i64: 256, 120>}, {pipeline_mode = #tpu.pipeline_mode<synchronous>, transform_indices = @transform_4, window_bounds = array<i64: 1, 120>}, {pipeline_mode = #tpu.pipeline_mode<synchronous>, transform_indices = @transform_5, window_bounds = array<i64: 120, 84>}, {pipeline_mode = #tpu.pipeline_mode<synchronous>, transform_indices = @transform_6, window_bounds = array<i64: 1, 84>}, {pipeline_mode = #tpu.pipeline_mode<synchronous>, transform_indices = @transform_7, window_bounds = array<i64: 84, 15>}, {pipeline_mode = #tpu.pipeline_mode<synchronous>, transform_indices = @transform_8, window_bounds = array<i64: 1, 15>}, {transform_indices = @transform_9, window_bounds = array<i64: 8, 15>}]} {
    %c0 = arith.constant 0 : index
    %c0_0 = arith.constant 0 : index
    %0 = vector.load %arg2[%c0, %c0_0] : memref<2400x256xbf16, #tpu.memory_space<vmem>>, vector<2400x256xbf16>
    %c0_1 = arith.constant 0 : index
    %c0_2 = arith.constant 0 : index
    %c0_3 = arith.constant 0 : index
    %1 = vector.load %arg1[%c0_1, %c0_2, %c0_3] : memref<4x8x2400xbf16, #tpu.memory_space<vmem>>, vector<1x8x2400xbf16>
    %2 = vector.shape_cast %1 : vector<1x8x2400xbf16> to vector<8x2400xbf16>
    %cst = arith.constant dense<0.000000e+00> : vector<8x256xf32>
    %3 = tpu.matmul %2, %0, %cst {dimension_numbers = #tpu.dot_dimension_numbers<[1], [0], [0], [1], [0, 0, 1, 1], [], []>} : vector<8x2400xbf16>, vector<2400x256xbf16>, vector<8x256xf32> -> vector<8x256xf32>
    %c1 = arith.constant 1 : index
    %c0_4 = arith.constant 0 : index
    %c0_5 = arith.constant 0 : index
    %4 = vector.load %arg1[%c1, %c0_4, %c0_5] : memref<4x8x2400xbf16, #tpu.memory_space<vmem>>, vector<1x8x2400xbf16>
    %5 = vector.shape_cast %4 : vector<1x8x2400xbf16> to vector<8x2400xbf16>
    %cst_6 = arith.constant dense<0.000000e+00> : vector<8x256xf32>
    %6 = tpu.matmul %5, %0, %cst_6 {dimension_numbers = #tpu.dot_dimension_numbers<[1], [0], [0], [1], [0, 0, 1, 1], [], []>} : vector<8x2400xbf16>, vector<2400x256xbf16>, vector<8x256xf32> -> vector<8x256xf32>
    %7 = arith.maximumf %3, %6 : vector<8x256xf32>
    %c2 = arith.constant 2 : index
    %c0_7 = arith.constant 0 : index
    %c0_8 = arith.constant 0 : index
    %8 = vector.load %arg1[%c2, %c0_7, %c0_8] : memref<4x8x2400xbf16, #tpu.memory_space<vmem>>, vector<1x8x2400xbf16>
    %9 = vector.shape_cast %8 : vector<1x8x2400xbf16> to vector<8x2400xbf16>
    %cst_9 = arith.constant dense<0.000000e+00> : vector<8x256xf32>
    %10 = tpu.matmul %9, %0, %cst_9 {dimension_numbers = #tpu.dot_dimension_numbers<[1], [0], [0], [1], [0, 0, 1, 1], [], []>} : vector<8x2400xbf16>, vector<2400x256xbf16>, vector<8x256xf32> -> vector<8x256xf32>
    %11 = arith.maximumf %7, %10 : vector<8x256xf32>
    %c3 = arith.constant 3 : index
    %c0_10 = arith.constant 0 : index
    %c0_11 = arith.constant 0 : index
    %12 = vector.load %arg1[%c3, %c0_10, %c0_11] : memref<4x8x2400xbf16, #tpu.memory_space<vmem>>, vector<1x8x2400xbf16>
    %13 = vector.shape_cast %12 : vector<1x8x2400xbf16> to vector<8x2400xbf16>
    %cst_12 = arith.constant dense<0.000000e+00> : vector<8x256xf32>
    %14 = tpu.matmul %13, %0, %cst_12 {dimension_numbers = #tpu.dot_dimension_numbers<[1], [0], [0], [1], [0, 0, 1, 1], [], []>} : vector<8x2400xbf16>, vector<2400x256xbf16>, vector<8x256xf32> -> vector<8x256xf32>
    %15 = arith.maximumf %11, %14 : vector<8x256xf32>
    %c0_13 = arith.constant 0 : index
    %c0_14 = arith.constant 0 : index
    %16 = vector.load %arg3[%c0_13, %c0_14] : memref<1x256xf32, #tpu.memory_space<vmem>>, vector<1x256xf32>
    %17 = vector.broadcast %16 : vector<1x256xf32> to vector<8x256xf32>
    %18 = arith.addf %15, %17 : vector<8x256xf32>
    %cst_15 = arith.constant 0.000000e+00 : f32
    %19 = vector.broadcast %cst_15 : f32 to vector<8x256xf32>
    %20 = arith.maximumf %18, %19 : vector<8x256xf32>
    %21 = arith.truncf %20 : vector<8x256xf32> to vector<8x256xbf16>
    %c0_16 = arith.constant 0 : index
    %c0_17 = arith.constant 0 : index
    %22 = vector.load %arg4[%c0_16, %c0_17] : memref<256x120xbf16, #tpu.memory_space<vmem>>, vector<256x120xbf16>
    %cst_18 = arith.constant dense<0.000000e+00> : vector<8x120xf32>
    %23 = tpu.matmul %21, %22, %cst_18 {dimension_numbers = #tpu.dot_dimension_numbers<[1], [0], [0], [1], [0, 0, 1, 1], [], []>} : vector<8x256xbf16>, vector<256x120xbf16>, vector<8x120xf32> -> vector<8x120xf32>
    %c0_19 = arith.constant 0 : index
    %c0_20 = arith.constant 0 : index
    %24 = vector.load %arg5[%c0_19, %c0_20] : memref<1x120xf32, #tpu.memory_space<vmem>>, vector<1x120xf32>
    %25 = vector.broadcast %24 : vector<1x120xf32> to vector<8x120xf32>
    %26 = arith.addf %23, %25 : vector<8x120xf32>
    %cst_21 = arith.constant 0.000000e+00 : f32
    %27 = vector.broadcast %cst_21 : f32 to vector<8x120xf32>
    %28 = arith.maximumf %26, %27 : vector<8x120xf32>
    %29 = arith.truncf %28 : vector<8x120xf32> to vector<8x120xbf16>
    %c0_22 = arith.constant 0 : index
    %c0_23 = arith.constant 0 : index
    %30 = vector.load %arg6[%c0_22, %c0_23] : memref<120x84xbf16, #tpu.memory_space<vmem>>, vector<120x84xbf16>
    %cst_24 = arith.constant dense<0.000000e+00> : vector<8x84xf32>
    %31 = tpu.matmul %29, %30, %cst_24 {dimension_numbers = #tpu.dot_dimension_numbers<[1], [0], [0], [1], [0, 0, 1, 1], [], []>} : vector<8x120xbf16>, vector<120x84xbf16>, vector<8x84xf32> -> vector<8x84xf32>
    %c0_25 = arith.constant 0 : index
    %c0_26 = arith.constant 0 : index
    %32 = vector.load %arg7[%c0_25, %c0_26] : memref<1x84xf32, #tpu.memory_space<vmem>>, vector<1x84xf32>
    %33 = vector.broadcast %32 : vector<1x84xf32> to vector<8x84xf32>
    %34 = arith.addf %31, %33 : vector<8x84xf32>
    %cst_27 = arith.constant 0.000000e+00 : f32
    %35 = vector.broadcast %cst_27 : f32 to vector<8x84xf32>
    %36 = arith.maximumf %34, %35 : vector<8x84xf32>
    %37 = arith.truncf %36 : vector<8x84xf32> to vector<8x84xbf16>
    %c0_28 = arith.constant 0 : index
    %c0_29 = arith.constant 0 : index
    %38 = vector.load %arg8[%c0_28, %c0_29] : memref<84x15xbf16, #tpu.memory_space<vmem>>, vector<84x15xbf16>
    %cst_30 = arith.constant dense<0.000000e+00> : vector<8x15xf32>
    %39 = tpu.matmul %37, %38, %cst_30 {dimension_numbers = #tpu.dot_dimension_numbers<[1], [0], [0], [1], [0, 0, 1, 1], [], []>} : vector<8x84xbf16>, vector<84x15xbf16>, vector<8x15xf32> -> vector<8x15xf32>
    %c0_31 = arith.constant 0 : index
    %c0_32 = arith.constant 0 : index
    %40 = vector.load %arg9[%c0_31, %c0_32] : memref<1x15xf32, #tpu.memory_space<vmem>>, vector<1x15xf32>
    %41 = vector.broadcast %40 : vector<1x15xf32> to vector<8x15xf32>
    %42 = arith.addf %39, %41 : vector<8x15xf32>
    %c0_33 = arith.constant 0 : index
    %c0_34 = arith.constant 0 : index
    %43 = vector.load %arg10[%c0_33, %c0_34] : memref<8x15xf32, #tpu.memory_space<vmem>>, vector<8x15xf32>
    tpu.vector_store %arg10[%c0_33, %c0_34], %42 {strides = array<i32>} : memref<8x15xf32, #tpu.memory_space<vmem>>, vector<8x15xf32>,
    return
  }
  func.func @transform_0(%arg0: i32) -> (i32, i32, i32) {
    %c0_i32 = arith.constant 0 : i32
    %c0_i32_0 = arith.constant 0 : i32
    %c0_i32_1 = arith.constant 0 : i32
    return %c0_i32, %arg0, %c0_i32_0 : i32, i32, i32
  }
  func.func @transform_1(%arg0: i32) -> (i32, i32) {
    %c0_i32 = arith.constant 0 : i32
    %c0_i32_0 = arith.constant 0 : i32
    %c0_i32_1 = arith.constant 0 : i32
    return %c0_i32, %c0_i32_0 : i32, i32
  }
  func.func @transform_2(%arg0: i32) -> (i32, i32) {
    %c0_i32 = arith.constant 0 : i32
    %c0_i32_0 = arith.constant 0 : i32
    %c0_i32_1 = arith.constant 0 : i32
    return %c0_i32, %c0_i32_0 : i32, i32
  }
  func.func @transform_3(%arg0: i32) -> (i32, i32) {
    %c0_i32 = arith.constant 0 : i32
    %c0_i32_0 = arith.constant 0 : i32
    %c0_i32_1 = arith.constant 0 : i32
    return %c0_i32, %c0_i32_0 : i32, i32
  }
  func.func @transform_4(%arg0: i32) -> (i32, i32) {
    %c0_i32 = arith.constant 0 : i32
    %c0_i32_0 = arith.constant 0 : i32
    %c0_i32_1 = arith.constant 0 : i32
    return %c0_i32, %c0_i32_0 : i32, i32
  }
  func.func @transform_5(%arg0: i32) -> (i32, i32) {
    %c0_i32 = arith.constant 0 : i32
    %c0_i32_0 = arith.constant 0 : i32
    %c0_i32_1 = arith.constant 0 : i32
    return %c0_i32, %c0_i32_0 : i32, i32
  }
  func.func @transform_6(%arg0: i32) -> (i32, i32) {
    %c0_i32 = arith.constant 0 : i32
    %c0_i32_0 = arith.constant 0 : i32
    %c0_i32_1 = arith.constant 0 : i32
    return %c0_i32, %c0_i32_0 : i32, i32
  }
  func.func @transform_7(%arg0: i32) -> (i32, i32) {
    %c0_i32 = arith.constant 0 : i32
    %c0_i32_0 = arith.constant 0 : i32
    %c0_i32_1 = arith.constant 0 : i32
    return %c0_i32, %c0_i32_0 : i32, i32
  }
  func.func @transform_8(%arg0: i32) -> (i32, i32) {
    %c0_i32 = arith.constant 0 : i32
    %c0_i32_0 = arith.constant 0 : i32
    %c0_i32_1 = arith.constant 0 : i32
    return %c0_i32, %c0_i32_0 : i32, i32
  }
  func.func @transform_9(%arg0: i32) -> (i32, i32) {
    %c0_i32 = arith.constant 0 : i32
    %c0_i32_0 = arith.constant 0 : i32
    return %arg0, %c0_i32 : i32, i32
  }
}

</mosaic_0001>

<bundles_post_ra>
// kernel: chinese_number_cnn_forward.2
= control target key start
LH: loop header
LB: loop body
LE: loop exit
PB: predicated region body
PF: predicated region fallthrough
CT: control target
= control target key end

     0   :  { %vm123_vm0 = vcmask 1043456   ;;  %vm124_vm1 = vcmask 1044480   ;;  %v1775_v1 = vmov 0   ;;  %v1776_v2 = vmov 65535   ;;  %s2214_s0 = inlined_call_operand.vmem [shape: bf16[4,25,1152], index: 0, kind: input, shape index: {}]   ;;  %s2215_s1 = inlined_call_operand.vmem [shape: bf16[6,25], index: 1, kind: input, shape index: {}]   ;;  %s2216_s2 = inlined_call_operand.vmem [shape: f32[6,1], index: 2, kind: input, shape index: {}]   ;;  %s2217_s3 = inlined_call_operand.vmem [shape: bf16[6,1152], index: 3, kind: output, shape index: {}]  }
   0x1   :  { %v1671_v0 = vld [vmem:[%s2214_s0 + $0x4c] ss:$36 sps:$4 sm:$0x1f]   ;;  %186 = vmatprep.mubr.bf16.mxu0 %v1775_v1  ;;  %227 = vmatprep.mubr.bf16.mxu1 %v1775_v1  ;;  %v125_v3 = vsel %vm123_vm0, 4294967295, %v1776_v2  ;;  %v1677_v10 = vld [vmem:[%s2214_s0 + $0x4] ss:$36 sps:$4 sm:$0xff]  }
   0x2   :  { %1670 = vset.pattern.permute.xlu0 %v1775_v1  ;;  %v1805_v4 = vsel %vm124_vm1, %v125_v3, 0  ;;  %v1673_v5 = vld [vmem:[%s2214_s0 + $0x54] ss:$36 sps:$4 sm:$0x1f]   ;;  %v1679_v11 = vld [vmem:[%s2214_s0 + $0xc] ss:$36 sps:$4 sm:$0xff]  }
   0x3   :  { %v131_v6 = vand.u32 %v1671_v0, %v1805_v4  ;;  %v1675_v7 = vld [vmem:[%s2214_s0 + $0x48] ss:$36 sps:$4 sm:$0x1f]   ;;  %v1676_v8 = vld [vmem:[%s2214_s0 + $0x50] ss:$36 sps:$4 sm:$0x1f]   ;;  %v137_v9 = vand.u32 %v1673_v5, %v1805_v4 }
   0x4   :  { %v128_v12 = vand.u32 %v1675_v7, %v1805_v4  ;;  %v134_v13 = vand.u32 %v1676_v8, %v1805_v4  ;;  %v1681_v14 = vld [vmem:[%s2214_s0] ss:$36 sps:$4 sm:$0xff]   ;;  %v1682_v15 = vld [vmem:[%s2214_s0 + $0x8] ss:$36 sps:$4 sm:$0xff]   ;;  %vm119_vm2 = vcmask 203776   ;;  %v1777_v36 = vmov 0.0  }
   0x5   :  { %166 = vmatprep.subr.bf16.mxu0 %v131_v6  ;;  %207 = vmatprep.subr.bf16.mxu1 %v137_v9  ;;  %v1683_v16 = vld [vmem:[%s2214_s0 + $0x58] ss:$36 sps:$4 sm:$0x1f]   ;;  %v1686_v18 = vld [vmem:[%s2214_s0 + $0x60] ss:$36 sps:$4 sm:$0x1f]  }
   0x6   :  { %167 = vmatpush1.bf16.msra.mxu0 %v128_v12  ;;  %208 = vmatpush1.bf16.msra.mxu1 %v134_v13  ;;  %v1685_v17 = vld [vmem:[%s2214_s0 + $0x5c] ss:$36 sps:$4 sm:$0x1f]   ;;  %v1688_v19 = vld [vmem:[%s2214_s0 + $0x64] ss:$36 sps:$4 sm:$0x1f]   ;;  %v140_v23 = vand.u32 %v1683_v16, %v1805_v4  ;;  %v146_v24 = vand.u32 %v1686_v18, %v1805_v4 }
   0x7   :  { %168 = vmatprep.subr.bf16.mxu0 %v1677_v10  ;;  %209 = vmatprep.subr.bf16.mxu1 %v1679_v11  ;;  %v143_v20 = vand.u32 %v1685_v17, %v1805_v4  ;;  %v149_v21 = vand.u32 %v1688_v19, %v1805_v4  ;;  %v1849_v22 = vld [vmem:[%s2215_s1] sm:$0x7]  ;;  %v1691_v25 = vld [vmem:[%s2214_s0 + $0x14] ss:$36 sps:$4 sm:$0xff]   ;;  %vm1778_vm3 = vmmov 0  }
   0x8   :  { %v1694_v26 = vld [vmem:[%s2214_s0 + $0x1c] ss:$36 sps:$4 sm:$0xff]   ;;  %v1689_v27 = vld [vmem:[%s2214_s0 + $0x10] ss:$36 sps:$4 sm:$0xff]   ;;  %v1714_v48 = vld [vmem:[%s2214_s0 + $0xa4] ss:$36 sps:$4 sm:$0xff]  }
   0x9   :  { %v1692_v28 = vld [vmem:[%s2214_s0 + $0x18] ss:$36 sps:$4 sm:$0xff]   ;;  %v1698_v31 = vld [vmem:[%s2214_s0 + $0x68] ss:$36 sps:$4 sm:$0x1f]  }
   0xa   :  { %169 = vmatpush1.bf16.msra.mxu0 %v1681_v14  ;;  %210 = vmatpush1.bf16.msra.mxu1 %v1682_v15  ;;  %v1697_v29 = vld [vmem:[%s2214_s0 + $0xdc] ss:$36 sps:$4 sm:$0x1f]   ;;  %v152_v33 = vand.u32 %v1698_v31, %v1805_v4  ;;  %v1705_v35 = vld [vmem:[%s2214_s0 + $0xe4] ss:$36 sps:$4 sm:$0x1f]  }
   0xb   :  { %248 = vmatprep.subr.bf16.mxu0 %v143_v20  ;;  %289 = vmatprep.subr.bf16.mxu1 %v149_v21  ;;  %v1695_v30 = vld [vmem:[%s2214_s0 + $0xd8] ss:$36 sps:$4 sm:$0x1f]   ;;  %v466_v32 = vand.u32 %v1697_v29, %v1805_v4  ;;  %v1708_v38 = vld [vmem:[%s2214_s0 + $0xec] ss:$36 sps:$4 sm:$0x1f]   ;;  %v472_v43 = vand.u32 %v1705_v35, %v1805_v4 }
   0xc   :  { %v463_v34 = vand.u32 %v1695_v30, %v1805_v4  ;;  %v1701_v37 = vld [vmem:[%s2214_s0 + $0x94] ss:$36 sps:$4 sm:$0xff]   ;;  %v1702_v40 = vld [vmem:[%s2214_s0 + $0x20] ss:$36 sps:$4 sm:$0xff]   ;;  %v478_v44 = vand.u32 %v1708_v38, %v1805_v4  ;;  %v1721_v58 = vld [vmem:[%s2214_s0 + $0xac] ss:$36 sps:$4 sm:$0xff]  }
   0xd   :  { %1478 = vmatmul.mubr.msk.bf16.vlgmr.msra.gmra.mxu0 %vm119_vm2, %v1849_v22  ;;  %1479 = vmatmul.mubr.msk.bf16.vlgmr.msra.gmra.mxu1 %vm119_vm2, %v1849_v22  ;;  %v1699_v39 = vld [vmem:[%s2214_s0 + $0x90] ss:$36 sps:$4 sm:$0xff]   ;;  %v1703_v41 = vld [vmem:[%s2214_s0 + $0xe0] ss:$36 sps:$4 sm:$0x1f]  }
   0xe   :  { %249 = vmatpush1.bf16.msra.mxu0 %v140_v23  ;;  %290 = vmatpush1.bf16.msra.mxu1 %v146_v24  ;;  %v1706_v42 = vld [vmem:[%s2214_s0 + $0xe8] ss:$36 sps:$4 sm:$0x1f]   ;;  %v1711_v45 = vld [vmem:[%s2214_s0 + $0x9c] ss:$36 sps:$4 sm:$0xff]   ;;  %v469_v46 = vand.u32 %v1703_v41, %v1805_v4 }
   0xf   :  { %250 = vmatprep.subr.bf16.mxu0 %v1691_v25  ;;  %291 = vmatprep.subr.bf16.mxu1 %v1694_v26  ;;  %v475_v47 = vand.u32 %v1706_v42, %v1805_v4  ;;  %v1717_v49 = vld [vmem:[%s2214_s0 + $0xf4] ss:$36 sps:$4 sm:$0x1f]   ;;  %v1712_v51 = vld [vmem:[%s2214_s0 + $0xa0] ss:$36 sps:$4 sm:$0xff]  }
  0x10   :  { %268 = vmatprep.mubr.bf16.mxu0 %v1775_v1  ;;  %309 = vmatprep.mubr.bf16.mxu1 %v1775_v1  ;;  %v1709_v50 = vld [vmem:[%s2214_s0 + $0x98] ss:$36 sps:$4 sm:$0xff]   ;;  %v1715_v52 = vld [vmem:[%s2214_s0 + $0xf0] ss:$36 sps:$4 sm:$0x1f]   ;;  %v484_v54 = vand.u32 %v1717_v49, %v1805_v4 }
  0x11   :  { %v1718_v53 = vld [vmem:[%s2214_s0 + $0xf8] ss:$36 sps:$4 sm:$0x1f]   ;;  %v481_v55 = vand.u32 %v1715_v52, %v1805_v4  ;;  %v1725_v57 = vld [vmem:[%s2214_s0 + $0x16c] ss:$36 sps:$4 sm:$0x1f]  }
  0x12   :  { %251 = vmatpush1.bf16.msra.mxu0 %v1689_v27  ;;  %292 = vmatpush1.bf16.msra.mxu1 %v1692_v28  ;;  %v487_v56 = vand.u32 %v1718_v53, %v1805_v4  ;;  %v1728_v59 = vld [vmem:[%s2214_s0 + $0x174] ss:$36 sps:$4 sm:$0x1f]   ;;  %v1719_v60 = vld [vmem:[%s2214_s0 + $0xa8] ss:$36 sps:$4 sm:$0xff]   ;;  %v810_v0 = vand.u32 %v1725_v57, %v1805_v4 }
  0x13   :  { %1634 = vmatprep.subr.bf16.mxu0 %v1777_v36  ;;  %501 = vmatprep.subr.bf16.mxu1 %v466_v32  ;;  %v1722_v61 = vld [vmem:[%s2214_s0 + $0xb0] ss:$36 sps:$4 sm:$0xff]   ;;  %v1723_v62 = vld [vmem:[%s2214_s0 + $0x168] ss:$36 sps:$4 sm:$0x1f]   ;;  %v816_v2 = vand.u32 %v1728_v59, %v1805_v4 }
  0x14   :  { %v1726_v63 = vld [vmem:[%s2214_s0 + $0x170] ss:$36 sps:$4 sm:$0x1f]   ;;  %v1731_v3 = vld [vmem:[%s2214_s0 + $0x124] ss:$36 sps:$4 sm:$0xff]   ;;  %v807_v7 = vand.u32 %v1723_v62, %v1805_v4 }
  0x15   :  { %1480 = vmatmul.mubr.msk.bf16.vlgmr.msra.gmra.mxu0 %vm119_vm2, %v1849_v22  ;;  %1481 = vmatmul.mubr.msk.bf16.vlgmr.msra.gmra.mxu1 %vm119_vm2, %v1849_v22  ;;  %v1734_v5 = vld [vmem:[%s2214_s0 + $0x12c] ss:$36 sps:$4 sm:$0xff]   ;;  %v1737_v6 = vld [vmem:[%s2214_s0 + $0x17c] ss:$36 sps:$4 sm:$0x1f]   ;;  %v813_v8 = vand.u32 %v1726_v63, %v1805_v4 }
  0x16   :  { %1635 = vmatpush3.bf16.msra.mxu0 %v152_v33  ;;  %502 = vmatpush1.bf16.msra.mxu1 %v463_v34  ;;  %v1993_v9 = vld [vmem:[%s2214_s0 + $0x200] ss:$36 sps:$4 sm:$0x1f]   ;;  %v2004_v12 = vld [vmem:[%s2214_s0 + $0x208] ss:$36 sps:$4 sm:$0x1f]   ;;  %v822_v18 = vand.u32 %v1737_v6, %v1805_v4 }
  0x17   :  { %1636 = vmatprep.subr.bf16.mxu0 %v1777_v36  ;;  %503 = vmatprep.subr.bf16.mxu1 %v1701_v37  ;;  %v1740_v10 = vld [vmem:[%s2214_s0 + $0x184] ss:$36 sps:$4 sm:$0x1f]   ;;  %v1157_v13 = vand.u32 %v1993_v9, %v1805_v4  ;;  %v1735_v15 = vld [vmem:[%s2214_s0 + $0x178] ss:$36 sps:$4 sm:$0x1f]   ;;  %v1163_v17 = vand.u32 %v2004_v12, %v1805_v4 }
  0x18   :  { %1638 = vmatprep.mubr.msk.bf16.mxu0 %vm1778_vm3, %v1777_v36  ;;  %521 = vmatprep.mubr.bf16.mxu1 %v1775_v1  ;;  %v1729_v11 = vld [vmem:[%s2214_s0 + $0x120] ss:$36 sps:$4 sm:$0xff]   ;;  %v1732_v14 = vld [vmem:[%s2214_s0 + $0x128] ss:$36 sps:$4 sm:$0xff]   ;;  %v828_v19 = vand.u32 %v1740_v10, %v1805_v4  ;;  %v819_v23 = vand.u32 %v1735_v15, %v1805_v4  ;;  %v1743_v26 = vld [vmem:[%s2214_s0 + $0x134] ss:$36 sps:$4 sm:$0xff]  }
  0x19   :  { %v1738_v16 = vld [vmem:[%s2214_s0 + $0x180] ss:$36 sps:$4 sm:$0x1f]   ;;  %v2030_v20 = vld [vmem:[%s2214_s0 + $0x210] ss:$36 sps:$4 sm:$0x1f]  }
  0x1a   :  { %1637 = vmatpush3.bf16.msra.mxu0 %v1702_v40  ;;  %504 = vmatpush1.bf16.msra.mxu1 %v1699_v39  ;;  %v2035_v21 = vld [vmem:[%s2214_s0 + $0x214] ss:$36 sps:$4 sm:$0x1f]   ;;  %v1749_v24 = vld [vmem:[%s2214_s0 + $0x1fc] ss:$36 sps:$4 sm:$0x1f]   ;;  %v825_v25 = vand.u32 %v1738_v16, %v1805_v4  ;;  %v1169_v28 = vand.u32 %v2030_v20, %v1805_v4 }
  0x1b   :  { %542 = vmatprep.subr.bf16.mxu0 %v472_v43  ;;  %583 = vmatprep.subr.bf16.mxu1 %v478_v44  ;;  %v1172_v27 = vand.u32 %v2035_v21, %v1805_v4  ;;  %v2052_v29 = vld [vmem:[%s2214_s0 + $0x218] ss:$36 sps:$4 sm:$0x1f]   ;;  %v1741_v31 = vld [vmem:[%s2214_s0 + $0x130] ss:$36 sps:$4 sm:$0xff]   ;;  %v1154_v38 = vand.u32 %v1749_v24, %v1805_v4 }
  0x1c   :  { %v1746_v30 = vld [vmem:[%s2214_s0 + $0x13c] ss:$36 sps:$4 sm:$0xff]   ;;  %v1175_v32 = vand.u32 %v2052_v29, %v1805_v4  ;;  %v1750_v35 = vld [vmem:[%s2214_s0 + $0x188] ss:$36 sps:$4 sm:$0x1f]  }
  0x1d   :  { %1639 = vmatmul.mubr.msk.bf16.vlgmr.msra.gmra.mxu0 %vm119_vm2, %v1849_v22  ;;  %1521 = vmatmul.mubr.msk.bf16.vlgmr.msra.gmra.mxu1 %vm119_vm2, %v1849_v22  ;;  %v1744_v33 = vld [vmem:[%s2214_s0 + $0x138] ss:$36 sps:$4 sm:$0xff]   ;;  %v1390_v37 = vld [vmem:[%s2216_s2] sm:$0x3f]  ;;  %v831_v39 = vand.u32 %v1750_v35, %v1805_v4  ;;  %v1751_v44 = vld [vmem:[%s2214_s0 + $0x1b0] ss:$36 sps:$4 sm:$0xff]  }
  0x1e   :  { %543 = vmatpush1.bf16.msra.mxu0 %v469_v46  ;;  %584 = vmatpush1.bf16.msra.mxu1 %v475_v47  ;;  %v1747_v34 = vld [vmem:[%s2214_s0 + $0x1f8] ss:$36 sps:$4 sm:$0x1f]   ;;  %v1757_v42 = vld [vmem:[%s2214_s0 + $0x204] ss:$36 sps:$4 sm:$0x1f]  }
  0x1f   :  { %544 = vmatprep.subr.bf16.mxu0 %v1711_v45  ;;  %585 = vmatprep.subr.bf16.mxu1 %v1714_v48  ;;  %v1151_v40 = vand.u32 %v1747_v34, %v1805_v4  ;;  %v1753_v41 = vld [vmem:[%s2214_s0 + $0x1b4] ss:$36 sps:$4 sm:$0xff]   ;;  %v1760_v43 = vld [vmem:[%s2214_s0 + $0x20c] ss:$36 sps:$4 sm:$0x1f]   ;;  %v1160_v46 = vand.u32 %v1757_v42, %v1805_v4 }
  0x20   :  { %562 = vmatprep.mubr.bf16.mxu0 %v1775_v1  ;;  %603 = vmatprep.mubr.bf16.mxu1 %v1775_v1  ;;  %v1754_v45 = vld [vmem:[%s2214_s0 + $0x140] ss:$36 sps:$4 sm:$0xff]   ;;  %v1166_v47 = vand.u32 %v1760_v43, %v1805_v4  ;;  %v1773_v52 = vld [vmem:[%s2214_s0 + $0x1cc] ss:$36 sps:$4 sm:$0xff]  }
  0x21   :  { %1393 = vperm.xlu0 %1670, %v1390_v37   ;;  %v1763_v48 = vld [vmem:[%s2214_s0 + $0x1bc] ss:$36 sps:$4 sm:$0xff]   ;;  %v1766_v49 = vld [vmem:[%s2214_s0 + $0x1c4] ss:$36 sps:$4 sm:$0xff]  }
  0x22   :  { %545 = vmatpush1.bf16.msra.mxu0 %v1709_v50  ;;  %586 = vmatpush1.bf16.msra.mxu1 %v1712_v51  ;;  %v1761_v50 = vld [vmem:[%s2214_s0 + $0x1b8] ss:$36 sps:$4 sm:$0xff]   ;;  %v1764_v51 = vld [vmem:[%s2214_s0 + $0x1c0] ss:$36 sps:$4 sm:$0xff]   ;;  %v1771_v53 = vld [vmem:[%s2214_s0 + $0x1c8] ss:$36 sps:$4 sm:$0xff]  }
  0x23   :  { %624 = vmatprep.subr.bf16.mxu0 %v484_v54  ;;  %1642 = vmatprep.subr.bf16.mxu1 %v1777_v36  ;;  %v1774_v54 = vld [vmem:[%s2214_s0 + $0x1d0] ss:$36 sps:$4 sm:$0xff]  }
  0x25   :  { %1522 = vmatmul.mubr.msk.bf16.vlgmr.msra.gmra.mxu0 %vm119_vm2, %v1849_v22  ;;  %1523 = vmatmul.mubr.msk.bf16.vlgmr.msra.gmra.mxu1 %vm119_vm2, %v1849_v22 }
  0x26   :  { %625 = vmatpush1.bf16.msra.mxu0 %v481_v55  ;;  %1643 = vmatpush3.bf16.msra.mxu1 %v487_v56 }
  0x27   :  { %626 = vmatprep.subr.bf16.mxu0 %v1721_v58  ;;  %1644 = vmatprep.subr.bf16.mxu1 %v1777_v36 }
  0x28   :  { %644 = vmatprep.mubr.bf16.mxu0 %v1775_v1  ;;  %1646 = vmatprep.mubr.msk.bf16.mxu1 %vm1778_vm3, %v1777_v36 }
  0x2a   :  { %627 = vmatpush1.bf16.msra.mxu0 %v1719_v60  ;;  %1645 = vmatpush3.bf16.msra.mxu1 %v1722_v61 }
  0x2b   :  { %845 = vmatprep.subr.bf16.mxu0 %v810_v0  ;;  %886 = vmatprep.subr.bf16.mxu1 %v816_v2 }
  0x2d   :  { %1524 = vmatmul.mubr.msk.bf16.vlgmr.msra.gmra.mxu0 %vm119_vm2, %v1849_v22  ;;  %1647 = vmatmul.mubr.msk.bf16.vlgmr.msra.gmra.mxu1 %vm119_vm2, %v1849_v22 }
  0x2e   :  { %846 = vmatpush1.bf16.msra.mxu0 %v807_v7  ;;  %887 = vmatpush1.bf16.msra.mxu1 %v813_v8 }
  0x2f   :  { %847 = vmatprep.subr.bf16.mxu0 %v1731_v3  ;;  %888 = vmatprep.subr.bf16.mxu1 %v1734_v5 }
  0x30   :  { %865 = vmatprep.mubr.bf16.mxu0 %v1775_v1  ;;  %906 = vmatprep.mubr.bf16.mxu1 %v1775_v1 }
  0x32   :  { %848 = vmatpush1.bf16.msra.mxu0 %v1729_v11  ;;  %889 = vmatpush1.bf16.msra.mxu1 %v1732_v14 }
  0x33   :  { %927 = vmatprep.subr.bf16.mxu0 %v822_v18  ;;  %968 = vmatprep.subr.bf16.mxu1 %v828_v19 }
  0x35   :  { %1564 = vmatmul.mubr.msk.bf16.vlgmr.msra.gmra.mxu0 %vm119_vm2, %v1849_v22  ;;  %1565 = vmatmul.mubr.msk.bf16.vlgmr.msra.gmra.mxu1 %vm119_vm2, %v1849_v22 }
  0x36   :  { %928 = vmatpush1.bf16.msra.mxu0 %v819_v23  ;;  %969 = vmatpush1.bf16.msra.mxu1 %v825_v25 }
  0x37   :  { %929 = vmatprep.subr.bf16.mxu0 %v1743_v26  ;;  %970 = vmatprep.subr.bf16.mxu1 %v1746_v30 }
  0x38   :  { %947 = vmatprep.mubr.bf16.mxu0 %v1775_v1  ;;  %988 = vmatprep.mubr.bf16.mxu1 %v1775_v1 }
  0x3a   :  { %930 = vmatpush1.bf16.msra.mxu0 %v1741_v31  ;;  %971 = vmatpush1.bf16.msra.mxu1 %v1744_v33 }
  0x3b   :  { %1650 = vmatprep.subr.bf16.mxu0 %v1777_v36  ;;  %1189 = vmatprep.subr.bf16.mxu1 %v1154_v38 }
  0x3d   :  { %1566 = vmatmul.mubr.msk.bf16.vlgmr.msra.gmra.mxu0 %vm119_vm2, %v1849_v22  ;;  %1567 = vmatmul.mubr.msk.bf16.vlgmr.msra.gmra.mxu1 %vm119_vm2, %v1849_v22 }
  0x3e   :  { %1651 = vmatpush3.bf16.msra.mxu0 %v831_v39  ;;  %1190 = vmatpush1.bf16.msra.mxu1 %v1151_v40 }
  0x3f   :  { %1652 = vmatprep.subr.bf16.mxu0 %v1777_v36  ;;  %1191 = vmatprep.subr.bf16.mxu1 %v1753_v41 }
  0x40   :  { %1654 = vmatprep.mubr.msk.bf16.mxu0 %vm1778_vm3, %v1777_v36  ;;  %1209 = vmatprep.mubr.bf16.mxu1 %v1775_v1 }
  0x42   :  { %1653 = vmatpush3.bf16.msra.mxu0 %v1754_v45  ;;  %1192 = vmatpush1.bf16.msra.mxu1 %v1751_v44 }
  0x43   :  { %1230 = vmatprep.subr.bf16.mxu0 %v1160_v46  ;;  %1271 = vmatprep.subr.bf16.mxu1 %v1166_v47 }
  0x45   :  { %1655 = vmatmul.mubr.msk.bf16.vlgmr.msra.gmra.mxu0 %vm119_vm2, %v1849_v22  ;;  %1607 = vmatmul.mubr.msk.bf16.vlgmr.msra.gmra.mxu1 %vm119_vm2, %v1849_v22 }
  0x46   :  { %1231 = vmatpush1.bf16.msra.mxu0 %v1157_v13  ;;  %1272 = vmatpush1.bf16.msra.mxu1 %v1163_v17 }
  0x47   :  { %1232 = vmatprep.subr.bf16.mxu0 %v1763_v48  ;;  %1273 = vmatprep.subr.bf16.mxu1 %v1766_v49 }
  0x48   :  { %1250 = vmatprep.mubr.bf16.mxu0 %v1775_v1  ;;  %1291 = vmatprep.mubr.bf16.mxu1 %v1775_v1 }
  0x4a   :  { %1233 = vmatpush1.bf16.msra.mxu0 %v1761_v50  ;;  %1274 = vmatpush1.bf16.msra.mxu1 %v1764_v51 }
  0x4b   :  { %1312 = vmatprep.subr.bf16.mxu0 %v1172_v27  ;;  %1658 = vmatprep.subr.bf16.mxu1 %v1777_v36 }
  0x4d   :  { %1608 = vmatmul.mubr.msk.bf16.vlgmr.msra.gmra.mxu0 %vm119_vm2, %v1849_v22  ;;  %1609 = vmatmul.mubr.msk.bf16.vlgmr.msra.gmra.mxu1 %vm119_vm2, %v1849_v22 }
  0x4e   :  { %1313 = vmatpush1.bf16.msra.mxu0 %v1169_v28  ;;  %1659 = vmatpush3.bf16.msra.mxu1 %v1175_v32 }
  0x4f   :  { %1314 = vmatprep.subr.bf16.mxu0 %v1773_v52  ;;  %1660 = vmatprep.subr.bf16.mxu1 %v1777_v36 }
  0x50   :  { %1332 = vmatprep.mubr.bf16.mxu0 %v1775_v1  ;;  %1662 = vmatprep.mubr.msk.bf16.mxu1 %vm1778_vm3, %v1777_v36 }
  0x52   :  { %1315 = vmatpush1.bf16.msra.mxu0 %v1771_v53  ;;  %1661 = vmatpush3.bf16.msra.mxu1 %v1774_v54 }
  0x55   :  { %1610 = vmatmul.mubr.msk.bf16.vlgmr.msra.gmra.mxu0 %vm119_vm2, %v1849_v22  ;;  %1663 = vmatmul.mubr.msk.bf16.vlgmr.msra.gmra.mxu1 %vm119_vm2, %v1849_v22 }
  0x9c   :  { %v2178_v50 = vpop.permute.xlu0 %1393 }
  0xcd   :  { %v188_v4 = vpop.f32.mrf.mxu0  ;;  %v2158_v55 = vpop.f32.mrf.mxu1 }
  0xcf   :  { %v190_v56 = vpop.f32.mrf.mxu0  ;;  %v2160_v57 = vpop.f32.mrf.mxu1 }
  0xd1   :  { %v192_v58 = vpop.f32.mrf.mxu0  ;;  %v233_v59 = vpop.f32.mrf.mxu1 }
  0xd3   :  { %v193_v1 = vpop.f32.mrf.mxu0  ;;  %v234_v60 = vpop.f32.mrf.mxu1 }
  0xd5   :  { %v2162_v61 = vpop.f32.mrf.mxu0  ;;  %v2164_v36 = vpop.f32.mrf.mxu1 }
  0xd7   :  { %v2166_v62 = vpop.f32.mrf.mxu0  ;;  %v2168_v63 = vpop.f32.mrf.mxu1 }
  0xd9   :  { %v274_v0 = vpop.f32.mrf.mxu0  ;;  %v315_v22 = vpop.f32.mrf.mxu1 }
  0xdb   :  { %v275_v2 = vpop.f32.mrf.mxu0  ;;  %v316_v3 = vpop.f32.mrf.mxu1 }
  0xdd   :  { %v2170_v5 = vpop.f32.mrf.mxu0  ;;  %v523_v6 = vpop.f32.mrf.mxu1 }
  0xde   :  { %v693_v45 = vmax.f32 %v188_v4, %v523_v6 }
  0xdf   :  { %v1640_v7 = vpop.f32.mrf.mxu0  ;;  %v525_v8 = vpop.f32.mrf.mxu1 }
  0xe0   :  { %v694_v48 = vmax.f32 %v190_v56, %v525_v8 }
  0xe1   :  { %v355_v9 = vpop.f32.mrf.mxu0  ;;  %v527_v10 = vpop.f32.mrf.mxu1 }
  0xe3   :  { %v1641_v11 = vpop.f32.mrf.mxu0  ;;  %v528_v12 = vpop.f32.mrf.mxu1 }
  0xe5   :  { %v564_v13 = vpop.f32.mrf.mxu0  ;;  %v605_v14 = vpop.f32.mrf.mxu1 }
  0xe6   :  { %v695_v2 = vmax.f32 %v2158_v55, %v564_v13  ;;  %v697_v4 = vmax.f32 %v2162_v61, %v605_v14 }
  0xe7   :  { %v566_v15 = vpop.f32.mrf.mxu0  ;;  %v607_v16 = vpop.f32.mrf.mxu1 }
  0xe8   :  { %v696_v3 = vmax.f32 %v2160_v57, %v566_v15  ;;  %v698_v6 = vmax.f32 %v2166_v62, %v607_v16 }
  0xe9   :  { %v568_v17 = vpop.f32.mrf.mxu0  ;;  %v609_v18 = vpop.f32.mrf.mxu1 }
  0xeb   :  { %v569_v19 = vpop.f32.mrf.mxu0  ;;  %v610_v20 = vpop.f32.mrf.mxu1 }
  0xed   :  { %v2172_v21 = vpop.f32.mrf.mxu0  ;;  %v2174_v23 = vpop.f32.mrf.mxu1 }
  0xef   :  { %v2176_v24 = vpop.f32.mrf.mxu0  ;;  %v1648_v25 = vpop.f32.mrf.mxu1 }
  0xf1   :  { %v650_v26 = vpop.f32.mrf.mxu0  ;;  %v690_v27 = vpop.f32.mrf.mxu1 }
  0xf2   :  { %v699_v26 = vmax.f32 %v2164_v36, %v2172_v21  ;;  %v701_v27 = vmax.f32 %v2170_v5, %v2174_v23 }
  0xf3   :  { %v651_v28 = vpop.f32.mrf.mxu0  ;;  %v1649_v29 = vpop.f32.mrf.mxu1 }
  0xf5   :  { %v867_v30 = vpop.f32.mrf.mxu0  ;;  %v908_v31 = vpop.f32.mrf.mxu1 }
  0xf6   :  { %v1037_v49 = vmax.f32 %v693_v45, %v867_v30  ;;  %v1039_v9 = vmax.f32 %v695_v2, %v908_v31 }
  0xf7   :  { %v869_v32 = vpop.f32.mrf.mxu0  ;;  %v910_v33 = vpop.f32.mrf.mxu1 }
  0xf8   :  { %v1038_v53 = vmax.f32 %v694_v48, %v869_v32  ;;  %v1040_v17 = vmax.f32 %v696_v3, %v910_v33  ;;  %v700_v32 = vmax.f32 %v2168_v63, %v2176_v24 }
  0xf9   :  { %v871_v34 = vpop.f32.mrf.mxu0  ;;  %v912_v35 = vpop.f32.mrf.mxu1 }
  0xfb   :  { %v872_v37 = vpop.f32.mrf.mxu0  ;;  %v913_v38 = vpop.f32.mrf.mxu1 }
  0xfd   :  { %v949_v39 = vpop.f32.mrf.mxu0  ;;  %v990_v40 = vpop.f32.mrf.mxu1 }
  0xfe   :  { %v1041_v10 = vmax.f32 %v697_v4, %v949_v39  ;;  %v1043_v33 = vmax.f32 %v699_v26, %v990_v40 }
  0xff   :  { %v951_v41 = vpop.f32.mrf.mxu0  ;;  %v992_v42 = vpop.f32.mrf.mxu1 }
 0x100   :  { %v1042_v20 = vmax.f32 %v698_v6, %v951_v41  ;;  %v1044_v21 = vmax.f32 %v700_v32, %v992_v42 }
 0x101   :  { %v953_v43 = vpop.f32.mrf.mxu0  ;;  %v994_v44 = vpop.f32.mrf.mxu1 }
 0x103   :  { %v954_v46 = vpop.f32.mrf.mxu0  ;;  %v995_v47 = vpop.f32.mrf.mxu1 }
 0x105   :  { %v1031_v51 = vpop.f32.mrf.mxu0  ;;  %v1211_v52 = vpop.f32.mrf.mxu1 }
 0x106   :  { %v1381_v54 = vmax.f32 %v1037_v49, %v1211_v52  ;;  %v1045_v34 = vmax.f32 %v701_v27, %v1031_v51 }
 0x107   :  { %v1656_v58 = vpop.f32.mrf.mxu0  ;;  %v1213_v59 = vpop.f32.mrf.mxu1 }
 0x108   :  { %v1382_v1 = vmax.f32 %v1038_v53, %v1213_v59  ;;  %v1396_v60 = vadd.f32 %v2178_v50, %v1381_v54 }
 0x109   :  { %v1034_v0 = vpop.f32.mrf.mxu0  ;;  %v1215_v22 = vpop.f32.mrf.mxu1 }
 0x10a   :  { %v1397_v56 = vadd.f32 %v2178_v50, %v1382_v1  ;;  %v1405_v11 = vmax.f32 %v1396_v60, 0.0 }
 0x10b   :  { %v1657_v7 = vpop.f32.mrf.mxu0  ;;  %v1216_v8 = vpop.f32.mrf.mxu1 }
 0x10c   :  { %v1406_v12 = vmax.f32 %v1397_v56, 0.0 }
 0x10d   :  { %v1252_v18 = vpop.f32.mrf.mxu0  ;;  %v1293_v19 = vpop.f32.mrf.mxu1 }
 0x10e   :  { %v1617_v25 = vpack.c.bf16 %v1406_v12, %v1405_v11  ;;  %v1383_v55 = vmax.f32 %v1039_v9, %v1252_v18  ;;  %v1385_v13 = vmax.f32 %v1041_v10, %v1293_v19 }
 0x10f   :  { %v1254_v61 = vpop.f32.mrf.mxu0  ;;  %v1295_v14 = vpop.f32.mrf.mxu1 }
 0x110   :  { %1451 = vst [vmem:[%s2217_s3] sm:$0x77] %v1617_v25  ;;  %v1398_v57 = vadd.f32 %v2178_v50, %v1383_v55  ;;  %v1400_v62 = vadd.f32 %v2178_v50, %v1385_v13  ;;  %v1384_v15 = vmax.f32 %v1040_v17, %v1254_v61  ;;  %v1386_v16 = vmax.f32 %v1042_v20, %v1295_v14 }
 0x111   :  { %v1256_v28 = vpop.f32.mrf.mxu0  ;;  %v1297_v29 = vpop.f32.mrf.mxu1 }
 0x112   :  { %v1399_v30 = vadd.f32 %v2178_v50, %v1384_v15  ;;  %v1401_v31 = vadd.f32 %v2178_v50, %v1386_v16  ;;  %v1407_v38 = vmax.f32 %v1398_v57, 0.0  ;;  %v1409_v39 = vmax.f32 %v1400_v62, 0.0 }
 0x113   :  { %v1257_v35 = vpop.f32.mrf.mxu0  ;;  %v1298_v37 = vpop.f32.mrf.mxu1 }
 0x114   :  { %v1408_v41 = vmax.f32 %v1399_v30, 0.0  ;;  %v1410_v36 = vmax.f32 %v1401_v31, 0.0 }
 0x115   :  { %v1334_v43 = vpop.f32.mrf.mxu0  ;;  %v1375_v5 = vpop.f32.mrf.mxu1 }
 0x116   :  { %v1618_v23 = vpack.c.bf16 %v1408_v41, %v1407_v38  ;;  %v1619_v44 = vpack.c.bf16 %v1410_v36, %v1409_v39  ;;  %v1387_v45 = vmax.f32 %v1043_v33, %v1334_v43  ;;  %v1389_v46 = vmax.f32 %v1045_v34, %v1375_v5 }
 0x117   :  { %v1336_v47 = vpop.f32.mrf.mxu0  ;;  %v1664_v48 = vpop.f32.mrf.mxu1 }
 0x118   :  { %1452 = vst [vmem:[%s2217_s3 + $0x8] sm:$0x77] %v1618_v23  ;;  %1453 = vst [vmem:[%s2217_s3 + $0x10] sm:$0x77] %v1619_v44  ;;  %v1402_v63 = vadd.f32 %v2178_v50, %v1387_v45  ;;  %v1404_v24 = vadd.f32 %v2178_v50, %v1389_v46  ;;  %v1388_v40 = vmax.f32 %v1044_v21, %v1336_v47 }
 0x119   :  { %v1338_v42 = vpop.f32.mrf.mxu0  ;;  %v1378_v49 = vpop.f32.mrf.mxu1 }
 0x11a   :  { %v1413_v51 = vmax.f32 %v1404_v24, 0.0  ;;  %v1403_v52 = vadd.f32 %v2178_v50, %v1388_v40  ;;  %v1411_v58 = vmax.f32 %v1402_v63, 0.0 }
 0x11b   :  { %v1339_v53 = vpop.f32.mrf.mxu0  ;;  %v1665_v54 = vpop.f32.mrf.mxu1 }
 0x11c   :  { %v1621_v59 = vpack.c.bf16 %v1413_v51, %v1413_v51  ;;  %v1412_v1 = vmax.f32 %v1403_v52, 0.0 }
 0x11e   :  { %1455 = vst [vmem:[%s2217_s3 + $0x20] sm:$0x7] %v1621_v59  ;;  %v1620_v60 = vpack.c.bf16 %v1412_v1, %v1411_v58 }
 0x120   :  { %1454 = vst [vmem:[%s2217_s3 + $0x18] sm:$0x77] %v1620_v60 }

// kernel: tile.8
= control target key start
LH: loop header
LB: loop body
LE: loop exit
PB: predicated region body
PF: predicated region fallthrough
CT: control target
= control target key end

     0   :  { %s28_s0 = inlined_call_operand.vmem [shape: f32[16], index: 0, kind: input, shape index: {}]   ;;  %s29_s1 = inlined_call_operand.vmem [shape: f32[16,16], index: 1, kind: output, shape index: {}]  }
   0x1   :  { %v4_v0 = vld [vmem:[%s28_s0] ss:$0 sm:$0xff] }
   0x2   :  { %5 = vst [vmem:[%s29_s1] sm:$0xff] %v4_v0  ;;  %8 = vst [vmem:[%s29_s1 + $0x8] sm:$0xff] %v4_v0 }

// kernel: tile.9
= control target key start
LH: loop header
LB: loop body
LE: loop exit
PB: predicated region body
PF: predicated region fallthrough
CT: control target
= control target key end

     0   :  { %s7_s6 = smov 3  ;;  %s21_s9 = smov 3  ;;  %vm4_vm0 = vcmask 130048   ;;  %vm11_vm1 = vcmask 1048448   ;;  %vm18_vm2 = vcmask 917248   ;;  %vm25_vm3 = vcmask 786048   ;;  %s131_s0 = inlined_call_operand.vmem [shape: f32[16,16], index: 0, kind: input, shape index: {}]   ;;  %s132_s1 = inlined_call_operand.vmem [shape: f32[1,256], index: 1, kind: output, shape index: {}]  }
   0x1   :  { %v69_v0 = vld [vmem:[%s131_s0 + $0x7] ss:$8 sm:%s7_s6]   ;;  %s84_s10 = smov 112   ;;  %v71_v1 = vld [vmem:[%s131_s0 + $0x5] ss:$8 sm:%s21_s9]   ;;  %s14_s13 = smov 3 }
   0x2   :  { %9 = vrot.lane.b32.xlu0 %v69_v0, %s84_s10  ;;  %s85_s14 = smov 80   ;;  %v70_v2 = vld [vmem:[%s131_s0 + $0x6] ss:$8 sm:%s14_s13]   ;;  %s28_s17 = smov 3  ;;  %vm32_vm4 = vcmask 654848   ;;  %vm39_vm5 = vcmask 523648  }
   0x3   :  { %23 = vrot.lane.b32.xlu1 %v71_v1, %s85_s14  ;;  %v72_v3 = vld [vmem:[%s131_s0 + $0x4] ss:$8 sm:%s28_s17]   ;;  %s35_s20 = smov 3  ;;  %s42_s21 = smov 3  ;;  %vm46_vm6 = vcmask 392448   ;;  %vm53_vm7 = vcmask 261248  }
   0x4   :  { %s86_s22 = smov 96   ;;  %s87_s23 = smov 64   ;;  %v73_v4 = vld [vmem:[%s131_s0 + $0x3] ss:$8 sm:%s35_s20]   ;;  %v74_v5 = vld [vmem:[%s131_s0 + $0x2] ss:$8 sm:%s42_s21]  }
   0x5   :  { %s2_s26 = smov 3  ;;  %s49_s29 = smov 3 }
   0x6   :  { %16 = vrot.lane.b32.xlu0 %v70_v2, %s86_s22  ;;  %v3_v6 = vld [vmem:[%s131_s0] ss:$8 sm:%s2_s26]   ;;  %s88_s3 = smov 48   ;;  %s89_s4 = smov 32  }
   0x7   :  { %30 = vrot.lane.b32.xlu1 %v72_v3, %s87_s23  ;;  %5 = vst.msk [vmem:[#allocation0] ss:$8 sm:$0x3] %vm4_vm0, %v3_v6   ;;  %v75_v7 = vld [vmem:[%s131_s0 + $0x1] ss:$8 sm:%s49_s29]   ;;  %s90_s0 = smov 16  }
   0xa   :  { %37 = vrot.lane.b32.xlu0 %v73_v4, %s88_s3 }
   0xb   :  { %44 = vrot.lane.b32.xlu1 %v74_v5, %s89_s4 }
   0xe   :  { %51 = vrot.lane.b32.xlu0 %v75_v7, %s90_s0 }
  0x74   :  { %v10_v8 = vpop.permute.xlu0 %9  }
  0x75   :  { %12 = vst.msk [vmem:[#allocation0] ss:$8 sm:$0x3] %vm11_vm1, %v10_v8   ;;  %v24_v9 = vpop.permute.xlu1 %23  }
  0x78   :  { %v17_v10 = vpop.permute.xlu0 %16  }
  0x79   :  { %19 = vst.msk [vmem:[#allocation0] ss:$8 sm:$0x3] %vm18_vm2, %v17_v10   ;;  %v31_v11 = vpop.permute.xlu1 %30  }
  0x7a   :  { %26 = vst.msk [vmem:[#allocation0] ss:$8 sm:$0x3] %vm25_vm3, %v24_v9  }
  0x7b   :  { %33 = vst.msk [vmem:[#allocation0] ss:$8 sm:$0x3] %vm32_vm4, %v31_v11  }
  0x7c   :  { %v38_v12 = vpop.permute.xlu0 %37  }
  0x7d   :  { %40 = vst.msk [vmem:[#allocation0] ss:$8 sm:$0x3] %vm39_vm5, %v38_v12   ;;  %v45_v13 = vpop.permute.xlu1 %44  }
  0x7e   :  { %47 = vst.msk [vmem:[#allocation0] ss:$8 sm:$0x3] %vm46_vm6, %v45_v13  }
  0x80   :  { %v52_v14 = vpop.permute.xlu0 %51  }
  0x81   :  { %54 = vst.msk [vmem:[#allocation0] ss:$8 sm:$0x3] %vm53_vm7, %v52_v14  }
  0x88   :  { %v59_v15 = vld [vmem:[#allocation0] sm:$0x1]  ;;  %v64_v16 = vld [vmem:[#allocation0 + $0x8] sm:$0x1] }
  0x89   :  { %62 = vst [vmem:[%s132_s1] sm:$0x1] %v59_v15  ;;  %76 = vst [vmem:[%s132_s1 + $0x1] sm:$0x1] %v64_v16 }

// kernel: chinese_number_cnn_forward.3
= control target key start
LH: loop header
LB: loop body
LE: loop exit
PB: predicated region body
PF: predicated region fallthrough
CT: control target
= control target key end

     0   :  { %vm1909_vm0 = vcmask 785408   ;;  %vm4065_vm1 = vcmask 1043456   ;;  %vm5807_vm2 = vmmov 0   ;;  %vm4166_vm3 = vcmask 1041408   ;;  %s10384_s1 = inlined_call_operand.vmem [shape: bf16[2400,256], index: 1, kind: input, shape index: {}]   ;;  %s10385_s0 = inlined_call_operand.vmem [shape: bf16[4,8,2400], index: 0, kind: input, shape index: {}]   ;;  %s10386_s3 = inlined_call_operand.vmem [shape: bf16[256,120], index: 3, kind: input, shape index: {}]   ;;  %s10387_s5 = inlined_call_operand.vmem [shape: bf16[120,84], index: 5, kind: input, shape index: {}]   ;;  %s10388_s2 = inlined_call_operand.vmem [shape: f32[1,256], index: 2, kind: input, shape index: {}]   ;;  %s10389_s7 = inlined_call_operand.vmem [shape: bf16[84,15], index: 7, kind: input, shape index: {}]   ;;  %s10390_s4 = inlined_call_operand.vmem [shape: f32[1,120], index: 4, kind: input, shape index: {}]   ;;  %s10391_s6 = inlined_call_operand.vmem [shape: f32[1,84], index: 6, kind: input, shape index: {}]   ;;  %s10392_s8 = inlined_call_operand.vmem [shape: f32[1,15], index: 8, kind: input, shape index: {}]   ;;  %s10393_s9 = inlined_call_operand.vmem [shape: f32[8,15], index: 9, kind: output, shape index: {}]  }
   0x1   :  { %v4738_v0 = vld [vmem:[%s10384_s1 + $0x74] ss:$8 sps:$4 sm:$0xff]   ;;  %v4742_v2 = vld [vmem:[%s10384_s1 + $0x70] ss:$8 sps:$4 sm:$0xff]   ;;  %v4744_v4 = vld [vmem:[%s10384_s1 + $0x64] ss:$8 sps:$4 sm:$0xff]  }
   0x2   :  { %v4740_v1 = vld [vmem:[%s10384_s1 + $0x174] ss:$8 sps:$4 sm:$0xff]   ;;  %1913 = vmatprep.subr.bf16.mxu0 %v4738_v0  ;;  %v4743_v3 = vld [vmem:[%s10384_s1 + $0x170] ss:$8 sps:$4 sm:$0xff]   ;;  %v4746_v5 = vld [vmem:[%s10384_s1 + $0x164] ss:$8 sps:$4 sm:$0xff]  }
   0x3   :  { %1954 = vmatprep.subr.bf16.mxu1 %v4740_v1  ;;  %1914 = vmatpush1.bf16.msra.mxu0 %v4742_v2  ;;  %v4748_v6 = vld [vmem:[%s10384_s1 + $0x60] ss:$8 sps:$4 sm:$0xff]   ;;  %v4750_v8 = vld [vmem:[%s10384_s1 + $0x54] ss:$8 sps:$4 sm:$0xff]   ;;  %v4754_v10 = vld [vmem:[%s10384_s1 + $0x50] ss:$8 sps:$4 sm:$0xff]  }
   0x4   :  { %1955 = vmatpush1.bf16.msra.mxu1 %v4743_v3  ;;  %1915 = vmatprep.subr.bf16.mxu0 %v4744_v4  ;;  %v4749_v7 = vld [vmem:[%s10384_s1 + $0x160] ss:$8 sps:$4 sm:$0xff]   ;;  %v4752_v9 = vld [vmem:[%s10384_s1 + $0x154] ss:$8 sps:$4 sm:$0xff]   ;;  %v4755_v11 = vld [vmem:[%s10384_s1 + $0x150] ss:$8 sps:$4 sm:$0xff]  }
   0x5   :  { %1956 = vmatprep.subr.bf16.mxu1 %v4746_v5  ;;  %v4756_v12 = vld [vmem:[%s10384_s1 + $0x44] ss:$8 sps:$4 sm:$0xff]   ;;  %v4760_v14 = vld [vmem:[%s10384_s1 + $0x40] ss:$8 sps:$4 sm:$0xff]   ;;  %v4762_v16 = vld [vmem:[%s10384_s1 + $0x34] ss:$8 sps:$4 sm:$0xff]  }
   0x6   :  { %v4758_v13 = vld [vmem:[%s10384_s1 + $0x144] ss:$8 sps:$4 sm:$0xff]   ;;  %v4761_v15 = vld [vmem:[%s10384_s1 + $0x140] ss:$8 sps:$4 sm:$0xff]   ;;  %v4764_v17 = vld [vmem:[%s10384_s1 + $0x134] ss:$8 sps:$4 sm:$0xff]  }
   0x7   :  { %1916 = vmatpush1.bf16.msra.mxu0 %v4748_v6  ;;  %v4766_v18 = vld [vmem:[%s10384_s1 + $0x30] ss:$8 sps:$4 sm:$0xff]   ;;  %v4768_v20 = vld [vmem:[%s10384_s1 + $0x24] ss:$8 sps:$4 sm:$0xff]   ;;  %v4772_v22 = vld [vmem:[%s10384_s1 + $0x20] ss:$8 sps:$4 sm:$0xff]  }
   0x8   :  { %1957 = vmatpush1.bf16.msra.mxu1 %v4749_v7  ;;  %1917 = vmatprep.subr.bf16.mxu0 %v4750_v8  ;;  %v4767_v19 = vld [vmem:[%s10384_s1 + $0x130] ss:$8 sps:$4 sm:$0xff]   ;;  %v4770_v21 = vld [vmem:[%s10384_s1 + $0x124] ss:$8 sps:$4 sm:$0xff]   ;;  %v4773_v23 = vld [vmem:[%s10384_s1 + $0x120] ss:$8 sps:$4 sm:$0xff]  }
   0x9   :  { %1958 = vmatprep.subr.bf16.mxu1 %v4752_v9  ;;  %v4774_v24 = vld [vmem:[%s10384_s1 + $0x14] ss:$8 sps:$4 sm:$0xff]   ;;  %v4778_v26 = vld [vmem:[%s10384_s1 + $0x10] ss:$8 sps:$4 sm:$0xff]   ;;  %v4780_v28 = vld [vmem:[%s10384_s1 + $0x4] ss:$8 sps:$4 sm:$0xff]  }
   0xa   :  { %v4776_v25 = vld [vmem:[%s10384_s1 + $0x114] ss:$8 sps:$4 sm:$0xff]   ;;  %v4779_v27 = vld [vmem:[%s10384_s1 + $0x110] ss:$8 sps:$4 sm:$0xff]   ;;  %v4782_v29 = vld [vmem:[%s10384_s1 + $0x104] ss:$8 sps:$4 sm:$0xff]  }
   0xb   :  { %1918 = vmatpush1.bf16.msra.mxu0 %v4754_v10  ;;  %v4784_v30 = vld [vmem:[%s10384_s1] ss:$8 sps:$4 sm:$0xff]   ;;  %v4786_v32 = vld [vmem:[%s10384_s1 + $0xf4] ss:$8 sps:$4 sm:$0xff]   ;;  %v4790_v34 = vld [vmem:[%s10384_s1 + $0xf0] ss:$8 sps:$4 sm:$0xff]  }
   0xc   :  { %1959 = vmatpush1.bf16.msra.mxu1 %v4755_v11  ;;  %1919 = vmatprep.subr.bf16.mxu0 %v4756_v12  ;;  %v4785_v31 = vld [vmem:[%s10384_s1 + $0x100] ss:$8 sps:$4 sm:$0xff]   ;;  %v4788_v33 = vld [vmem:[%s10384_s1 + $0x1f4] ss:$8 sps:$4 sm:$0xff]   ;;  %v4791_v35 = vld [vmem:[%s10384_s1 + $0x1f0] ss:$8 sps:$4 sm:$0xff]  }
   0xd   :  { %1960 = vmatprep.subr.bf16.mxu1 %v4758_v13  ;;  %v4792_v36 = vld [vmem:[%s10384_s1 + $0xe4] ss:$8 sps:$4 sm:$0xff]   ;;  %v4796_v38 = vld [vmem:[%s10384_s1 + $0xe0] ss:$8 sps:$4 sm:$0xff]   ;;  %v4798_v40 = vld [vmem:[%s10384_s1 + $0xd4] ss:$8 sps:$4 sm:$0xff]  }
   0xe   :  { %v4794_v37 = vld [vmem:[%s10384_s1 + $0x1e4] ss:$8 sps:$4 sm:$0xff]   ;;  %v4797_v39 = vld [vmem:[%s10384_s1 + $0x1e0] ss:$8 sps:$4 sm:$0xff]   ;;  %v4800_v41 = vld [vmem:[%s10384_s1 + $0x1d4] ss:$8 sps:$4 sm:$0xff]  }
   0xf   :  { %1920 = vmatpush1.bf16.msra.mxu0 %v4760_v14  ;;  %v4802_v42 = vld [vmem:[%s10384_s1 + $0xd0] ss:$8 sps:$4 sm:$0xff]   ;;  %v4804_v44 = vld [vmem:[%s10384_s1 + $0xc4] ss:$8 sps:$4 sm:$0xff]   ;;  %v4808_v46 = vld [vmem:[%s10384_s1 + $0xc0] ss:$8 sps:$4 sm:$0xff]  }
  0x10   :  { %1961 = vmatpush1.bf16.msra.mxu1 %v4761_v15  ;;  %1921 = vmatprep.subr.bf16.mxu0 %v4762_v16  ;;  %v4803_v43 = vld [vmem:[%s10384_s1 + $0x1d0] ss:$8 sps:$4 sm:$0xff]   ;;  %v4806_v45 = vld [vmem:[%s10384_s1 + $0x1c4] ss:$8 sps:$4 sm:$0xff]   ;;  %v4809_v50 = vld [vmem:[%s10384_s1 + $0x1c0] ss:$8 sps:$4 sm:$0xff]  }
  0x11   :  { %1962 = vmatprep.subr.bf16.mxu1 %v4764_v17  ;;  %v333_v47 = vld [vmem:[%s10385_s0] sm:$0xff]  ;;  %v334_v49 = vld [vmem:[%s10385_s0 + $0x8] sm:$0xff]  ;;  %v4810_v52 = vld [vmem:[%s10384_s1 + $0xb4] ss:$8 sps:$4 sm:$0xff]   ;;  %vm4061_vm4 = vcmask 982016   ;;  %vm4162_vm5 = vcmask 687104  }
  0x12   :  { %v4217_v48 = vcombine.high %v333_v47, %v333_v47  ;;  %v4219_v51 = vcombine.high %v334_v49, %v334_v49  ;;  %v4812_v53 = vld [vmem:[%s10384_s1 + $0x1b4] ss:$8 sps:$4 sm:$0xff]   ;;  %v4814_v54 = vld [vmem:[%s10384_s1 + $0xb0] ss:$8 sps:$4 sm:$0xff]   ;;  %v4816_v56 = vld [vmem:[%s10384_s1 + $0xa4] ss:$8 sps:$4 sm:$0xff]   ;;  %v4216_v6 = vcombine.low %v333_v47, %v333_v47  ;;  %v4218_v7 = vcombine.low %v334_v49, %v334_v49 }
  0x13   :  { %1922 = vmatpush1.bf16.msra.mxu0 %v4766_v18  ;;  %v4815_v55 = vld [vmem:[%s10384_s1 + $0x1b0] ss:$8 sps:$4 sm:$0xff]   ;;  %v4818_v57 = vld [vmem:[%s10384_s1 + $0x1a4] ss:$8 sps:$4 sm:$0xff]   ;;  %v4820_v58 = vld [vmem:[%s10384_s1 + $0xa0] ss:$8 sps:$4 sm:$0xff]  }
  0x14   :  { %1963 = vmatpush1.bf16.msra.mxu1 %v4767_v19  ;;  %1923 = vmatprep.subr.bf16.mxu0 %v4768_v20  ;;  %v4821_v59 = vld [vmem:[%s10384_s1 + $0x1a0] ss:$8 sps:$4 sm:$0xff]   ;;  %v4822_v60 = vld [vmem:[%s10384_s1 + $0x94] ss:$8 sps:$4 sm:$0xff]   ;;  %v4826_v62 = vld [vmem:[%s10384_s1 + $0x90] ss:$8 sps:$4 sm:$0xff]  }
  0x15   :  { %1964 = vmatprep.subr.bf16.mxu1 %v4770_v21  ;;  %1945 = vmatprep.mubr.bf16.mxu0 %v4217_v48  ;;  %v4824_v61 = vld [vmem:[%s10384_s1 + $0x194] ss:$8 sps:$4 sm:$0xff]   ;;  %v4827_v63 = vld [vmem:[%s10384_s1 + $0x190] ss:$8 sps:$4 sm:$0xff]   ;;  %v4828_v0 = vld [vmem:[%s10384_s1 + $0x84] ss:$8 sps:$4 sm:$0xff]  }
  0x16   :  { %1986 = vmatprep.mubr.bf16.mxu1 %v4219_v51  ;;  %v4830_v1 = vld [vmem:[%s10384_s1 + $0x184] ss:$8 sps:$4 sm:$0xff]   ;;  %v4832_v2 = vld [vmem:[%s10384_s1 + $0x80] ss:$8 sps:$4 sm:$0xff]   ;;  %v4838_v4 = vld [vmem:[%s10384_s1 + $0x274] ss:$8 sps:$4 sm:$0xff]  }
  0x17   :  { %1924 = vmatpush1.bf16.msra.mxu0 %v4772_v22  ;;  %v4833_v3 = vld [vmem:[%s10384_s1 + $0x180] ss:$8 sps:$4 sm:$0xff]   ;;  %v4840_v5 = vld [vmem:[%s10384_s1 + $0x374] ss:$8 sps:$4 sm:$0xff]   ;;  %v4842_v8 = vld [vmem:[%s10384_s1 + $0x270] ss:$8 sps:$4 sm:$0xff]  }
  0x18   :  { %1965 = vmatpush1.bf16.msra.mxu1 %v4773_v23  ;;  %1925 = vmatprep.subr.bf16.mxu0 %v4774_v24  ;;  %v4843_v9 = vld [vmem:[%s10384_s1 + $0x370] ss:$8 sps:$4 sm:$0xff]   ;;  %v4844_v10 = vld [vmem:[%s10384_s1 + $0x264] ss:$8 sps:$4 sm:$0xff]   ;;  %v4848_v12 = vld [vmem:[%s10384_s1 + $0x260] ss:$8 sps:$4 sm:$0xff]  }
  0x19   :  { %1966 = vmatprep.subr.bf16.mxu1 %v4776_v25  ;;  %v4846_v11 = vld [vmem:[%s10384_s1 + $0x364] ss:$8 sps:$4 sm:$0xff]   ;;  %v4849_v13 = vld [vmem:[%s10384_s1 + $0x360] ss:$8 sps:$4 sm:$0xff]   ;;  %v4850_v14 = vld [vmem:[%s10384_s1 + $0x254] ss:$8 sps:$4 sm:$0xff]  }
  0x1a   :  { %v4852_v15 = vld [vmem:[%s10384_s1 + $0x354] ss:$8 sps:$4 sm:$0xff]   ;;  %v4854_v16 = vld [vmem:[%s10384_s1 + $0x250] ss:$8 sps:$4 sm:$0xff]   ;;  %v4856_v18 = vld [vmem:[%s10384_s1 + $0x244] ss:$8 sps:$4 sm:$0xff]  }
  0x1b   :  { %1926 = vmatpush1.bf16.msra.mxu0 %v4778_v26  ;;  %v4855_v17 = vld [vmem:[%s10384_s1 + $0x350] ss:$8 sps:$4 sm:$0xff]   ;;  %v4858_v19 = vld [vmem:[%s10384_s1 + $0x344] ss:$8 sps:$4 sm:$0xff]   ;;  %v4860_v20 = vld [vmem:[%s10384_s1 + $0x240] ss:$8 sps:$4 sm:$0xff]  }
  0x1c   :  { %1967 = vmatpush1.bf16.msra.mxu1 %v4779_v27  ;;  %1927 = vmatprep.subr.bf16.mxu0 %v4780_v28  ;;  %v4861_v21 = vld [vmem:[%s10384_s1 + $0x340] ss:$8 sps:$4 sm:$0xff]   ;;  %v4862_v22 = vld [vmem:[%s10384_s1 + $0x234] ss:$8 sps:$4 sm:$0xff]   ;;  %v4866_v24 = vld [vmem:[%s10384_s1 + $0x230] ss:$8 sps:$4 sm:$0xff]  }
  0x1d   :  { %1968 = vmatprep.subr.bf16.mxu1 %v4782_v29  ;;  %v4864_v23 = vld [vmem:[%s10384_s1 + $0x334] ss:$8 sps:$4 sm:$0xff]   ;;  %v4867_v25 = vld [vmem:[%s10384_s1 + $0x330] ss:$8 sps:$4 sm:$0xff]   ;;  %v4868_v26 = vld [vmem:[%s10384_s1 + $0x224] ss:$8 sps:$4 sm:$0xff]  }
  0x1e   :  { %v4870_v27 = vld [vmem:[%s10384_s1 + $0x324] ss:$8 sps:$4 sm:$0xff]   ;;  %v4872_v28 = vld [vmem:[%s10384_s1 + $0x220] ss:$8 sps:$4 sm:$0xff]   ;;  %v4900_v51 = vld [vmem:[%s10384_s1 + $0x3d4] ss:$8 sps:$4 sm:$0xff]  }
  0x1f   :  { %1928 = vmatpush1.bf16.msra.mxu0 %v4784_v30  ;;  %v4873_v29 = vld [vmem:[%s10384_s1 + $0x320] ss:$8 sps:$4 sm:$0xff]   ;;  %v4874_v30 = vld [vmem:[%s10384_s1 + $0x214] ss:$8 sps:$4 sm:$0xff]   ;;  %v4894_v47 = vld [vmem:[%s10384_s1 + $0x3e4] ss:$8 sps:$4 sm:$0xff]  }
  0x20   :  { %1969 = vmatpush1.bf16.msra.mxu1 %v4785_v31  ;;  %1929 = vmatprep.subr.bf16.mxu0 %v4786_v32  ;;  %v4876_v31 = vld [vmem:[%s10384_s1 + $0x314] ss:$8 sps:$4 sm:$0xff]   ;;  %v4896_v48 = vld [vmem:[%s10384_s1 + $0x2e0] ss:$8 sps:$4 sm:$0xff]   ;;  %vm4210_vm6 = vcmask 121856  }
  0x21   :  { %1970 = vmatprep.subr.bf16.mxu1 %v4788_v33  ;;  %v6137_v32 = vld [vmem:[%s10385_s0 + $0x10] sm:$0xff]  ;;  %v6142_v33 = vld [vmem:[%s10385_s0 + $0x18] sm:$0xff]  ;;  %v4897_v49 = vld [vmem:[%s10384_s1 + $0x3e0] ss:$8 sps:$4 sm:$0xff]  }
  0x23   :  { %1930 = vmatpush2.bf16.msra.mxu0 %v4790_v34  ;;  %v4878_v34 = vld [vmem:[%s10384_s1 + $0x210] ss:$8 sps:$4 sm:$0xff]  }
  0x24   :  { %1971 = vmatpush2.bf16.msra.mxu1 %v4791_v35  ;;  %1931 = vmatprep.subr.bf16.mxu0 %v4792_v36  ;;  %v4221_v35 = vcombine.high %v6137_v32, %v6137_v32  ;;  %v4223_v36 = vcombine.high %v6142_v33, %v6142_v33 }
  0x25   :  { %1972 = vmatprep.subr.bf16.mxu1 %v4794_v37  ;;  %v4879_v37 = vld [vmem:[%s10384_s1 + $0x310] ss:$8 sps:$4 sm:$0xff]  }
  0x27   :  { %1932 = vmatpush2.bf16.msra.mxu0 %v4796_v38  ;;  %v4880_v38 = vld [vmem:[%s10384_s1 + $0x204] ss:$8 sps:$4 sm:$0xff]  }
  0x28   :  { %1973 = vmatpush2.bf16.msra.mxu1 %v4797_v39  ;;  %1933 = vmatprep.subr.bf16.mxu0 %v4798_v40  ;;  %v4882_v39 = vld [vmem:[%s10384_s1 + $0x304] ss:$8 sps:$4 sm:$0xff]   ;;  %v4884_v40 = vld [vmem:[%s10384_s1 + $0x200] ss:$8 sps:$4 sm:$0xff]  }
  0x29   :  { %1974 = vmatprep.subr.bf16.mxu1 %v4800_v41  ;;  %v4885_v41 = vld [vmem:[%s10384_s1 + $0x300] ss:$8 sps:$4 sm:$0xff]  }
  0x2b   :  { %1934 = vmatpush2.bf16.msra.mxu0 %v4802_v42  ;;  %v4886_v42 = vld [vmem:[%s10384_s1 + $0x2f4] ss:$8 sps:$4 sm:$0xff]  }
  0x2c   :  { %1975 = vmatpush2.bf16.msra.mxu1 %v4803_v43  ;;  %1935 = vmatprep.subr.bf16.mxu0 %v4804_v44  ;;  %v4888_v43 = vld [vmem:[%s10384_s1 + $0x3f4] ss:$8 sps:$4 sm:$0xff]   ;;  %v4890_v44 = vld [vmem:[%s10384_s1 + $0x2f0] ss:$8 sps:$4 sm:$0xff]  }
  0x2d   :  { %1976 = vmatprep.subr.bf16.mxu1 %v4806_v45  ;;  %v4891_v45 = vld [vmem:[%s10384_s1 + $0x3f0] ss:$8 sps:$4 sm:$0xff]  }
  0x2f   :  { %1936 = vmatpush2.bf16.msra.mxu0 %v4808_v46  ;;  %v4892_v46 = vld [vmem:[%s10384_s1 + $0x2e4] ss:$8 sps:$4 sm:$0xff]  }
  0x30   :  { %1977 = vmatpush2.bf16.msra.mxu1 %v4809_v50  ;;  %1937 = vmatprep.subr.bf16.mxu0 %v4810_v52  ;;  %v4898_v50 = vld [vmem:[%s10384_s1 + $0x2d4] ss:$8 sps:$4 sm:$0xff]   ;;  %v4902_v52 = vld [vmem:[%s10384_s1 + $0x2d0] ss:$8 sps:$4 sm:$0xff]  }
  0x31   :  { %1978 = vmatprep.subr.bf16.mxu1 %v4812_v53  ;;  %v4903_v53 = vld [vmem:[%s10384_s1 + $0x3d0] ss:$8 sps:$4 sm:$0xff]  }
  0x33   :  { %1938 = vmatpush2.bf16.msra.mxu0 %v4814_v54  ;;  %v4904_v54 = vld [vmem:[%s10384_s1 + $0x2c4] ss:$8 sps:$4 sm:$0xff]  }
  0x34   :  { %1979 = vmatpush2.bf16.msra.mxu1 %v4815_v55  ;;  %1939 = vmatprep.subr.bf16.mxu0 %v4816_v56  ;;  %v4906_v55 = vld [vmem:[%s10384_s1 + $0x3c4] ss:$8 sps:$4 sm:$0xff]   ;;  %v4908_v56 = vld [vmem:[%s10384_s1 + $0x2c0] ss:$8 sps:$4 sm:$0xff]  }
  0x35   :  { %1980 = vmatprep.subr.bf16.mxu1 %v4818_v57  ;;  %v4909_v57 = vld [vmem:[%s10384_s1 + $0x3c0] ss:$8 sps:$4 sm:$0xff]  }
  0x37   :  { %1940 = vmatpush2.bf16.msra.mxu0 %v4820_v58  ;;  %v4910_v58 = vld [vmem:[%s10384_s1 + $0x2b4] ss:$8 sps:$4 sm:$0xff]  }
  0x38   :  { %1981 = vmatpush2.bf16.msra.mxu1 %v4821_v59  ;;  %1941 = vmatprep.subr.bf16.mxu0 %v4822_v60  ;;  %v4912_v59 = vld [vmem:[%s10384_s1 + $0x3b4] ss:$8 sps:$4 sm:$0xff]   ;;  %v4914_v60 = vld [vmem:[%s10384_s1 + $0x2b0] ss:$8 sps:$4 sm:$0xff]  }
  0x39   :  { %1982 = vmatprep.subr.bf16.mxu1 %v4824_v61  ;;  %v4915_v61 = vld [vmem:[%s10384_s1 + $0x3b0] ss:$8 sps:$4 sm:$0xff]  }
  0x3b   :  { %1942 = vmatpush2.bf16.msra.mxu0 %v4826_v62  ;;  %v4916_v62 = vld [vmem:[%s10384_s1 + $0x2a4] ss:$8 sps:$4 sm:$0xff]  }
  0x3c   :  { %1983 = vmatpush2.bf16.msra.mxu1 %v4827_v63  ;;  %1943 = vmatprep.subr.bf16.mxu0 %v4828_v0  ;;  %v4918_v63 = vld [vmem:[%s10384_s1 + $0x3a4] ss:$8 sps:$4 sm:$0xff]   ;;  %v4920_v0 = vld [vmem:[%s10384_s1 + $0x2a0] ss:$8 sps:$4 sm:$0xff]  }
  0x3d   :  { %1984 = vmatprep.subr.bf16.mxu1 %v4830_v1  ;;  %v4921_v1 = vld [vmem:[%s10384_s1 + $0x3a0] ss:$8 sps:$4 sm:$0xff]  }
  0x3f   :  { %1944 = vmatpush2.bf16.msra.mxu0 %v4832_v2  ;;  %v4922_v2 = vld [vmem:[%s10384_s1 + $0x294] ss:$8 sps:$4 sm:$0xff]  }
  0x40   :  { %1985 = vmatpush2.bf16.msra.mxu1 %v4833_v3  ;;  %1995 = vmatprep.subr.bf16.mxu0 %v4838_v4  ;;  %v4924_v3 = vld [vmem:[%s10384_s1 + $0x394] ss:$8 sps:$4 sm:$0xff]   ;;  %v4926_v4 = vld [vmem:[%s10384_s1 + $0x290] ss:$8 sps:$4 sm:$0xff]  }
  0x41   :  { %2036 = vmatprep.subr.bf16.mxu1 %v4840_v5  ;;  %v4927_v5 = vld [vmem:[%s10384_s1 + $0x390] ss:$8 sps:$4 sm:$0xff]  }
  0x42   :  { %1946 = vmatmul.mubr.bf16.vlgmr.msra.gmra.mxu0 %v4216_v6  ;;  %v4928_v6 = vld [vmem:[%s10384_s1 + $0x284] ss:$8 sps:$4 sm:$0xff]  }
  0x43   :  { %1987 = vmatmul.mubr.bf16.vlgmr.msra.gmra.mxu1 %v4218_v7  ;;  %1996 = vmatpush1.bf16.msra.mxu0 %v4842_v8  ;;  %v4930_v7 = vld [vmem:[%s10384_s1 + $0x384] ss:$8 sps:$4 sm:$0xff]   ;;  %v4932_v8 = vld [vmem:[%s10384_s1 + $0x280] ss:$8 sps:$4 sm:$0xff]  }
  0x44   :  { %2037 = vmatpush1.bf16.msra.mxu1 %v4843_v9  ;;  %1997 = vmatprep.subr.bf16.mxu0 %v4844_v10  ;;  %v4933_v9 = vld [vmem:[%s10384_s1 + $0x380] ss:$8 sps:$4 sm:$0xff]   ;;  %v4938_v10 = vld [vmem:[%s10384_s1 + $0x474] ss:$8 sps:$4 sm:$0xff]  }
  0x45   :  { %2038 = vmatprep.subr.bf16.mxu1 %v4846_v11  ;;  %2027 = vmatprep.mubr.bf16.mxu0 %v4221_v35  ;;  %v4940_v11 = vld [vmem:[%s10384_s1 + $0x574] ss:$8 sps:$4 sm:$0xff]   ;;  %v4967_v35 = vld [vmem:[%s10384_s1 + $0x530] ss:$8 sps:$4 sm:$0xff]  }
  0x46   :  { %2068 = vmatprep.mubr.bf16.mxu1 %v4223_v36  ;;  %v4968_v36 = vld [vmem:[%s10384_s1 + $0x424] ss:$8 sps:$4 sm:$0xff]  }
  0x47   :  { %1998 = vmatpush1.bf16.msra.mxu0 %v4848_v12  ;;  %v4220_v12 = vcombine.low %v6137_v32, %v6137_v32  ;;  %v4962_v32 = vld [vmem:[%s10384_s1 + $0x434] ss:$8 sps:$4 sm:$0xff]  }
  0x48   :  { %2039 = vmatpush1.bf16.msra.mxu1 %v4849_v13  ;;  %1999 = vmatprep.subr.bf16.mxu0 %v4850_v14  ;;  %v4222_v13 = vcombine.low %v6142_v33, %v6142_v33  ;;  %v4942_v14 = vld [vmem:[%s10384_s1 + $0x470] ss:$8 sps:$4 sm:$0xff]   ;;  %v4964_v33 = vld [vmem:[%s10384_s1 + $0x534] ss:$8 sps:$4 sm:$0xff]  }
  0x49   :  { %2040 = vmatprep.subr.bf16.mxu1 %v4852_v15  ;;  %v4943_v15 = vld [vmem:[%s10384_s1 + $0x570] ss:$8 sps:$4 sm:$0xff]  }
  0x4b   :  { %2000 = vmatpush1.bf16.msra.mxu0 %v4854_v16  ;;  %v4944_v16 = vld [vmem:[%s10384_s1 + $0x464] ss:$8 sps:$4 sm:$0xff]  }
  0x4c   :  { %2041 = vmatpush1.bf16.msra.mxu1 %v4855_v17  ;;  %2001 = vmatprep.subr.bf16.mxu0 %v4856_v18  ;;  %v4946_v17 = vld [vmem:[%s10384_s1 + $0x564] ss:$8 sps:$4 sm:$0xff]  }
  0x4d   :  { %2042 = vmatprep.subr.bf16.mxu1 %v4858_v19  ;;  %v6287_v18 = vld [vmem:[%s10385_s0 + $0x20] sm:$0xff]  ;;  %v6292_v19 = vld [vmem:[%s10385_s0 + $0x28] sm:$0xff] }
  0x4f   :  { %2002 = vmatpush1.bf16.msra.mxu0 %v4860_v20  ;;  %v4225_v20 = vcombine.high %v6287_v18, %v6287_v18 }
  0x50   :  { %2043 = vmatpush1.bf16.msra.mxu1 %v4861_v21  ;;  %2003 = vmatprep.subr.bf16.mxu0 %v4862_v22  ;;  %v4227_v21 = vcombine.high %v6292_v19, %v6292_v19  ;;  %v4948_v22 = vld [vmem:[%s10384_s1 + $0x460] ss:$8 sps:$4 sm:$0xff]  }
  0x51   :  { %2044 = vmatprep.subr.bf16.mxu1 %v4864_v23  ;;  %v4949_v23 = vld [vmem:[%s10384_s1 + $0x560] ss:$8 sps:$4 sm:$0xff]  }
  0x53   :  { %2004 = vmatpush1.bf16.msra.mxu0 %v4866_v24  ;;  %v4950_v24 = vld [vmem:[%s10384_s1 + $0x454] ss:$8 sps:$4 sm:$0xff]  }
  0x54   :  { %2045 = vmatpush1.bf16.msra.mxu1 %v4867_v25  ;;  %2005 = vmatprep.subr.bf16.mxu0 %v4868_v26  ;;  %v4952_v25 = vld [vmem:[%s10384_s1 + $0x554] ss:$8 sps:$4 sm:$0xff]   ;;  %v4954_v26 = vld [vmem:[%s10384_s1 + $0x450] ss:$8 sps:$4 sm:$0xff]  }
  0x55   :  { %2046 = vmatprep.subr.bf16.mxu1 %v4870_v27  ;;  %v4955_v27 = vld [vmem:[%s10384_s1 + $0x550] ss:$8 sps:$4 sm:$0xff]  }
  0x57   :  { %2006 = vmatpush1.bf16.msra.mxu0 %v4872_v28  ;;  %v4956_v28 = vld [vmem:[%s10384_s1 + $0x444] ss:$8 sps:$4 sm:$0xff]  }
  0x58   :  { %2047 = vmatpush1.bf16.msra.mxu1 %v4873_v29  ;;  %2007 = vmatprep.subr.bf16.mxu0 %v4874_v30  ;;  %v4958_v29 = vld [vmem:[%s10384_s1 + $0x544] ss:$8 sps:$4 sm:$0xff]   ;;  %v4960_v30 = vld [vmem:[%s10384_s1 + $0x440] ss:$8 sps:$4 sm:$0xff]  }
  0x59   :  { %2048 = vmatprep.subr.bf16.mxu1 %v4876_v31  ;;  %v4961_v31 = vld [vmem:[%s10384_s1 + $0x540] ss:$8 sps:$4 sm:$0xff]  }
  0x5b   :  { %2008 = vmatpush1.bf16.msra.mxu0 %v4878_v34  ;;  %v4966_v34 = vld [vmem:[%s10384_s1 + $0x430] ss:$8 sps:$4 sm:$0xff]  }
  0x5c   :  { %2049 = vmatpush1.bf16.msra.mxu1 %v4879_v37  ;;  %2009 = vmatprep.subr.bf16.mxu0 %v4880_v38  ;;  %v4970_v37 = vld [vmem:[%s10384_s1 + $0x524] ss:$8 sps:$4 sm:$0xff]   ;;  %v4972_v38 = vld [vmem:[%s10384_s1 + $0x420] ss:$8 sps:$4 sm:$0xff]  }
  0x5d   :  { %2050 = vmatprep.subr.bf16.mxu1 %v4882_v39  ;;  %v4973_v39 = vld [vmem:[%s10384_s1 + $0x520] ss:$8 sps:$4 sm:$0xff]  }
  0x5f   :  { %2010 = vmatpush1.bf16.msra.mxu0 %v4884_v40  ;;  %v4974_v40 = vld [vmem:[%s10384_s1 + $0x414] ss:$8 sps:$4 sm:$0xff]  }
  0x60   :  { %2051 = vmatpush1.bf16.msra.mxu1 %v4885_v41  ;;  %2011 = vmatprep.subr.bf16.mxu0 %v4886_v42  ;;  %v4976_v41 = vld [vmem:[%s10384_s1 + $0x514] ss:$8 sps:$4 sm:$0xff]   ;;  %v4978_v42 = vld [vmem:[%s10384_s1 + $0x410] ss:$8 sps:$4 sm:$0xff]  }
  0x61   :  { %2052 = vmatprep.subr.bf16.mxu1 %v4888_v43  ;;  %v4979_v43 = vld [vmem:[%s10384_s1 + $0x510] ss:$8 sps:$4 sm:$0xff]  }
  0x63   :  { %2012 = vmatpush2.bf16.msra.mxu0 %v4890_v44  ;;  %v4980_v44 = vld [vmem:[%s10384_s1 + $0x404] ss:$8 sps:$4 sm:$0xff]  }
  0x64   :  { %2053 = vmatpush2.bf16.msra.mxu1 %v4891_v45  ;;  %2013 = vmatprep.subr.bf16.mxu0 %v4892_v46  ;;  %v4982_v45 = vld [vmem:[%s10384_s1 + $0x504] ss:$8 sps:$4 sm:$0xff]   ;;  %v4984_v46 = vld [vmem:[%s10384_s1 + $0x400] ss:$8 sps:$4 sm:$0xff]  }
  0x65   :  { %2054 = vmatprep.subr.bf16.mxu1 %v4894_v47  ;;  %v4985_v47 = vld [vmem:[%s10384_s1 + $0x500] ss:$8 sps:$4 sm:$0xff]  }
  0x67   :  { %2014 = vmatpush2.bf16.msra.mxu0 %v4896_v48  ;;  %v4986_v48 = vld [vmem:[%s10384_s1 + $0x4f4] ss:$8 sps:$4 sm:$0xff]  }
  0x68   :  { %2055 = vmatpush2.bf16.msra.mxu1 %v4897_v49  ;;  %2015 = vmatprep.subr.bf16.mxu0 %v4898_v50  ;;  %v4988_v49 = vld [vmem:[%s10384_s1 + $0x5f4] ss:$8 sps:$4 sm:$0xff]   ;;  %v4990_v50 = vld [vmem:[%s10384_s1 + $0x4f0] ss:$8 sps:$4 sm:$0xff]  }
  0x69   :  { %2056 = vmatprep.subr.bf16.mxu1 %v4900_v51  ;;  %v4991_v51 = vld [vmem:[%s10384_s1 + $0x5f0] ss:$8 sps:$4 sm:$0xff]  }
  0x6b   :  { %2016 = vmatpush2.bf16.msra.mxu0 %v4902_v52  ;;  %v4992_v52 = vld [vmem:[%s10384_s1 + $0x4e4] ss:$8 sps:$4 sm:$0xff]  }
  0x6c   :  { %2057 = vmatpush2.bf16.msra.mxu1 %v4903_v53  ;;  %2017 = vmatprep.subr.bf16.mxu0 %v4904_v54  ;;  %v4994_v53 = vld [vmem:[%s10384_s1 + $0x5e4] ss:$8 sps:$4 sm:$0xff]   ;;  %v4996_v54 = vld [vmem:[%s10384_s1 + $0x4e0] ss:$8 sps:$4 sm:$0xff]  }
  0x6d   :  { %2058 = vmatprep.subr.bf16.mxu1 %v4906_v55  ;;  %v4997_v55 = vld [vmem:[%s10384_s1 + $0x5e0] ss:$8 sps:$4 sm:$0xff]  }
  0x6f   :  { %2018 = vmatpush2.bf16.msra.mxu0 %v4908_v56  ;;  %v4998_v56 = vld [vmem:[%s10384_s1 + $0x4d4] ss:$8 sps:$4 sm:$0xff]  }
  0x70   :  { %2059 = vmatpush2.bf16.msra.mxu1 %v4909_v57  ;;  %2019 = vmatprep.subr.bf16.mxu0 %v4910_v58  ;;  %v5000_v57 = vld [vmem:[%s10384_s1 + $0x5d4] ss:$8 sps:$4 sm:$0xff]   ;;  %v5002_v58 = vld [vmem:[%s10384_s1 + $0x4d0] ss:$8 sps:$4 sm:$0xff]  }
  0x71   :  { %2060 = vmatprep.subr.bf16.mxu1 %v4912_v59  ;;  %v5003_v59 = vld [vmem:[%s10384_s1 + $0x5d0] ss:$8 sps:$4 sm:$0xff]  }
  0x73   :  { %2020 = vmatpush2.bf16.msra.mxu0 %v4914_v60  ;;  %v5004_v60 = vld [vmem:[%s10384_s1 + $0x4c4] ss:$8 sps:$4 sm:$0xff]  }
  0x74   :  { %2061 = vmatpush2.bf16.msra.mxu1 %v4915_v61  ;;  %2021 = vmatprep.subr.bf16.mxu0 %v4916_v62  ;;  %v5006_v61 = vld [vmem:[%s10384_s1 + $0x5c4] ss:$8 sps:$4 sm:$0xff]   ;;  %v5008_v62 = vld [vmem:[%s10384_s1 + $0x4c0] ss:$8 sps:$4 sm:$0xff]  }
  0x75   :  { %2062 = vmatprep.subr.bf16.mxu1 %v4918_v63  ;;  %v5009_v63 = vld [vmem:[%s10384_s1 + $0x5c0] ss:$8 sps:$4 sm:$0xff]  }
  0x77   :  { %2022 = vmatpush2.bf16.msra.mxu0 %v4920_v0  ;;  %v5010_v0 = vld [vmem:[%s10384_s1 + $0x4b4] ss:$8 sps:$4 sm:$0xff]  }
  0x78   :  { %2063 = vmatpush2.bf16.msra.mxu1 %v4921_v1  ;;  %2023 = vmatprep.subr.bf16.mxu0 %v4922_v2  ;;  %v5012_v1 = vld [vmem:[%s10384_s1 + $0x5b4] ss:$8 sps:$4 sm:$0xff]   ;;  %v5014_v2 = vld [vmem:[%s10384_s1 + $0x4b0] ss:$8 sps:$4 sm:$0xff]  }
  0x79   :  { %2064 = vmatprep.subr.bf16.mxu1 %v4924_v3  ;;  %v5015_v3 = vld [vmem:[%s10384_s1 + $0x5b0] ss:$8 sps:$4 sm:$0xff]  }
  0x7b   :  { %2024 = vmatpush2.bf16.msra.mxu0 %v4926_v4  ;;  %v5016_v4 = vld [vmem:[%s10384_s1 + $0x4a4] ss:$8 sps:$4 sm:$0xff]  }
  0x7c   :  { %2065 = vmatpush2.bf16.msra.mxu1 %v4927_v5  ;;  %2025 = vmatprep.subr.bf16.mxu0 %v4928_v6  ;;  %v5018_v5 = vld [vmem:[%s10384_s1 + $0x5a4] ss:$8 sps:$4 sm:$0xff]   ;;  %v5020_v6 = vld [vmem:[%s10384_s1 + $0x4a0] ss:$8 sps:$4 sm:$0xff]  }
  0x7d   :  { %2066 = vmatprep.subr.bf16.mxu1 %v4930_v7  ;;  %v5021_v7 = vld [vmem:[%s10384_s1 + $0x5a0] ss:$8 sps:$4 sm:$0xff]  }
  0x7f   :  { %2026 = vmatpush2.bf16.msra.mxu0 %v4932_v8  ;;  %v5022_v8 = vld [vmem:[%s10384_s1 + $0x494] ss:$8 sps:$4 sm:$0xff]  }
  0x80   :  { %2067 = vmatpush2.bf16.msra.mxu1 %v4933_v9  ;;  %2077 = vmatprep.subr.bf16.mxu0 %v4938_v10  ;;  %v5024_v9 = vld [vmem:[%s10384_s1 + $0x594] ss:$8 sps:$4 sm:$0xff]   ;;  %v5026_v10 = vld [vmem:[%s10384_s1 + $0x490] ss:$8 sps:$4 sm:$0xff]  }
  0x81   :  { %2118 = vmatprep.subr.bf16.mxu1 %v4940_v11  ;;  %v5027_v11 = vld [vmem:[%s10384_s1 + $0x590] ss:$8 sps:$4 sm:$0xff]  }
  0x82   :  { %2028 = vmatmul.mubr.bf16.vlgmr.msra.gmra.mxu0 %v4220_v12  ;;  %v5028_v12 = vld [vmem:[%s10384_s1 + $0x484] ss:$8 sps:$4 sm:$0xff]  }
  0x83   :  { %2069 = vmatmul.mubr.bf16.vlgmr.msra.gmra.mxu1 %v4222_v13  ;;  %2078 = vmatpush1.bf16.msra.mxu0 %v4942_v14  ;;  %v5030_v13 = vld [vmem:[%s10384_s1 + $0x584] ss:$8 sps:$4 sm:$0xff]   ;;  %v5032_v14 = vld [vmem:[%s10384_s1 + $0x480] ss:$8 sps:$4 sm:$0xff]  }
  0x84   :  { %2119 = vmatpush1.bf16.msra.mxu1 %v4943_v15  ;;  %2079 = vmatprep.subr.bf16.mxu0 %v4944_v16  ;;  %v5033_v15 = vld [vmem:[%s10384_s1 + $0x580] ss:$8 sps:$4 sm:$0xff]   ;;  %v5038_v16 = vld [vmem:[%s10384_s1 + $0x674] ss:$8 sps:$4 sm:$0xff]  }
  0x85   :  { %2120 = vmatprep.subr.bf16.mxu1 %v4946_v17  ;;  %2109 = vmatprep.mubr.bf16.mxu0 %v4225_v20  ;;  %v5040_v17 = vld [vmem:[%s10384_s1 + $0x774] ss:$8 sps:$4 sm:$0xff]  }
  0x86   :  { %2150 = vmatprep.mubr.bf16.mxu1 %v4227_v21  ;;  %v6481_v20 = vld [vmem:[%s10385_s0 + $0x30] sm:$0xff]  ;;  %v4224_v21 = vcombine.low %v6287_v18, %v6287_v18  ;;  %v6503_v18 = vld [vmem:[%s10384_s1 + $0x664] ss:$8 sps:$4 sm:$0xff]  }
  0x87   :  { %2080 = vmatpush1.bf16.msra.mxu0 %v4948_v22  ;;  %v4226_v22 = vcombine.low %v6292_v19, %v6292_v19  ;;  %v5046_v19 = vld [vmem:[%s10384_s1 + $0x764] ss:$8 sps:$4 sm:$0xff]  }
  0x88   :  { %2121 = vmatpush1.bf16.msra.mxu1 %v4949_v23  ;;  %2081 = vmatprep.subr.bf16.mxu0 %v4950_v24  ;;  %v6490_v23 = vld [vmem:[%s10385_s0 + $0x38] sm:$0xff] }
  0x89   :  { %2122 = vmatprep.subr.bf16.mxu1 %v4952_v25  ;;  %v6495_v24 = vld [vmem:[%s10384_s1 + $0x670] ss:$8 sps:$4 sm:$0xff]  }
  0x8a   :  { %v5043_v25 = vld [vmem:[%s10384_s1 + $0x770] ss:$8 sps:$4 sm:$0xff]  }
  0x8b   :  { %2082 = vmatpush1.bf16.msra.mxu0 %v4954_v26  ;;  %v4229_v26 = vcombine.high %v6481_v20, %v6481_v20 }
  0x8c   :  { %2123 = vmatpush1.bf16.msra.mxu1 %v4955_v27  ;;  %2083 = vmatprep.subr.bf16.mxu0 %v4956_v28  ;;  %v4231_v27 = vcombine.high %v6490_v23, %v6490_v23  ;;  %v6516_v28 = vld [vmem:[%s10384_s1 + $0x660] ss:$8 sps:$4 sm:$0xff]  }
  0x8d   :  { %2124 = vmatprep.subr.bf16.mxu1 %v4958_v29  ;;  %v5049_v29 = vld [vmem:[%s10384_s1 + $0x760] ss:$8 sps:$4 sm:$0xff]  }
  0x8f   :  { %2084 = vmatpush1.bf16.msra.mxu0 %v4960_v30  ;;  %v6525_v30 = vld [vmem:[%s10384_s1 + $0x654] ss:$8 sps:$4 sm:$0xff]  }
  0x90   :  { %2125 = vmatpush1.bf16.msra.mxu1 %v4961_v31  ;;  %2085 = vmatprep.subr.bf16.mxu0 %v4962_v32  ;;  %v5052_v31 = vld [vmem:[%s10384_s1 + $0x754] ss:$8 sps:$4 sm:$0xff]   ;;  %v6534_v32 = vld [vmem:[%s10384_s1 + $0x650] ss:$8 sps:$4 sm:$0xff]  }
  0x91   :  { %2126 = vmatprep.subr.bf16.mxu1 %v4964_v33  ;;  %v5055_v33 = vld [vmem:[%s10384_s1 + $0x750] ss:$8 sps:$4 sm:$0xff]  }
  0x93   :  { %2086 = vmatpush1.bf16.msra.mxu0 %v4966_v34  ;;  %v6543_v34 = vld [vmem:[%s10384_s1 + $0x644] ss:$8 sps:$4 sm:$0xff]  }
  0x94   :  { %2127 = vmatpush1.bf16.msra.mxu1 %v4967_v35  ;;  %2087 = vmatprep.subr.bf16.mxu0 %v4968_v36  ;;  %v5058_v35 = vld [vmem:[%s10384_s1 + $0x744] ss:$8 sps:$4 sm:$0xff]   ;;  %v6551_v36 = vld [vmem:[%s10384_s1 + $0x640] ss:$8 sps:$4 sm:$0xff]  }
  0x95   :  { %2128 = vmatprep.subr.bf16.mxu1 %v4970_v37  ;;  %v5061_v37 = vld [vmem:[%s10384_s1 + $0x740] ss:$8 sps:$4 sm:$0xff]  }
  0x97   :  { %2088 = vmatpush1.bf16.msra.mxu0 %v4972_v38  ;;  %v6561_v38 = vld [vmem:[%s10384_s1 + $0x634] ss:$8 sps:$4 sm:$0xff]  }
  0x98   :  { %2129 = vmatpush1.bf16.msra.mxu1 %v4973_v39  ;;  %2089 = vmatprep.subr.bf16.mxu0 %v4974_v40  ;;  %v5064_v39 = vld [vmem:[%s10384_s1 + $0x734] ss:$8 sps:$4 sm:$0xff]   ;;  %v6570_v40 = vld [vmem:[%s10384_s1 + $0x630] ss:$8 sps:$4 sm:$0xff]  }
  0x99   :  { %2130 = vmatprep.subr.bf16.mxu1 %v4976_v41  ;;  %v5067_v41 = vld [vmem:[%s10384_s1 + $0x730] ss:$8 sps:$4 sm:$0xff]  }
  0x9b   :  { %2090 = vmatpush1.bf16.msra.mxu0 %v4978_v42  ;;  %v6579_v42 = vld [vmem:[%s10384_s1 + $0x624] ss:$8 sps:$4 sm:$0xff]  }
  0x9c   :  { %2131 = vmatpush1.bf16.msra.mxu1 %v4979_v43  ;;  %2091 = vmatprep.subr.bf16.mxu0 %v4980_v44  ;;  %v5070_v43 = vld [vmem:[%s10384_s1 + $0x724] ss:$8 sps:$4 sm:$0xff]   ;;  %v6588_v44 = vld [vmem:[%s10384_s1 + $0x620] ss:$8 sps:$4 sm:$0xff]  }
  0x9d   :  { %2132 = vmatprep.subr.bf16.mxu1 %v4982_v45  ;;  %v5073_v45 = vld [vmem:[%s10384_s1 + $0x720] ss:$8 sps:$4 sm:$0xff]  }
  0x9f   :  { %2092 = vmatpush1.bf16.msra.mxu0 %v4984_v46  ;;  %v6597_v46 = vld [vmem:[%s10384_s1 + $0x614] ss:$8 sps:$4 sm:$0xff]  }
  0xa0   :  { %2133 = vmatpush1.bf16.msra.mxu1 %v4985_v47  ;;  %2093 = vmatprep.subr.bf16.mxu0 %v4986_v48  ;;  %v5076_v47 = vld [vmem:[%s10384_s1 + $0x714] ss:$8 sps:$4 sm:$0xff]   ;;  %v6606_v48 = vld [vmem:[%s10384_s1 + $0x610] ss:$8 sps:$4 sm:$0xff]  }
  0xa1   :  { %2134 = vmatprep.subr.bf16.mxu1 %v4988_v49  ;;  %v5079_v49 = vld [vmem:[%s10384_s1 + $0x710] ss:$8 sps:$4 sm:$0xff]  }
  0xa3   :  { %2094 = vmatpush2.bf16.msra.mxu0 %v4990_v50  ;;  %v6615_v50 = vld [vmem:[%s10384_s1 + $0x604] ss:$8 sps:$4 sm:$0xff]  }
  0xa4   :  { %2135 = vmatpush2.bf16.msra.mxu1 %v4991_v51  ;;  %2095 = vmatprep.subr.bf16.mxu0 %v4992_v52  ;;  %v5082_v51 = vld [vmem:[%s10384_s1 + $0x704] ss:$8 sps:$4 sm:$0xff]   ;;  %v6624_v52 = vld [vmem:[%s10384_s1 + $0x600] ss:$8 sps:$4 sm:$0xff]  }
  0xa5   :  { %2136 = vmatprep.subr.bf16.mxu1 %v4994_v53  ;;  %v5085_v53 = vld [vmem:[%s10384_s1 + $0x700] ss:$8 sps:$4 sm:$0xff]  }
  0xa7   :  { %2096 = vmatpush2.bf16.msra.mxu0 %v4996_v54  ;;  %v6633_v54 = vld [vmem:[%s10384_s1 + $0x6f4] ss:$8 sps:$4 sm:$0xff]  }
  0xa8   :  { %2137 = vmatpush2.bf16.msra.mxu1 %v4997_v55  ;;  %2097 = vmatprep.subr.bf16.mxu0 %v4998_v56  ;;  %v5088_v55 = vld [vmem:[%s10384_s1 + $0x7f4] ss:$8 sps:$4 sm:$0xff]   ;;  %v6642_v56 = vld [vmem:[%s10384_s1 + $0x6f0] ss:$8 sps:$4 sm:$0xff]  }
  0xa9   :  { %2138 = vmatprep.subr.bf16.mxu1 %v5000_v57  ;;  %v5091_v57 = vld [vmem:[%s10384_s1 + $0x7f0] ss:$8 sps:$4 sm:$0xff]  }
  0xab   :  { %2098 = vmatpush2.bf16.msra.mxu0 %v5002_v58  ;;  %v6651_v58 = vld [vmem:[%s10384_s1 + $0x6e4] ss:$8 sps:$4 sm:$0xff]  }
  0xac   :  { %2139 = vmatpush2.bf16.msra.mxu1 %v5003_v59  ;;  %2099 = vmatprep.subr.bf16.mxu0 %v5004_v60  ;;  %v6656_v59 = vld [vmem:[%s10384_s1 + $0x7e4] ss:$8 sps:$4 sm:$0xff]   ;;  %v6662_v60 = vld [vmem:[%s10384_s1 + $0x6e0] ss:$8 sps:$4 sm:$0xff]  }
  0xad   :  { %2140 = vmatprep.subr.bf16.mxu1 %v5006_v61  ;;  %v6667_v61 = vld [vmem:[%s10384_s1 + $0x7e0] ss:$8 sps:$4 sm:$0xff]  }
  0xaf   :  { %2100 = vmatpush2.bf16.msra.mxu0 %v5008_v62  ;;  %v6674_v62 = vld [vmem:[%s10384_s1 + $0x6d4] ss:$8 sps:$4 sm:$0xff]  }
  0xb0   :  { %2141 = vmatpush2.bf16.msra.mxu1 %v5009_v63  ;;  %2101 = vmatprep.subr.bf16.mxu0 %v5010_v0  ;;  %v6679_v63 = vld [vmem:[%s10384_s1 + $0x7d4] ss:$8 sps:$4 sm:$0xff]   ;;  %v6686_v0 = vld [vmem:[%s10384_s1 + $0x6d0] ss:$8 sps:$4 sm:$0xff]  }
  0xb1   :  { %2142 = vmatprep.subr.bf16.mxu1 %v5012_v1  ;;  %v6691_v1 = vld [vmem:[%s10384_s1 + $0x7d0] ss:$8 sps:$4 sm:$0xff]  }
  0xb3   :  { %2102 = vmatpush2.bf16.msra.mxu0 %v5014_v2  ;;  %v6698_v2 = vld [vmem:[%s10384_s1 + $0x6c4] ss:$8 sps:$4 sm:$0xff]  }
  0xb4   :  { %2143 = vmatpush2.bf16.msra.mxu1 %v5015_v3  ;;  %2103 = vmatprep.subr.bf16.mxu0 %v5016_v4  ;;  %v6703_v3 = vld [vmem:[%s10384_s1 + $0x7c4] ss:$8 sps:$4 sm:$0xff]   ;;  %v6710_v4 = vld [vmem:[%s10384_s1 + $0x6c0] ss:$8 sps:$4 sm:$0xff]  }
  0xb5   :  { %2144 = vmatprep.subr.bf16.mxu1 %v5018_v5  ;;  %v6715_v5 = vld [vmem:[%s10384_s1 + $0x7c0] ss:$8 sps:$4 sm:$0xff]  }
  0xb7   :  { %2104 = vmatpush2.bf16.msra.mxu0 %v5020_v6  ;;  %v6722_v6 = vld [vmem:[%s10384_s1 + $0x6b4] ss:$8 sps:$4 sm:$0xff]  }
  0xb8   :  { %2145 = vmatpush2.bf16.msra.mxu1 %v5021_v7  ;;  %2105 = vmatprep.subr.bf16.mxu0 %v5022_v8  ;;  %v6727_v7 = vld [vmem:[%s10384_s1 + $0x7b4] ss:$8 sps:$4 sm:$0xff]   ;;  %v6734_v8 = vld [vmem:[%s10384_s1 + $0x6b0] ss:$8 sps:$4 sm:$0xff]  }
  0xb9   :  { %2146 = vmatprep.subr.bf16.mxu1 %v5024_v9  ;;  %10655 = vst [vmem:[#allocation2_spill] sm:$0xff] %v6727_v7  ;;  %v6739_v9 = vld [vmem:[%s10384_s1 + $0x7b0] ss:$8 sps:$4 sm:$0xff]  }
  0xba   :  { %10656 = vst [vmem:[#allocation3_spill] sm:$0xff] %v6739_v9 }
  0xbb   :  { %2106 = vmatpush2.bf16.msra.mxu0 %v5026_v10  ;;  %v6746_v10 = vld [vmem:[%s10384_s1 + $0x6a4] ss:$8 sps:$4 sm:$0xff]  }
  0xbc   :  { %2147 = vmatpush2.bf16.msra.mxu1 %v5027_v11  ;;  %2107 = vmatprep.subr.bf16.mxu0 %v5028_v12  ;;  %v6751_v11 = vld [vmem:[%s10384_s1 + $0x7a4] ss:$8 sps:$4 sm:$0xff]   ;;  %v6758_v12 = vld [vmem:[%s10384_s1 + $0x6a0] ss:$8 sps:$4 sm:$0xff]  }
  0xbd   :  { %2148 = vmatprep.subr.bf16.mxu1 %v5030_v13  ;;  %10657 = vst [vmem:[#allocation4_spill] sm:$0xff] %v6751_v11  ;;  %v6763_v13 = vld [vmem:[%s10384_s1 + $0x7a0] ss:$8 sps:$4 sm:$0xff]  }
  0xbe   :  { %10658 = vst [vmem:[#allocation5_spill] sm:$0xff] %v6763_v13 }
  0xbf   :  { %2108 = vmatpush2.bf16.msra.mxu0 %v5032_v14  ;;  %v6770_v14 = vld [vmem:[%s10384_s1 + $0x694] ss:$8 sps:$4 sm:$0xff]  }
  0xc0   :  { %2149 = vmatpush2.bf16.msra.mxu1 %v5033_v15  ;;  %2159 = vmatprep.subr.bf16.mxu0 %v5038_v16  ;;  %v6775_v15 = vld [vmem:[%s10384_s1 + $0x794] ss:$8 sps:$4 sm:$0xff]   ;;  %v6782_v16 = vld [vmem:[%s10384_s1 + $0x690] ss:$8 sps:$4 sm:$0xff]  }
  0xc1   :  { %2200 = vmatprep.subr.bf16.mxu1 %v5040_v17  ;;  %10659 = vst [vmem:[#allocation6_spill] sm:$0xff] %v6775_v15  ;;  %v6787_v17 = vld [vmem:[%s10384_s1 + $0x790] ss:$8 sps:$4 sm:$0xff]  }
  0xc2   :  { %2110 = vmatmul.mubr.bf16.vlgmr.msra.gmra.mxu0 %v4224_v21  ;;  %10660 = vst [vmem:[#allocation7_spill] sm:$0xff] %v6787_v17  ;;  %v6794_v21 = vld [vmem:[%s10384_s1 + $0x684] ss:$8 sps:$4 sm:$0xff]  }
  0xc3   :  { %2151 = vmatmul.mubr.bf16.vlgmr.msra.gmra.mxu1 %v4226_v22  ;;  %2160 = vmatpush1.bf16.msra.mxu0 %v6495_v24  ;;  %v6799_v22 = vld [vmem:[%s10384_s1 + $0x784] ss:$8 sps:$4 sm:$0xff]  }
  0xc4   :  { %2201 = vmatpush1.bf16.msra.mxu1 %v5043_v25  ;;  %2161 = vmatprep.subr.bf16.mxu0 %v6503_v18  ;;  %10661 = vst [vmem:[#allocation8_spill] sm:$0xff] %v6799_v22  ;;  %v6806_v25 = vld [vmem:[%s10384_s1 + $0x680] ss:$8 sps:$4 sm:$0xff]  }
  0xc5   :  { %2202 = vmatprep.subr.bf16.mxu1 %v5046_v19  ;;  %2191 = vmatprep.mubr.bf16.mxu0 %v4229_v26  ;;  %v6811_v19 = vld [vmem:[%s10384_s1 + $0x780] ss:$8 sps:$4 sm:$0xff]   ;;  %v6818_v26 = vld [vmem:[%s10384_s1 + $0x874] ss:$8 sps:$4 sm:$0xff]  }
  0xc6   :  { %2232 = vmatprep.mubr.bf16.mxu1 %v4231_v27  ;;  %10662 = vst [vmem:[#allocation9_spill] sm:$0xff] %v6811_v19  ;;  %v6823_v27 = vld [vmem:[%s10384_s1 + $0x954] ss:$8 sps:$4 sm:$0xff]  }
  0xc7   :  { %2162 = vmatpush1.bf16.msra.mxu0 %v6516_v28  ;;  %10663 = vst [vmem:[#allocation10_spill] sm:$0xff] %v6823_v27 }
  0xc8   :  { %2203 = vmatpush1.bf16.msra.mxu1 %v5049_v29  ;;  %2163 = vmatprep.subr.bf16.mxu0 %v6525_v30  ;;  %v4228_v29 = vcombine.low %v6481_v20, %v6481_v20  ;;  %v6844_v20 = vld [vmem:[%s10384_s1 + $0x950] ss:$8 sps:$4 sm:$0xff]  }
  0xc9   :  { %2204 = vmatprep.subr.bf16.mxu1 %v5052_v31  ;;  %v4230_v31 = vcombine.low %v6490_v23, %v6490_v23  ;;  %10664 = vst [vmem:[#allocation11_spill] sm:$0xff] %v6844_v20  ;;  %v6851_v23 = vld [vmem:[%s10384_s1 + $0x864] ss:$8 sps:$4 sm:$0xff]  }
  0xcb   :  { %2164 = vmatpush1.bf16.msra.mxu0 %v6534_v32 }
  0xcc   :  { %2205 = vmatpush1.bf16.msra.mxu1 %v5055_v33  ;;  %2165 = vmatprep.subr.bf16.mxu0 %v6543_v34  ;;  %v6832_v33 = vld [vmem:[%s10385_s0 + $0x40] sm:$0xff] }
  0xcd   :  { %2206 = vmatprep.subr.bf16.mxu1 %v5058_v35  ;;  %v6839_v35 = vld [vmem:[%s10384_s1 + $0x870] ss:$8 sps:$4 sm:$0xff]  }
  0xcf   :  { %2166 = vmatpush1.bf16.msra.mxu0 %v6551_v36 }
  0xd0   :  { %2207 = vmatpush1.bf16.msra.mxu1 %v5061_v37  ;;  %2167 = vmatprep.subr.bf16.mxu0 %v6561_v38  ;;  %v6856_v37 = vld [vmem:[%s10384_s1 + $0x944] ss:$8 sps:$4 sm:$0xff]  }
  0xd1   :  { %2208 = vmatprep.subr.bf16.mxu1 %v5064_v39  ;;  %10665 = vst [vmem:[#allocation12_spill] sm:$0xff] %v6856_v37  ;;  %v4233_v39 = vcombine.high %v6832_v33, %v6832_v33 }
  0xd3   :  { %2168 = vmatpush1.bf16.msra.mxu0 %v6570_v40 }
  0xd4   :  { %2209 = vmatpush1.bf16.msra.mxu1 %v5067_v41  ;;  %2169 = vmatprep.subr.bf16.mxu0 %v6579_v42 }
  0xd5   :  { %2210 = vmatprep.subr.bf16.mxu1 %v5070_v43 }
  0xd7   :  { %2170 = vmatpush1.bf16.msra.mxu0 %v6588_v44 }
  0xd8   :  { %2211 = vmatpush1.bf16.msra.mxu1 %v5073_v45  ;;  %2171 = vmatprep.subr.bf16.mxu0 %v6597_v46 }
  0xd9   :  { %2212 = vmatprep.subr.bf16.mxu1 %v5076_v47  ;;  %v6867_v47 = vld [vmem:[%s10384_s1 + $0x860] ss:$8 sps:$4 sm:$0xff]  }
  0xdb   :  { %2172 = vmatpush1.bf16.msra.mxu0 %v6606_v48 }
  0xdc   :  { %2213 = vmatpush1.bf16.msra.mxu1 %v5079_v49  ;;  %2173 = vmatprep.subr.bf16.mxu0 %v6615_v50  ;;  %v6872_v49 = vld [vmem:[%s10384_s1 + $0x940] ss:$8 sps:$4 sm:$0xff]  }
  0xdd   :  { %2214 = vmatprep.subr.bf16.mxu1 %v5082_v51  ;;  %10666 = vst [vmem:[#allocation13_spill] sm:$0xff] %v6872_v49 }
  0xdf   :  { %2174 = vmatpush1.bf16.msra.mxu0 %v6624_v52 }
  0xe0   :  { %2215 = vmatpush1.bf16.msra.mxu1 %v5085_v53  ;;  %2175 = vmatprep.subr.bf16.mxu0 %v6633_v54 }
  0xe1   :  { %2216 = vmatprep.subr.bf16.mxu1 %v5088_v55  ;;  %v6879_v55 = vld [vmem:[%s10384_s1 + $0x854] ss:$8 sps:$4 sm:$0xff]  }
  0xe3   :  { %2176 = vmatpush2.bf16.msra.mxu0 %v6642_v56 }
  0xe4   :  { %2217 = vmatpush2.bf16.msra.mxu1 %v5091_v57  ;;  %2177 = vmatprep.subr.bf16.mxu0 %v6651_v58  ;;  %v6884_v57 = vld [vmem:[%s10384_s1 + $0x934] ss:$8 sps:$4 sm:$0xff]  }
  0xe5   :  { %2218 = vmatprep.subr.bf16.mxu1 %v6656_v59  ;;  %10667 = vst [vmem:[#allocation14_spill] sm:$0xff] %v6884_v57 }
  0xe7   :  { %2178 = vmatpush2.bf16.msra.mxu0 %v6662_v60 }
  0xe8   :  { %2219 = vmatpush2.bf16.msra.mxu1 %v6667_v61  ;;  %2179 = vmatprep.subr.bf16.mxu0 %v6674_v62 }
  0xe9   :  { %2220 = vmatprep.subr.bf16.mxu1 %v6679_v63 }
  0xeb   :  { %2180 = vmatpush2.bf16.msra.mxu0 %v6686_v0 }
  0xec   :  { %2221 = vmatpush2.bf16.msra.mxu1 %v6691_v1  ;;  %2181 = vmatprep.subr.bf16.mxu0 %v6698_v2 }
  0xed   :  { %2222 = vmatprep.subr.bf16.mxu1 %v6703_v3 }
  0xef   :  { %2182 = vmatpush2.bf16.msra.mxu0 %v6710_v4 }
  0xf0   :  { %2223 = vmatpush2.bf16.msra.mxu1 %v6715_v5  ;;  %2183 = vmatprep.subr.bf16.mxu0 %v6722_v6 }
  0xf1   :  { %2224 = vmatprep.subr.bf16.mxu1 %v6727_v7 }
  0xf3   :  { %2184 = vmatpush2.bf16.msra.mxu0 %v6734_v8 }
  0xf4   :  { %2225 = vmatpush2.bf16.msra.mxu1 %v6739_v9  ;;  %2185 = vmatprep.subr.bf16.mxu0 %v6746_v10 }
  0xf5   :  { %2226 = vmatprep.subr.bf16.mxu1 %v6751_v11 }
  0xf7   :  { %2186 = vmatpush2.bf16.msra.mxu0 %v6758_v12 }
  0xf8   :  { %2227 = vmatpush2.bf16.msra.mxu1 %v6763_v13  ;;  %2187 = vmatprep.subr.bf16.mxu0 %v6770_v14  ;;  %v7032_v13 = vld [vmem:[%s10384_s1 + $0x8f4] ss:$8 sps:$4 sm:$0xff]  }
  0xf9   :  { %2228 = vmatprep.subr.bf16.mxu1 %v6775_v15  ;;  %v7014_v15 = vld [vmem:[%s10384_s1 + $0x70] ss:$8 sps:$4 sm:$0xff]   ;;  %10682 = vst [vmem:[#allocation29_spill] sm:$0xff] %v7032_v13 }
  0xfa   :  { %10679 = vst [vmem:[#allocation26_spill] sm:$0xff] %v7014_v15 }
  0xfb   :  { %2188 = vmatpush2.bf16.msra.mxu0 %v6782_v16 }
  0xfc   :  { %2229 = vmatpush2.bf16.msra.mxu1 %v6787_v17  ;;  %2189 = vmatprep.subr.bf16.mxu0 %v6794_v21  ;;  %v7005_v17 = vld [vmem:[%s10384_s1 + $0x804] ss:$8 sps:$4 sm:$0xff]  }
  0xfd   :  { %2230 = vmatprep.subr.bf16.mxu1 %v6799_v22  ;;  %v6999_v22 = vld [vmem:[%s10384_s1 + $0x74] ss:$8 sps:$4 sm:$0xff]   ;;  %10678 = vst [vmem:[#allocation25_spill] sm:$0xff] %v7005_v17 }
  0xfe   :  { %10677 = vst [vmem:[#allocation24_spill] sm:$0xff] %v6999_v22 }
  0xff   :  { %2190 = vmatpush2.bf16.msra.mxu0 %v6806_v25 }
 0x100   :  { %2231 = vmatpush2.bf16.msra.mxu1 %v6811_v19  ;;  %2241 = vmatprep.subr.bf16.mxu0 %v6818_v26  ;;  %v6986_v19 = vld [vmem:[%s10385_s0 + $0x4c] sm:$0xff] }
 0x101   :  { %2286 = vmatprep.subr.bf16.mxu1 %v6823_v27  ;;  %v6978_v27 = vld [vmem:[%s10384_s1 + $0x814] ss:$8 sps:$4 sm:$0xff]  }
 0x102   :  { %v1947_v41 = vpop.f32.mrf.mxu0  ;;  %2192 = vmatmul.mubr.bf16.vlgmr.msra.gmra.mxu0 %v4228_v29  ;;  %10675 = vst [vmem:[#allocation22_spill] sm:$0xff] %v6978_v27 }
 0x103   :  { %v1988_v43 = vpop.f32.mrf.mxu1  ;;  %2233 = vmatmul.mubr.bf16.vlgmr.msra.gmra.mxu1 %v4230_v31  ;;  %2242 = vmatpush1.bf16.msra.mxu0 %v6839_v35  ;;  %v10396_v31 = vmov 0  }
 0x104   :  { %v6860_v45 = vadd.f32 %v1988_v43, %v1947_v41  ;;  %2287 = vmatpush1.bf16.msra.mxu1 %v6844_v20  ;;  %v1949_v51 = vpop.f32.mrf.mxu0  ;;  %2243 = vmatprep.subr.bf16.mxu0 %v6851_v23 }
 0x105   :  { %v1990_v53 = vpop.f32.mrf.mxu1  ;;  %2288 = vmatprep.subr.bf16.mxu1 %v6856_v37  ;;  %2314 = vmatprep.mubr.bf16.mxu1 %v10396_v31  ;;  %v6894_v37 = vld [vmem:[%s10384_s1 + $0x850] ss:$8 sps:$4 sm:$0xff]   ;;  %v6935_v31 = vld [vmem:[%s10384_s1 + $0x914] ss:$8 sps:$4 sm:$0xff]  }
 0x106   :  { %v6886_v29 = vadd.f32 %v1990_v53, %v1949_v51  ;;  %2273 = vmatprep.mubr.bf16.mxu0 %v4233_v39  ;;  %v1951_v41 = vpop.f32.mrf.mxu0  ;;  %v6899_v51 = vld [vmem:[%s10384_s1 + $0x930] ss:$8 sps:$4 sm:$0xff]   ;;  %v6906_v39 = vld [vmem:[%s10384_s1 + $0x844] ss:$8 sps:$4 sm:$0xff]   ;;  %10671 = vst [vmem:[#allocation18_spill] sm:$0xff] %v6935_v31 }
 0x107   :  { %v1992_v43 = vpop.f32.mrf.mxu1  ;;  %2244 = vmatpush1.bf16.msra.mxu0 %v6867_v47  ;;  %10668 = vst [vmem:[#allocation15_spill] sm:$0xff] %v6899_v51  ;;  %v6911_v41 = vld [vmem:[%s10384_s1 + $0x924] ss:$8 sps:$4 sm:$0xff]  }
 0x108   :  { %2289 = vmatpush1.bf16.msra.mxu1 %v6872_v49  ;;  %v1952_v53 = vpop.f32.mrf.mxu0  ;;  %2245 = vmatprep.subr.bf16.mxu0 %v6879_v55  ;;  %10669 = vst [vmem:[#allocation16_spill] sm:$0xff] %v6911_v41  ;;  %v6923_v43 = vld [vmem:[%s10384_s1 + $0x920] ss:$8 sps:$4 sm:$0xff]  }
 0x109   :  { %v1993_v20 = vpop.f32.mrf.mxu1  ;;  %2290 = vmatprep.subr.bf16.mxu1 %v6884_v57  ;;  %10670 = vst [vmem:[#allocation17_spill] sm:$0xff] %v6923_v43  ;;  %v6930_v53 = vld [vmem:[%s10384_s1 + $0x834] ss:$8 sps:$4 sm:$0xff]   ;;  %v6954_v57 = vld [vmem:[%s10384_s1 + $0x824] ss:$8 sps:$4 sm:$0xff]  }
 0x10a   :  { %v6918_v20 = vld [vmem:[%s10384_s1 + $0x840] ss:$8 sps:$4 sm:$0xff]  }
 0x10b   :  { %2246 = vmatpush1.bf16.msra.mxu0 %v6894_v37  ;;  %v6966_v49 = vld [vmem:[%s10384_s1 + $0x820] ss:$8 sps:$4 sm:$0xff]  }
 0x10c   :  { %2291 = vmatpush1.bf16.msra.mxu1 %v6899_v51  ;;  %2247 = vmatprep.subr.bf16.mxu0 %v6906_v39  ;;  %v6942_v51 = vld [vmem:[%s10384_s1 + $0x830] ss:$8 sps:$4 sm:$0xff]  }
 0x10d   :  { %2292 = vmatprep.subr.bf16.mxu1 %v6911_v41  ;;  %v6947_v41 = vld [vmem:[%s10384_s1 + $0x910] ss:$8 sps:$4 sm:$0xff]  }
 0x10e   :  { %10672 = vst [vmem:[#allocation19_spill] sm:$0xff] %v6947_v41 }
 0x10f   :  { %2248 = vmatpush1.bf16.msra.mxu0 %v6918_v20 }
 0x110   :  { %2293 = vmatpush1.bf16.msra.mxu1 %v6923_v43  ;;  %2249 = vmatprep.subr.bf16.mxu0 %v6930_v53  ;;  %v6959_v43 = vld [vmem:[%s10384_s1 + $0x904] ss:$8 sps:$4 sm:$0xff]  }
 0x111   :  { %2294 = vmatprep.subr.bf16.mxu1 %v6935_v31  ;;  %10673 = vst [vmem:[#allocation20_spill] sm:$0xff] %v6959_v43  ;;  %v6971_v31 = vld [vmem:[%s10384_s1 + $0x900] ss:$8 sps:$4 sm:$0xff]  }
 0x112   :  { %10674 = vst [vmem:[#allocation21_spill] sm:$0xff] %v6971_v31 }
 0x113   :  { %2250 = vmatpush1.bf16.msra.mxu0 %v6942_v51 }
 0x114   :  { %2295 = vmatpush1.bf16.msra.mxu1 %v6947_v41  ;;  %2251 = vmatprep.subr.bf16.mxu0 %v6954_v57  ;;  %v5176_v41 = vld [vmem:[%s10385_s0 + $0x48] ss:$0 sps:$4 sm:$0xff]  }
 0x115   :  { %2296 = vmatprep.subr.bf16.mxu1 %v6959_v43  ;;  %v6993_v43 = vld [vmem:[%s10384_s1 + $0x810] ss:$8 sps:$4 sm:$0xff]  }
 0x116   :  { %10676 = vst [vmem:[#allocation23_spill] sm:$0xff] %v6993_v43 }
 0x117   :  { %2252 = vmatpush1.bf16.msra.mxu0 %v6966_v49 }
 0x118   :  { %2297 = vmatpush1.bf16.msra.mxu1 %v6971_v31  ;;  %2253 = vmatprep.subr.bf16.mxu0 %v6978_v27  ;;  %v4547_v31 = vcombine.high %v6986_v19, %v6986_v19 }
 0x119   :  { %2403 = vmatprep.subr.bf16.mxu1 %v6999_v22  ;;  %v7020_v22 = vld [vmem:[%s10384_s1 + $0x800] ss:$8 sps:$4 sm:$0xff]  }
 0x11a   :  { %10680 = vst [vmem:[#allocation27_spill] sm:$0xff] %v7020_v22 }
 0x11b   :  { %4535 = vmatmul.mubr.msk.bf16.vlgmr.msra.gmra.mxu1 %vm1909_vm0, %v5176_v41  ;;  %2254 = vmatpush1.bf16.msra.mxu0 %v6993_v43  ;;  %v7026_v41 = vld [vmem:[%s10384_s1 + $0x64] ss:$8 sps:$4 sm:$0xff]   ;;  %v7253_v43 = vld [vmem:[%s10384_s1 + $0xd0] ss:$8 sps:$4 sm:$0xff]  }
 0x11c   :  { %2404 = vmatpush1.bf16.msra.mxu1 %v7014_v15  ;;  %2255 = vmatprep.subr.bf16.mxu0 %v7005_v17  ;;  %10681 = vst [vmem:[#allocation28_spill] sm:$0xff] %v7026_v41  ;;  %v7038_v15 = vld [vmem:[%s10384_s1 + $0x60] ss:$8 sps:$4 sm:$0xff]   ;;  %v7044_v17 = vld [vmem:[%s10384_s1 + $0x8f0] ss:$8 sps:$4 sm:$0xff]   ;;  %10717 = vst [vmem:[#allocation64_spill] sm:$0xff] %v7253_v43 }
 0x11d   :  { %2405 = vmatprep.subr.bf16.mxu1 %v7026_v41  ;;  %2435 = vmatprep.mubr.bf16.mxu1 %v4547_v31  ;;  %10683 = vst [vmem:[#allocation30_spill] sm:$0xff] %v7038_v15  ;;  %10684 = vst [vmem:[#allocation31_spill] sm:$0xff] %v7044_v17  ;;  %v7050_v31 = vld [vmem:[%s10384_s1 + $0x54] ss:$8 sps:$4 sm:$0xff]   ;;  %v7056_v41 = vld [vmem:[%s10384_s1 + $0x8e4] ss:$8 sps:$4 sm:$0xff]  }
 0x11e   :  { %10685 = vst [vmem:[#allocation32_spill] sm:$0xff] %v7050_v31  ;;  %10686 = vst [vmem:[#allocation33_spill] sm:$0xff] %v7056_v41 }
 0x11f   :  { %2256 = vmatpush1.bf16.msra.mxu0 %v7020_v22 }
 0x120   :  { %2406 = vmatpush1.bf16.msra.mxu1 %v7038_v15  ;;  %2257 = vmatprep.subr.bf16.mxu0 %v7032_v13  ;;  %v7062_v15 = vld [vmem:[%s10384_s1 + $0x50] ss:$8 sps:$4 sm:$0xff]   ;;  %v7068_v13 = vld [vmem:[%s10384_s1 + $0x8e0] ss:$8 sps:$4 sm:$0xff]  }
 0x121   :  { %2407 = vmatprep.subr.bf16.mxu1 %v7050_v31  ;;  %10687 = vst [vmem:[#allocation34_spill] sm:$0xff] %v7062_v15  ;;  %10688 = vst [vmem:[#allocation35_spill] sm:$0xff] %v7068_v13  ;;  %v7074_v31 = vld [vmem:[%s10384_s1 + $0x44] ss:$8 sps:$4 sm:$0xff]  }
 0x122   :  { %10689 = vst [vmem:[#allocation36_spill] sm:$0xff] %v7074_v31 }
 0x123   :  { %2258 = vmatpush2.bf16.msra.mxu0 %v7044_v17  ;;  %v7080_v17 = vld [vmem:[%s10384_s1 + $0x8d4] ss:$8 sps:$4 sm:$0xff]  }
 0x124   :  { %2408 = vmatpush1.bf16.msra.mxu1 %v7062_v15  ;;  %2259 = vmatprep.subr.bf16.mxu0 %v7056_v41  ;;  %10690 = vst [vmem:[#allocation37_spill] sm:$0xff] %v7080_v17  ;;  %v7086_v15 = vld [vmem:[%s10384_s1 + $0x40] ss:$8 sps:$4 sm:$0xff]   ;;  %v7092_v41 = vld [vmem:[%s10384_s1 + $0x8d0] ss:$8 sps:$4 sm:$0xff]  }
 0x125   :  { %2409 = vmatprep.subr.bf16.mxu1 %v7074_v31  ;;  %10691 = vst [vmem:[#allocation38_spill] sm:$0xff] %v7086_v15  ;;  %10692 = vst [vmem:[#allocation39_spill] sm:$0xff] %v7092_v41  ;;  %v7098_v31 = vld [vmem:[%s10384_s1 + $0x34] ss:$8 sps:$4 sm:$0xff]  }
 0x126   :  { %10693 = vst [vmem:[#allocation40_spill] sm:$0xff] %v7098_v31 }
 0x127   :  { %2260 = vmatpush2.bf16.msra.mxu0 %v7068_v13  ;;  %v7104_v13 = vld [vmem:[%s10384_s1 + $0x8c4] ss:$8 sps:$4 sm:$0xff]  }
 0x128   :  { %2410 = vmatpush1.bf16.msra.mxu1 %v7086_v15  ;;  %2261 = vmatprep.subr.bf16.mxu0 %v7080_v17  ;;  %10694 = vst [vmem:[#allocation41_spill] sm:$0xff] %v7104_v13  ;;  %v7110_v15 = vld [vmem:[%s10384_s1 + $0x30] ss:$8 sps:$4 sm:$0xff]   ;;  %v7116_v17 = vld [vmem:[%s10384_s1 + $0x8c0] ss:$8 sps:$4 sm:$0xff]  }
 0x129   :  { %2411 = vmatprep.subr.bf16.mxu1 %v7098_v31  ;;  %10695 = vst [vmem:[#allocation42_spill] sm:$0xff] %v7110_v15  ;;  %10696 = vst [vmem:[#allocation43_spill] sm:$0xff] %v7116_v17  ;;  %v7122_v31 = vld [vmem:[%s10384_s1 + $0x24] ss:$8 sps:$4 sm:$0xff]  }
 0x12a   :  { %10697 = vst [vmem:[#allocation44_spill] sm:$0xff] %v7122_v31 }
 0x12b   :  { %2262 = vmatpush2.bf16.msra.mxu0 %v7092_v41  ;;  %v7128_v41 = vld [vmem:[%s10384_s1 + $0x8b4] ss:$8 sps:$4 sm:$0xff]  }
 0x12c   :  { %2412 = vmatpush1.bf16.msra.mxu1 %v7110_v15  ;;  %2263 = vmatprep.subr.bf16.mxu0 %v7104_v13  ;;  %10698 = vst [vmem:[#allocation45_spill] sm:$0xff] %v7128_v41  ;;  %v7134_v15 = vld [vmem:[%s10384_s1 + $0x20] ss:$8 sps:$4 sm:$0xff]   ;;  %v7140_v13 = vld [vmem:[%s10384_s1 + $0x8b0] ss:$8 sps:$4 sm:$0xff]  }
 0x12d   :  { %2413 = vmatprep.subr.bf16.mxu1 %v7122_v31  ;;  %10699 = vst [vmem:[#allocation46_spill] sm:$0xff] %v7134_v15  ;;  %10700 = vst [vmem:[#allocation47_spill] sm:$0xff] %v7140_v13  ;;  %v7146_v31 = vld [vmem:[%s10384_s1 + $0x14] ss:$8 sps:$4 sm:$0xff]  }
 0x12e   :  { %10701 = vst [vmem:[#allocation48_spill] sm:$0xff] %v7146_v31 }
 0x12f   :  { %2264 = vmatpush2.bf16.msra.mxu0 %v7116_v17  ;;  %v7152_v17 = vld [vmem:[%s10384_s1 + $0x8a4] ss:$8 sps:$4 sm:$0xff]  }
 0x130   :  { %2414 = vmatpush1.bf16.msra.mxu1 %v7134_v15  ;;  %2265 = vmatprep.subr.bf16.mxu0 %v7128_v41  ;;  %10702 = vst [vmem:[#allocation49_spill] sm:$0xff] %v7152_v17  ;;  %v7158_v15 = vld [vmem:[%s10384_s1 + $0x10] ss:$8 sps:$4 sm:$0xff]   ;;  %v7164_v41 = vld [vmem:[%s10384_s1 + $0x8a0] ss:$8 sps:$4 sm:$0xff]  }
 0x131   :  { %2415 = vmatprep.subr.bf16.mxu1 %v7146_v31  ;;  %10703 = vst [vmem:[#allocation50_spill] sm:$0xff] %v7158_v15  ;;  %10704 = vst [vmem:[#allocation51_spill] sm:$0xff] %v7164_v41  ;;  %v7170_v31 = vld [vmem:[%s10384_s1 + $0x4] ss:$8 sps:$4 sm:$0xff]  }
 0x132   :  { %10705 = vst [vmem:[#allocation52_spill] sm:$0xff] %v7170_v31 }
 0x133   :  { %2266 = vmatpush2.bf16.msra.mxu0 %v7140_v13  ;;  %v7176_v13 = vld [vmem:[%s10384_s1 + $0x894] ss:$8 sps:$4 sm:$0xff]  }
 0x134   :  { %2416 = vmatpush1.bf16.msra.mxu1 %v7158_v15  ;;  %2267 = vmatprep.subr.bf16.mxu0 %v7152_v17  ;;  %10706 = vst [vmem:[#allocation53_spill] sm:$0xff] %v7176_v13  ;;  %v7182_v15 = vld [vmem:[%s10384_s1] ss:$8 sps:$4 sm:$0xff]   ;;  %v7188_v17 = vld [vmem:[%s10384_s1 + $0x890] ss:$8 sps:$4 sm:$0xff]  }
 0x135   :  { %2417 = vmatprep.subr.bf16.mxu1 %v7170_v31  ;;  %10707 = vst [vmem:[#allocation54_spill] sm:$0xff] %v7182_v15  ;;  %10708 = vst [vmem:[#allocation55_spill] sm:$0xff] %v7188_v17  ;;  %v7194_v31 = vld [vmem:[%s10384_s1 + $0xf4] ss:$8 sps:$4 sm:$0xff]  }
 0x136   :  { %10709 = vst [vmem:[#allocation56_spill] sm:$0xff] %v7194_v31 }
 0x137   :  { %2268 = vmatpush2.bf16.msra.mxu0 %v7164_v41  ;;  %v7200_v41 = vld [vmem:[%s10384_s1 + $0x884] ss:$8 sps:$4 sm:$0xff]  }
 0x138   :  { %2418 = vmatpush1.bf16.msra.mxu1 %v7182_v15  ;;  %2269 = vmatprep.subr.bf16.mxu0 %v7176_v13  ;;  %10710 = vst [vmem:[#allocation57_spill] sm:$0xff] %v7200_v41  ;;  %v7206_v15 = vld [vmem:[%s10384_s1 + $0xf0] ss:$8 sps:$4 sm:$0xff]   ;;  %v7212_v13 = vld [vmem:[%s10384_s1 + $0x880] ss:$8 sps:$4 sm:$0xff]  }
 0x139   :  { %2419 = vmatprep.subr.bf16.mxu1 %v7194_v31  ;;  %10711 = vst [vmem:[#allocation58_spill] sm:$0xff] %v7206_v15  ;;  %10712 = vst [vmem:[#allocation59_spill] sm:$0xff] %v7212_v13  ;;  %v7218_v31 = vld [vmem:[%s10384_s1 + $0xe4] ss:$8 sps:$4 sm:$0xff]  }
 0x13a   :  { %10713 = vst [vmem:[#allocation60_spill] sm:$0xff] %v7218_v31 }
 0x13b   :  { %2270 = vmatpush2.bf16.msra.mxu0 %v7188_v17  ;;  %v4232_v17 = vcombine.low %v6832_v33, %v6832_v33  ;;  %v7244_v33 = vld [vmem:[%s10384_s1 + $0x174] ss:$8 sps:$4 sm:$0xff]  }
 0x13c   :  { %2420 = vmatpush2.bf16.msra.mxu1 %v7206_v15  ;;  %2271 = vmatprep.subr.bf16.mxu0 %v7200_v41  ;;  %v7226_v15 = vld [vmem:[%s10385_s0 + $0x54] sm:$0xff]  ;;  %v7232_v41 = vld [vmem:[%s10384_s1 + $0xe0] ss:$8 sps:$4 sm:$0xff]   ;;  %10716 = vst [vmem:[#allocation63_spill] sm:$0xff] %v7244_v33 }
 0x13d   :  { %2421 = vmatprep.subr.bf16.mxu1 %v7218_v31  ;;  %10714 = vst [vmem:[#allocation61_spill] sm:$0xff] %v7232_v41  ;;  %v7238_v31 = vld [vmem:[%s10384_s1 + $0xd4] ss:$8 sps:$4 sm:$0xff]  }
 0x13e   :  { %10715 = vst [vmem:[#allocation62_spill] sm:$0xff] %v7238_v31 }
 0x13f   :  { %2272 = vmatpush2.bf16.msra.mxu0 %v7212_v13  ;;  %v4549_v13 = vcombine.high %v7226_v15, %v7226_v15 }
 0x140   :  { %2422 = vmatpush2.bf16.msra.mxu1 %v7232_v41  ;;  %2444 = vmatprep.subr.bf16.mxu0 %v7244_v33 }
 0x141   :  { %2423 = vmatprep.subr.bf16.mxu1 %v7238_v31  ;;  %v7259_v31 = vld [vmem:[%s10384_s1 + $0x170] ss:$8 sps:$4 sm:$0xff]  }
 0x142   :  { %v2029_v22 = vpop.f32.mrf.mxu0  ;;  %2274 = vmatmul.mubr.bf16.vlgmr.msra.gmra.mxu0 %v4232_v17  ;;  %10718 = vst [vmem:[#allocation65_spill] sm:$0xff] %v7259_v31  ;;  %v7265_v17 = vld [vmem:[%s10384_s1 + $0xc4] ss:$8 sps:$4 sm:$0xff]  }
 0x143   :  { %v2070_v11 = vpop.f32.mrf.mxu1  ;;  %v2030_v41 = vadd.f32 %v2029_v22, %v6860_v45  ;;  %2445 = vmatpush1.bf16.msra.mxu0 %v7259_v31  ;;  %10719 = vst [vmem:[#allocation66_spill] sm:$0xff] %v7265_v17  ;;  %v7271_v22 = vld [vmem:[%s10384_s1 + $0x164] ss:$8 sps:$4 sm:$0xff]   ;;  %2476 = vmatprep.mubr.bf16.mxu0 %v4549_v13 }
 0x144   :  { %2424 = vmatpush2.bf16.msra.mxu1 %v7253_v43  ;;  %v2031_v33 = vpop.f32.mrf.mxu0  ;;  %10720 = vst [vmem:[#allocation67_spill] sm:$0xff] %v7271_v22  ;;  %2446 = vmatprep.subr.bf16.mxu0 %v7271_v22  ;;  %v7288_v22 = vld [vmem:[%s10384_s1 + $0x160] ss:$8 sps:$4 sm:$0xff]  }
 0x145   :  { %v2072_v9 = vpop.f32.mrf.mxu1  ;;  %2425 = vmatprep.subr.bf16.mxu1 %v7265_v17  ;;  %v7274_v45 = vadd.f32 %v2070_v11, %v2030_v41  ;;  %v2032_v43 = vadd.f32 %v2031_v33, %v6886_v29  ;;  %v7282_v17 = vld [vmem:[%s10384_s1 + $0xc0] ss:$8 sps:$4 sm:$0xff]   ;;  %10722 = vst [vmem:[#allocation69_spill] sm:$0xff] %v7288_v22  ;;  %v7306_v29 = vld [vmem:[%s10384_s1 + $0xb0] ss:$8 sps:$4 sm:$0xff]  }
 0x146   :  { %v2033_v31 = vpop.f32.mrf.mxu0  ;;  %10721 = vst [vmem:[#allocation68_spill] sm:$0xff] %v7282_v17  ;;  %10725 = vst [vmem:[#allocation72_spill] sm:$0xff] %v7306_v29  ;;  %v7318_v41 = vld [vmem:[%s10384_s1 + $0xa4] ss:$8 sps:$4 sm:$0xff]   ;;  %v7330_v33 = vld [vmem:[%s10384_s1 + $0xa0] ss:$8 sps:$4 sm:$0xff]  }
 0x147   :  { %v2074_v27 = vpop.f32.mrf.mxu1  ;;  %v7277_v7 = vadd.f32 %v2072_v9, %v2032_v43  ;;  %2447 = vmatpush1.bf16.msra.mxu0 %v7288_v22  ;;  %v7294_v9 = vld [vmem:[%s10384_s1 + $0xb4] ss:$8 sps:$4 sm:$0xff]   ;;  %v7312_v43 = vld [vmem:[%s10384_s1 + $0x150] ss:$8 sps:$4 sm:$0xff]   ;;  %10727 = vst [vmem:[#allocation74_spill] sm:$0xff] %v7318_v41  ;;  %10729 = vst [vmem:[#allocation76_spill] sm:$0xff] %v7330_v33 }
 0x148   :  { %2426 = vmatpush2.bf16.msra.mxu1 %v7282_v17  ;;  %v2034_v11 = vpop.f32.mrf.mxu0  ;;  %10723 = vst [vmem:[#allocation70_spill] sm:$0xff] %v7294_v9  ;;  %v7300_v27 = vld [vmem:[%s10384_s1 + $0x154] ss:$8 sps:$4 sm:$0xff]   ;;  %10726 = vst [vmem:[#allocation73_spill] sm:$0xff] %v7312_v43  ;;  %v7324_v31 = vld [vmem:[%s10384_s1 + $0x144] ss:$8 sps:$4 sm:$0xff]  }
 0x149   :  { %v2075_v13 = vpop.f32.mrf.mxu1  ;;  %2427 = vmatprep.subr.bf16.mxu1 %v7294_v9  ;;  %10724 = vst [vmem:[#allocation71_spill] sm:$0xff] %v7300_v27  ;;  %2448 = vmatprep.subr.bf16.mxu0 %v7300_v27  ;;  %10728 = vst [vmem:[#allocation75_spill] sm:$0xff] %v7324_v31  ;;  %v7336_v11 = vld [vmem:[%s10384_s1 + $0x140] ss:$8 sps:$4 sm:$0xff]   ;;  %v7372_v9 = vld [vmem:[%s10384_s1 + $0x124] ss:$8 sps:$4 sm:$0xff]  }
 0x14a   :  { %10730 = vst [vmem:[#allocation77_spill] sm:$0xff] %v7336_v11  ;;  %v7342_v13 = vld [vmem:[%s10384_s1 + $0x94] ss:$8 sps:$4 sm:$0xff]   ;;  %10736 = vst [vmem:[#allocation83_spill] sm:$0xff] %v7372_v9 }
 0x14b   :  { %2449 = vmatpush1.bf16.msra.mxu0 %v7312_v43  ;;  %10731 = vst [vmem:[#allocation78_spill] sm:$0xff] %v7342_v13  ;;  %v7380_v17 = vld [vmem:[%s10385_s0 + $0x5c] sm:$0xff] }
 0x14c   :  { %2428 = vmatpush2.bf16.msra.mxu1 %v7306_v29  ;;  %2450 = vmatprep.subr.bf16.mxu0 %v7324_v31  ;;  %v7360_v29 = vld [vmem:[%s10384_s1 + $0x130] ss:$8 sps:$4 sm:$0xff]  }
 0x14d   :  { %2429 = vmatprep.subr.bf16.mxu1 %v7318_v41  ;;  %v7348_v41 = vld [vmem:[%s10384_s1 + $0x134] ss:$8 sps:$4 sm:$0xff]   ;;  %10734 = vst [vmem:[#allocation81_spill] sm:$0xff] %v7360_v29  ;;  %v7661_v31 = vld [vmem:[%s10384_s1 + $0x2d0] ss:$8 sps:$4 sm:$0xff]  }
 0x14e   :  { %10732 = vst [vmem:[#allocation79_spill] sm:$0xff] %v7348_v41  ;;  %10781 = vst [vmem:[#allocation128_spill] sm:$0xff] %v7661_v31 }
 0x14f   :  { %2451 = vmatpush1.bf16.msra.mxu0 %v7336_v11 }
 0x150   :  { %2430 = vmatpush2.bf16.msra.mxu1 %v7330_v33  ;;  %2452 = vmatprep.subr.bf16.mxu0 %v7348_v41  ;;  %v7354_v33 = vld [vmem:[%s10384_s1 + $0x90] ss:$8 sps:$4 sm:$0xff]  }
 0x151   :  { %2431 = vmatprep.subr.bf16.mxu1 %v7342_v13  ;;  %10733 = vst [vmem:[#allocation80_spill] sm:$0xff] %v7354_v33  ;;  %v7366_v13 = vld [vmem:[%s10384_s1 + $0x84] ss:$8 sps:$4 sm:$0xff]  }
 0x152   :  { %10735 = vst [vmem:[#allocation82_spill] sm:$0xff] %v7366_v13 }
 0x153   :  { %2453 = vmatpush1.bf16.msra.mxu0 %v7360_v29  ;;  %v7385_v29 = vld [vmem:[%s10384_s1 + $0x80] ss:$8 sps:$4 sm:$0xff]  }
 0x154   :  { %2432 = vmatpush2.bf16.msra.mxu1 %v7354_v33  ;;  %2454 = vmatprep.subr.bf16.mxu0 %v7372_v9  ;;  %v4546_v33 = vcombine.low %v6986_v19, %v6986_v19  ;;  %10737 = vst [vmem:[#allocation84_spill] sm:$0xff] %v7385_v29  ;;  %v7397_v19 = vld [vmem:[%s10384_s1 + $0x114] ss:$8 sps:$4 sm:$0xff]  }
 0x155   :  { %2433 = vmatprep.subr.bf16.mxu1 %v7366_v13  ;;  %v7391_v13 = vld [vmem:[%s10384_s1 + $0x120] ss:$8 sps:$4 sm:$0xff]   ;;  %10739 = vst [vmem:[#allocation86_spill] sm:$0xff] %v7397_v19  ;;  %v7403_v9 = vld [vmem:[%s10384_s1 + $0x274] ss:$8 sps:$4 sm:$0xff]  }
 0x156   :  { %10738 = vst [vmem:[#allocation85_spill] sm:$0xff] %v7391_v13  ;;  %10740 = vst [vmem:[#allocation87_spill] sm:$0xff] %v7403_v9 }
 0x157   :  { %2455 = vmatpush1.bf16.msra.mxu0 %v7391_v13  ;;  %v7411_v13 = vld [vmem:[%s10384_s1 + $0x110] ss:$8 sps:$4 sm:$0xff]  }
 0x158   :  { %2434 = vmatpush2.bf16.msra.mxu1 %v7385_v29  ;;  %2456 = vmatprep.subr.bf16.mxu0 %v7397_v19  ;;  %v4551_v29 = vcombine.high %v7380_v17, %v7380_v17  ;;  %10741 = vst [vmem:[#allocation88_spill] sm:$0xff] %v7411_v13  ;;  %v7417_v19 = vld [vmem:[%s10384_s1 + $0x270] ss:$8 sps:$4 sm:$0xff]  }
 0x159   :  { %2485 = vmatprep.subr.bf16.mxu1 %v7403_v9  ;;  %10742 = vst [vmem:[#allocation89_spill] sm:$0xff] %v7417_v19  ;;  %v7423_v9 = vld [vmem:[%s10384_s1 + $0x104] ss:$8 sps:$4 sm:$0xff]  }
 0x15a   :  { %10743 = vst [vmem:[#allocation90_spill] sm:$0xff] %v7423_v9 }
 0x15b   :  { %2436 = vmatmul.mubr.bf16.vlgmr.msra.gmra.mxu1 %v4546_v33  ;;  %2457 = vmatpush1.bf16.msra.mxu0 %v7411_v13  ;;  %v7429_v33 = vld [vmem:[%s10384_s1 + $0x264] ss:$8 sps:$4 sm:$0xff]   ;;  %v7435_v13 = vld [vmem:[%s10384_s1 + $0x100] ss:$8 sps:$4 sm:$0xff]  }
 0x15c   :  { %2486 = vmatpush1.bf16.msra.mxu1 %v7417_v19  ;;  %2458 = vmatprep.subr.bf16.mxu0 %v7423_v9  ;;  %10744 = vst [vmem:[#allocation91_spill] sm:$0xff] %v7429_v33  ;;  %10745 = vst [vmem:[#allocation92_spill] sm:$0xff] %v7435_v13  ;;  %v7441_v19 = vld [vmem:[%s10384_s1 + $0x260] ss:$8 sps:$4 sm:$0xff]   ;;  %v7447_v9 = vld [vmem:[%s10384_s1 + $0x1f4] ss:$8 sps:$4 sm:$0xff]  }
 0x15d   :  { %2487 = vmatprep.subr.bf16.mxu1 %v7429_v33  ;;  %2517 = vmatprep.mubr.bf16.mxu1 %v4551_v29  ;;  %10746 = vst [vmem:[#allocation93_spill] sm:$0xff] %v7441_v19  ;;  %10747 = vst [vmem:[#allocation94_spill] sm:$0xff] %v7447_v9  ;;  %v7453_v29 = vld [vmem:[%s10384_s1 + $0x254] ss:$8 sps:$4 sm:$0xff]   ;;  %v7459_v33 = vld [vmem:[%s10384_s1 + $0x1f0] ss:$8 sps:$4 sm:$0xff]  }
 0x15e   :  { %10748 = vst [vmem:[#allocation95_spill] sm:$0xff] %v7453_v29  ;;  %10749 = vst [vmem:[#allocation96_spill] sm:$0xff] %v7459_v33 }
 0x15f   :  { %2459 = vmatpush1.bf16.msra.mxu0 %v7435_v13  ;;  %v7634_v13 = vld [vmem:[%s10384_s1 + $0x180] ss:$8 sps:$4 sm:$0xff]  }
 0x160   :  { %2488 = vmatpush1.bf16.msra.mxu1 %v7441_v19  ;;  %2460 = vmatprep.subr.bf16.mxu0 %v7447_v9  ;;  %v7465_v19 = vld [vmem:[%s10384_s1 + $0x250] ss:$8 sps:$4 sm:$0xff]   ;;  %v7471_v9 = vld [vmem:[%s10384_s1 + $0x1e4] ss:$8 sps:$4 sm:$0xff]   ;;  %10777 = vst [vmem:[#allocation124_spill] sm:$0xff] %v7634_v13 }
 0x161   :  { %2489 = vmatprep.subr.bf16.mxu1 %v7453_v29  ;;  %10750 = vst [vmem:[#allocation97_spill] sm:$0xff] %v7465_v19  ;;  %10751 = vst [vmem:[#allocation98_spill] sm:$0xff] %v7471_v9  ;;  %v7477_v29 = vld [vmem:[%s10384_s1 + $0x244] ss:$8 sps:$4 sm:$0xff]  }
 0x162   :  { %10752 = vst [vmem:[#allocation99_spill] sm:$0xff] %v7477_v29 }
 0x163   :  { %2461 = vmatpush2.bf16.msra.mxu0 %v7459_v33  ;;  %v7483_v33 = vld [vmem:[%s10384_s1 + $0x1e0] ss:$8 sps:$4 sm:$0xff]  }
 0x164   :  { %2490 = vmatpush1.bf16.msra.mxu1 %v7465_v19  ;;  %2462 = vmatprep.subr.bf16.mxu0 %v7471_v9  ;;  %10753 = vst [vmem:[#allocation100_spill] sm:$0xff] %v7483_v33  ;;  %v7489_v19 = vld [vmem:[%s10384_s1 + $0x240] ss:$8 sps:$4 sm:$0xff]   ;;  %v7495_v9 = vld [vmem:[%s10384_s1 + $0x1d4] ss:$8 sps:$4 sm:$0xff]  }
 0x165   :  { %2491 = vmatprep.subr.bf16.mxu1 %v7477_v29  ;;  %10754 = vst [vmem:[#allocation101_spill] sm:$0xff] %v7489_v19  ;;  %10755 = vst [vmem:[#allocation102_spill] sm:$0xff] %v7495_v9  ;;  %v7501_v29 = vld [vmem:[%s10384_s1 + $0x234] ss:$8 sps:$4 sm:$0xff]  }
 0x166   :  { %10756 = vst [vmem:[#allocation103_spill] sm:$0xff] %v7501_v29 }
 0x167   :  { %2463 = vmatpush2.bf16.msra.mxu0 %v7483_v33  ;;  %v7507_v33 = vld [vmem:[%s10384_s1 + $0x1d0] ss:$8 sps:$4 sm:$0xff]  }
 0x168   :  { %2492 = vmatpush1.bf16.msra.mxu1 %v7489_v19  ;;  %2464 = vmatprep.subr.bf16.mxu0 %v7495_v9  ;;  %10757 = vst [vmem:[#allocation104_spill] sm:$0xff] %v7507_v33  ;;  %v7513_v19 = vld [vmem:[%s10384_s1 + $0x230] ss:$8 sps:$4 sm:$0xff]   ;;  %v7519_v9 = vld [vmem:[%s10384_s1 + $0x1c4] ss:$8 sps:$4 sm:$0xff]  }
 0x169   :  { %2493 = vmatprep.subr.bf16.mxu1 %v7501_v29  ;;  %10758 = vst [vmem:[#allocation105_spill] sm:$0xff] %v7513_v19  ;;  %10759 = vst [vmem:[#allocation106_spill] sm:$0xff] %v7519_v9  ;;  %v7525_v29 = vld [vmem:[%s10384_s1 + $0x224] ss:$8 sps:$4 sm:$0xff]  }
 0x16a   :  { %10760 = vst [vmem:[#allocation107_spill] sm:$0xff] %v7525_v29 }
 0x16b   :  { %2465 = vmatpush2.bf16.msra.mxu0 %v7507_v33  ;;  %v7531_v33 = vld [vmem:[%s10384_s1 + $0x1c0] ss:$8 sps:$4 sm:$0xff]  }
 0x16c   :  { %2494 = vmatpush1.bf16.msra.mxu1 %v7513_v19  ;;  %2466 = vmatprep.subr.bf16.mxu0 %v7519_v9  ;;  %10761 = vst [vmem:[#allocation108_spill] sm:$0xff] %v7531_v33  ;;  %v7537_v19 = vld [vmem:[%s10384_s1 + $0x220] ss:$8 sps:$4 sm:$0xff]   ;;  %v7543_v9 = vld [vmem:[%s10384_s1 + $0x1b4] ss:$8 sps:$4 sm:$0xff]  }
 0x16d   :  { %2495 = vmatprep.subr.bf16.mxu1 %v7525_v29  ;;  %10762 = vst [vmem:[#allocation109_spill] sm:$0xff] %v7537_v19  ;;  %10763 = vst [vmem:[#allocation110_spill] sm:$0xff] %v7543_v9  ;;  %v7549_v29 = vld [vmem:[%s10384_s1 + $0x214] ss:$8 sps:$4 sm:$0xff]  }
 0x16e   :  { %10764 = vst [vmem:[#allocation111_spill] sm:$0xff] %v7549_v29 }
 0x16f   :  { %2467 = vmatpush2.bf16.msra.mxu0 %v7531_v33  ;;  %v7555_v33 = vld [vmem:[%s10384_s1 + $0x1b0] ss:$8 sps:$4 sm:$0xff]  }
 0x170   :  { %2496 = vmatpush1.bf16.msra.mxu1 %v7537_v19  ;;  %2468 = vmatprep.subr.bf16.mxu0 %v7543_v9  ;;  %10765 = vst [vmem:[#allocation112_spill] sm:$0xff] %v7555_v33  ;;  %v7561_v19 = vld [vmem:[%s10384_s1 + $0x210] ss:$8 sps:$4 sm:$0xff]   ;;  %v7567_v9 = vld [vmem:[%s10384_s1 + $0x1a4] ss:$8 sps:$4 sm:$0xff]  }
 0x171   :  { %2497 = vmatprep.subr.bf16.mxu1 %v7549_v29  ;;  %10766 = vst [vmem:[#allocation113_spill] sm:$0xff] %v7561_v19  ;;  %10767 = vst [vmem:[#allocation114_spill] sm:$0xff] %v7567_v9  ;;  %v7573_v29 = vld [vmem:[%s10384_s1 + $0x204] ss:$8 sps:$4 sm:$0xff]  }
 0x172   :  { %10768 = vst [vmem:[#allocation115_spill] sm:$0xff] %v7573_v29 }
 0x173   :  { %2469 = vmatpush2.bf16.msra.mxu0 %v7555_v33  ;;  %v7579_v33 = vld [vmem:[%s10384_s1 + $0x1a0] ss:$8 sps:$4 sm:$0xff]  }
 0x174   :  { %2498 = vmatpush1.bf16.msra.mxu1 %v7561_v19  ;;  %2470 = vmatprep.subr.bf16.mxu0 %v7567_v9  ;;  %10769 = vst [vmem:[#allocation116_spill] sm:$0xff] %v7579_v33  ;;  %v7585_v19 = vld [vmem:[%s10384_s1 + $0x200] ss:$8 sps:$4 sm:$0xff]   ;;  %v7591_v9 = vld [vmem:[%s10384_s1 + $0x194] ss:$8 sps:$4 sm:$0xff]  }
 0x175   :  { %2499 = vmatprep.subr.bf16.mxu1 %v7573_v29  ;;  %10770 = vst [vmem:[#allocation117_spill] sm:$0xff] %v7585_v19  ;;  %10771 = vst [vmem:[#allocation118_spill] sm:$0xff] %v7591_v9  ;;  %v7597_v29 = vld [vmem:[%s10384_s1 + $0x2f4] ss:$8 sps:$4 sm:$0xff]  }
 0x176   :  { %10772 = vst [vmem:[#allocation119_spill] sm:$0xff] %v7597_v29 }
 0x177   :  { %2471 = vmatpush2.bf16.msra.mxu0 %v7579_v33  ;;  %v7603_v33 = vld [vmem:[%s10384_s1 + $0x190] ss:$8 sps:$4 sm:$0xff]  }
 0x178   :  { %2500 = vmatpush1.bf16.msra.mxu1 %v7585_v19  ;;  %2472 = vmatprep.subr.bf16.mxu0 %v7591_v9  ;;  %10773 = vst [vmem:[#allocation120_spill] sm:$0xff] %v7603_v33  ;;  %v7609_v19 = vld [vmem:[%s10384_s1 + $0x2f0] ss:$8 sps:$4 sm:$0xff]   ;;  %v7615_v9 = vld [vmem:[%s10384_s1 + $0x184] ss:$8 sps:$4 sm:$0xff]  }
 0x179   :  { %2501 = vmatprep.subr.bf16.mxu1 %v7597_v29  ;;  %10774 = vst [vmem:[#allocation121_spill] sm:$0xff] %v7609_v19  ;;  %10775 = vst [vmem:[#allocation122_spill] sm:$0xff] %v7615_v9  ;;  %v7621_v29 = vld [vmem:[%s10384_s1 + $0x2e4] ss:$8 sps:$4 sm:$0xff]  }
 0x17a   :  { %10776 = vst [vmem:[#allocation123_spill] sm:$0xff] %v7621_v29 }
 0x17b   :  { %2473 = vmatpush2.bf16.msra.mxu0 %v7603_v33  ;;  %v4548_v33 = vcombine.low %v7226_v15, %v7226_v15  ;;  %v7646_v15 = vld [vmem:[%s10384_s1 + $0x2d4] ss:$8 sps:$4 sm:$0xff]  }
 0x17c   :  { %2502 = vmatpush2.bf16.msra.mxu1 %v7609_v19  ;;  %2474 = vmatprep.subr.bf16.mxu0 %v7615_v9  ;;  %v7629_v19 = vld [vmem:[%s10385_s0 + $0x64] sm:$0xff]  ;;  %10779 = vst [vmem:[#allocation126_spill] sm:$0xff] %v7646_v15 }
 0x17d   :  { %2503 = vmatprep.subr.bf16.mxu1 %v7621_v29  ;;  %v7640_v9 = vld [vmem:[%s10384_s1 + $0x2e0] ss:$8 sps:$4 sm:$0xff]   ;;  %v7652_v29 = vld [vmem:[%s10384_s1 + $0x374] ss:$8 sps:$4 sm:$0xff]  }
 0x17e   :  { %10778 = vst [vmem:[#allocation125_spill] sm:$0xff] %v7640_v9  ;;  %10780 = vst [vmem:[#allocation127_spill] sm:$0xff] %v7652_v29 }
 0x17f   :  { %2475 = vmatpush2.bf16.msra.mxu0 %v7634_v13  ;;  %v4553_v13 = vcombine.high %v7629_v19, %v7629_v19 }
 0x180   :  { %2504 = vmatpush2.bf16.msra.mxu1 %v7640_v9  ;;  %2526 = vmatprep.subr.bf16.mxu0 %v7652_v29 }
 0x181   :  { %2505 = vmatprep.subr.bf16.mxu1 %v7646_v15  ;;  %v7667_v15 = vld [vmem:[%s10384_s1 + $0x370] ss:$8 sps:$4 sm:$0xff]  }
 0x182   :  { %v2111_v41 = vpop.f32.mrf.mxu0  ;;  %2477 = vmatmul.mubr.bf16.vlgmr.msra.gmra.mxu0 %v4548_v33  ;;  %10782 = vst [vmem:[#allocation129_spill] sm:$0xff] %v7667_v15 }
 0x183   :  { %v2152_v11 = vpop.f32.mrf.mxu1  ;;  %v2112_v9 = vadd.f32 %v2111_v41, %v7274_v45  ;;  %2527 = vmatpush1.bf16.msra.mxu0 %v7667_v15  ;;  %v7673_v45 = vld [vmem:[%s10384_s1 + $0x2c4] ss:$8 sps:$4 sm:$0xff]   ;;  %2558 = vmatprep.mubr.bf16.mxu0 %v4553_v13 }
 0x184   :  { %2506 = vmatpush2.bf16.msra.mxu1 %v7661_v31  ;;  %v2113_v29 = vpop.f32.mrf.mxu0  ;;  %10783 = vst [vmem:[#allocation130_spill] sm:$0xff] %v7673_v45  ;;  %v7679_v41 = vld [vmem:[%s10384_s1 + $0x364] ss:$8 sps:$4 sm:$0xff]  }
 0x185   :  { %v2154_v43 = vpop.f32.mrf.mxu1  ;;  %2507 = vmatprep.subr.bf16.mxu1 %v7673_v45  ;;  %10784 = vst [vmem:[#allocation131_spill] sm:$0xff] %v7679_v41  ;;  %2528 = vmatprep.subr.bf16.mxu0 %v7679_v41  ;;  %v7682_v33 = vadd.f32 %v2152_v11, %v2112_v9  ;;  %v2114_v31 = vadd.f32 %v2113_v29, %v7277_v7  ;;  %v7690_v45 = vld [vmem:[%s10384_s1 + $0x2c0] ss:$8 sps:$4 sm:$0xff]   ;;  %v7720_v11 = vld [vmem:[%s10384_s1 + $0x350] ss:$8 sps:$4 sm:$0xff]  }
 0x186   :  { %v2115_v15 = vpop.f32.mrf.mxu0  ;;  %10785 = vst [vmem:[#allocation132_spill] sm:$0xff] %v7690_v45  ;;  %v7696_v41 = vld [vmem:[%s10384_s1 + $0x360] ss:$8 sps:$4 sm:$0xff]   ;;  %10790 = vst [vmem:[#allocation137_spill] sm:$0xff] %v7720_v11  ;;  %v7726_v13 = vld [vmem:[%s10384_s1 + $0x2a4] ss:$8 sps:$4 sm:$0xff]  }
 0x187   :  { %v2156_v27 = vpop.f32.mrf.mxu1  ;;  %v7685_v22 = vadd.f32 %v2154_v43, %v2114_v31  ;;  %10786 = vst [vmem:[#allocation133_spill] sm:$0xff] %v7696_v41  ;;  %2529 = vmatpush1.bf16.msra.mxu0 %v7696_v41  ;;  %v7708_v43 = vld [vmem:[%s10384_s1 + $0x354] ss:$8 sps:$4 sm:$0xff]   ;;  %v7714_v31 = vld [vmem:[%s10384_s1 + $0x2b0] ss:$8 sps:$4 sm:$0xff]   ;;  %10791 = vst [vmem:[#allocation138_spill] sm:$0xff] %v7726_v13 }
 0x188   :  { %2508 = vmatpush2.bf16.msra.mxu1 %v7690_v45  ;;  %v2116_v7 = vpop.f32.mrf.mxu0  ;;  %v7702_v27 = vld [vmem:[%s10384_s1 + $0x2b4] ss:$8 sps:$4 sm:$0xff]   ;;  %10788 = vst [vmem:[#allocation135_spill] sm:$0xff] %v7708_v43  ;;  %2530 = vmatprep.subr.bf16.mxu0 %v7708_v43  ;;  %10789 = vst [vmem:[#allocation136_spill] sm:$0xff] %v7714_v31  ;;  %v7732_v29 = vld [vmem:[%s10384_s1 + $0x344] ss:$8 sps:$4 sm:$0xff]  }
 0x189   :  { %v2157_v9 = vpop.f32.mrf.mxu1  ;;  %10787 = vst [vmem:[#allocation134_spill] sm:$0xff] %v7702_v27  ;;  %2509 = vmatprep.subr.bf16.mxu1 %v7702_v27  ;;  %10792 = vst [vmem:[#allocation139_spill] sm:$0xff] %v7732_v29  ;;  %v7738_v15 = vld [vmem:[%s10384_s1 + $0x2a0] ss:$8 sps:$4 sm:$0xff]   ;;  %v7780_v27 = vld [vmem:[%s10384_s1 + $0x324] ss:$8 sps:$4 sm:$0xff]  }
 0x18a   :  { %10793 = vst [vmem:[#allocation140_spill] sm:$0xff] %v7738_v15  ;;  %v7744_v7 = vld [vmem:[%s10384_s1 + $0x340] ss:$8 sps:$4 sm:$0xff]   ;;  %v7750_v9 = vld [vmem:[%s10384_s1 + $0x294] ss:$8 sps:$4 sm:$0xff]   ;;  %10800 = vst [vmem:[#allocation147_spill] sm:$0xff] %v7780_v27 }
 0x18b   :  { %2531 = vmatpush1.bf16.msra.mxu0 %v7720_v11  ;;  %10794 = vst [vmem:[#allocation141_spill] sm:$0xff] %v7744_v7  ;;  %10795 = vst [vmem:[#allocation142_spill] sm:$0xff] %v7750_v9  ;;  %v7788_v45 = vld [vmem:[%s10385_s0 + $0x6c] sm:$0xff] }
 0x18c   :  { %2510 = vmatpush2.bf16.msra.mxu1 %v7714_v31  ;;  %2532 = vmatprep.subr.bf16.mxu0 %v7732_v29  ;;  %v7768_v31 = vld [vmem:[%s10384_s1 + $0x330] ss:$8 sps:$4 sm:$0xff]  }
 0x18d   :  { %2511 = vmatprep.subr.bf16.mxu1 %v7726_v13  ;;  %v7756_v13 = vld [vmem:[%s10384_s1 + $0x334] ss:$8 sps:$4 sm:$0xff]   ;;  %10798 = vst [vmem:[#allocation145_spill] sm:$0xff] %v7768_v31  ;;  %v8069_v29 = vld [vmem:[%s10384_s1 + $0x4d0] ss:$8 sps:$4 sm:$0xff]  }
 0x18e   :  { %10796 = vst [vmem:[#allocation143_spill] sm:$0xff] %v7756_v13  ;;  %10845 = vst [vmem:[#allocation192_spill] sm:$0xff] %v8069_v29 }
 0x18f   :  { %2533 = vmatpush1.bf16.msra.mxu0 %v7744_v7 }
 0x190   :  { %2512 = vmatpush2.bf16.msra.mxu1 %v7738_v15  ;;  %2534 = vmatprep.subr.bf16.mxu0 %v7756_v13  ;;  %v7762_v15 = vld [vmem:[%s10384_s1 + $0x290] ss:$8 sps:$4 sm:$0xff]  }
 0x191   :  { %2513 = vmatprep.subr.bf16.mxu1 %v7750_v9  ;;  %10797 = vst [vmem:[#allocation144_spill] sm:$0xff] %v7762_v15  ;;  %v7774_v9 = vld [vmem:[%s10384_s1 + $0x284] ss:$8 sps:$4 sm:$0xff]  }
 0x192   :  { %10799 = vst [vmem:[#allocation146_spill] sm:$0xff] %v7774_v9 }
 0x193   :  { %2535 = vmatpush1.bf16.msra.mxu0 %v7768_v31  ;;  %v7793_v31 = vld [vmem:[%s10384_s1 + $0x280] ss:$8 sps:$4 sm:$0xff]  }
 0x194   :  { %2514 = vmatpush2.bf16.msra.mxu1 %v7762_v15  ;;  %2536 = vmatprep.subr.bf16.mxu0 %v7780_v27  ;;  %v4550_v15 = vcombine.low %v7380_v17, %v7380_v17  ;;  %10801 = vst [vmem:[#allocation148_spill] sm:$0xff] %v7793_v31  ;;  %v7805_v17 = vld [vmem:[%s10384_s1 + $0x314] ss:$8 sps:$4 sm:$0xff]  }
 0x195   :  { %2515 = vmatprep.subr.bf16.mxu1 %v7774_v9  ;;  %v7799_v9 = vld [vmem:[%s10384_s1 + $0x320] ss:$8 sps:$4 sm:$0xff]   ;;  %10803 = vst [vmem:[#allocation150_spill] sm:$0xff] %v7805_v17  ;;  %v7811_v27 = vld [vmem:[%s10384_s1 + $0x474] ss:$8 sps:$4 sm:$0xff]  }
 0x196   :  { %10802 = vst [vmem:[#allocation149_spill] sm:$0xff] %v7799_v9  ;;  %10804 = vst [vmem:[#allocation151_spill] sm:$0xff] %v7811_v27 }
 0x197   :  { %2537 = vmatpush1.bf16.msra.mxu0 %v7799_v9  ;;  %v7819_v9 = vld [vmem:[%s10384_s1 + $0x310] ss:$8 sps:$4 sm:$0xff]  }
 0x198   :  { %2516 = vmatpush2.bf16.msra.mxu1 %v7793_v31  ;;  %2538 = vmatprep.subr.bf16.mxu0 %v7805_v17  ;;  %v4555_v31 = vcombine.high %v7788_v45, %v7788_v45  ;;  %10805 = vst [vmem:[#allocation152_spill] sm:$0xff] %v7819_v9  ;;  %v7825_v17 = vld [vmem:[%s10384_s1 + $0x470] ss:$8 sps:$4 sm:$0xff]  }
 0x199   :  { %2567 = vmatprep.subr.bf16.mxu1 %v7811_v27  ;;  %10806 = vst [vmem:[#allocation153_spill] sm:$0xff] %v7825_v17  ;;  %v7831_v27 = vld [vmem:[%s10384_s1 + $0x304] ss:$8 sps:$4 sm:$0xff]  }
 0x19a   :  { %10807 = vst [vmem:[#allocation154_spill] sm:$0xff] %v7831_v27 }
 0x19b   :  { %2518 = vmatmul.mubr.bf16.vlgmr.msra.gmra.mxu1 %v4550_v15  ;;  %2539 = vmatpush1.bf16.msra.mxu0 %v7819_v9  ;;  %v7837_v15 = vld [vmem:[%s10384_s1 + $0x464] ss:$8 sps:$4 sm:$0xff]   ;;  %v7843_v9 = vld [vmem:[%s10384_s1 + $0x300] ss:$8 sps:$4 sm:$0xff]  }
 0x19c   :  { %2568 = vmatpush1.bf16.msra.mxu1 %v7825_v17  ;;  %2540 = vmatprep.subr.bf16.mxu0 %v7831_v27  ;;  %10808 = vst [vmem:[#allocation155_spill] sm:$0xff] %v7837_v15  ;;  %10809 = vst [vmem:[#allocation156_spill] sm:$0xff] %v7843_v9  ;;  %v7849_v17 = vld [vmem:[%s10384_s1 + $0x460] ss:$8 sps:$4 sm:$0xff]   ;;  %v7855_v27 = vld [vmem:[%s10384_s1 + $0x3f4] ss:$8 sps:$4 sm:$0xff]  }
 0x19d   :  { %2569 = vmatprep.subr.bf16.mxu1 %v7837_v15  ;;  %2599 = vmatprep.mubr.bf16.mxu1 %v4555_v31  ;;  %10810 = vst [vmem:[#allocation157_spill] sm:$0xff] %v7849_v17  ;;  %10811 = vst [vmem:[#allocation158_spill] sm:$0xff] %v7855_v27  ;;  %v7861_v31 = vld [vmem:[%s10384_s1 + $0x454] ss:$8 sps:$4 sm:$0xff]   ;;  %v7867_v15 = vld [vmem:[%s10384_s1 + $0x3f0] ss:$8 sps:$4 sm:$0xff]  }
 0x19e   :  { %10812 = vst [vmem:[#allocation159_spill] sm:$0xff] %v7861_v31  ;;  %10813 = vst [vmem:[#allocation160_spill] sm:$0xff] %v7867_v15 }
 0x19f   :  { %2541 = vmatpush1.bf16.msra.mxu0 %v7843_v9  ;;  %v8042_v9 = vld [vmem:[%s10384_s1 + $0x380] ss:$8 sps:$4 sm:$0xff]  }
 0x1a0   :  { %2570 = vmatpush1.bf16.msra.mxu1 %v7849_v17  ;;  %2542 = vmatprep.subr.bf16.mxu0 %v7855_v27  ;;  %v7873_v17 = vld [vmem:[%s10384_s1 + $0x450] ss:$8 sps:$4 sm:$0xff]   ;;  %v7879_v27 = vld [vmem:[%s10384_s1 + $0x3e4] ss:$8 sps:$4 sm:$0xff]   ;;  %10841 = vst [vmem:[#allocation188_spill] sm:$0xff] %v8042_v9 }
 0x1a1   :  { %2571 = vmatprep.subr.bf16.mxu1 %v7861_v31  ;;  %10814 = vst [vmem:[#allocation161_spill] sm:$0xff] %v7873_v17  ;;  %10815 = vst [vmem:[#allocation162_spill] sm:$0xff] %v7879_v27  ;;  %v7885_v31 = vld [vmem:[%s10384_s1 + $0x444] ss:$8 sps:$4 sm:$0xff]  }
 0x1a2   :  { %10816 = vst [vmem:[#allocation163_spill] sm:$0xff] %v7885_v31 }
 0x1a3   :  { %2543 = vmatpush2.bf16.msra.mxu0 %v7867_v15  ;;  %v7891_v15 = vld [vmem:[%s10384_s1 + $0x3e0] ss:$8 sps:$4 sm:$0xff]  }
 0x1a4   :  { %2572 = vmatpush1.bf16.msra.mxu1 %v7873_v17  ;;  %2544 = vmatprep.subr.bf16.mxu0 %v7879_v27  ;;  %10817 = vst [vmem:[#allocation164_spill] sm:$0xff] %v7891_v15  ;;  %v7897_v17 = vld [vmem:[%s10384_s1 + $0x440] ss:$8 sps:$4 sm:$0xff]   ;;  %v7903_v27 = vld [vmem:[%s10384_s1 + $0x3d4] ss:$8 sps:$4 sm:$0xff]  }
 0x1a5   :  { %2573 = vmatprep.subr.bf16.mxu1 %v7885_v31  ;;  %10818 = vst [vmem:[#allocation165_spill] sm:$0xff] %v7897_v17  ;;  %10819 = vst [vmem:[#allocation166_spill] sm:$0xff] %v7903_v27  ;;  %v7909_v31 = vld [vmem:[%s10384_s1 + $0x434] ss:$8 sps:$4 sm:$0xff]  }
 0x1a6   :  { %10820 = vst [vmem:[#allocation167_spill] sm:$0xff] %v7909_v31 }
 0x1a7   :  { %2545 = vmatpush2.bf16.msra.mxu0 %v7891_v15  ;;  %v7915_v15 = vld [vmem:[%s10384_s1 + $0x3d0] ss:$8 sps:$4 sm:$0xff]  }
 0x1a8   :  { %2574 = vmatpush1.bf16.msra.mxu1 %v7897_v17  ;;  %2546 = vmatprep.subr.bf16.mxu0 %v7903_v27  ;;  %10821 = vst [vmem:[#allocation168_spill] sm:$0xff] %v7915_v15  ;;  %v7921_v17 = vld [vmem:[%s10384_s1 + $0x430] ss:$8 sps:$4 sm:$0xff]   ;;  %v7927_v27 = vld [vmem:[%s10384_s1 + $0x3c4] ss:$8 sps:$4 sm:$0xff]  }
 0x1a9   :  { %2575 = vmatprep.subr.bf16.mxu1 %v7909_v31  ;;  %10822 = vst [vmem:[#allocation169_spill] sm:$0xff] %v7921_v17  ;;  %10823 = vst [vmem:[#allocation170_spill] sm:$0xff] %v7927_v27  ;;  %v7933_v31 = vld [vmem:[%s10384_s1 + $0x424] ss:$8 sps:$4 sm:$0xff]  }
 0x1aa   :  { %10824 = vst [vmem:[#allocation171_spill] sm:$0xff] %v7933_v31 }
 0x1ab   :  { %2547 = vmatpush2.bf16.msra.mxu0 %v7915_v15  ;;  %v7939_v15 = vld [vmem:[%s10384_s1 + $0x3c0] ss:$8 sps:$4 sm:$0xff]  }
 0x1ac   :  { %2576 = vmatpush1.bf16.msra.mxu1 %v7921_v17  ;;  %2548 = vmatprep.subr.bf16.mxu0 %v7927_v27  ;;  %10825 = vst [vmem:[#allocation172_spill] sm:$0xff] %v7939_v15  ;;  %v7945_v17 = vld [vmem:[%s10384_s1 + $0x420] ss:$8 sps:$4 sm:$0xff]   ;;  %v7951_v27 = vld [vmem:[%s10384_s1 + $0x3b4] ss:$8 sps:$4 sm:$0xff]  }
 0x1ad   :  { %2577 = vmatprep.subr.bf16.mxu1 %v7933_v31  ;;  %10826 = vst [vmem:[#allocation173_spill] sm:$0xff] %v7945_v17  ;;  %10827 = vst [vmem:[#allocation174_spill] sm:$0xff] %v7951_v27  ;;  %v7957_v31 = vld [vmem:[%s10384_s1 + $0x414] ss:$8 sps:$4 sm:$0xff]  }
 0x1ae   :  { %10828 = vst [vmem:[#allocation175_spill] sm:$0xff] %v7957_v31 }
 0x1af   :  { %2549 = vmatpush2.bf16.msra.mxu0 %v7939_v15  ;;  %v7963_v15 = vld [vmem:[%s10384_s1 + $0x3b0] ss:$8 sps:$4 sm:$0xff]  }
 0x1b0   :  { %2578 = vmatpush1.bf16.msra.mxu1 %v7945_v17  ;;  %2550 = vmatprep.subr.bf16.mxu0 %v7951_v27  ;;  %10829 = vst [vmem:[#allocation176_spill] sm:$0xff] %v7963_v15  ;;  %v7969_v17 = vld [vmem:[%s10384_s1 + $0x410] ss:$8 sps:$4 sm:$0xff]   ;;  %v7975_v27 = vld [vmem:[%s10384_s1 + $0x3a4] ss:$8 sps:$4 sm:$0xff]  }
 0x1b1   :  { %2579 = vmatprep.subr.bf16.mxu1 %v7957_v31  ;;  %10830 = vst [vmem:[#allocation177_spill] sm:$0xff] %v7969_v17  ;;  %10831 = vst [vmem:[#allocation178_spill] sm:$0xff] %v7975_v27  ;;  %v7981_v31 = vld [vmem:[%s10384_s1 + $0x404] ss:$8 sps:$4 sm:$0xff]  }
 0x1b2   :  { %10832 = vst [vmem:[#allocation179_spill] sm:$0xff] %v7981_v31 }
 0x1b3   :  { %2551 = vmatpush2.bf16.msra.mxu0 %v7963_v15  ;;  %v7987_v15 = vld [vmem:[%s10384_s1 + $0x3a0] ss:$8 sps:$4 sm:$0xff]  }
 0x1b4   :  { %2580 = vmatpush1.bf16.msra.mxu1 %v7969_v17  ;;  %2552 = vmatprep.subr.bf16.mxu0 %v7975_v27  ;;  %10833 = vst [vmem:[#allocation180_spill] sm:$0xff] %v7987_v15  ;;  %v7993_v17 = vld [vmem:[%s10384_s1 + $0x400] ss:$8 sps:$4 sm:$0xff]   ;;  %v7999_v27 = vld [vmem:[%s10384_s1 + $0x394] ss:$8 sps:$4 sm:$0xff]  }
 0x1b5   :  { %2581 = vmatprep.subr.bf16.mxu1 %v7981_v31  ;;  %10834 = vst [vmem:[#allocation181_spill] sm:$0xff] %v7993_v17  ;;  %10835 = vst [vmem:[#allocation182_spill] sm:$0xff] %v7999_v27  ;;  %v8005_v31 = vld [vmem:[%s10384_s1 + $0x4f4] ss:$8 sps:$4 sm:$0xff]  }
 0x1b6   :  { %10836 = vst [vmem:[#allocation183_spill] sm:$0xff] %v8005_v31 }
 0x1b7   :  { %2553 = vmatpush2.bf16.msra.mxu0 %v7987_v15  ;;  %v8011_v15 = vld [vmem:[%s10384_s1 + $0x390] ss:$8 sps:$4 sm:$0xff]  }
 0x1b8   :  { %2582 = vmatpush1.bf16.msra.mxu1 %v7993_v17  ;;  %2554 = vmatprep.subr.bf16.mxu0 %v7999_v27  ;;  %10837 = vst [vmem:[#allocation184_spill] sm:$0xff] %v8011_v15  ;;  %v8017_v17 = vld [vmem:[%s10384_s1 + $0x4f0] ss:$8 sps:$4 sm:$0xff]   ;;  %v8023_v27 = vld [vmem:[%s10384_s1 + $0x384] ss:$8 sps:$4 sm:$0xff]  }
 0x1b9   :  { %2583 = vmatprep.subr.bf16.mxu1 %v8005_v31  ;;  %10838 = vst [vmem:[#allocation185_spill] sm:$0xff] %v8017_v17  ;;  %10839 = vst [vmem:[#allocation186_spill] sm:$0xff] %v8023_v27  ;;  %v8029_v31 = vld [vmem:[%s10384_s1 + $0x4e4] ss:$8 sps:$4 sm:$0xff]  }
 0x1ba   :  { %10840 = vst [vmem:[#allocation187_spill] sm:$0xff] %v8029_v31 }
 0x1bb   :  { %2555 = vmatpush2.bf16.msra.mxu0 %v8011_v15  ;;  %v4552_v15 = vcombine.low %v7629_v19, %v7629_v19  ;;  %v8054_v19 = vld [vmem:[%s10384_s1 + $0x4d4] ss:$8 sps:$4 sm:$0xff]  }
 0x1bc   :  { %2584 = vmatpush2.bf16.msra.mxu1 %v8017_v17  ;;  %2556 = vmatprep.subr.bf16.mxu0 %v8023_v27  ;;  %v8037_v17 = vld [vmem:[%s10385_s0 + $0x74] sm:$0xff]  ;;  %v8048_v27 = vld [vmem:[%s10384_s1 + $0x4e0] ss:$8 sps:$4 sm:$0xff]   ;;  %10843 = vst [vmem:[#allocation190_spill] sm:$0xff] %v8054_v19 }
 0x1bd   :  { %2585 = vmatprep.subr.bf16.mxu1 %v8029_v31  ;;  %10842 = vst [vmem:[#allocation189_spill] sm:$0xff] %v8048_v27  ;;  %v8060_v31 = vld [vmem:[%s10384_s1 + $0x574] ss:$8 sps:$4 sm:$0xff]  }
 0x1be   :  { %10844 = vst [vmem:[#allocation191_spill] sm:$0xff] %v8060_v31 }
 0x1bf   :  { %2557 = vmatpush2.bf16.msra.mxu0 %v8042_v9  ;;  %v4557_v9 = vcombine.high %v8037_v17, %v8037_v17 }
 0x1c0   :  { %2586 = vmatpush2.bf16.msra.mxu1 %v8048_v27  ;;  %2608 = vmatprep.subr.bf16.mxu0 %v8060_v31 }
 0x1c1   :  { %2587 = vmatprep.subr.bf16.mxu1 %v8054_v19  ;;  %v8075_v19 = vld [vmem:[%s10384_s1 + $0x570] ss:$8 sps:$4 sm:$0xff]  }
 0x1c2   :  { %v2193_v13 = vpop.f32.mrf.mxu0  ;;  %2559 = vmatmul.mubr.bf16.vlgmr.msra.gmra.mxu0 %v4552_v15  ;;  %10846 = vst [vmem:[#allocation193_spill] sm:$0xff] %v8075_v19 }
 0x1c3   :  { %v2234_v7 = vpop.f32.mrf.mxu1  ;;  %v2194_v27 = vadd.f32 %v2193_v13, %v7682_v33  ;;  %2609 = vmatpush1.bf16.msra.mxu0 %v8075_v19  ;;  %v8081_v33 = vld [vmem:[%s10384_s1 + $0x4c4] ss:$8 sps:$4 sm:$0xff]   ;;  %2640 = vmatprep.mubr.bf16.mxu0 %v4557_v9 }
 0x1c4   :  { %2588 = vmatpush2.bf16.msra.mxu1 %v8069_v29  ;;  %v2195_v31 = vpop.f32.mrf.mxu0  ;;  %10847 = vst [vmem:[#allocation194_spill] sm:$0xff] %v8081_v33  ;;  %v8087_v13 = vld [vmem:[%s10384_s1 + $0x564] ss:$8 sps:$4 sm:$0xff]  }
 0x1c5   :  { %v2236_v11 = vpop.f32.mrf.mxu1  ;;  %2589 = vmatprep.subr.bf16.mxu1 %v8081_v33  ;;  %10848 = vst [vmem:[#allocation195_spill] sm:$0xff] %v8087_v13  ;;  %2610 = vmatprep.subr.bf16.mxu0 %v8087_v13  ;;  %v8090_v15 = vadd.f32 %v2234_v7, %v2194_v27  ;;  %v2196_v29 = vadd.f32 %v2195_v31, %v7685_v22  ;;  %v8098_v33 = vld [vmem:[%s10384_s1 + $0x4c0] ss:$8 sps:$4 sm:$0xff]   ;;  %v8128_v7 = vld [vmem:[%s10384_s1 + $0x550] ss:$8 sps:$4 sm:$0xff]  }
 0x1c6   :  { %v2197_v19 = vpop.f32.mrf.mxu0  ;;  %10849 = vst [vmem:[#allocation196_spill] sm:$0xff] %v8098_v33  ;;  %v8104_v13 = vld [vmem:[%s10384_s1 + $0x560] ss:$8 sps:$4 sm:$0xff]   ;;  %v8134_v9 = vld [vmem:[%s10384_s1 + $0x4a4] ss:$8 sps:$4 sm:$0xff]  }
 0x1c7   :  { %v2238_v43 = vpop.f32.mrf.mxu1  ;;  %v8093_v41 = vadd.f32 %v2236_v11, %v2196_v29  ;;  %2611 = vmatpush1.bf16.msra.mxu0 %v8104_v13  ;;  %v8116_v11 = vld [vmem:[%s10384_s1 + $0x554] ss:$8 sps:$4 sm:$0xff]   ;;  %v8122_v29 = vld [vmem:[%s10384_s1 + $0x4b0] ss:$8 sps:$4 sm:$0xff]   ;;  %10852 = vst [vmem:[#allocation199_spill] sm:$0xff] %v8134_v9 }
 0x1c8   :  { %2590 = vmatpush2.bf16.msra.mxu1 %v8098_v33  ;;  %v2198_v22 = vpop.f32.mrf.mxu0  ;;  %v8110_v43 = vld [vmem:[%s10384_s1 + $0x4b4] ss:$8 sps:$4 sm:$0xff]   ;;  %2612 = vmatprep.subr.bf16.mxu0 %v8116_v11  ;;  %10851 = vst [vmem:[#allocation198_spill] sm:$0xff] %v8122_v29  ;;  %v8140_v31 = vld [vmem:[%s10384_s1 + $0x544] ss:$8 sps:$4 sm:$0xff]  }
 0x1c9   :  { %v2239_v27 = vpop.f32.mrf.mxu1  ;;  %10850 = vst [vmem:[#allocation197_spill] sm:$0xff] %v8110_v43  ;;  %2591 = vmatprep.subr.bf16.mxu1 %v8110_v43  ;;  %v8146_v19 = vld [vmem:[%s10384_s1 + $0x4a0] ss:$8 sps:$4 sm:$0xff]   ;;  %v8188_v43 = vld [vmem:[%s10384_s1 + $0x524] ss:$8 sps:$4 sm:$0xff]  }
 0x1ca   :  { %10853 = vst [vmem:[#allocation200_spill] sm:$0xff] %v8146_v19  ;;  %v8152_v22 = vld [vmem:[%s10384_s1 + $0x540] ss:$8 sps:$4 sm:$0xff]   ;;  %v8158_v27 = vld [vmem:[%s10384_s1 + $0x494] ss:$8 sps:$4 sm:$0xff]   ;;  %10860 = vst [vmem:[#allocation207_spill] sm:$0xff] %v8188_v43 }
 0x1cb   :  { %2613 = vmatpush1.bf16.msra.mxu0 %v8128_v7  ;;  %10854 = vst [vmem:[#allocation201_spill] sm:$0xff] %v8152_v22  ;;  %10855 = vst [vmem:[#allocation202_spill] sm:$0xff] %v8158_v27  ;;  %v8196_v33 = vld [vmem:[%s10385_s0 + $0x7c] sm:$0xff] }
 0x1cc   :  { %2592 = vmatpush2.bf16.msra.mxu1 %v8122_v29  ;;  %2614 = vmatprep.subr.bf16.mxu0 %v8140_v31  ;;  %v8176_v29 = vld [vmem:[%s10384_s1 + $0x530] ss:$8 sps:$4 sm:$0xff]  }
 0x1cd   :  { %2593 = vmatprep.subr.bf16.mxu1 %v8134_v9  ;;  %v8164_v9 = vld [vmem:[%s10384_s1 + $0x534] ss:$8 sps:$4 sm:$0xff]   ;;  %10858 = vst [vmem:[#allocation205_spill] sm:$0xff] %v8176_v29 }
 0x1ce   :  { %10856 = vst [vmem:[#allocation203_spill] sm:$0xff] %v8164_v9 }
 0x1cf   :  { %2615 = vmatpush1.bf16.msra.mxu0 %v8152_v22  ;;  %v8245_v22 = vld [vmem:[%s10384_s1 + $0x500] ss:$8 sps:$4 sm:$0xff]  }
 0x1d0   :  { %2594 = vmatpush2.bf16.msra.mxu1 %v8146_v19  ;;  %2616 = vmatprep.subr.bf16.mxu0 %v8164_v9  ;;  %v8170_v19 = vld [vmem:[%s10384_s1 + $0x490] ss:$8 sps:$4 sm:$0xff]  }
 0x1d1   :  { %2595 = vmatprep.subr.bf16.mxu1 %v8158_v27  ;;  %10857 = vst [vmem:[#allocation204_spill] sm:$0xff] %v8170_v19  ;;  %v8182_v27 = vld [vmem:[%s10384_s1 + $0x484] ss:$8 sps:$4 sm:$0xff]  }
 0x1d2   :  { %10859 = vst [vmem:[#allocation206_spill] sm:$0xff] %v8182_v27 }
 0x1d3   :  { %2617 = vmatpush1.bf16.msra.mxu0 %v8176_v29  ;;  %v8201_v29 = vld [vmem:[%s10384_s1 + $0x480] ss:$8 sps:$4 sm:$0xff]  }
 0x1d4   :  { %2596 = vmatpush2.bf16.msra.mxu1 %v8170_v19  ;;  %2618 = vmatprep.subr.bf16.mxu0 %v8188_v43  ;;  %v4554_v19 = vcombine.low %v7788_v45, %v7788_v45  ;;  %10861 = vst [vmem:[#allocation208_spill] sm:$0xff] %v8201_v29  ;;  %v8213_v45 = vld [vmem:[%s10384_s1 + $0x514] ss:$8 sps:$4 sm:$0xff]  }
 0x1d5   :  { %2597 = vmatprep.subr.bf16.mxu1 %v8182_v27  ;;  %v8207_v27 = vld [vmem:[%s10384_s1 + $0x520] ss:$8 sps:$4 sm:$0xff]   ;;  %10863 = vst [vmem:[#allocation210_spill] sm:$0xff] %v8213_v45  ;;  %v8219_v43 = vld [vmem:[%s10384_s1 + $0x674] ss:$8 sps:$4 sm:$0xff]  }
 0x1d6   :  { %10862 = vst [vmem:[#allocation209_spill] sm:$0xff] %v8207_v27  ;;  %10864 = vst [vmem:[#allocation211_spill] sm:$0xff] %v8219_v43 }
 0x1d7   :  { %2619 = vmatpush1.bf16.msra.mxu0 %v8207_v27  ;;  %v8229_v27 = vld [vmem:[%s10384_s1 + $0x510] ss:$8 sps:$4 sm:$0xff]  }
 0x1d8   :  { %2598 = vmatpush2.bf16.msra.mxu1 %v8201_v29  ;;  %2620 = vmatprep.subr.bf16.mxu0 %v8213_v45  ;;  %v4559_v29 = vcombine.high %v8196_v33, %v8196_v33  ;;  %10865 = vst [vmem:[#allocation212_spill] sm:$0xff] %v8229_v27 }
 0x1d9   :  { %2649 = vmatprep.subr.bf16.mxu1 %v8219_v43  ;;  %v8238_v43 = vld [vmem:[%s10384_s1 + $0x504] ss:$8 sps:$4 sm:$0xff]  }
 0x1db   :  { %v8224_v9 = vpop.f32.mrf.mxu1  ;;  %2600 = vmatmul.mubr.bf16.vlgmr.msra.gmra.mxu1 %v4554_v19  ;;  %2621 = vmatpush1.bf16.msra.mxu0 %v8229_v27  ;;  %v8252_v27 = vld [vmem:[%s10384_s1 + $0x5f4] ss:$8 sps:$4 sm:$0xff]  }
 0x1dc   :  { %2650 = vmatpush1.bf16.msra.mxu1 %v6495_v24  ;;  %2622 = vmatprep.subr.bf16.mxu0 %v8238_v43 }
 0x1dd   :  { %v8233_v45 = vpop.f32.mrf.mxu1  ;;  %2651 = vmatprep.subr.bf16.mxu1 %v6503_v18  ;;  %2681 = vmatprep.mubr.bf16.mxu1 %v4559_v29  ;;  %v8259_v18 = vld [vmem:[%s10384_s1 + $0x5f0] ss:$8 sps:$4 sm:$0xff]   ;;  %v8359_v29 = vld [vmem:[%s10385_s0 + $0x84] sm:$0xff] }
 0x1df   :  { %v2320_v19 = vpop.f32.mrf.mxu1  ;;  %2623 = vmatpush1.bf16.msra.mxu0 %v8245_v22 }
 0x1e0   :  { %2652 = vmatpush1.bf16.msra.mxu1 %v6516_v28  ;;  %2624 = vmatprep.subr.bf16.mxu0 %v8252_v27  ;;  %v8266_v28 = vld [vmem:[%s10384_s1 + $0x5e4] ss:$8 sps:$4 sm:$0xff]  }
 0x1e1   :  { %v2321_v24 = vpop.f32.mrf.mxu1  ;;  %2653 = vmatprep.subr.bf16.mxu1 %v6525_v30  ;;  %v8273_v30 = vld [vmem:[%s10384_s1 + $0x5e0] ss:$8 sps:$4 sm:$0xff]  }
 0x1e3   :  { %2625 = vmatpush2.bf16.msra.mxu0 %v8259_v18 }
 0x1e4   :  { %2654 = vmatpush1.bf16.msra.mxu1 %v6534_v32  ;;  %2626 = vmatprep.subr.bf16.mxu0 %v8266_v28  ;;  %v8280_v32 = vld [vmem:[%s10384_s1 + $0x5d4] ss:$8 sps:$4 sm:$0xff]  }
 0x1e5   :  { %2655 = vmatprep.subr.bf16.mxu1 %v6543_v34  ;;  %v8287_v34 = vld [vmem:[%s10384_s1 + $0x5d0] ss:$8 sps:$4 sm:$0xff]  }
 0x1e7   :  { %2627 = vmatpush2.bf16.msra.mxu0 %v8273_v30 }
 0x1e8   :  { %2656 = vmatpush1.bf16.msra.mxu1 %v6551_v36  ;;  %2628 = vmatprep.subr.bf16.mxu0 %v8280_v32  ;;  %v8294_v36 = vld [vmem:[%s10384_s1 + $0x5c4] ss:$8 sps:$4 sm:$0xff]  }
 0x1e9   :  { %2657 = vmatprep.subr.bf16.mxu1 %v6561_v38  ;;  %v8301_v38 = vld [vmem:[%s10384_s1 + $0x5c0] ss:$8 sps:$4 sm:$0xff]  }
 0x1eb   :  { %2629 = vmatpush2.bf16.msra.mxu0 %v8287_v34 }
 0x1ec   :  { %2658 = vmatpush1.bf16.msra.mxu1 %v6570_v40  ;;  %2630 = vmatprep.subr.bf16.mxu0 %v8294_v36  ;;  %v8308_v40 = vld [vmem:[%s10384_s1 + $0x5b4] ss:$8 sps:$4 sm:$0xff]  }
 0x1ed   :  { %2659 = vmatprep.subr.bf16.mxu1 %v6579_v42  ;;  %v8315_v42 = vld [vmem:[%s10384_s1 + $0x5b0] ss:$8 sps:$4 sm:$0xff]  }
 0x1ef   :  { %2631 = vmatpush2.bf16.msra.mxu0 %v8301_v38 }
 0x1f0   :  { %2660 = vmatpush1.bf16.msra.mxu1 %v6588_v44  ;;  %2632 = vmatprep.subr.bf16.mxu0 %v8308_v40  ;;  %v8322_v44 = vld [vmem:[%s10384_s1 + $0x5a4] ss:$8 sps:$4 sm:$0xff]  }
 0x1f1   :  { %2661 = vmatprep.subr.bf16.mxu1 %v6597_v46  ;;  %v8329_v46 = vld [vmem:[%s10384_s1 + $0x5a0] ss:$8 sps:$4 sm:$0xff]  }
 0x1f3   :  { %2633 = vmatpush2.bf16.msra.mxu0 %v8315_v42 }
 0x1f4   :  { %2662 = vmatpush1.bf16.msra.mxu1 %v6606_v48  ;;  %2634 = vmatprep.subr.bf16.mxu0 %v8322_v44  ;;  %v8336_v48 = vld [vmem:[%s10384_s1 + $0x594] ss:$8 sps:$4 sm:$0xff]  }
 0x1f5   :  { %2663 = vmatprep.subr.bf16.mxu1 %v6615_v50  ;;  %v8343_v50 = vld [vmem:[%s10384_s1 + $0x590] ss:$8 sps:$4 sm:$0xff]  }
 0x1f7   :  { %2635 = vmatpush2.bf16.msra.mxu0 %v8329_v46 }
 0x1f8   :  { %2664 = vmatpush1.bf16.msra.mxu1 %v6624_v52  ;;  %2636 = vmatprep.subr.bf16.mxu0 %v8336_v48  ;;  %v8350_v52 = vld [vmem:[%s10384_s1 + $0x584] ss:$8 sps:$4 sm:$0xff]  }
 0x1f9   :  { %2665 = vmatprep.subr.bf16.mxu1 %v6633_v54  ;;  %v4556_v54 = vcombine.low %v8037_v17, %v8037_v17  ;;  %v4561_v17 = vcombine.high %v8359_v29, %v8359_v29 }
 0x1fb   :  { %2637 = vmatpush2.bf16.msra.mxu0 %v8343_v50 }
 0x1fc   :  { %2666 = vmatpush2.bf16.msra.mxu1 %v6642_v56  ;;  %2638 = vmatprep.subr.bf16.mxu0 %v8350_v52  ;;  %v8364_v56 = vld [vmem:[%s10384_s1 + $0x580] ss:$8 sps:$4 sm:$0xff]  }
 0x1fd   :  { %2667 = vmatprep.subr.bf16.mxu1 %v6651_v58  ;;  %v8372_v58 = vld [vmem:[%s10384_s1 + $0x774] ss:$8 sps:$4 sm:$0xff]  }
 0x1fe   :  { %10866 = vst [vmem:[#allocation213_spill] sm:$0xff] %v8372_v58 }
 0x1ff   :  { %2639 = vmatpush2.bf16.msra.mxu0 %v8364_v56 }
 0x200   :  { %2668 = vmatpush2.bf16.msra.mxu1 %v6662_v60  ;;  %2690 = vmatprep.subr.bf16.mxu0 %v8372_v58  ;;  %v8382_v60 = vld [vmem:[%s10384_s1 + $0x770] ss:$8 sps:$4 sm:$0xff]   ;;  %v8389_v58 = vld [vmem:[%s10384_s1 + $0x764] ss:$8 sps:$4 sm:$0xff]  }
 0x201   :  { %2669 = vmatprep.subr.bf16.mxu1 %v6674_v62  ;;  %10867 = vst [vmem:[#allocation214_spill] sm:$0xff] %v8389_v58 }
 0x202   :  { %v2275_v19 = vpop.f32.mrf.mxu0  ;;  %2641 = vmatmul.mubr.bf16.vlgmr.msra.gmra.mxu0 %v4556_v54 }
 0x203   :  { %v2276_v24 = vadd.f32 %v2275_v19, %v8090_v15  ;;  %2691 = vmatpush1.bf16.msra.mxu0 %v8382_v60  ;;  %2722 = vmatprep.mubr.bf16.mxu0 %v4561_v17 }
 0x204   :  { %2670 = vmatpush2.bf16.msra.mxu1 %v6686_v0  ;;  %v2277_v62 = vpop.f32.mrf.mxu0  ;;  %2692 = vmatprep.subr.bf16.mxu0 %v8389_v58 }
 0x205   :  { %2671 = vmatprep.subr.bf16.mxu1 %v6698_v2  ;;  %v8393_v15 = vadd.f32 %v8224_v9, %v2276_v24  ;;  %v2278_v0 = vadd.f32 %v2277_v62, %v8093_v41  ;;  %v8403_v2 = vld [vmem:[%s10384_s1 + $0x760] ss:$8 sps:$4 sm:$0xff]   ;;  %v8410_v41 = vld [vmem:[%s10384_s1 + $0x754] ss:$8 sps:$4 sm:$0xff]   ;;  %v4558_v9 = vcombine.low %v8196_v33, %v8196_v33  ;;  %v8488_v24 = vld [vmem:[%s10384_s1 + $0x704] ss:$8 sps:$4 sm:$0xff]  }
 0x206   :  { %v2279_v54 = vpop.f32.mrf.mxu0  ;;  %v8495_v62 = vld [vmem:[%s10384_s1 + $0x700] ss:$8 sps:$4 sm:$0xff]  }
 0x207   :  { %v8397_v19 = vadd.f32 %v8233_v45, %v2278_v0  ;;  %2693 = vmatpush1.bf16.msra.mxu0 %v8403_v2  ;;  %v8472_v45 = vld [vmem:[%s10384_s1 + $0x714] ss:$8 sps:$4 sm:$0xff]  }
 0x208   :  { %2672 = vmatpush2.bf16.msra.mxu1 %v6710_v4  ;;  %v2280_v58 = vpop.f32.mrf.mxu0  ;;  %2694 = vmatprep.subr.bf16.mxu0 %v8410_v41  ;;  %v8417_v4 = vld [vmem:[%s10384_s1 + $0x750] ss:$8 sps:$4 sm:$0xff]   ;;  %v8502_v0 = vld [vmem:[%s10384_s1 + $0x7f4] ss:$8 sps:$4 sm:$0xff]  }
 0x209   :  { %2673 = vmatprep.subr.bf16.mxu1 %v6722_v6  ;;  %v8424_v6 = vld [vmem:[%s10384_s1 + $0x744] ss:$8 sps:$4 sm:$0xff]   ;;  %v8481_v58 = vld [vmem:[%s10384_s1 + $0x710] ss:$8 sps:$4 sm:$0xff]  }
 0x20a   :  { %v10882_v54 = vld [vmem:[#allocation9_spill] sm:$0xff] }
 0x20b   :  { %2695 = vmatpush1.bf16.msra.mxu0 %v8417_v4 }
 0x20c   :  { %2674 = vmatpush2.bf16.msra.mxu1 %v6734_v8  ;;  %2696 = vmatprep.subr.bf16.mxu0 %v8424_v6  ;;  %v8431_v8 = vld [vmem:[%s10384_s1 + $0x740] ss:$8 sps:$4 sm:$0xff]  }
 0x20d   :  { %2675 = vmatprep.subr.bf16.mxu1 %v6746_v10  ;;  %v8438_v10 = vld [vmem:[%s10384_s1 + $0x734] ss:$8 sps:$4 sm:$0xff]  }
 0x20f   :  { %2697 = vmatpush1.bf16.msra.mxu0 %v8431_v8 }
 0x210   :  { %2676 = vmatpush2.bf16.msra.mxu1 %v6758_v12  ;;  %2698 = vmatprep.subr.bf16.mxu0 %v8438_v10  ;;  %v8445_v12 = vld [vmem:[%s10384_s1 + $0x730] ss:$8 sps:$4 sm:$0xff]  }
 0x211   :  { %2677 = vmatprep.subr.bf16.mxu1 %v6770_v14  ;;  %v8452_v14 = vld [vmem:[%s10384_s1 + $0x724] ss:$8 sps:$4 sm:$0xff]  }
 0x213   :  { %2699 = vmatpush1.bf16.msra.mxu0 %v8445_v12 }
 0x214   :  { %2678 = vmatpush2.bf16.msra.mxu1 %v6782_v16  ;;  %2700 = vmatprep.subr.bf16.mxu0 %v8452_v14  ;;  %v8460_v16 = vld [vmem:[%s10385_s0 + $0x8c] sm:$0xff] }
 0x215   :  { %2679 = vmatprep.subr.bf16.mxu1 %v6794_v21  ;;  %v8466_v21 = vld [vmem:[%s10384_s1 + $0x720] ss:$8 sps:$4 sm:$0xff]   ;;  %v4563_v33 = vcombine.high %v8460_v16, %v8460_v16 }
 0x217   :  { %2701 = vmatpush1.bf16.msra.mxu0 %v8466_v21 }
 0x218   :  { %2680 = vmatpush2.bf16.msra.mxu1 %v6806_v25  ;;  %2702 = vmatprep.subr.bf16.mxu0 %v8472_v45 }
 0x219   :  { %2731 = vmatprep.subr.bf16.mxu1 %v6818_v26 }
 0x21b   :  { %v2437_v25 = vpop.f32.mrf.mxu1  ;;  %2682 = vmatmul.mubr.bf16.vlgmr.msra.gmra.mxu1 %v4558_v9  ;;  %2703 = vmatpush1.bf16.msra.mxu0 %v8481_v58  ;;  %v10883_v9 = vld [vmem:[#allocation35_spill] sm:$0xff] }
 0x21c   :  { %2732 = vmatpush1.bf16.msra.mxu1 %v6839_v35  ;;  %2704 = vmatprep.subr.bf16.mxu0 %v8488_v24 }
 0x21d   :  { %v2439_v17 = vpop.f32.mrf.mxu1  ;;  %2733 = vmatprep.subr.bf16.mxu1 %v6851_v23  ;;  %2763 = vmatprep.mubr.bf16.mxu1 %v4563_v33  ;;  %v8509_v23 = vld [vmem:[%s10384_s1 + $0x7f0] ss:$8 sps:$4 sm:$0xff]  }
 0x21e   :  { %v10884_v33 = vld [vmem:[#allocation37_spill] sm:$0xff] }
 0x21f   :  { %v2441_v26 = vpop.f32.mrf.mxu1  ;;  %2705 = vmatpush1.bf16.msra.mxu0 %v8495_v62 }
 0x220   :  { %2734 = vmatpush1.bf16.msra.mxu1 %v6867_v47  ;;  %2706 = vmatprep.subr.bf16.mxu0 %v8502_v0  ;;  %v10872_v47 = vld [vmem:[#allocation4_spill] sm:$0xff]  ;;  %v10885_v26 = vld [vmem:[#allocation10_spill] sm:$0xff] }
 0x221   :  { %v2442_v35 = vpop.f32.mrf.mxu1  ;;  %2735 = vmatprep.subr.bf16.mxu1 %v6879_v55  ;;  %v10874_v55 = vld [vmem:[#allocation5_spill] sm:$0xff] }
 0x223   :  { %2707 = vmatpush2.bf16.msra.mxu0 %v8509_v23 }
 0x224   :  { %2736 = vmatpush1.bf16.msra.mxu1 %v6894_v37  ;;  %2708 = vmatprep.subr.bf16.mxu0 %v6656_v59  ;;  %v10868_v59 = vld [vmem:[#allocation2_spill] sm:$0xff]  ;;  %v10870_v37 = vld [vmem:[#allocation3_spill] sm:$0xff] }
 0x225   :  { %2737 = vmatprep.subr.bf16.mxu1 %v6906_v39  ;;  %v10880_v39 = vld [vmem:[#allocation8_spill] sm:$0xff] }
 0x227   :  { %2709 = vmatpush2.bf16.msra.mxu0 %v6667_v61  ;;  %v10869_v61 = vld [vmem:[#allocation22_spill] sm:$0xff] }
 0x228   :  { %2738 = vmatpush1.bf16.msra.mxu1 %v6918_v20  ;;  %2710 = vmatprep.subr.bf16.mxu0 %v6679_v63  ;;  %v10871_v63 = vld [vmem:[#allocation23_spill] sm:$0xff]  ;;  %v10881_v20 = vld [vmem:[#allocation33_spill] sm:$0xff] }
 0x229   :  { %2739 = vmatprep.subr.bf16.mxu1 %v6930_v53  ;;  %v4560_v53 = vcombine.low %v8359_v29, %v8359_v29 }
 0x22b   :  { %2711 = vmatpush2.bf16.msra.mxu0 %v6691_v1  ;;  %v10873_v1 = vld [vmem:[#allocation25_spill] sm:$0xff] }
 0x22c   :  { %2740 = vmatpush1.bf16.msra.mxu1 %v6942_v51  ;;  %2712 = vmatprep.subr.bf16.mxu0 %v6703_v3  ;;  %v10875_v3 = vld [vmem:[#allocation27_spill] sm:$0xff] }
 0x22d   :  { %2741 = vmatprep.subr.bf16.mxu1 %v6954_v57  ;;  %v10876_v57 = vld [vmem:[#allocation6_spill] sm:$0xff]  ;;  %v10879_v51 = vld [vmem:[#allocation31_spill] sm:$0xff] }
 0x22f   :  { %2713 = vmatpush2.bf16.msra.mxu0 %v6715_v5  ;;  %v10877_v5 = vld [vmem:[#allocation29_spill] sm:$0xff] }
 0x230   :  { %2742 = vmatpush1.bf16.msra.mxu1 %v6966_v49  ;;  %2714 = vmatprep.subr.bf16.mxu0 %v10868_v59  ;;  %v10878_v49 = vld [vmem:[#allocation7_spill] sm:$0xff] }
 0x231   :  { %2743 = vmatprep.subr.bf16.mxu1 %v10869_v61  ;;  %v10886_v61 = vld [vmem:[#allocation39_spill] sm:$0xff] }
 0x233   :  { %2715 = vmatpush2.bf16.msra.mxu0 %v10870_v37  ;;  %v10887_v37 = vld [vmem:[#allocation11_spill] sm:$0xff] }
 0x234   :  { %2744 = vmatpush1.bf16.msra.mxu1 %v10871_v63  ;;  %2716 = vmatprep.subr.bf16.mxu0 %v10872_v47  ;;  %v10888_v47 = vld [vmem:[#allocation41_spill] sm:$0xff] }
 0x235   :  { %2745 = vmatprep.subr.bf16.mxu1 %v10873_v1  ;;  %v10889_v1 = vld [vmem:[#allocation12_spill] sm:$0xff] }
 0x237   :  { %2717 = vmatpush2.bf16.msra.mxu0 %v10874_v55  ;;  %v10890_v55 = vmov 0  }
 0x238   :  { %2746 = vmatpush1.bf16.msra.mxu1 %v10875_v3  ;;  %2718 = vmatprep.subr.bf16.mxu0 %v10876_v57  ;;  %v10891_v57 = vld [vmem:[#allocation43_spill] sm:$0xff] }
 0x239   :  { %2747 = vmatprep.subr.bf16.mxu1 %v10877_v5  ;;  %v10892_v5 = vld [vmem:[#allocation13_spill] sm:$0xff] }
 0x23b   :  { %2719 = vmatpush2.bf16.msra.mxu0 %v10878_v49 }
 0x23c   :  { %2748 = vmatpush2.bf16.msra.mxu1 %v10879_v51  ;;  %2720 = vmatprep.subr.bf16.mxu0 %v10880_v39  ;;  %v10893_v51 = vld [vmem:[#allocation45_spill] sm:$0xff]  ;;  %v10895_v39 = vld [vmem:[#allocation47_spill] sm:$0xff] }
 0x23d   :  { %2749 = vmatprep.subr.bf16.mxu1 %v10881_v20  ;;  %v10896_v20 = vld [vmem:[#allocation15_spill] sm:$0xff] }
 0x23f   :  { %2721 = vmatpush2.bf16.msra.mxu0 %v10882_v54  ;;  %v10898_v54 = vld [vmem:[#allocation16_spill] sm:$0xff] }
 0x240   :  { %2750 = vmatpush2.bf16.msra.mxu1 %v10883_v9  ;;  %2776 = vmatprep.subr.bf16.mxu0 %v10885_v26  ;;  %v10900_v9 = vld [vmem:[#allocation17_spill] sm:$0xff]  ;;  %v10902_v26 = vld [vmem:[#allocation18_spill] sm:$0xff] }
 0x241   :  { %2751 = vmatprep.subr.bf16.mxu1 %v10884_v33  ;;  %v10901_v33 = vld [vmem:[#allocation53_spill] sm:$0xff] }
 0x242   :  { %v2478_v35 = vpop.f32.mrf.mxu0  ;;  %2723 = vmatmul.mubr.bf16.vlgmr.msra.gmra.mxu0 %v4560_v53  ;;  %v10897_v53 = vld [vmem:[#allocation49_spill] sm:$0xff] }
 0x243   :  { %v2479_v59 = vadd.f32 %v2478_v35, %v2437_v25  ;;  %2777 = vmatpush1.bf16.msra.mxu0 %v10887_v37  ;;  %2804 = vmatprep.mubr.bf16.mxu0 %v10890_v55  ;;  %v10894_v25 = vld [vmem:[#allocation14_spill] sm:$0xff]  ;;  %v10903_v35 = vld [vmem:[#allocation55_spill] sm:$0xff]  ;;  %v10905_v37 = vld [vmem:[#allocation57_spill] sm:$0xff] }
 0x244   :  { %2752 = vmatpush2.bf16.msra.mxu1 %v10886_v61  ;;  %v2480_v63 = vpop.f32.mrf.mxu0  ;;  %2778 = vmatprep.subr.bf16.mxu0 %v10889_v1  ;;  %v10904_v61 = vld [vmem:[#allocation19_spill] sm:$0xff]  ;;  %v5225_v1 = vld [vmem:[%s10385_s0 + $0x94] ss:$0 sps:$4 sm:$0xff]  }
 0x245   :  { %2753 = vmatprep.subr.bf16.mxu1 %v10888_v47  ;;  %v2481_v29 = vadd.f32 %v2480_v63, %v2439_v17  ;;  %v10899_v17 = vld [vmem:[#allocation51_spill] sm:$0xff]  ;;  %v10906_v63 = vld [vmem:[#allocation20_spill] sm:$0xff]  ;;  %v4562_v47 = vcombine.low %v8460_v16, %v8460_v16 }
 0x246   :  { %v2482_v3 = vpop.f32.mrf.mxu0  ;;  %v10910_v16 = vld [vmem:[#allocation63_spill] sm:$0xff] }
 0x247   :  { %2779 = vmatpush1.bf16.msra.mxu0 %v10892_v5  ;;  %v8574_v3 = vld [vmem:[%s10385_s0 + $0x98] sm:$0xff]  ;;  %v10907_v5 = vld [vmem:[#allocation59_spill] sm:$0xff] }
 0x248   :  { %2754 = vmatpush2.bf16.msra.mxu1 %v10891_v57  ;;  %v2483_v49 = vpop.f32.mrf.mxu0  ;;  %2780 = vmatprep.subr.bf16.mxu0 %v10894_v25  ;;  %v8579_v57 = vld [vmem:[%s10385_s0 + $0xa0] sm:$0xff]  ;;  %v4577_v25 = vcombine.high %v8574_v3, %v8574_v3 }
 0x249   :  { %2755 = vmatprep.subr.bf16.mxu1 %v10893_v51  ;;  %v10908_v49 = vld [vmem:[#allocation21_spill] sm:$0xff]  ;;  %v10909_v51 = vld [vmem:[#allocation24_spill] sm:$0xff] }
 0x24b   :  { %2781 = vmatpush1.bf16.msra.mxu0 %v10896_v20 }
 0x24c   :  { %2756 = vmatpush2.bf16.msra.mxu1 %v10895_v39  ;;  %2782 = vmatprep.subr.bf16.mxu0 %v10898_v54  ;;  %v4579_v39 = vcombine.high %v8579_v57, %v8579_v57  ;;  %v10911_v54 = vld [vmem:[#allocation26_spill] sm:$0xff] }
 0x24d   :  { %2757 = vmatprep.subr.bf16.mxu1 %v10897_v53 }
 0x24f   :  { %2783 = vmatpush1.bf16.msra.mxu0 %v10900_v9 }
 0x250   :  { %2758 = vmatpush2.bf16.msra.mxu1 %v10899_v17  ;;  %2784 = vmatprep.subr.bf16.mxu0 %v10902_v26  ;;  %v10912_v17 = vld [vmem:[#allocation65_spill] sm:$0xff]  ;;  %v10914_v26 = vld [vmem:[#allocation67_spill] sm:$0xff] }
 0x251   :  { %2759 = vmatprep.subr.bf16.mxu1 %v10901_v33  ;;  %v10913_v33 = vld [vmem:[#allocation28_spill] sm:$0xff] }
 0x253   :  { %2785 = vmatpush1.bf16.msra.mxu0 %v10904_v61 }
 0x254   :  { %2760 = vmatpush2.bf16.msra.mxu1 %v10903_v35  ;;  %2786 = vmatprep.subr.bf16.mxu0 %v10906_v63  ;;  %v10916_v63 = vld [vmem:[#allocation69_spill] sm:$0xff] }
 0x255   :  { %2761 = vmatprep.subr.bf16.mxu1 %v10905_v37  ;;  %v10915_v37 = vld [vmem:[#allocation30_spill] sm:$0xff] }
 0x257   :  { %2787 = vmatpush1.bf16.msra.mxu0 %v10908_v49  ;;  %v10920_v49 = vld [vmem:[#allocation73_spill] sm:$0xff] }
 0x258   :  { %2762 = vmatpush2.bf16.msra.mxu1 %v10907_v5  ;;  %2895 = vmatprep.subr.bf16.mxu0 %v10909_v51  ;;  %v10919_v5 = vld [vmem:[#allocation34_spill] sm:$0xff]  ;;  %v10921_v51 = vld [vmem:[#allocation36_spill] sm:$0xff] }
 0x259   :  { %2936 = vmatprep.subr.bf16.mxu1 %v10910_v16  ;;  %v10922_v16 = vld [vmem:[#allocation75_spill] sm:$0xff] }
 0x25a   :  { %4565 = vmatmul.mubr.msk.bf16.vlgmr.msra.gmra.mxu0 %vm1909_vm0, %v5225_v1  ;;  %v10917_v1 = vld [vmem:[#allocation32_spill] sm:$0xff] }
 0x25b   :  { %v2519_v20 = vpop.f32.mrf.mxu1  ;;  %2764 = vmatmul.mubr.bf16.vlgmr.msra.gmra.mxu1 %v4562_v47  ;;  %2896 = vmatpush1.bf16.msra.mxu0 %v10911_v54  ;;  %v10927_v54 = vld [vmem:[#allocation42_spill] sm:$0xff] }
 0x25c   :  { %v2520_v53 = vadd.f32 %v2519_v20, %v2479_v59  ;;  %2937 = vmatpush1.bf16.msra.mxu1 %v10912_v17  ;;  %2897 = vmatprep.subr.bf16.mxu0 %v10913_v33  ;;  %v10918_v59 = vld [vmem:[#allocation71_spill] sm:$0xff]  ;;  %v10928_v17 = vld [vmem:[#allocation81_spill] sm:$0xff] }
 0x25d   :  { %v2521_v9 = vpop.f32.mrf.mxu1  ;;  %2938 = vmatprep.subr.bf16.mxu1 %v10914_v26  ;;  %2927 = vmatprep.mubr.bf16.mxu0 %v4577_v25  ;;  %v10924_v25 = vld [vmem:[#allocation77_spill] sm:$0xff]  ;;  %v10926_v20 = vld [vmem:[#allocation79_spill] sm:$0xff]  ;;  %v10931_v26 = vld [vmem:[#allocation46_spill] sm:$0xff] }
 0x25e   :  { %v2522_v35 = vadd.f32 %v2521_v9, %v2481_v29  ;;  %2968 = vmatprep.mubr.bf16.mxu1 %v4579_v39  ;;  %v10923_v29 = vld [vmem:[#allocation38_spill] sm:$0xff]  ;;  %v10925_v39 = vld [vmem:[#allocation40_spill] sm:$0xff]  ;;  %v10930_v33 = vld [vmem:[#allocation83_spill] sm:$0xff] }
 0x25f   :  { %v2523_v61 = vpop.f32.mrf.mxu1  ;;  %2898 = vmatpush1.bf16.msra.mxu0 %v10915_v37  ;;  %v10929_v9 = vld [vmem:[#allocation44_spill] sm:$0xff] }
 0x260   :  { %2939 = vmatpush1.bf16.msra.mxu1 %v10916_v63  ;;  %2899 = vmatprep.subr.bf16.mxu0 %v10917_v1  ;;  %v10932_v61 = vld [vmem:[#allocation85_spill] sm:$0xff]  ;;  %v10933_v37 = vld [vmem:[#allocation48_spill] sm:$0xff]  ;;  %v10934_v63 = vld [vmem:[#allocation86_spill] sm:$0xff] }
 0x261   :  { %v2524_v47 = vpop.f32.mrf.mxu1  ;;  %2940 = vmatprep.subr.bf16.mxu1 %v10918_v59  ;;  %v10936_v1 = vld [vmem:[#allocation88_spill] sm:$0xff] }
 0x262   :  { %v10935_v47 = vld [vmem:[#allocation50_spill] sm:$0xff]  ;;  %v10937_v59 = vld [vmem:[#allocation52_spill] sm:$0xff] }
 0x263   :  { %2900 = vmatpush1.bf16.msra.mxu0 %v10919_v5  ;;  %v10938_v5 = vld [vmem:[#allocation90_spill] sm:$0xff] }
 0x264   :  { %2941 = vmatpush1.bf16.msra.mxu1 %v10920_v49  ;;  %2901 = vmatprep.subr.bf16.mxu0 %v10921_v51  ;;  %v10939_v49 = vld [vmem:[#allocation54_spill] sm:$0xff]  ;;  %v10940_v51 = vld [vmem:[#allocation92_spill] sm:$0xff] }
 0x265   :  { %2942 = vmatprep.subr.bf16.mxu1 %v10922_v16  ;;  %v10941_v16 = vld [vmem:[#allocation56_spill] sm:$0xff] }
 0x267   :  { %2902 = vmatpush1.bf16.msra.mxu0 %v10923_v29  ;;  %v10942_v29 = vld [vmem:[#allocation94_spill] sm:$0xff] }
 0x268   :  { %2943 = vmatpush1.bf16.msra.mxu1 %v10924_v25  ;;  %2903 = vmatprep.subr.bf16.mxu0 %v10925_v39  ;;  %v10943_v25 = vld [vmem:[#allocation58_spill] sm:$0xff]  ;;  %v10944_v39 = vld [vmem:[#allocation96_spill] sm:$0xff] }
 0x269   :  { %2944 = vmatprep.subr.bf16.mxu1 %v10926_v20  ;;  %v10945_v20 = vld [vmem:[#allocation60_spill] sm:$0xff] }
 0x26b   :  { %2904 = vmatpush1.bf16.msra.mxu0 %v10927_v54  ;;  %v10946_v54 = vld [vmem:[#allocation98_spill] sm:$0xff] }
 0x26c   :  { %2945 = vmatpush1.bf16.msra.mxu1 %v10928_v17  ;;  %2905 = vmatprep.subr.bf16.mxu0 %v10929_v9  ;;  %v10947_v17 = vld [vmem:[#allocation61_spill] sm:$0xff]  ;;  %v10948_v9 = vld [vmem:[#allocation100_spill] sm:$0xff] }
 0x26d   :  { %2946 = vmatprep.subr.bf16.mxu1 %v10930_v33  ;;  %v10949_v33 = vld [vmem:[#allocation62_spill] sm:$0xff] }
 0x26f   :  { %2906 = vmatpush1.bf16.msra.mxu0 %v10931_v26  ;;  %v10950_v26 = vld [vmem:[#allocation102_spill] sm:$0xff] }
 0x270   :  { %2947 = vmatpush1.bf16.msra.mxu1 %v10932_v61  ;;  %2907 = vmatprep.subr.bf16.mxu0 %v10933_v37 }
 0x271   :  { %2948 = vmatprep.subr.bf16.mxu1 %v10934_v63  ;;  %v10951_v63 = vld [vmem:[#allocation64_spill] sm:$0xff] }
 0x273   :  { %2908 = vmatpush1.bf16.msra.mxu0 %v10935_v47  ;;  %v10952_v47 = vld [vmem:[#allocation104_spill] sm:$0xff] }
 0x274   :  { %2949 = vmatpush1.bf16.msra.mxu1 %v10936_v1  ;;  %2909 = vmatprep.subr.bf16.mxu0 %v10937_v59  ;;  %v10953_v59 = vld [vmem:[#allocation66_spill] sm:$0xff] }
 0x275   :  { %2950 = vmatprep.subr.bf16.mxu1 %v10938_v5  ;;  %v10954_v5 = vld [vmem:[#allocation106_spill] sm:$0xff] }
 0x277   :  { %2910 = vmatpush1.bf16.msra.mxu0 %v10939_v49 }
 0x278   :  { %2951 = vmatpush1.bf16.msra.mxu1 %v10940_v51  ;;  %2911 = vmatprep.subr.bf16.mxu0 %v10941_v16  ;;  %v10955_v16 = vld [vmem:[#allocation68_spill] sm:$0xff] }
 0x279   :  { %2952 = vmatprep.subr.bf16.mxu1 %v10942_v29  ;;  %v10956_v29 = vld [vmem:[#allocation108_spill] sm:$0xff] }
 0x27b   :  { %2912 = vmatpush2.bf16.msra.mxu0 %v10943_v25 }
 0x27c   :  { %2953 = vmatpush2.bf16.msra.mxu1 %v10944_v39  ;;  %2913 = vmatprep.subr.bf16.mxu0 %v10945_v20  ;;  %v10957_v39 = vld [vmem:[#allocation70_spill] sm:$0xff] }
 0x27d   :  { %2954 = vmatprep.subr.bf16.mxu1 %v10946_v54  ;;  %v10958_v20 = vld [vmem:[#allocation110_spill] sm:$0xff]  ;;  %v10960_v54 = vld [vmem:[#allocation112_spill] sm:$0xff] }
 0x27f   :  { %2914 = vmatpush2.bf16.msra.mxu0 %v10947_v17  ;;  %v10961_v17 = vld [vmem:[#allocation74_spill] sm:$0xff] }
 0x280   :  { %2955 = vmatpush2.bf16.msra.mxu1 %v10948_v9  ;;  %2915 = vmatprep.subr.bf16.mxu0 %v10949_v33  ;;  %v10962_v9 = vld [vmem:[#allocation114_spill] sm:$0xff]  ;;  %v10963_v33 = vld [vmem:[#allocation76_spill] sm:$0xff] }
 0x281   :  { %2956 = vmatprep.subr.bf16.mxu1 %v10950_v26  ;;  %v10965_v26 = vld [vmem:[#allocation78_spill] sm:$0xff] }
 0x282   :  { %v2560_v61 = vpop.f32.mrf.mxu0 }
 0x283   :  { %v2561_v37 = vadd.f32 %v2560_v61, %v2520_v53  ;;  %2916 = vmatpush2.bf16.msra.mxu0 %v10951_v63  ;;  %v10959_v53 = vld [vmem:[#allocation72_spill] sm:$0xff]  ;;  %v10966_v61 = vld [vmem:[#allocation118_spill] sm:$0xff] }
 0x284   :  { %2957 = vmatpush2.bf16.msra.mxu1 %v10952_v47  ;;  %v2562_v1 = vpop.f32.mrf.mxu0  ;;  %2917 = vmatprep.subr.bf16.mxu0 %v10953_v59  ;;  %v10967_v63 = vld [vmem:[#allocation80_spill] sm:$0xff]  ;;  %v10970_v59 = vld [vmem:[#allocation122_spill] sm:$0xff] }
 0x285   :  { %2958 = vmatprep.subr.bf16.mxu1 %v10954_v5  ;;  %v2563_v49 = vadd.f32 %v2562_v1, %v2522_v35  ;;  %v10964_v35 = vld [vmem:[#allocation116_spill] sm:$0xff]  ;;  %v10969_v1 = vld [vmem:[#allocation82_spill] sm:$0xff]  ;;  %v4576_v5 = vcombine.low %v8574_v3, %v8574_v3  ;;  %v10974_v3 = vld [vmem:[#allocation127_spill] sm:$0xff] }
 0x286   :  { %v2564_v51 = vpop.f32.mrf.mxu0  ;;  %v10968_v47 = vld [vmem:[#allocation120_spill] sm:$0xff] }
 0x287   :  { %2918 = vmatpush2.bf16.msra.mxu0 %v10955_v16  ;;  %v4578_v51 = vcombine.low %v8579_v57, %v8579_v57  ;;  %v8657_v16 = vld [vmem:[%s10385_s0 + $0xa8] sm:$0xff] }
 0x288   :  { %2959 = vmatpush2.bf16.msra.mxu1 %v10956_v29  ;;  %v2565_v25 = vpop.f32.mrf.mxu0  ;;  %2919 = vmatprep.subr.bf16.mxu0 %v10957_v39  ;;  %v8662_v29 = vld [vmem:[%s10385_s0 + $0xb0] sm:$0xff]  ;;  %v4581_v57 = vcombine.high %v8657_v16, %v8657_v16 }
 0x289   :  { %2960 = vmatprep.subr.bf16.mxu1 %v10958_v20  ;;  %v10971_v25 = vld [vmem:[#allocation84_spill] sm:$0xff]  ;;  %v10973_v20 = vld [vmem:[#allocation87_spill] sm:$0xff] }
 0x28a   :  { %v10972_v39 = vld [vmem:[#allocation124_spill] sm:$0xff] }
 0x28b   :  { %2920 = vmatpush2.bf16.msra.mxu0 %v10959_v53  ;;  %v4583_v53 = vcombine.high %v8662_v29, %v8662_v29 }
 0x28c   :  { %2961 = vmatpush2.bf16.msra.mxu1 %v10960_v54  ;;  %2921 = vmatprep.subr.bf16.mxu0 %v10961_v17 }
 0x28d   :  { %2962 = vmatprep.subr.bf16.mxu1 %v10962_v9  ;;  %v10975_v9 = vld [vmem:[#allocation89_spill] sm:$0xff] }
 0x28f   :  { %2922 = vmatpush2.bf16.msra.mxu0 %v10963_v33  ;;  %v10976_v33 = vld [vmem:[#allocation129_spill] sm:$0xff] }
 0x290   :  { %2963 = vmatpush2.bf16.msra.mxu1 %v10964_v35  ;;  %2923 = vmatprep.subr.bf16.mxu0 %v10965_v26  ;;  %v10977_v26 = vld [vmem:[#allocation91_spill] sm:$0xff] }
 0x291   :  { %2964 = vmatprep.subr.bf16.mxu1 %v10966_v61  ;;  %v10978_v61 = vld [vmem:[#allocation131_spill] sm:$0xff] }
 0x293   :  { %2924 = vmatpush2.bf16.msra.mxu0 %v10967_v63 }
 0x294   :  { %2965 = vmatpush2.bf16.msra.mxu1 %v10968_v47  ;;  %2925 = vmatprep.subr.bf16.mxu0 %v10969_v1  ;;  %v10979_v1 = vld [vmem:[#allocation93_spill] sm:$0xff] }
 0x295   :  { %2966 = vmatprep.subr.bf16.mxu1 %v10970_v59  ;;  %v10980_v59 = vld [vmem:[#allocation133_spill] sm:$0xff] }
 0x297   :  { %2926 = vmatpush2.bf16.msra.mxu0 %v10971_v25  ;;  %v10983_v25 = vld [vmem:[#allocation97_spill] sm:$0xff] }
 0x298   :  { %2967 = vmatpush2.bf16.msra.mxu1 %v10972_v39  ;;  %2977 = vmatprep.subr.bf16.mxu0 %v10973_v20  ;;  %v10984_v39 = vld [vmem:[#allocation137_spill] sm:$0xff]  ;;  %v10985_v20 = vld [vmem:[#allocation99_spill] sm:$0xff] }
 0x299   :  { %3018 = vmatprep.subr.bf16.mxu1 %v10974_v3  ;;  %v10986_v3 = vld [vmem:[#allocation139_spill] sm:$0xff] }
 0x29a   :  { %2928 = vmatmul.mubr.bf16.vlgmr.msra.gmra.mxu0 %v4576_v5 }
 0x29b   :  { %v2601_v54 = vpop.f32.mrf.mxu1  ;;  %2969 = vmatmul.mubr.bf16.vlgmr.msra.gmra.mxu1 %v4578_v51  ;;  %2978 = vmatpush1.bf16.msra.mxu0 %v10975_v9  ;;  %v10981_v51 = vld [vmem:[#allocation95_spill] sm:$0xff]  ;;  %v10991_v9 = vld [vmem:[#allocation105_spill] sm:$0xff] }
 0x29c   :  { %v2602_v17 = vadd.f32 %v2601_v54, %v2561_v37  ;;  %3019 = vmatpush1.bf16.msra.mxu1 %v10976_v33  ;;  %2979 = vmatprep.subr.bf16.mxu0 %v10977_v26  ;;  %v10982_v37 = vld [vmem:[#allocation135_spill] sm:$0xff]  ;;  %v10992_v33 = vld [vmem:[#allocation145_spill] sm:$0xff] }
 0x29d   :  { %v2603_v35 = vpop.f32.mrf.mxu1  ;;  %3020 = vmatprep.subr.bf16.mxu1 %v10978_v61  ;;  %3009 = vmatprep.mubr.bf16.mxu0 %v4581_v57  ;;  %v10988_v57 = vld [vmem:[#allocation141_spill] sm:$0xff]  ;;  %v10990_v54 = vld [vmem:[#allocation143_spill] sm:$0xff] }
 0x29e   :  { %v2604_v63 = vadd.f32 %v2603_v35, %v2563_v49  ;;  %3050 = vmatprep.mubr.bf16.mxu1 %v4583_v53  ;;  %v10987_v49 = vld [vmem:[#allocation101_spill] sm:$0xff]  ;;  %v10989_v53 = vld [vmem:[#allocation103_spill] sm:$0xff] }
 0x29f   :  { %v2605_v47 = vpop.f32.mrf.mxu1  ;;  %2980 = vmatpush1.bf16.msra.mxu0 %v10979_v1  ;;  %v10993_v35 = vld [vmem:[#allocation107_spill] sm:$0xff]  ;;  %v10995_v61 = vld [vmem:[#allocation109_spill] sm:$0xff] }
 0x2a0   :  { %3021 = vmatpush1.bf16.msra.mxu1 %v10980_v59  ;;  %2981 = vmatprep.subr.bf16.mxu0 %v10981_v51  ;;  %v10994_v26 = vld [vmem:[#allocation147_spill] sm:$0xff]  ;;  %v10996_v47 = vld [vmem:[#allocation149_spill] sm:$0xff]  ;;  %v10998_v59 = vld [vmem:[#allocation150_spill] sm:$0xff] }
 0x2a1   :  { %v2606_v5 = vpop.f32.mrf.mxu1  ;;  %3022 = vmatprep.subr.bf16.mxu1 %v10982_v37  ;;  %v10997_v1 = vld [vmem:[#allocation111_spill] sm:$0xff]  ;;  %v11000_v51 = vld [vmem:[#allocation152_spill] sm:$0xff] }
 0x2a2   :  { %v10999_v5 = vld [vmem:[#allocation113_spill] sm:$0xff]  ;;  %v11001_v37 = vld [vmem:[#allocation115_spill] sm:$0xff] }
 0x2a3   :  { %2982 = vmatpush1.bf16.msra.mxu0 %v10983_v25  ;;  %v11002_v25 = vld [vmem:[#allocation154_spill] sm:$0xff] }
 0x2a4   :  { %3023 = vmatpush1.bf16.msra.mxu1 %v10984_v39  ;;  %2983 = vmatprep.subr.bf16.mxu0 %v10985_v20  ;;  %v11003_v39 = vld [vmem:[#allocation117_spill] sm:$0xff]  ;;  %v11004_v20 = vld [vmem:[#allocation156_spill] sm:$0xff] }
 0x2a5   :  { %3024 = vmatprep.subr.bf16.mxu1 %v10986_v3  ;;  %v11005_v3 = vld [vmem:[#allocation119_spill] sm:$0xff] }
 0x2a7   :  { %2984 = vmatpush1.bf16.msra.mxu0 %v10987_v49  ;;  %v11006_v49 = vld [vmem:[#allocation158_spill] sm:$0xff] }
 0x2a8   :  { %3025 = vmatpush1.bf16.msra.mxu1 %v10988_v57  ;;  %2985 = vmatprep.subr.bf16.mxu0 %v10989_v53  ;;  %v11007_v57 = vld [vmem:[#allocation121_spill] sm:$0xff]  ;;  %v11008_v53 = vld [vmem:[#allocation160_spill] sm:$0xff] }
 0x2a9   :  { %3026 = vmatprep.subr.bf16.mxu1 %v10990_v54  ;;  %v11009_v54 = vld [vmem:[#allocation123_spill] sm:$0xff] }
 0x2ab   :  { %2986 = vmatpush1.bf16.msra.mxu0 %v10991_v9  ;;  %v11010_v9 = vld [vmem:[#allocation162_spill] sm:$0xff] }
 0x2ac   :  { %3027 = vmatpush1.bf16.msra.mxu1 %v10992_v33  ;;  %2987 = vmatprep.subr.bf16.mxu0 %v10993_v35  ;;  %v11011_v33 = vld [vmem:[#allocation125_spill] sm:$0xff]  ;;  %v11012_v35 = vld [vmem:[#allocation164_spill] sm:$0xff] }
 0x2ad   :  { %3028 = vmatprep.subr.bf16.mxu1 %v10994_v26  ;;  %v11013_v26 = vld [vmem:[#allocation126_spill] sm:$0xff] }
 0x2af   :  { %2988 = vmatpush1.bf16.msra.mxu0 %v10995_v61  ;;  %v11014_v61 = vld [vmem:[#allocation166_spill] sm:$0xff] }
 0x2b0   :  { %3029 = vmatpush1.bf16.msra.mxu1 %v10996_v47  ;;  %2989 = vmatprep.subr.bf16.mxu0 %v10997_v1 }
 0x2b1   :  { %3030 = vmatprep.subr.bf16.mxu1 %v10998_v59  ;;  %v11015_v59 = vld [vmem:[#allocation128_spill] sm:$0xff] }
 0x2b3   :  { %2990 = vmatpush1.bf16.msra.mxu0 %v10999_v5  ;;  %v11016_v5 = vld [vmem:[#allocation168_spill] sm:$0xff] }
 0x2b4   :  { %3031 = vmatpush1.bf16.msra.mxu1 %v11000_v51  ;;  %2991 = vmatprep.subr.bf16.mxu0 %v11001_v37  ;;  %v11017_v37 = vld [vmem:[#allocation130_spill] sm:$0xff] }
 0x2b5   :  { %3032 = vmatprep.subr.bf16.mxu1 %v11002_v25  ;;  %v11018_v25 = vld [vmem:[#allocation170_spill] sm:$0xff] }
 0x2b7   :  { %2992 = vmatpush1.bf16.msra.mxu0 %v11003_v39 }
 0x2b8   :  { %3033 = vmatpush1.bf16.msra.mxu1 %v11004_v20  ;;  %2993 = vmatprep.subr.bf16.mxu0 %v11005_v3  ;;  %v11019_v3 = vld [vmem:[#allocation132_spill] sm:$0xff] }
 0x2b9   :  { %3034 = vmatprep.subr.bf16.mxu1 %v11006_v49  ;;  %v11020_v49 = vld [vmem:[#allocation172_spill] sm:$0xff] }
 0x2bb   :  { %2994 = vmatpush2.bf16.msra.mxu0 %v11007_v57 }
 0x2bc   :  { %3035 = vmatpush2.bf16.msra.mxu1 %v11008_v53  ;;  %2995 = vmatprep.subr.bf16.mxu0 %v11009_v54  ;;  %v11021_v53 = vld [vmem:[#allocation134_spill] sm:$0xff] }
 0x2bd   :  { %3036 = vmatprep.subr.bf16.mxu1 %v11010_v9  ;;  %v11022_v54 = vld [vmem:[#allocation174_spill] sm:$0xff]  ;;  %v11024_v9 = vld [vmem:[#allocation176_spill] sm:$0xff] }
 0x2bf   :  { %2996 = vmatpush2.bf16.msra.mxu0 %v11011_v33  ;;  %v11025_v33 = vld [vmem:[#allocation138_spill] sm:$0xff] }
 0x2c0   :  { %3037 = vmatpush2.bf16.msra.mxu1 %v11012_v35  ;;  %2997 = vmatprep.subr.bf16.mxu0 %v11013_v26  ;;  %v11026_v35 = vld [vmem:[#allocation178_spill] sm:$0xff]  ;;  %v11027_v26 = vld [vmem:[#allocation140_spill] sm:$0xff] }
 0x2c1   :  { %3038 = vmatprep.subr.bf16.mxu1 %v11014_v61  ;;  %v11029_v61 = vld [vmem:[#allocation142_spill] sm:$0xff] }
 0x2c2   :  { %v2642_v47 = vpop.f32.mrf.mxu0 }
 0x2c3   :  { %v2643_v1 = vadd.f32 %v2642_v47, %v2602_v17  ;;  %2998 = vmatpush2.bf16.msra.mxu0 %v11015_v59  ;;  %v11023_v17 = vld [vmem:[#allocation136_spill] sm:$0xff]  ;;  %v11030_v47 = vld [vmem:[#allocation182_spill] sm:$0xff] }
 0x2c4   :  { %3039 = vmatpush2.bf16.msra.mxu1 %v11016_v5  ;;  %v2644_v51 = vpop.f32.mrf.mxu0  ;;  %2999 = vmatprep.subr.bf16.mxu0 %v11017_v37  ;;  %v11031_v59 = vld [vmem:[#allocation144_spill] sm:$0xff]  ;;  %v11034_v37 = vld [vmem:[#allocation186_spill] sm:$0xff] }
 0x2c5   :  { %3040 = vmatprep.subr.bf16.mxu1 %v11018_v25  ;;  %v2645_v39 = vadd.f32 %v2644_v51, %v2604_v63  ;;  %v11028_v63 = vld [vmem:[#allocation180_spill] sm:$0xff]  ;;  %v11033_v51 = vld [vmem:[#allocation146_spill] sm:$0xff]  ;;  %v4580_v25 = vcombine.low %v8657_v16, %v8657_v16  ;;  %v11038_v16 = vld [vmem:[#allocation191_spill] sm:$0xff] }
 0x2c6   :  { %v2646_v20 = vpop.f32.mrf.mxu0  ;;  %v11032_v5 = vld [vmem:[#allocation184_spill] sm:$0xff] }
 0x2c7   :  { %3000 = vmatpush2.bf16.msra.mxu0 %v11019_v3  ;;  %v4582_v20 = vcombine.low %v8662_v29, %v8662_v29  ;;  %v8739_v3 = vld [vmem:[%s10385_s0 + $0xb8] sm:$0xff] }
 0x2c8   :  { %3041 = vmatpush2.bf16.msra.mxu1 %v11020_v49  ;;  %v2647_v57 = vpop.f32.mrf.mxu0  ;;  %3001 = vmatprep.subr.bf16.mxu0 %v11021_v53  ;;  %v8744_v49 = vld [vmem:[%s10385_s0 + $0xc0] sm:$0xff]  ;;  %v11036_v53 = vld [vmem:[#allocation188_spill] sm:$0xff]  ;;  %v4585_v29 = vcombine.high %v8739_v3, %v8739_v3 }
 0x2c9   :  { %3042 = vmatprep.subr.bf16.mxu1 %v11022_v54  ;;  %v11035_v57 = vld [vmem:[#allocation148_spill] sm:$0xff]  ;;  %v11037_v54 = vld [vmem:[#allocation151_spill] sm:$0xff] }
 0x2cb   :  { %3002 = vmatpush2.bf16.msra.mxu0 %v11023_v17  ;;  %v4587_v17 = vcombine.high %v8744_v49, %v8744_v49 }
 0x2cc   :  { %3043 = vmatpush2.bf16.msra.mxu1 %v11024_v9  ;;  %3003 = vmatprep.subr.bf16.mxu0 %v11025_v33 }
 0x2cd   :  { %3044 = vmatprep.subr.bf16.mxu1 %v11026_v35  ;;  %v11039_v35 = vld [vmem:[#allocation153_spill] sm:$0xff] }
 0x2cf   :  { %3004 = vmatpush2.bf16.msra.mxu0 %v11027_v26  ;;  %v11040_v26 = vld [vmem:[#allocation193_spill] sm:$0xff] }
 0x2d0   :  { %3045 = vmatpush2.bf16.msra.mxu1 %v11028_v63  ;;  %3005 = vmatprep.subr.bf16.mxu0 %v11029_v61  ;;  %v11041_v61 = vld [vmem:[#allocation155_spill] sm:$0xff] }
 0x2d1   :  { %3046 = vmatprep.subr.bf16.mxu1 %v11030_v47  ;;  %v11042_v47 = vld [vmem:[#allocation195_spill] sm:$0xff] }
 0x2d3   :  { %3006 = vmatpush2.bf16.msra.mxu0 %v11031_v59 }
 0x2d4   :  { %3047 = vmatpush2.bf16.msra.mxu1 %v11032_v5  ;;  %3007 = vmatprep.subr.bf16.mxu0 %v11033_v51  ;;  %v11043_v51 = vld [vmem:[#allocation157_spill] sm:$0xff] }
 0x2d5   :  { %3048 = vmatprep.subr.bf16.mxu1 %v11034_v37 }
 0x2d7   :  { %3008 = vmatpush2.bf16.msra.mxu0 %v11035_v57  ;;  %v11048_v57 = vld [vmem:[#allocation201_spill] sm:$0xff] }
 0x2d8   :  { %3049 = vmatpush2.bf16.msra.mxu1 %v11036_v53  ;;  %3059 = vmatprep.subr.bf16.mxu0 %v11037_v54  ;;  %v11049_v53 = vld [vmem:[#allocation167_spill] sm:$0xff]  ;;  %v11051_v54 = vld [vmem:[#allocation169_spill] sm:$0xff] }
 0x2d9   :  { %3100 = vmatprep.subr.bf16.mxu1 %v11038_v16  ;;  %v11052_v16 = vld [vmem:[#allocation205_spill] sm:$0xff] }
 0x2da   :  { %3010 = vmatmul.mubr.bf16.vlgmr.msra.gmra.mxu0 %v4580_v25  ;;  %v11044_v25 = vld [vmem:[#allocation159_spill] sm:$0xff] }
 0x2db   :  { %v2683_v9 = vpop.f32.mrf.mxu1  ;;  %3051 = vmatmul.mubr.bf16.vlgmr.msra.gmra.mxu1 %v4582_v20  ;;  %3060 = vmatpush1.bf16.msra.mxu0 %v11039_v35  ;;  %v11046_v20 = vld [vmem:[#allocation163_spill] sm:$0xff]  ;;  %v11059_v35 = vld [vmem:[#allocation177_spill] sm:$0xff] }
 0x2dc   :  { %v2684_v33 = vadd.f32 %v2683_v9, %v2643_v1  ;;  %3101 = vmatpush1.bf16.msra.mxu1 %v11040_v26  ;;  %3061 = vmatprep.subr.bf16.mxu0 %v11041_v61  ;;  %v11045_v1 = vld [vmem:[#allocation161_spill] sm:$0xff]  ;;  %v11058_v9 = vld [vmem:[#allocation210_spill] sm:$0xff]  ;;  %v11060_v26 = vld [vmem:[#allocation212_spill] sm:$0xff] }
 0x2dd   :  { %v2685_v63 = vpop.f32.mrf.mxu1  ;;  %3102 = vmatprep.subr.bf16.mxu1 %v11042_v47  ;;  %3091 = vmatprep.mubr.bf16.mxu0 %v4585_v29  ;;  %v11054_v29 = vld [vmem:[#allocation207_spill] sm:$0xff]  ;;  %v11062_v61 = vld [vmem:[#allocation181_spill] sm:$0xff] }
 0x2de   :  { %v2686_v59 = vadd.f32 %v2685_v63, %v2645_v39  ;;  %3132 = vmatprep.mubr.bf16.mxu1 %v4587_v17  ;;  %v11047_v39 = vld [vmem:[#allocation165_spill] sm:$0xff]  ;;  %v11061_v63 = vld [vmem:[#allocation179_spill] sm:$0xff] }
 0x2df   :  { %v2687_v5 = vpop.f32.mrf.mxu1  ;;  %3062 = vmatpush1.bf16.msra.mxu0 %v11043_v51  ;;  %v11056_v17 = vld [vmem:[#allocation209_spill] sm:$0xff]  ;;  %v11063_v47 = vld [vmem:[#allocation183_spill] sm:$0xff] }
 0x2e0   :  { %3103 = vmatpush1.bf16.msra.mxu1 %v8104_v13  ;;  %3063 = vmatprep.subr.bf16.mxu0 %v11044_v25  ;;  %v11050_v13 = vld [vmem:[#allocation203_spill] sm:$0xff]  ;;  %v11064_v5 = vld [vmem:[#allocation185_spill] sm:$0xff] }
 0x2e1   :  { %v2688_v37 = vpop.f32.mrf.mxu1  ;;  %3104 = vmatprep.subr.bf16.mxu1 %v8116_v11  ;;  %v11053_v11 = vld [vmem:[#allocation171_spill] sm:$0xff] }
 0x2e2   :  { %v11065_v51 = vld [vmem:[#allocation187_spill] sm:$0xff]  ;;  %v11066_v37 = vld [vmem:[#allocation189_spill] sm:$0xff] }
 0x2e3   :  { %3064 = vmatpush1.bf16.msra.mxu0 %v11045_v1  ;;  %v11068_v1 = vld [vmem:[#allocation192_spill] sm:$0xff] }
 0x2e4   :  { %3105 = vmatpush1.bf16.msra.mxu1 %v8128_v7  ;;  %3065 = vmatprep.subr.bf16.mxu0 %v11046_v20  ;;  %v11055_v7 = vld [vmem:[#allocation173_spill] sm:$0xff] }
 0x2e5   :  { %3106 = vmatprep.subr.bf16.mxu1 %v8140_v31  ;;  %v11057_v31 = vld [vmem:[#allocation175_spill] sm:$0xff] }
 0x2e7   :  { %3066 = vmatpush1.bf16.msra.mxu0 %v11047_v39  ;;  %v11070_v39 = vld [vmem:[#allocation196_spill] sm:$0xff] }
 0x2e8   :  { %3107 = vmatpush1.bf16.msra.mxu1 %v11048_v57  ;;  %3067 = vmatprep.subr.bf16.mxu0 %v11049_v53  ;;  %v11071_v57 = vld [vmem:[#allocation197_spill] sm:$0xff] }
 0x2e9   :  { %3108 = vmatprep.subr.bf16.mxu1 %v11050_v13 }
 0x2eb   :  { %3068 = vmatpush1.bf16.msra.mxu0 %v11051_v54 }
 0x2ec   :  { %3109 = vmatpush1.bf16.msra.mxu1 %v11052_v16  ;;  %3069 = vmatprep.subr.bf16.mxu0 %v11053_v11  ;;  %v8839_v16 = vld [vmem:[%s10384_s1 + $0x670] ss:$8 sps:$4 sm:$0xff]  }
 0x2ed   :  { %3110 = vmatprep.subr.bf16.mxu1 %v11054_v29  ;;  %v8846_v29 = vld [vmem:[%s10384_s1 + $0x664] ss:$8 sps:$4 sm:$0xff]  }
 0x2ef   :  { %3070 = vmatpush1.bf16.msra.mxu0 %v11055_v7  ;;  %v11081_v7 = vld [vmem:[#allocation214_spill] sm:$0xff] }
 0x2f0   :  { %3111 = vmatpush1.bf16.msra.mxu1 %v11056_v17  ;;  %3071 = vmatprep.subr.bf16.mxu0 %v11057_v31 }
 0x2f1   :  { %3112 = vmatprep.subr.bf16.mxu1 %v11058_v9 }
 0x2f3   :  { %3072 = vmatpush1.bf16.msra.mxu0 %v11059_v35 }
 0x2f4   :  { %3113 = vmatpush1.bf16.msra.mxu1 %v11060_v26  ;;  %3073 = vmatprep.subr.bf16.mxu0 %v11061_v63  ;;  %v8859_v63 = vld [vmem:[%s10384_s1 + $0x660] ss:$8 sps:$4 sm:$0xff]  }
 0x2f5   :  { %3114 = vmatprep.subr.bf16.mxu1 %v8238_v43  ;;  %v11067_v43 = vld [vmem:[#allocation190_spill] sm:$0xff] }
 0x2f7   :  { %3074 = vmatpush1.bf16.msra.mxu0 %v11062_v61 }
 0x2f8   :  { %3115 = vmatpush1.bf16.msra.mxu1 %v8245_v22  ;;  %3075 = vmatprep.subr.bf16.mxu0 %v11063_v47 }
 0x2f9   :  { %3116 = vmatprep.subr.bf16.mxu1 %v8252_v27 }
 0x2fb   :  { %3076 = vmatpush2.bf16.msra.mxu0 %v11064_v5  ;;  %v8866_v5 = vld [vmem:[%s10384_s1 + $0x654] ss:$8 sps:$4 sm:$0xff]  }
 0x2fc   :  { %3117 = vmatpush2.bf16.msra.mxu1 %v8259_v18  ;;  %3077 = vmatprep.subr.bf16.mxu0 %v11065_v51  ;;  %v11069_v18 = vld [vmem:[#allocation194_spill] sm:$0xff] }
 0x2fd   :  { %3118 = vmatprep.subr.bf16.mxu1 %v8266_v28 }
 0x2ff   :  { %3078 = vmatpush2.bf16.msra.mxu0 %v11066_v37  ;;  %v8875_v37 = vld [vmem:[%s10384_s1 + $0x650] ss:$8 sps:$4 sm:$0xff]  }
 0x300   :  { %3119 = vmatpush2.bf16.msra.mxu1 %v8273_v30  ;;  %3079 = vmatprep.subr.bf16.mxu0 %v11067_v43  ;;  %v8978_v43 = vld [vmem:[%s10384_s1 + $0x6e0] ss:$8 sps:$4 sm:$0xff]  }
 0x301   :  { %3120 = vmatprep.subr.bf16.mxu1 %v8280_v32  ;;  %v11072_v32 = vld [vmem:[#allocation198_spill] sm:$0xff] }
 0x302   :  { %v2724_v22 = vpop.f32.mrf.mxu0 }
 0x303   :  { %v2725_v25 = vadd.f32 %v2724_v22, %v2684_v33  ;;  %3080 = vmatpush2.bf16.msra.mxu0 %v11068_v1  ;;  %v11075_v33 = vld [vmem:[#allocation202_spill] sm:$0xff]  ;;  %v8990_v22 = vld [vmem:[%s10384_s1 + $0x6d4] ss:$8 sps:$4 sm:$0xff]   ;;  %v9002_v1 = vld [vmem:[%s10384_s1 + $0x6d0] ss:$8 sps:$4 sm:$0xff]  }
 0x304   :  { %3121 = vmatpush2.bf16.msra.mxu1 %v8287_v34  ;;  %v2726_v27 = vpop.f32.mrf.mxu0  ;;  %3081 = vmatprep.subr.bf16.mxu0 %v11069_v18  ;;  %v11073_v34 = vld [vmem:[#allocation199_spill] sm:$0xff] }
 0x305   :  { %3122 = vmatprep.subr.bf16.mxu1 %v8294_v36  ;;  %v2727_v28 = vadd.f32 %v2726_v27, %v2686_v59  ;;  %v11074_v36 = vld [vmem:[#allocation200_spill] sm:$0xff]  ;;  %v9014_v18 = vld [vmem:[%s10384_s1 + $0x6c4] ss:$8 sps:$4 sm:$0xff]  }
 0x306   :  { %v2728_v20 = vpop.f32.mrf.mxu0  ;;  %v9008_v27 = vld [vmem:[%s10384_s1 + $0x7d0] ss:$8 sps:$4 sm:$0xff]  }
 0x307   :  { %3082 = vmatpush2.bf16.msra.mxu0 %v11070_v39  ;;  %v9026_v20 = vld [vmem:[%s10384_s1 + $0x6c0] ss:$8 sps:$4 sm:$0xff]  }
 0x308   :  { %3123 = vmatpush2.bf16.msra.mxu1 %v8301_v38  ;;  %v2729_v30 = vpop.f32.mrf.mxu0  ;;  %3083 = vmatprep.subr.bf16.mxu0 %v11071_v57  ;;  %v11076_v38 = vld [vmem:[#allocation204_spill] sm:$0xff]  ;;  %v9032_v39 = vld [vmem:[%s10384_s1 + $0x7c0] ss:$8 sps:$4 sm:$0xff]  }
 0x309   :  { %3124 = vmatprep.subr.bf16.mxu1 %v8308_v40  ;;  %v11077_v40 = vld [vmem:[#allocation206_spill] sm:$0xff]  ;;  %11083 = vst [vmem:[#allocation22_spill] sm:$0xff] %v9032_v39  ;;  %v9038_v30 = vld [vmem:[%s10384_s1 + $0x6b4] ss:$8 sps:$4 sm:$0xff]  }
 0x30a   :  { %v9044_v57 = vld [vmem:[%s10384_s1 + $0x7b4] ss:$8 sps:$4 sm:$0xff]  }
 0x30b   :  { %3084 = vmatpush2.bf16.msra.mxu0 %v11072_v32  ;;  %11084 = vst [vmem:[#allocation3_spill] sm:$0xff] %v9044_v57  ;;  %v9050_v32 = vld [vmem:[%s10384_s1 + $0x6b0] ss:$8 sps:$4 sm:$0xff]  }
 0x30c   :  { %3125 = vmatpush2.bf16.msra.mxu1 %v8315_v42  ;;  %3085 = vmatprep.subr.bf16.mxu0 %v11073_v34  ;;  %v4584_v42 = vcombine.low %v8739_v3, %v8739_v3  ;;  %v11080_v3 = vld [vmem:[#allocation213_spill] sm:$0xff] }
 0x30d   :  { %3126 = vmatprep.subr.bf16.mxu1 %v8322_v44  ;;  %v4586_v44 = vcombine.low %v8744_v49, %v8744_v49  ;;  %v9056_v34 = vld [vmem:[%s10384_s1 + $0x7b0] ss:$8 sps:$4 sm:$0xff]  }
 0x30e   :  { %11085 = vst [vmem:[#allocation23_spill] sm:$0xff] %v9056_v34 }
 0x30f   :  { %3086 = vmatpush2.bf16.msra.mxu0 %v11074_v36  ;;  %v9062_v36 = vld [vmem:[%s10384_s1 + $0x6a4] ss:$8 sps:$4 sm:$0xff]  }
 0x310   :  { %3127 = vmatpush2.bf16.msra.mxu1 %v8329_v46  ;;  %3087 = vmatprep.subr.bf16.mxu0 %v11075_v33  ;;  %v8821_v46 = vld [vmem:[%s10385_s0 + $0xc8] sm:$0xff] }
 0x311   :  { %3128 = vmatprep.subr.bf16.mxu1 %v8336_v48  ;;  %v8826_v48 = vld [vmem:[%s10385_s0 + $0xd0] sm:$0xff]  ;;  %v4589_v49 = vcombine.high %v8821_v46, %v8821_v46  ;;  %v9068_v33 = vld [vmem:[%s10384_s1 + $0x7a4] ss:$8 sps:$4 sm:$0xff]  }
 0x312   :  { %v4591_v59 = vcombine.high %v8826_v48, %v8826_v48  ;;  %11086 = vst [vmem:[#allocation4_spill] sm:$0xff] %v9068_v33 }
 0x313   :  { %3088 = vmatpush2.bf16.msra.mxu0 %v11076_v38  ;;  %v9074_v38 = vld [vmem:[%s10384_s1 + $0x6a0] ss:$8 sps:$4 sm:$0xff]  }
 0x314   :  { %3129 = vmatpush2.bf16.msra.mxu1 %v8343_v50  ;;  %3089 = vmatprep.subr.bf16.mxu0 %v11077_v40  ;;  %v11078_v50 = vld [vmem:[#allocation208_spill] sm:$0xff]  ;;  %v9080_v40 = vld [vmem:[%s10384_s1 + $0x7a0] ss:$8 sps:$4 sm:$0xff]  }
 0x315   :  { %3130 = vmatprep.subr.bf16.mxu1 %v8350_v52  ;;  %v11079_v52 = vld [vmem:[#allocation211_spill] sm:$0xff]  ;;  %11087 = vst [vmem:[#allocation25_spill] sm:$0xff] %v9080_v40 }
 0x317   :  { %3090 = vmatpush2.bf16.msra.mxu0 %v11078_v50  ;;  %v9098_v50 = vld [vmem:[%s10384_s1 + $0x690] ss:$8 sps:$4 sm:$0xff]  }
 0x318   :  { %3131 = vmatpush2.bf16.msra.mxu1 %v8364_v56  ;;  %3141 = vmatprep.subr.bf16.mxu0 %v11079_v52  ;;  %v9104_v52 = vld [vmem:[%s10384_s1 + $0x790] ss:$8 sps:$4 sm:$0xff]  }
 0x319   :  { %3182 = vmatprep.subr.bf16.mxu1 %v11080_v3  ;;  %11089 = vst [vmem:[#allocation27_spill] sm:$0xff] %v9104_v52  ;;  %v9110_v3 = vld [vmem:[%s10384_s1 + $0x684] ss:$8 sps:$4 sm:$0xff]  }
 0x31a   :  { %v2806_v13 = vpop.f32.mrf.mxu0  ;;  %3092 = vmatmul.mubr.bf16.vlgmr.msra.gmra.mxu0 %v4584_v42  ;;  %v9086_v42 = vld [vmem:[%s10384_s1 + $0x694] ss:$8 sps:$4 sm:$0xff]  }
 0x31b   :  { %v2765_v53 = vpop.f32.mrf.mxu1  ;;  %3133 = vmatmul.mubr.bf16.vlgmr.msra.gmra.mxu1 %v4586_v44  ;;  %3142 = vmatpush1.bf16.msra.mxu0 %v8839_v16  ;;  %v9092_v44 = vld [vmem:[%s10384_s1 + $0x794] ss:$8 sps:$4 sm:$0xff]  }
 0x31c   :  { %v2766_v54 = vadd.f32 %v2765_v53, %v2725_v25  ;;  %3183 = vmatpush1.bf16.msra.mxu1 %v8382_v60  ;;  %v2808_v11 = vpop.f32.mrf.mxu0  ;;  %3143 = vmatprep.subr.bf16.mxu0 %v8846_v29  ;;  %v8996_v25 = vld [vmem:[%s10384_s1 + $0x7d4] ss:$8 sps:$4 sm:$0xff]   ;;  %11088 = vst [vmem:[#allocation5_spill] sm:$0xff] %v9092_v44  ;;  %v4590_v53 = vcombine.low %v8826_v48, %v8826_v48 }
 0x31d   :  { %v2767_v56 = vpop.f32.mrf.mxu1  ;;  %3184 = vmatprep.subr.bf16.mxu1 %v11081_v7  ;;  %3173 = vmatprep.mubr.bf16.mxu0 %v4589_v49  ;;  %v9116_v49 = vld [vmem:[%s10384_s1 + $0x784] ss:$8 sps:$4 sm:$0xff]   ;;  %v9149_v48 = vld [vmem:[%s10384_s1 + $0x954] ss:$8 sps:$4 sm:$0xff]  }
 0x31e   :  { %v8850_v17 = vadd.f32 %v2806_v13, %v2766_v54  ;;  %v2768_v31 = vadd.f32 %v2767_v56, %v2727_v28  ;;  %3214 = vmatprep.mubr.bf16.mxu1 %v4591_v59  ;;  %v2810_v35 = vpop.f32.mrf.mxu0  ;;  %v9020_v28 = vld [vmem:[%s10384_s1 + $0x7c4] ss:$8 sps:$4 sm:$0xff]   ;;  %11090 = vst [vmem:[#allocation6_spill] sm:$0xff] %v9116_v49  ;;  %v4588_v59 = vcombine.low %v8821_v46, %v8821_v46  ;;  %v9126_v13 = vld [vmem:[%s10385_s0 + $0xd8] sm:$0xff]  ;;  %v9131_v54 = vld [vmem:[%s10384_s1 + $0x680] ss:$8 sps:$4 sm:$0xff]  }
 0x31f   :  { %v2769_v9 = vpop.f32.mrf.mxu1  ;;  %3144 = vmatpush1.bf16.msra.mxu0 %v8859_v63  ;;  %11082 = vst [vmem:[#allocation2_spill] sm:$0xff] %v9020_v28  ;;  %v9137_v56 = vld [vmem:[%s10384_s1 + $0x780] ss:$8 sps:$4 sm:$0xff]   ;;  %v9143_v46 = vld [vmem:[%s10384_s1 + $0x874] ss:$8 sps:$4 sm:$0xff]   ;;  %11092 = vst [vmem:[#allocation7_spill] sm:$0xff] %v9149_v48 }
 0x320   :  { %v8854_v26 = vadd.f32 %v2808_v11, %v2768_v31  ;;  %3185 = vmatpush1.bf16.msra.mxu1 %v8403_v2  ;;  %v2811_v47 = vpop.f32.mrf.mxu0  ;;  %3145 = vmatprep.subr.bf16.mxu0 %v8866_v5  ;;  %v8882_v2 = vld [vmem:[%s10384_s1 + $0x644] ss:$8 sps:$4 sm:$0xff]   ;;  %11091 = vst [vmem:[#allocation29_spill] sm:$0xff] %v9137_v56  ;;  %v4593_v11 = vcombine.high %v9126_v13, %v9126_v13  ;;  %v9159_v35 = vld [vmem:[%s10384_s1 + $0x870] ss:$8 sps:$4 sm:$0xff]  }
 0x321   :  { %v2770_v61 = vpop.f32.mrf.mxu1  ;;  %3186 = vmatprep.subr.bf16.mxu1 %v8410_v41  ;;  %v8889_v41 = vld [vmem:[%s10384_s1 + $0x640] ss:$8 sps:$4 sm:$0xff]  }
 0x322   :  { %v9165_v61 = vld [vmem:[%s10384_s1 + $0x950] ss:$8 sps:$4 sm:$0xff]  }
 0x323   :  { %3146 = vmatpush1.bf16.msra.mxu0 %v8875_v37  ;;  %11093 = vst [vmem:[#allocation31_spill] sm:$0xff] %v9165_v61 }
 0x324   :  { %3187 = vmatpush1.bf16.msra.mxu1 %v8417_v4  ;;  %3147 = vmatprep.subr.bf16.mxu0 %v8882_v2  ;;  %v8896_v4 = vld [vmem:[%s10384_s1 + $0x634] ss:$8 sps:$4 sm:$0xff]  }
 0x325   :  { %3188 = vmatprep.subr.bf16.mxu1 %v8424_v6  ;;  %v8903_v6 = vld [vmem:[%s10384_s1 + $0x630] ss:$8 sps:$4 sm:$0xff]  }
 0x327   :  { %3148 = vmatpush1.bf16.msra.mxu0 %v8889_v41 }
 0x328   :  { %3189 = vmatpush1.bf16.msra.mxu1 %v8431_v8  ;;  %3149 = vmatprep.subr.bf16.mxu0 %v8896_v4  ;;  %v8910_v8 = vld [vmem:[%s10384_s1 + $0x624] ss:$8 sps:$4 sm:$0xff]  }
 0x329   :  { %3190 = vmatprep.subr.bf16.mxu1 %v8438_v10  ;;  %v8917_v10 = vld [vmem:[%s10384_s1 + $0x620] ss:$8 sps:$4 sm:$0xff]  }
 0x32b   :  { %3150 = vmatpush1.bf16.msra.mxu0 %v8903_v6 }
 0x32c   :  { %3191 = vmatpush1.bf16.msra.mxu1 %v8445_v12  ;;  %3151 = vmatprep.subr.bf16.mxu0 %v8910_v8  ;;  %v8924_v12 = vld [vmem:[%s10384_s1 + $0x614] ss:$8 sps:$4 sm:$0xff]  }
 0x32d   :  { %3192 = vmatprep.subr.bf16.mxu1 %v8452_v14  ;;  %v8931_v14 = vld [vmem:[%s10384_s1 + $0x610] ss:$8 sps:$4 sm:$0xff]  }
 0x32f   :  { %3152 = vmatpush1.bf16.msra.mxu0 %v8917_v10 }
 0x330   :  { %3193 = vmatpush1.bf16.msra.mxu1 %v8466_v21  ;;  %3153 = vmatprep.subr.bf16.mxu0 %v8924_v12  ;;  %v8938_v21 = vld [vmem:[%s10384_s1 + $0x604] ss:$8 sps:$4 sm:$0xff]  }
 0x331   :  { %3194 = vmatprep.subr.bf16.mxu1 %v8472_v45  ;;  %v8945_v45 = vld [vmem:[%s10384_s1 + $0x600] ss:$8 sps:$4 sm:$0xff]  }
 0x333   :  { %3154 = vmatpush1.bf16.msra.mxu0 %v8931_v14 }
 0x334   :  { %3195 = vmatpush1.bf16.msra.mxu1 %v8481_v58  ;;  %3155 = vmatprep.subr.bf16.mxu0 %v8938_v21  ;;  %v8952_v58 = vld [vmem:[%s10384_s1 + $0x6f4] ss:$8 sps:$4 sm:$0xff]  }
 0x335   :  { %3196 = vmatprep.subr.bf16.mxu1 %v8488_v24  ;;  %v8959_v24 = vld [vmem:[%s10384_s1 + $0x6f0] ss:$8 sps:$4 sm:$0xff]  }
 0x337   :  { %3156 = vmatpush1.bf16.msra.mxu0 %v8945_v45 }
 0x338   :  { %3197 = vmatpush1.bf16.msra.mxu1 %v8495_v62  ;;  %3157 = vmatprep.subr.bf16.mxu0 %v8952_v58  ;;  %v8966_v62 = vld [vmem:[%s10384_s1 + $0x6e4] ss:$8 sps:$4 sm:$0xff]  }
 0x339   :  { %3198 = vmatprep.subr.bf16.mxu1 %v8502_v0  ;;  %v8972_v0 = vld [vmem:[%s10384_s1 + $0x7e4] ss:$8 sps:$4 sm:$0xff]  }
 0x33b   :  { %3158 = vmatpush2.bf16.msra.mxu0 %v8959_v24 }
 0x33c   :  { %3199 = vmatpush2.bf16.msra.mxu1 %v8509_v23  ;;  %3159 = vmatprep.subr.bf16.mxu0 %v8966_v62  ;;  %v8984_v23 = vld [vmem:[%s10384_s1 + $0x7e0] ss:$8 sps:$4 sm:$0xff]  }
 0x33d   :  { %3200 = vmatprep.subr.bf16.mxu1 %v8972_v0 }
 0x33f   :  { %3160 = vmatpush2.bf16.msra.mxu0 %v8978_v43 }
 0x340   :  { %3201 = vmatpush2.bf16.msra.mxu1 %v8984_v23  ;;  %3161 = vmatprep.subr.bf16.mxu0 %v8990_v22 }
 0x341   :  { %3202 = vmatprep.subr.bf16.mxu1 %v8996_v25 }
 0x343   :  { %3162 = vmatpush2.bf16.msra.mxu0 %v9002_v1 }
 0x344   :  { %3203 = vmatpush2.bf16.msra.mxu1 %v9008_v27  ;;  %3163 = vmatprep.subr.bf16.mxu0 %v9014_v18 }
 0x345   :  { %3204 = vmatprep.subr.bf16.mxu1 %v9020_v28 }
 0x347   :  { %3164 = vmatpush2.bf16.msra.mxu0 %v9026_v20 }
 0x348   :  { %3205 = vmatpush2.bf16.msra.mxu1 %v9032_v39  ;;  %3165 = vmatprep.subr.bf16.mxu0 %v9038_v30 }
 0x349   :  { %3206 = vmatprep.subr.bf16.mxu1 %v9044_v57 }
 0x34b   :  { %3166 = vmatpush2.bf16.msra.mxu0 %v9050_v32 }
 0x34c   :  { %3207 = vmatpush2.bf16.msra.mxu1 %v9056_v34  ;;  %3167 = vmatprep.subr.bf16.mxu0 %v9062_v36  ;;  %v5577_v34 = vld [vmem:[%s10384_s1 + $0x70] ss:$8 sps:$4 sm:$0xff]  }
 0x34d   :  { %3208 = vmatprep.subr.bf16.mxu1 %v9068_v33 }
 0x34f   :  { %3168 = vmatpush2.bf16.msra.mxu0 %v9074_v38 }
 0x350   :  { %3209 = vmatpush2.bf16.msra.mxu1 %v9080_v40  ;;  %3169 = vmatprep.subr.bf16.mxu0 %v9086_v42  ;;  %v5575_v40 = vld [vmem:[%s10384_s1 + $0x74] ss:$8 sps:$4 sm:$0xff]  }
 0x351   :  { %3210 = vmatprep.subr.bf16.mxu1 %v9092_v44  ;;  %v9302_v44 = vld [vmem:[%s10384_s1 + $0x814] ss:$8 sps:$4 sm:$0xff]  }
 0x352   :  { %11107 = vst [vmem:[#allocation14_spill] sm:$0xff] %v9302_v44 }
 0x353   :  { %3170 = vmatpush2.bf16.msra.mxu0 %v9098_v50 }
 0x354   :  { %3211 = vmatpush2.bf16.msra.mxu1 %v9104_v52  ;;  %3171 = vmatprep.subr.bf16.mxu0 %v9110_v3  ;;  %v9290_v52 = vld [vmem:[%s10384_s1 + $0x820] ss:$8 sps:$4 sm:$0xff]  }
 0x355   :  { %3212 = vmatprep.subr.bf16.mxu1 %v9116_v49  ;;  %v5242_v49 = vld [vmem:[%s10385_s0 + $0xe0] ss:$0 sps:$4 sm:$0xff]   ;;  %11105 = vst [vmem:[#allocation13_spill] sm:$0xff] %v9290_v52 }
 0x357   :  { %3172 = vmatpush2.bf16.msra.mxu0 %v9131_v54 }
 0x358   :  { %3213 = vmatpush2.bf16.msra.mxu1 %v9137_v56  ;;  %3223 = vmatprep.subr.bf16.mxu0 %v9143_v46  ;;  %v9270_v56 = vld [vmem:[%s10384_s1 + $0x824] ss:$8 sps:$4 sm:$0xff]  }
 0x359   :  { %3268 = vmatprep.subr.bf16.mxu1 %v9149_v48  ;;  %v9192_v48 = vld [vmem:[%s10384_s1 + $0x940] ss:$8 sps:$4 sm:$0xff]   ;;  %11103 = vst [vmem:[#allocation12_spill] sm:$0xff] %v9270_v56 }
 0x35a   :  { %v2929_v7 = vpop.f32.mrf.mxu0  ;;  %3174 = vmatmul.mubr.bf16.vlgmr.msra.gmra.mxu0 %v4588_v59  ;;  %v9171_v59 = vld [vmem:[%s10384_s1 + $0x864] ss:$8 sps:$4 sm:$0xff]   ;;  %11095 = vst [vmem:[#allocation33_spill] sm:$0xff] %v9192_v48 }
 0x35b   :  { %v2970_v31 = vpop.f32.mrf.mxu1  ;;  %3215 = vmatmul.mubr.bf16.vlgmr.msra.gmra.mxu1 %v4590_v53  ;;  %3224 = vmatpush1.bf16.msra.mxu0 %v9159_v35  ;;  %v9177_v53 = vld [vmem:[%s10384_s1 + $0x944] ss:$8 sps:$4 sm:$0xff]  }
 0x35c   :  { %v9154_v9 = vadd.f32 %v2970_v31, %v2929_v7  ;;  %3269 = vmatpush1.bf16.msra.mxu1 %v9165_v61  ;;  %v2931_v47 = vpop.f32.mrf.mxu0  ;;  %3225 = vmatprep.subr.bf16.mxu0 %v9171_v59  ;;  %11094 = vst [vmem:[#allocation8_spill] sm:$0xff] %v9177_v53  ;;  %v9186_v61 = vld [vmem:[%s10384_s1 + $0x860] ss:$8 sps:$4 sm:$0xff]  }
 0x35d   :  { %v2972_v51 = vpop.f32.mrf.mxu1  ;;  %3270 = vmatprep.subr.bf16.mxu1 %v9177_v53  ;;  %3296 = vmatprep.mubr.bf16.mxu1 %v10890_v55  ;;  %v9246_v55 = vld [vmem:[%s10384_s1 + $0x834] ss:$8 sps:$4 sm:$0xff]   ;;  %v9258_v53 = vld [vmem:[%s10384_s1 + $0x830] ss:$8 sps:$4 sm:$0xff]  }
 0x35e   :  { %v9180_v7 = vadd.f32 %v2972_v51, %v2931_v47  ;;  %3255 = vmatprep.mubr.bf16.mxu0 %v4593_v11  ;;  %v2933_v31 = vpop.f32.mrf.mxu0  ;;  %v9204_v11 = vld [vmem:[%s10384_s1 + $0x934] ss:$8 sps:$4 sm:$0xff]   ;;  %11101 = vst [vmem:[#allocation11_spill] sm:$0xff] %v9258_v53 }
 0x35f   :  { %v2974_v60 = vpop.f32.mrf.mxu1  ;;  %3226 = vmatpush1.bf16.msra.mxu0 %v9186_v61  ;;  %11096 = vst [vmem:[#allocation9_spill] sm:$0xff] %v9204_v11  ;;  %v9210_v31 = vld [vmem:[%s10384_s1 + $0x850] ss:$8 sps:$4 sm:$0xff]  }
 0x360   :  { %3271 = vmatpush1.bf16.msra.mxu1 %v9192_v48  ;;  %v2934_v51 = vpop.f32.mrf.mxu0  ;;  %v9198_v60 = vld [vmem:[%s10384_s1 + $0x854] ss:$8 sps:$4 sm:$0xff]   ;;  %v9234_v48 = vld [vmem:[%s10384_s1 + $0x840] ss:$8 sps:$4 sm:$0xff]  }
 0x361   :  { %v2975_v47 = vpop.f32.mrf.mxu1  ;;  %3227 = vmatprep.subr.bf16.mxu0 %v9198_v60  ;;  %3272 = vmatprep.subr.bf16.mxu1 %v9204_v11  ;;  %v9216_v51 = vld [vmem:[%s10384_s1 + $0x930] ss:$8 sps:$4 sm:$0xff]   ;;  %v9228_v11 = vld [vmem:[%s10384_s1 + $0x924] ss:$8 sps:$4 sm:$0xff]  }
 0x362   :  { %11097 = vst [vmem:[#allocation35_spill] sm:$0xff] %v9216_v51  ;;  %v9222_v47 = vld [vmem:[%s10384_s1 + $0x844] ss:$8 sps:$4 sm:$0xff]   ;;  %11098 = vst [vmem:[#allocation37_spill] sm:$0xff] %v9228_v11 }
 0x363   :  { %3228 = vmatpush1.bf16.msra.mxu0 %v9210_v31 }
 0x364   :  { %3273 = vmatpush1.bf16.msra.mxu1 %v9216_v51  ;;  %3229 = vmatprep.subr.bf16.mxu0 %v9222_v47  ;;  %v9240_v51 = vld [vmem:[%s10384_s1 + $0x920] ss:$8 sps:$4 sm:$0xff]  }
 0x365   :  { %3274 = vmatprep.subr.bf16.mxu1 %v9228_v11  ;;  %11099 = vst [vmem:[#allocation10_spill] sm:$0xff] %v9240_v51  ;;  %v9252_v11 = vld [vmem:[%s10384_s1 + $0x914] ss:$8 sps:$4 sm:$0xff]  }
 0x366   :  { %11100 = vst [vmem:[#allocation39_spill] sm:$0xff] %v9252_v11 }
 0x367   :  { %3230 = vmatpush1.bf16.msra.mxu0 %v9234_v48 }
 0x368   :  { %3275 = vmatpush1.bf16.msra.mxu1 %v9240_v51  ;;  %3231 = vmatprep.subr.bf16.mxu0 %v9246_v55  ;;  %v9264_v51 = vld [vmem:[%s10384_s1 + $0x910] ss:$8 sps:$4 sm:$0xff]  }
 0x369   :  { %3276 = vmatprep.subr.bf16.mxu1 %v9252_v11  ;;  %11102 = vst [vmem:[#allocation41_spill] sm:$0xff] %v9264_v51  ;;  %v9276_v11 = vld [vmem:[%s10384_s1 + $0x904] ss:$8 sps:$4 sm:$0xff]  }
 0x36a   :  { %11104 = vst [vmem:[#allocation43_spill] sm:$0xff] %v9276_v11 }
 0x36b   :  { %3232 = vmatpush1.bf16.msra.mxu0 %v9258_v53  ;;  %v5620_v53 = vld [vmem:[%s10384_s1 + $0xc0] ss:$8 sps:$4 sm:$0xff]  }
 0x36c   :  { %3277 = vmatpush1.bf16.msra.mxu1 %v9264_v51  ;;  %3233 = vmatprep.subr.bf16.mxu0 %v9270_v56  ;;  %v9285_v51 = vld [vmem:[%s10385_s0 + $0xe4] sm:$0xff] }
 0x36d   :  { %3278 = vmatprep.subr.bf16.mxu1 %v9276_v11  ;;  %v9296_v11 = vld [vmem:[%s10384_s1 + $0x900] ss:$8 sps:$4 sm:$0xff]   ;;  %v4607_v33 = vcombine.high %v9285_v51, %v9285_v51  ;;  %v5618_v56 = vld [vmem:[%s10384_s1 + $0xc4] ss:$8 sps:$4 sm:$0xff]  }
 0x36e   :  { %11106 = vst [vmem:[#allocation45_spill] sm:$0xff] %v9296_v11 }
 0x36f   :  { %3234 = vmatpush1.bf16.msra.mxu0 %v9290_v52 }
 0x370   :  { %3279 = vmatpush1.bf16.msra.mxu1 %v9296_v11  ;;  %3235 = vmatprep.subr.bf16.mxu0 %v9302_v44  ;;  %v9314_v11 = vld [vmem:[%s10384_s1 + $0x810] ss:$8 sps:$4 sm:$0xff]  }
 0x371   :  { %3387 = vmatprep.subr.bf16.mxu1 %v5575_v40  ;;  %11108 = vst [vmem:[#allocation47_spill] sm:$0xff] %v9314_v11  ;;  %v9323_v40 = vld [vmem:[%s10384_s1 + $0x804] ss:$8 sps:$4 sm:$0xff]  }
 0x372   :  { %11109 = vst [vmem:[#allocation15_spill] sm:$0xff] %v9323_v40 }
 0x373   :  { %4595 = vmatmul.mubr.msk.bf16.vlgmr.msra.gmra.mxu1 %vm1909_vm0, %v5242_v49  ;;  %3236 = vmatpush1.bf16.msra.mxu0 %v9314_v11  ;;  %v5579_v49 = vld [vmem:[%s10384_s1 + $0x64] ss:$8 sps:$4 sm:$0xff]   ;;  %v9332_v11 = vld [vmem:[%s10384_s1 + $0x800] ss:$8 sps:$4 sm:$0xff]  }
 0x374   :  { %3388 = vmatpush1.bf16.msra.mxu1 %v5577_v34  ;;  %3237 = vmatprep.subr.bf16.mxu0 %v9323_v40  ;;  %11110 = vst [vmem:[#allocation49_spill] sm:$0xff] %v9332_v11  ;;  %v5581_v34 = vld [vmem:[%s10384_s1 + $0x60] ss:$8 sps:$4 sm:$0xff]   ;;  %v9341_v40 = vld [vmem:[%s10384_s1 + $0x8f4] ss:$8 sps:$4 sm:$0xff]  }
 0x375   :  { %3389 = vmatprep.subr.bf16.mxu1 %v5579_v49  ;;  %3419 = vmatprep.mubr.bf16.mxu1 %v4607_v33  ;;  %11111 = vst [vmem:[#allocation16_spill] sm:$0xff] %v9341_v40  ;;  %v5583_v33 = vld [vmem:[%s10384_s1 + $0x54] ss:$8 sps:$4 sm:$0xff]   ;;  %v9350_v49 = vld [vmem:[%s10384_s1 + $0x8f0] ss:$8 sps:$4 sm:$0xff]  }
 0x376   :  { %11112 = vst [vmem:[#allocation51_spill] sm:$0xff] %v9350_v49 }
 0x377   :  { %3238 = vmatpush1.bf16.msra.mxu0 %v9332_v11  ;;  %v9478_v11 = vld [vmem:[%s10385_s0 + $0xec] sm:$0xff] }
 0x378   :  { %3390 = vmatpush1.bf16.msra.mxu1 %v5581_v34  ;;  %3239 = vmatprep.subr.bf16.mxu0 %v9341_v40  ;;  %v5585_v34 = vld [vmem:[%s10384_s1 + $0x50] ss:$8 sps:$4 sm:$0xff]   ;;  %v9359_v40 = vld [vmem:[%s10384_s1 + $0x8e4] ss:$8 sps:$4 sm:$0xff]   ;;  %v4609_v44 = vcombine.high %v9478_v11, %v9478_v11 }
 0x379   :  { %3391 = vmatprep.subr.bf16.mxu1 %v5583_v33  ;;  %11113 = vst [vmem:[#allocation17_spill] sm:$0xff] %v9359_v40  ;;  %v5587_v33 = vld [vmem:[%s10384_s1 + $0x44] ss:$8 sps:$4 sm:$0xff]  }
 0x37b   :  { %3240 = vmatpush2.bf16.msra.mxu0 %v9350_v49  ;;  %v9368_v49 = vld [vmem:[%s10384_s1 + $0x8e0] ss:$8 sps:$4 sm:$0xff]  }
 0x37c   :  { %3392 = vmatpush1.bf16.msra.mxu1 %v5585_v34  ;;  %3241 = vmatprep.subr.bf16.mxu0 %v9359_v40  ;;  %11114 = vst [vmem:[#allocation53_spill] sm:$0xff] %v9368_v49  ;;  %v5589_v34 = vld [vmem:[%s10384_s1 + $0x40] ss:$8 sps:$4 sm:$0xff]   ;;  %v9377_v40 = vld [vmem:[%s10384_s1 + $0x8d4] ss:$8 sps:$4 sm:$0xff]  }
 0x37d   :  { %3393 = vmatprep.subr.bf16.mxu1 %v5587_v33  ;;  %11115 = vst [vmem:[#allocation18_spill] sm:$0xff] %v9377_v40  ;;  %v5591_v33 = vld [vmem:[%s10384_s1 + $0x34] ss:$8 sps:$4 sm:$0xff]  }
 0x37f   :  { %3242 = vmatpush2.bf16.msra.mxu0 %v9368_v49  ;;  %v9386_v49 = vld [vmem:[%s10384_s1 + $0x8d0] ss:$8 sps:$4 sm:$0xff]  }
 0x380   :  { %3394 = vmatpush1.bf16.msra.mxu1 %v5589_v34  ;;  %3243 = vmatprep.subr.bf16.mxu0 %v9377_v40  ;;  %11116 = vst [vmem:[#allocation55_spill] sm:$0xff] %v9386_v49  ;;  %v5593_v34 = vld [vmem:[%s10384_s1 + $0x30] ss:$8 sps:$4 sm:$0xff]   ;;  %v9395_v40 = vld [vmem:[%s10384_s1 + $0x8c4] ss:$8 sps:$4 sm:$0xff]  }
 0x381   :  { %3395 = vmatprep.subr.bf16.mxu1 %v5591_v33  ;;  %11117 = vst [vmem:[#allocation19_spill] sm:$0xff] %v9395_v40  ;;  %v5595_v33 = vld [vmem:[%s10384_s1 + $0x24] ss:$8 sps:$4 sm:$0xff]  }
 0x383   :  { %3244 = vmatpush2.bf16.msra.mxu0 %v9386_v49  ;;  %v9404_v49 = vld [vmem:[%s10384_s1 + $0x8c0] ss:$8 sps:$4 sm:$0xff]  }
 0x384   :  { %3396 = vmatpush1.bf16.msra.mxu1 %v5593_v34  ;;  %3245 = vmatprep.subr.bf16.mxu0 %v9395_v40  ;;  %11118 = vst [vmem:[#allocation57_spill] sm:$0xff] %v9404_v49  ;;  %v5597_v34 = vld [vmem:[%s10384_s1 + $0x20] ss:$8 sps:$4 sm:$0xff]   ;;  %v9413_v40 = vld [vmem:[%s10384_s1 + $0x8b4] ss:$8 sps:$4 sm:$0xff]  }
 0x385   :  { %3397 = vmatprep.subr.bf16.mxu1 %v5595_v33  ;;  %11119 = vst [vmem:[#allocation20_spill] sm:$0xff] %v9413_v40  ;;  %v5599_v33 = vld [vmem:[%s10384_s1 + $0x14] ss:$8 sps:$4 sm:$0xff]  }
 0x387   :  { %3246 = vmatpush2.bf16.msra.mxu0 %v9404_v49  ;;  %v9422_v49 = vld [vmem:[%s10384_s1 + $0x8b0] ss:$8 sps:$4 sm:$0xff]  }
 0x388   :  { %3398 = vmatpush1.bf16.msra.mxu1 %v5597_v34  ;;  %3247 = vmatprep.subr.bf16.mxu0 %v9413_v40  ;;  %11120 = vst [vmem:[#allocation59_spill] sm:$0xff] %v9422_v49  ;;  %v5601_v34 = vld [vmem:[%s10384_s1 + $0x10] ss:$8 sps:$4 sm:$0xff]   ;;  %v9431_v40 = vld [vmem:[%s10384_s1 + $0x8a4] ss:$8 sps:$4 sm:$0xff]  }
 0x389   :  { %3399 = vmatprep.subr.bf16.mxu1 %v5599_v33  ;;  %11121 = vst [vmem:[#allocation21_spill] sm:$0xff] %v9431_v40  ;;  %v5603_v33 = vld [vmem:[%s10384_s1 + $0x4] ss:$8 sps:$4 sm:$0xff]  }
 0x38b   :  { %3248 = vmatpush2.bf16.msra.mxu0 %v9422_v49  ;;  %v9440_v49 = vld [vmem:[%s10384_s1 + $0x8a0] ss:$8 sps:$4 sm:$0xff]  }
 0x38c   :  { %3400 = vmatpush1.bf16.msra.mxu1 %v5601_v34  ;;  %3249 = vmatprep.subr.bf16.mxu0 %v9431_v40  ;;  %11122 = vst [vmem:[#allocation24_spill] sm:$0xff] %v9440_v49  ;;  %v5605_v34 = vld [vmem:[%s10384_s1] ss:$8 sps:$4 sm:$0xff]   ;;  %v9449_v40 = vld [vmem:[%s10384_s1 + $0x894] ss:$8 sps:$4 sm:$0xff]  }
 0x38d   :  { %3401 = vmatprep.subr.bf16.mxu1 %v5603_v33  ;;  %11123 = vst [vmem:[#allocation63_spill] sm:$0xff] %v9449_v40  ;;  %v5607_v33 = vld [vmem:[%s10384_s1 + $0xf4] ss:$8 sps:$4 sm:$0xff]  }
 0x38f   :  { %3250 = vmatpush2.bf16.msra.mxu0 %v9440_v49  ;;  %v9458_v49 = vld [vmem:[%s10384_s1 + $0x890] ss:$8 sps:$4 sm:$0xff]  }
 0x390   :  { %3402 = vmatpush1.bf16.msra.mxu1 %v5605_v34  ;;  %3251 = vmatprep.subr.bf16.mxu0 %v9449_v40  ;;  %11124 = vst [vmem:[#allocation26_spill] sm:$0xff] %v9458_v49  ;;  %v5609_v34 = vld [vmem:[%s10384_s1 + $0xf0] ss:$8 sps:$4 sm:$0xff]   ;;  %v9467_v40 = vld [vmem:[%s10384_s1 + $0x884] ss:$8 sps:$4 sm:$0xff]  }
 0x391   :  { %3403 = vmatprep.subr.bf16.mxu1 %v5607_v33  ;;  %11125 = vst [vmem:[#allocation65_spill] sm:$0xff] %v9467_v40  ;;  %v5611_v33 = vld [vmem:[%s10384_s1 + $0xe4] ss:$8 sps:$4 sm:$0xff]  }
 0x393   :  { %3252 = vmatpush2.bf16.msra.mxu0 %v9458_v49  ;;  %v4592_v49 = vcombine.low %v9126_v13, %v9126_v13  ;;  %v5614_v13 = vld [vmem:[%s10384_s1 + $0xd4] ss:$8 sps:$4 sm:$0xff]  }
 0x394   :  { %3404 = vmatpush2.bf16.msra.mxu1 %v5609_v34  ;;  %3253 = vmatprep.subr.bf16.mxu0 %v9467_v40  ;;  %v9483_v34 = vld [vmem:[%s10384_s1 + $0x880] ss:$8 sps:$4 sm:$0xff]  }
 0x395   :  { %3405 = vmatprep.subr.bf16.mxu1 %v5611_v33  ;;  %11126 = vst [vmem:[#allocation28_spill] sm:$0xff] %v9483_v34  ;;  %v5613_v40 = vld [vmem:[%s10384_s1 + $0xe0] ss:$8 sps:$4 sm:$0xff]   ;;  %v5615_v33 = vld [vmem:[%s10384_s1 + $0x174] ss:$8 sps:$4 sm:$0xff]  }
 0x397   :  { %3254 = vmatpush2.bf16.msra.mxu0 %v9483_v34 }
 0x398   :  { %3406 = vmatpush2.bf16.msra.mxu1 %v5613_v40  ;;  %3428 = vmatprep.subr.bf16.mxu0 %v5615_v33  ;;  %v5616_v40 = vld [vmem:[%s10384_s1 + $0xd0] ss:$8 sps:$4 sm:$0xff]  }
 0x399   :  { %3407 = vmatprep.subr.bf16.mxu1 %v5614_v13  ;;  %v5617_v13 = vld [vmem:[%s10384_s1 + $0x170] ss:$8 sps:$4 sm:$0xff]  }
 0x39a   :  { %v3011_v57 = vpop.f32.mrf.mxu0  ;;  %3256 = vmatmul.mubr.bf16.vlgmr.msra.gmra.mxu0 %v4592_v49 }
 0x39b   :  { %v3052_v34 = vpop.f32.mrf.mxu1  ;;  %v3012_v52 = vadd.f32 %v3011_v57, %v9154_v9  ;;  %3429 = vmatpush1.bf16.msra.mxu0 %v5617_v13  ;;  %v5619_v57 = vld [vmem:[%s10384_s1 + $0x164] ss:$8 sps:$4 sm:$0xff]   ;;  %3460 = vmatprep.mubr.bf16.mxu0 %v4609_v44  ;;  %v5624_v44 = vld [vmem:[%s10384_s1 + $0xb0] ss:$8 sps:$4 sm:$0xff]  }
 0x39c   :  { %3408 = vmatpush2.bf16.msra.mxu1 %v5616_v40  ;;  %v3013_v39 = vpop.f32.mrf.mxu0  ;;  %3430 = vmatprep.subr.bf16.mxu0 %v5619_v57 }
 0x39d   :  { %v3054_v33 = vpop.f32.mrf.mxu1  ;;  %3409 = vmatprep.subr.bf16.mxu1 %v5618_v56  ;;  %v9510_v9 = vadd.f32 %v3052_v34, %v3012_v52  ;;  %v3014_v49 = vadd.f32 %v3013_v39, %v9180_v7  ;;  %v5621_v56 = vld [vmem:[%s10384_s1 + $0x160] ss:$8 sps:$4 sm:$0xff]   ;;  %v5622_v39 = vld [vmem:[%s10384_s1 + $0xb4] ss:$8 sps:$4 sm:$0xff]   ;;  %v5626_v7 = vld [vmem:[%s10384_s1 + $0xa4] ss:$8 sps:$4 sm:$0xff]  }
 0x39e   :  { %v3015_v40 = vpop.f32.mrf.mxu0  ;;  %v5627_v34 = vld [vmem:[%s10384_s1 + $0x144] ss:$8 sps:$4 sm:$0xff]  }
 0x39f   :  { %v3056_v28 = vpop.f32.mrf.mxu1  ;;  %v9513_v13 = vadd.f32 %v3054_v33, %v3014_v49  ;;  %3431 = vmatpush1.bf16.msra.mxu0 %v5621_v56  ;;  %v5628_v33 = vld [vmem:[%s10384_s1 + $0xa0] ss:$8 sps:$4 sm:$0xff]   ;;  %v5630_v40 = vld [vmem:[%s10384_s1 + $0x94] ss:$8 sps:$4 sm:$0xff]  }
 0x3a0   :  { %3410 = vmatpush2.bf16.msra.mxu1 %v5620_v53  ;;  %v3016_v57 = vpop.f32.mrf.mxu0  ;;  %v5623_v28 = vld [vmem:[%s10384_s1 + $0x154] ss:$8 sps:$4 sm:$0xff]   ;;  %v5625_v53 = vld [vmem:[%s10384_s1 + $0x150] ss:$8 sps:$4 sm:$0xff]   ;;  %v5629_v49 = vld [vmem:[%s10384_s1 + $0x140] ss:$8 sps:$4 sm:$0xff]  }
 0x3a1   :  { %v3057_v52 = vpop.f32.mrf.mxu1  ;;  %3411 = vmatprep.subr.bf16.mxu1 %v5622_v39  ;;  %3432 = vmatprep.subr.bf16.mxu0 %v5623_v28  ;;  %v5631_v56 = vld [vmem:[%s10384_s1 + $0x134] ss:$8 sps:$4 sm:$0xff]   ;;  %v5632_v57 = vld [vmem:[%s10384_s1 + $0x90] ss:$8 sps:$4 sm:$0xff]   ;;  %v5634_v39 = vld [vmem:[%s10384_s1 + $0x84] ss:$8 sps:$4 sm:$0xff]  }
 0x3a2   :  { %v5633_v52 = vld [vmem:[%s10384_s1 + $0x130] ss:$8 sps:$4 sm:$0xff]   ;;  %v5635_v28 = vld [vmem:[%s10384_s1 + $0x124] ss:$8 sps:$4 sm:$0xff]  }
 0x3a3   :  { %3433 = vmatpush1.bf16.msra.mxu0 %v5625_v53  ;;  %v9568_v53 = vld [vmem:[%s10385_s0 + $0xf4] sm:$0xff] }
 0x3a4   :  { %3412 = vmatpush2.bf16.msra.mxu1 %v5624_v44  ;;  %3434 = vmatprep.subr.bf16.mxu0 %v5627_v34  ;;  %v4606_v44 = vcombine.low %v9285_v51, %v9285_v51  ;;  %v5637_v34 = vld [vmem:[%s10384_s1 + $0x120] ss:$8 sps:$4 sm:$0xff]   ;;  %v5639_v51 = vld [vmem:[%s10384_s1 + $0x274] ss:$8 sps:$4 sm:$0xff]  }
 0x3a5   :  { %3413 = vmatprep.subr.bf16.mxu1 %v5626_v7  ;;  %v5636_v7 = vld [vmem:[%s10384_s1 + $0x80] ss:$8 sps:$4 sm:$0xff]  }
 0x3a7   :  { %3435 = vmatpush1.bf16.msra.mxu0 %v5629_v49  ;;  %v4611_v49 = vcombine.high %v9568_v53, %v9568_v53 }
 0x3a8   :  { %3414 = vmatpush2.bf16.msra.mxu1 %v5628_v33  ;;  %3436 = vmatprep.subr.bf16.mxu0 %v5631_v56  ;;  %v5638_v33 = vld [vmem:[%s10384_s1 + $0x114] ss:$8 sps:$4 sm:$0xff]   ;;  %v5641_v56 = vld [vmem:[%s10384_s1 + $0x270] ss:$8 sps:$4 sm:$0xff]  }
 0x3a9   :  { %3415 = vmatprep.subr.bf16.mxu1 %v5630_v40  ;;  %v5640_v40 = vld [vmem:[%s10384_s1 + $0x110] ss:$8 sps:$4 sm:$0xff]  }
 0x3ab   :  { %3437 = vmatpush1.bf16.msra.mxu0 %v5633_v52  ;;  %v5643_v52 = vld [vmem:[%s10384_s1 + $0x264] ss:$8 sps:$4 sm:$0xff]  }
 0x3ac   :  { %3416 = vmatpush2.bf16.msra.mxu1 %v5632_v57  ;;  %3438 = vmatprep.subr.bf16.mxu0 %v5635_v28  ;;  %v5642_v57 = vld [vmem:[%s10384_s1 + $0x104] ss:$8 sps:$4 sm:$0xff]   ;;  %v5645_v28 = vld [vmem:[%s10384_s1 + $0x260] ss:$8 sps:$4 sm:$0xff]  }
 0x3ad   :  { %3417 = vmatprep.subr.bf16.mxu1 %v5634_v39  ;;  %v5644_v39 = vld [vmem:[%s10384_s1 + $0x100] ss:$8 sps:$4 sm:$0xff]  }
 0x3af   :  { %3439 = vmatpush1.bf16.msra.mxu0 %v5637_v34  ;;  %v5648_v34 = vld [vmem:[%s10384_s1 + $0x1f0] ss:$8 sps:$4 sm:$0xff]  }
 0x3b0   :  { %3418 = vmatpush2.bf16.msra.mxu1 %v5636_v7  ;;  %3440 = vmatprep.subr.bf16.mxu0 %v5638_v33  ;;  %v5647_v7 = vld [vmem:[%s10384_s1 + $0x254] ss:$8 sps:$4 sm:$0xff]   ;;  %v5649_v33 = vld [vmem:[%s10384_s1 + $0x250] ss:$8 sps:$4 sm:$0xff]  }
 0x3b1   :  { %3469 = vmatprep.subr.bf16.mxu1 %v5639_v51  ;;  %v5650_v51 = vld [vmem:[%s10384_s1 + $0x1e4] ss:$8 sps:$4 sm:$0xff]  }
 0x3b3   :  { %3420 = vmatmul.mubr.bf16.vlgmr.msra.gmra.mxu1 %v4606_v44  ;;  %3441 = vmatpush1.bf16.msra.mxu0 %v5640_v40  ;;  %v5646_v44 = vld [vmem:[%s10384_s1 + $0x1f4] ss:$8 sps:$4 sm:$0xff]   ;;  %v5652_v40 = vld [vmem:[%s10384_s1 + $0x1e0] ss:$8 sps:$4 sm:$0xff]  }
 0x3b4   :  { %3470 = vmatpush1.bf16.msra.mxu1 %v5641_v56  ;;  %3442 = vmatprep.subr.bf16.mxu0 %v5642_v57  ;;  %v5653_v56 = vld [vmem:[%s10384_s1 + $0x240] ss:$8 sps:$4 sm:$0xff]   ;;  %v5654_v57 = vld [vmem:[%s10384_s1 + $0x1d4] ss:$8 sps:$4 sm:$0xff]  }
 0x3b5   :  { %3471 = vmatprep.subr.bf16.mxu1 %v5643_v52  ;;  %3501 = vmatprep.mubr.bf16.mxu1 %v4611_v49  ;;  %v5651_v49 = vld [vmem:[%s10384_s1 + $0x244] ss:$8 sps:$4 sm:$0xff]   ;;  %v5655_v52 = vld [vmem:[%s10384_s1 + $0x234] ss:$8 sps:$4 sm:$0xff]  }
 0x3b7   :  { %3443 = vmatpush1.bf16.msra.mxu0 %v5644_v39  ;;  %v5656_v39 = vld [vmem:[%s10384_s1 + $0x1d0] ss:$8 sps:$4 sm:$0xff]  }
 0x3b8   :  { %3472 = vmatpush1.bf16.msra.mxu1 %v5645_v28  ;;  %3444 = vmatprep.subr.bf16.mxu0 %v5646_v44  ;;  %v5657_v28 = vld [vmem:[%s10384_s1 + $0x230] ss:$8 sps:$4 sm:$0xff]   ;;  %v5658_v44 = vld [vmem:[%s10384_s1 + $0x1c4] ss:$8 sps:$4 sm:$0xff]  }
 0x3b9   :  { %3473 = vmatprep.subr.bf16.mxu1 %v5647_v7  ;;  %v5659_v7 = vld [vmem:[%s10384_s1 + $0x224] ss:$8 sps:$4 sm:$0xff]  }
 0x3bb   :  { %3445 = vmatpush2.bf16.msra.mxu0 %v5648_v34  ;;  %v5660_v34 = vld [vmem:[%s10384_s1 + $0x1c0] ss:$8 sps:$4 sm:$0xff]  }
 0x3bc   :  { %3474 = vmatpush1.bf16.msra.mxu1 %v5649_v33  ;;  %3446 = vmatprep.subr.bf16.mxu0 %v5650_v51  ;;  %v5661_v33 = vld [vmem:[%s10384_s1 + $0x220] ss:$8 sps:$4 sm:$0xff]   ;;  %v5662_v51 = vld [vmem:[%s10384_s1 + $0x1b4] ss:$8 sps:$4 sm:$0xff]  }
 0x3bd   :  { %3475 = vmatprep.subr.bf16.mxu1 %v5651_v49  ;;  %v5663_v49 = vld [vmem:[%s10384_s1 + $0x214] ss:$8 sps:$4 sm:$0xff]  }
 0x3bf   :  { %3447 = vmatpush2.bf16.msra.mxu0 %v5652_v40  ;;  %v5664_v40 = vld [vmem:[%s10384_s1 + $0x1b0] ss:$8 sps:$4 sm:$0xff]  }
 0x3c0   :  { %3476 = vmatpush1.bf16.msra.mxu1 %v5653_v56  ;;  %3448 = vmatprep.subr.bf16.mxu0 %v5654_v57  ;;  %v5665_v56 = vld [vmem:[%s10384_s1 + $0x210] ss:$8 sps:$4 sm:$0xff]   ;;  %v5666_v57 = vld [vmem:[%s10384_s1 + $0x1a4] ss:$8 sps:$4 sm:$0xff]  }
 0x3c1   :  { %3477 = vmatprep.subr.bf16.mxu1 %v5655_v52  ;;  %v5667_v52 = vld [vmem:[%s10384_s1 + $0x204] ss:$8 sps:$4 sm:$0xff]  }
 0x3c3   :  { %3449 = vmatpush2.bf16.msra.mxu0 %v5656_v39  ;;  %v5668_v39 = vld [vmem:[%s10384_s1 + $0x1a0] ss:$8 sps:$4 sm:$0xff]  }
 0x3c4   :  { %3478 = vmatpush1.bf16.msra.mxu1 %v5657_v28  ;;  %3450 = vmatprep.subr.bf16.mxu0 %v5658_v44  ;;  %v5669_v28 = vld [vmem:[%s10384_s1 + $0x200] ss:$8 sps:$4 sm:$0xff]   ;;  %v5670_v44 = vld [vmem:[%s10384_s1 + $0x194] ss:$8 sps:$4 sm:$0xff]  }
 0x3c5   :  { %3479 = vmatprep.subr.bf16.mxu1 %v5659_v7  ;;  %v5671_v7 = vld [vmem:[%s10384_s1 + $0x2f4] ss:$8 sps:$4 sm:$0xff]  }
 0x3c7   :  { %3451 = vmatpush2.bf16.msra.mxu0 %v5660_v34  ;;  %v5672_v34 = vld [vmem:[%s10384_s1 + $0x190] ss:$8 sps:$4 sm:$0xff]  }
 0x3c8   :  { %3480 = vmatpush1.bf16.msra.mxu1 %v5661_v33  ;;  %3452 = vmatprep.subr.bf16.mxu0 %v5662_v51  ;;  %v5673_v33 = vld [vmem:[%s10384_s1 + $0x2f0] ss:$8 sps:$4 sm:$0xff]   ;;  %v5674_v51 = vld [vmem:[%s10384_s1 + $0x184] ss:$8 sps:$4 sm:$0xff]  }
 0x3c9   :  { %3481 = vmatprep.subr.bf16.mxu1 %v5663_v49  ;;  %v5675_v49 = vld [vmem:[%s10384_s1 + $0x2e4] ss:$8 sps:$4 sm:$0xff]  }
 0x3cb   :  { %3453 = vmatpush2.bf16.msra.mxu0 %v5664_v40  ;;  %v4608_v40 = vcombine.low %v9478_v11, %v9478_v11  ;;  %v5679_v11 = vld [vmem:[%s10384_s1 + $0x374] ss:$8 sps:$4 sm:$0xff]  }
 0x3cc   :  { %3482 = vmatpush1.bf16.msra.mxu1 %v5665_v56  ;;  %3454 = vmatprep.subr.bf16.mxu0 %v5666_v57  ;;  %v9697_v56 = vld [vmem:[%s10385_s0 + $0xfc] sm:$0xff] }
 0x3cd   :  { %3483 = vmatprep.subr.bf16.mxu1 %v5667_v52  ;;  %v5676_v57 = vld [vmem:[%s10384_s1 + $0x180] ss:$8 sps:$4 sm:$0xff]  }
 0x3ce   :  { %v5677_v52 = vld [vmem:[%s10384_s1 + $0x2e0] ss:$8 sps:$4 sm:$0xff]  }
 0x3cf   :  { %3455 = vmatpush2.bf16.msra.mxu0 %v5668_v39  ;;  %v5678_v39 = vld [vmem:[%s10384_s1 + $0x2d4] ss:$8 sps:$4 sm:$0xff]  }
 0x3d0   :  { %3484 = vmatpush1.bf16.msra.mxu1 %v5669_v28  ;;  %3456 = vmatprep.subr.bf16.mxu0 %v5670_v44  ;;  %v4613_v28 = vcombine.high %v9697_v56, %v9697_v56 }
 0x3d1   :  { %3485 = vmatprep.subr.bf16.mxu1 %v5671_v7 }
 0x3d3   :  { %3457 = vmatpush2.bf16.msra.mxu0 %v5672_v34 }
 0x3d4   :  { %3486 = vmatpush2.bf16.msra.mxu1 %v5673_v33  ;;  %3458 = vmatprep.subr.bf16.mxu0 %v5674_v51  ;;  %v5680_v33 = vld [vmem:[%s10384_s1 + $0x2d0] ss:$8 sps:$4 sm:$0xff]  }
 0x3d5   :  { %3487 = vmatprep.subr.bf16.mxu1 %v5675_v49  ;;  %v5681_v51 = vld [vmem:[%s10384_s1 + $0x370] ss:$8 sps:$4 sm:$0xff]  }
 0x3d7   :  { %3459 = vmatpush2.bf16.msra.mxu0 %v5676_v57 }
 0x3d8   :  { %3488 = vmatpush2.bf16.msra.mxu1 %v5677_v52  ;;  %3510 = vmatprep.subr.bf16.mxu0 %v5679_v11  ;;  %v5682_v52 = vld [vmem:[%s10384_s1 + $0x2c4] ss:$8 sps:$4 sm:$0xff]  }
 0x3d9   :  { %3489 = vmatprep.subr.bf16.mxu1 %v5678_v39 }
 0x3da   :  { %v3093_v44 = vpop.f32.mrf.mxu0  ;;  %3461 = vmatmul.mubr.bf16.vlgmr.msra.gmra.mxu0 %v4608_v40 }
 0x3db   :  { %v3134_v7 = vpop.f32.mrf.mxu1  ;;  %v3094_v34 = vadd.f32 %v3093_v44, %v9510_v9  ;;  %3511 = vmatpush1.bf16.msra.mxu0 %v5681_v51  ;;  %v5683_v9 = vld [vmem:[%s10384_s1 + $0x364] ss:$8 sps:$4 sm:$0xff]   ;;  %3542 = vmatprep.mubr.bf16.mxu0 %v4613_v28  ;;  %v5684_v51 = vld [vmem:[%s10384_s1 + $0x2c0] ss:$8 sps:$4 sm:$0xff]   ;;  %v5687_v28 = vld [vmem:[%s10384_s1 + $0x354] ss:$8 sps:$4 sm:$0xff]  }
 0x3dc   :  { %3490 = vmatpush2.bf16.msra.mxu1 %v5680_v33  ;;  %v3095_v49 = vpop.f32.mrf.mxu0  ;;  %3512 = vmatprep.subr.bf16.mxu0 %v5683_v9 }
 0x3dd   :  { %v3136_v57 = vpop.f32.mrf.mxu1  ;;  %3491 = vmatprep.subr.bf16.mxu1 %v5682_v52  ;;  %v9726_v40 = vadd.f32 %v3134_v7, %v3094_v34  ;;  %v3096_v39 = vadd.f32 %v3095_v49, %v9513_v13  ;;  %v5685_v52 = vld [vmem:[%s10384_s1 + $0x360] ss:$8 sps:$4 sm:$0xff]   ;;  %v5686_v13 = vld [vmem:[%s10384_s1 + $0x2b4] ss:$8 sps:$4 sm:$0xff]   ;;  %v5688_v34 = vld [vmem:[%s10384_s1 + $0x2b0] ss:$8 sps:$4 sm:$0xff]  }
 0x3de   :  { %v3097_v11 = vpop.f32.mrf.mxu0  ;;  %v5689_v49 = vld [vmem:[%s10384_s1 + $0x350] ss:$8 sps:$4 sm:$0xff]  }
 0x3df   :  { %v3138_v44 = vpop.f32.mrf.mxu1  ;;  %v9729_v33 = vadd.f32 %v3136_v57, %v3096_v39  ;;  %3513 = vmatpush1.bf16.msra.mxu0 %v5685_v52  ;;  %v5690_v57 = vld [vmem:[%s10384_s1 + $0x2a4] ss:$8 sps:$4 sm:$0xff]   ;;  %v5692_v11 = vld [vmem:[%s10384_s1 + $0x2a0] ss:$8 sps:$4 sm:$0xff]   ;;  %v5695_v52 = vld [vmem:[%s10384_s1 + $0x334] ss:$8 sps:$4 sm:$0xff]  }
 0x3e0   :  { %3492 = vmatpush2.bf16.msra.mxu1 %v5684_v51  ;;  %v3098_v9 = vpop.f32.mrf.mxu0  ;;  %3514 = vmatprep.subr.bf16.mxu0 %v5687_v28  ;;  %v5691_v39 = vld [vmem:[%s10384_s1 + $0x344] ss:$8 sps:$4 sm:$0xff]   ;;  %v5693_v44 = vld [vmem:[%s10384_s1 + $0x340] ss:$8 sps:$4 sm:$0xff]   ;;  %v5694_v51 = vld [vmem:[%s10384_s1 + $0x294] ss:$8 sps:$4 sm:$0xff]  }
 0x3e1   :  { %v3139_v7 = vpop.f32.mrf.mxu1  ;;  %3493 = vmatprep.subr.bf16.mxu1 %v5686_v13  ;;  %v5696_v9 = vld [vmem:[%s10384_s1 + $0x290] ss:$8 sps:$4 sm:$0xff]   ;;  %v5698_v13 = vld [vmem:[%s10384_s1 + $0x284] ss:$8 sps:$4 sm:$0xff]  }
 0x3e2   :  { %v5697_v7 = vld [vmem:[%s10384_s1 + $0x330] ss:$8 sps:$4 sm:$0xff]   ;;  %v5699_v28 = vld [vmem:[%s10384_s1 + $0x324] ss:$8 sps:$4 sm:$0xff]  }
 0x3e3   :  { %3515 = vmatpush1.bf16.msra.mxu0 %v5689_v49  ;;  %v9784_v49 = vld [vmem:[%s10385_s0 + $0x104] sm:$0xff] }
 0x3e4   :  { %3494 = vmatpush2.bf16.msra.mxu1 %v5688_v34  ;;  %3516 = vmatprep.subr.bf16.mxu0 %v5691_v39  ;;  %v4610_v34 = vcombine.low %v9568_v53, %v9568_v53  ;;  %v5701_v39 = vld [vmem:[%s10384_s1 + $0x320] ss:$8 sps:$4 sm:$0xff]   ;;  %v5703_v53 = vld [vmem:[%s10384_s1 + $0x474] ss:$8 sps:$4 sm:$0xff]  }
 0x3e5   :  { %3495 = vmatprep.subr.bf16.mxu1 %v5690_v57  ;;  %v5700_v57 = vld [vmem:[%s10384_s1 + $0x280] ss:$8 sps:$4 sm:$0xff]  }
 0x3e7   :  { %3517 = vmatpush1.bf16.msra.mxu0 %v5693_v44  ;;  %v4615_v44 = vcombine.high %v9784_v49, %v9784_v49 }
 0x3e8   :  { %3496 = vmatpush2.bf16.msra.mxu1 %v5692_v11  ;;  %3518 = vmatprep.subr.bf16.mxu0 %v5695_v52  ;;  %v5702_v11 = vld [vmem:[%s10384_s1 + $0x314] ss:$8 sps:$4 sm:$0xff]   ;;  %v5705_v52 = vld [vmem:[%s10384_s1 + $0x470] ss:$8 sps:$4 sm:$0xff]  }
 0x3e9   :  { %3497 = vmatprep.subr.bf16.mxu1 %v5694_v51  ;;  %v5704_v51 = vld [vmem:[%s10384_s1 + $0x310] ss:$8 sps:$4 sm:$0xff]  }
 0x3eb   :  { %3519 = vmatpush1.bf16.msra.mxu0 %v5697_v7  ;;  %v5707_v7 = vld [vmem:[%s10384_s1 + $0x464] ss:$8 sps:$4 sm:$0xff]  }
 0x3ec   :  { %3498 = vmatpush2.bf16.msra.mxu1 %v5696_v9  ;;  %3520 = vmatprep.subr.bf16.mxu0 %v5699_v28  ;;  %v5706_v9 = vld [vmem:[%s10384_s1 + $0x304] ss:$8 sps:$4 sm:$0xff]   ;;  %v5709_v28 = vld [vmem:[%s10384_s1 + $0x460] ss:$8 sps:$4 sm:$0xff]  }
 0x3ed   :  { %3499 = vmatprep.subr.bf16.mxu1 %v5698_v13  ;;  %v5708_v13 = vld [vmem:[%s10384_s1 + $0x300] ss:$8 sps:$4 sm:$0xff]  }
 0x3ef   :  { %3521 = vmatpush1.bf16.msra.mxu0 %v5701_v39  ;;  %v5712_v39 = vld [vmem:[%s10384_s1 + $0x3f0] ss:$8 sps:$4 sm:$0xff]  }
 0x3f0   :  { %3500 = vmatpush2.bf16.msra.mxu1 %v5700_v57  ;;  %3522 = vmatprep.subr.bf16.mxu0 %v5702_v11  ;;  %v5711_v57 = vld [vmem:[%s10384_s1 + $0x454] ss:$8 sps:$4 sm:$0xff]   ;;  %v5713_v11 = vld [vmem:[%s10384_s1 + $0x450] ss:$8 sps:$4 sm:$0xff]  }
 0x3f1   :  { %3551 = vmatprep.subr.bf16.mxu1 %v5703_v53  ;;  %v5714_v53 = vld [vmem:[%s10384_s1 + $0x3e4] ss:$8 sps:$4 sm:$0xff]  }
 0x3f3   :  { %3502 = vmatmul.mubr.bf16.vlgmr.msra.gmra.mxu1 %v4610_v34  ;;  %3523 = vmatpush1.bf16.msra.mxu0 %v5704_v51  ;;  %v5710_v34 = vld [vmem:[%s10384_s1 + $0x3f4] ss:$8 sps:$4 sm:$0xff]   ;;  %v5716_v51 = vld [vmem:[%s10384_s1 + $0x3e0] ss:$8 sps:$4 sm:$0xff]  }
 0x3f4   :  { %3552 = vmatpush1.bf16.msra.mxu1 %v5705_v52  ;;  %3524 = vmatprep.subr.bf16.mxu0 %v5706_v9  ;;  %v5717_v52 = vld [vmem:[%s10384_s1 + $0x440] ss:$8 sps:$4 sm:$0xff]   ;;  %v5718_v9 = vld [vmem:[%s10384_s1 + $0x3d4] ss:$8 sps:$4 sm:$0xff]  }
 0x3f5   :  { %3553 = vmatprep.subr.bf16.mxu1 %v5707_v7  ;;  %3583 = vmatprep.mubr.bf16.mxu1 %v4615_v44  ;;  %v5715_v44 = vld [vmem:[%s10384_s1 + $0x444] ss:$8 sps:$4 sm:$0xff]   ;;  %v5719_v7 = vld [vmem:[%s10384_s1 + $0x434] ss:$8 sps:$4 sm:$0xff]  }
 0x3f7   :  { %3525 = vmatpush1.bf16.msra.mxu0 %v5708_v13  ;;  %v5720_v13 = vld [vmem:[%s10384_s1 + $0x3d0] ss:$8 sps:$4 sm:$0xff]  }
 0x3f8   :  { %3554 = vmatpush1.bf16.msra.mxu1 %v5709_v28  ;;  %3526 = vmatprep.subr.bf16.mxu0 %v5710_v34  ;;  %v5721_v28 = vld [vmem:[%s10384_s1 + $0x430] ss:$8 sps:$4 sm:$0xff]   ;;  %v5722_v34 = vld [vmem:[%s10384_s1 + $0x3c4] ss:$8 sps:$4 sm:$0xff]  }
 0x3f9   :  { %3555 = vmatprep.subr.bf16.mxu1 %v5711_v57  ;;  %v5723_v57 = vld [vmem:[%s10384_s1 + $0x424] ss:$8 sps:$4 sm:$0xff]  }
 0x3fb   :  { %3527 = vmatpush2.bf16.msra.mxu0 %v5712_v39  ;;  %v5724_v39 = vld [vmem:[%s10384_s1 + $0x3c0] ss:$8 sps:$4 sm:$0xff]  }
 0x3fc   :  { %3556 = vmatpush1.bf16.msra.mxu1 %v5713_v11  ;;  %3528 = vmatprep.subr.bf16.mxu0 %v5714_v53  ;;  %v5725_v11 = vld [vmem:[%s10384_s1 + $0x420] ss:$8 sps:$4 sm:$0xff]   ;;  %v5726_v53 = vld [vmem:[%s10384_s1 + $0x3b4] ss:$8 sps:$4 sm:$0xff]  }
 0x3fd   :  { %3557 = vmatprep.subr.bf16.mxu1 %v5715_v44  ;;  %v5727_v44 = vld [vmem:[%s10384_s1 + $0x414] ss:$8 sps:$4 sm:$0xff]  }
 0x3ff   :  { %3529 = vmatpush2.bf16.msra.mxu0 %v5716_v51  ;;  %v5728_v51 = vld [vmem:[%s10384_s1 + $0x3b0] ss:$8 sps:$4 sm:$0xff]  }
 0x400   :  { %3558 = vmatpush1.bf16.msra.mxu1 %v5717_v52  ;;  %3530 = vmatprep.subr.bf16.mxu0 %v5718_v9  ;;  %v5729_v52 = vld [vmem:[%s10384_s1 + $0x410] ss:$8 sps:$4 sm:$0xff]   ;;  %v5730_v9 = vld [vmem:[%s10384_s1 + $0x3a4] ss:$8 sps:$4 sm:$0xff]  }
 0x401   :  { %3559 = vmatprep.subr.bf16.mxu1 %v5719_v7  ;;  %v5731_v7 = vld [vmem:[%s10384_s1 + $0x404] ss:$8 sps:$4 sm:$0xff]  }
 0x403   :  { %3531 = vmatpush2.bf16.msra.mxu0 %v5720_v13  ;;  %v5732_v13 = vld [vmem:[%s10384_s1 + $0x3a0] ss:$8 sps:$4 sm:$0xff]  }
 0x404   :  { %3560 = vmatpush1.bf16.msra.mxu1 %v5721_v28  ;;  %3532 = vmatprep.subr.bf16.mxu0 %v5722_v34  ;;  %v5733_v28 = vld [vmem:[%s10384_s1 + $0x400] ss:$8 sps:$4 sm:$0xff]   ;;  %v5734_v34 = vld [vmem:[%s10384_s1 + $0x394] ss:$8 sps:$4 sm:$0xff]  }
 0x405   :  { %3561 = vmatprep.subr.bf16.mxu1 %v5723_v57  ;;  %v5735_v57 = vld [vmem:[%s10384_s1 + $0x4f4] ss:$8 sps:$4 sm:$0xff]  }
 0x407   :  { %3533 = vmatpush2.bf16.msra.mxu0 %v5724_v39  ;;  %v5736_v39 = vld [vmem:[%s10384_s1 + $0x390] ss:$8 sps:$4 sm:$0xff]  }
 0x408   :  { %3562 = vmatpush1.bf16.msra.mxu1 %v5725_v11  ;;  %3534 = vmatprep.subr.bf16.mxu0 %v5726_v53  ;;  %v5737_v11 = vld [vmem:[%s10384_s1 + $0x4f0] ss:$8 sps:$4 sm:$0xff]   ;;  %v5738_v53 = vld [vmem:[%s10384_s1 + $0x384] ss:$8 sps:$4 sm:$0xff]  }
 0x409   :  { %3563 = vmatprep.subr.bf16.mxu1 %v5727_v44  ;;  %v5739_v44 = vld [vmem:[%s10384_s1 + $0x4e4] ss:$8 sps:$4 sm:$0xff]  }
 0x40b   :  { %3535 = vmatpush2.bf16.msra.mxu0 %v5728_v51  ;;  %v4612_v51 = vcombine.low %v9697_v56, %v9697_v56  ;;  %v5743_v56 = vld [vmem:[%s10384_s1 + $0x574] ss:$8 sps:$4 sm:$0xff]  }
 0x40c   :  { %3564 = vmatpush1.bf16.msra.mxu1 %v5729_v52  ;;  %3536 = vmatprep.subr.bf16.mxu0 %v5730_v9  ;;  %v9913_v52 = vld [vmem:[%s10385_s0 + $0x10c] sm:$0xff]  ;;  %v5740_v9 = vld [vmem:[%s10384_s1 + $0x380] ss:$8 sps:$4 sm:$0xff]  }
 0x40d   :  { %3565 = vmatprep.subr.bf16.mxu1 %v5731_v7  ;;  %v5741_v7 = vld [vmem:[%s10384_s1 + $0x4e0] ss:$8 sps:$4 sm:$0xff]  }
 0x40f   :  { %3537 = vmatpush2.bf16.msra.mxu0 %v5732_v13  ;;  %v5742_v13 = vld [vmem:[%s10384_s1 + $0x4d4] ss:$8 sps:$4 sm:$0xff]  }
 0x410   :  { %3566 = vmatpush1.bf16.msra.mxu1 %v5733_v28  ;;  %3538 = vmatprep.subr.bf16.mxu0 %v5734_v34  ;;  %v4617_v28 = vcombine.high %v9913_v52, %v9913_v52 }
 0x411   :  { %3567 = vmatprep.subr.bf16.mxu1 %v5735_v57 }
 0x413   :  { %3539 = vmatpush2.bf16.msra.mxu0 %v5736_v39 }
 0x414   :  { %3568 = vmatpush2.bf16.msra.mxu1 %v5737_v11  ;;  %3540 = vmatprep.subr.bf16.mxu0 %v5738_v53  ;;  %v5744_v11 = vld [vmem:[%s10384_s1 + $0x4d0] ss:$8 sps:$4 sm:$0xff]  }
 0x415   :  { %3569 = vmatprep.subr.bf16.mxu1 %v5739_v44  ;;  %v5745_v53 = vld [vmem:[%s10384_s1 + $0x570] ss:$8 sps:$4 sm:$0xff]  }
 0x417   :  { %3541 = vmatpush2.bf16.msra.mxu0 %v5740_v9 }
 0x418   :  { %3570 = vmatpush2.bf16.msra.mxu1 %v5741_v7  ;;  %3592 = vmatprep.subr.bf16.mxu0 %v5743_v56  ;;  %v5746_v7 = vld [vmem:[%s10384_s1 + $0x4c4] ss:$8 sps:$4 sm:$0xff]  }
 0x419   :  { %3571 = vmatprep.subr.bf16.mxu1 %v5742_v13 }
 0x41a   :  { %v3175_v34 = vpop.f32.mrf.mxu0  ;;  %3543 = vmatmul.mubr.bf16.vlgmr.msra.gmra.mxu0 %v4612_v51 }
 0x41b   :  { %v3216_v57 = vpop.f32.mrf.mxu1  ;;  %v3176_v39 = vadd.f32 %v3175_v34, %v9726_v40  ;;  %3593 = vmatpush1.bf16.msra.mxu0 %v5745_v53  ;;  %v5747_v40 = vld [vmem:[%s10384_s1 + $0x564] ss:$8 sps:$4 sm:$0xff]   ;;  %3624 = vmatprep.mubr.bf16.mxu0 %v4617_v28  ;;  %v5748_v53 = vld [vmem:[%s10384_s1 + $0x4c0] ss:$8 sps:$4 sm:$0xff]   ;;  %v5751_v28 = vld [vmem:[%s10384_s1 + $0x554] ss:$8 sps:$4 sm:$0xff]  }
 0x41c   :  { %3572 = vmatpush2.bf16.msra.mxu1 %v5744_v11  ;;  %v3177_v44 = vpop.f32.mrf.mxu0  ;;  %3594 = vmatprep.subr.bf16.mxu0 %v5747_v40 }
 0x41d   :  { %v3218_v9 = vpop.f32.mrf.mxu1  ;;  %3573 = vmatprep.subr.bf16.mxu1 %v5746_v7  ;;  %v9942_v51 = vadd.f32 %v3216_v57, %v3176_v39  ;;  %v3178_v13 = vadd.f32 %v3177_v44, %v9729_v33  ;;  %v5749_v7 = vld [vmem:[%s10384_s1 + $0x560] ss:$8 sps:$4 sm:$0xff]   ;;  %v5750_v33 = vld [vmem:[%s10384_s1 + $0x4b4] ss:$8 sps:$4 sm:$0xff]   ;;  %v5752_v39 = vld [vmem:[%s10384_s1 + $0x4b0] ss:$8 sps:$4 sm:$0xff]  }
 0x41e   :  { %v3179_v56 = vpop.f32.mrf.mxu0  ;;  %v5753_v44 = vld [vmem:[%s10384_s1 + $0x550] ss:$8 sps:$4 sm:$0xff]  }
 0x41f   :  { %v3220_v34 = vpop.f32.mrf.mxu1  ;;  %v9945_v11 = vadd.f32 %v3218_v9, %v3178_v13  ;;  %3595 = vmatpush1.bf16.msra.mxu0 %v5749_v7  ;;  %v5754_v9 = vld [vmem:[%s10384_s1 + $0x4a4] ss:$8 sps:$4 sm:$0xff]   ;;  %v5756_v56 = vld [vmem:[%s10384_s1 + $0x4a0] ss:$8 sps:$4 sm:$0xff]   ;;  %v5759_v7 = vld [vmem:[%s10384_s1 + $0x534] ss:$8 sps:$4 sm:$0xff]  }
 0x420   :  { %3574 = vmatpush2.bf16.msra.mxu1 %v5748_v53  ;;  %v3180_v40 = vpop.f32.mrf.mxu0  ;;  %3596 = vmatprep.subr.bf16.mxu0 %v5751_v28  ;;  %v5755_v13 = vld [vmem:[%s10384_s1 + $0x544] ss:$8 sps:$4 sm:$0xff]   ;;  %v5757_v34 = vld [vmem:[%s10384_s1 + $0x540] ss:$8 sps:$4 sm:$0xff]   ;;  %v5758_v53 = vld [vmem:[%s10384_s1 + $0x494] ss:$8 sps:$4 sm:$0xff]  }
 0x421   :  { %v3221_v57 = vpop.f32.mrf.mxu1  ;;  %3575 = vmatprep.subr.bf16.mxu1 %v5750_v33  ;;  %v5760_v40 = vld [vmem:[%s10384_s1 + $0x490] ss:$8 sps:$4 sm:$0xff]   ;;  %v5762_v33 = vld [vmem:[%s10384_s1 + $0x484] ss:$8 sps:$4 sm:$0xff]  }
 0x422   :  { %v5761_v57 = vld [vmem:[%s10384_s1 + $0x530] ss:$8 sps:$4 sm:$0xff]   ;;  %v5763_v28 = vld [vmem:[%s10384_s1 + $0x524] ss:$8 sps:$4 sm:$0xff]  }
 0x423   :  { %3597 = vmatpush1.bf16.msra.mxu0 %v5753_v44  ;;  %v10000_v44 = vld [vmem:[%s10385_s0 + $0x114] sm:$0xff] }
 0x424   :  { %3576 = vmatpush2.bf16.msra.mxu1 %v5752_v39  ;;  %3598 = vmatprep.subr.bf16.mxu0 %v5755_v13  ;;  %v4614_v39 = vcombine.low %v9784_v49, %v9784_v49  ;;  %v5765_v13 = vld [vmem:[%s10384_s1 + $0x520] ss:$8 sps:$4 sm:$0xff]   ;;  %v5767_v49 = vld [vmem:[%s10384_s1 + $0x674] ss:$8 sps:$4 sm:$0xff]  }
 0x425   :  { %3577 = vmatprep.subr.bf16.mxu1 %v5754_v9  ;;  %v5764_v9 = vld [vmem:[%s10384_s1 + $0x480] ss:$8 sps:$4 sm:$0xff]  }
 0x427   :  { %3599 = vmatpush1.bf16.msra.mxu0 %v5757_v34  ;;  %v4619_v34 = vcombine.high %v10000_v44, %v10000_v44 }
 0x428   :  { %3578 = vmatpush2.bf16.msra.mxu1 %v5756_v56  ;;  %3600 = vmatprep.subr.bf16.mxu0 %v5759_v7  ;;  %v5766_v56 = vld [vmem:[%s10384_s1 + $0x514] ss:$8 sps:$4 sm:$0xff]   ;;  %v5768_v7 = vld [vmem:[%s10384_s1 + $0x510] ss:$8 sps:$4 sm:$0xff]  }
 0x429   :  { %3579 = vmatprep.subr.bf16.mxu1 %v5758_v53 }
 0x42b   :  { %3601 = vmatpush1.bf16.msra.mxu0 %v5761_v57  ;;  %v5769_v57 = vld [vmem:[%s10384_s1 + $0x504] ss:$8 sps:$4 sm:$0xff]  }
 0x42c   :  { %3580 = vmatpush2.bf16.msra.mxu1 %v5760_v40  ;;  %3602 = vmatprep.subr.bf16.mxu0 %v5763_v28  ;;  %v5770_v28 = vld [vmem:[%s10384_s1 + $0x500] ss:$8 sps:$4 sm:$0xff]  }
 0x42d   :  { %3581 = vmatprep.subr.bf16.mxu1 %v5762_v33 }
 0x42f   :  { %3603 = vmatpush1.bf16.msra.mxu0 %v5765_v13  ;;  %v5786_v13 = vld [vmem:[%s10384_s1 + $0x580] ss:$8 sps:$4 sm:$0xff]  }
 0x430   :  { %3582 = vmatpush2.bf16.msra.mxu1 %v5764_v9  ;;  %3604 = vmatprep.subr.bf16.mxu0 %v5766_v56  ;;  %v5773_v9 = vld [vmem:[%s10384_s1 + $0x5e4] ss:$8 sps:$4 sm:$0xff]  }
 0x431   :  { %3633 = vmatprep.subr.bf16.mxu1 %v5767_v49  ;;  %v5789_v49 = vld [vmem:[%s10384_s1 + $0x764] ss:$8 sps:$4 sm:$0xff]  }
 0x433   :  { %v10016_v53 = vpop.f32.mrf.mxu1  ;;  %3584 = vmatmul.mubr.bf16.vlgmr.msra.gmra.mxu1 %v4614_v39  ;;  %3605 = vmatpush1.bf16.msra.mxu0 %v5768_v7 }
 0x434   :  { %3634 = vmatpush1.bf16.msra.mxu1 %v8839_v16  ;;  %3606 = vmatprep.subr.bf16.mxu0 %v5769_v57  ;;  %v5771_v16 = vld [vmem:[%s10384_s1 + $0x5f4] ss:$8 sps:$4 sm:$0xff]   ;;  %v5790_v57 = vld [vmem:[%s10384_s1 + $0x760] ss:$8 sps:$4 sm:$0xff]  }
 0x435   :  { %v10022_v40 = vpop.f32.mrf.mxu1  ;;  %3635 = vmatprep.subr.bf16.mxu1 %v8846_v29  ;;  %3665 = vmatprep.mubr.bf16.mxu1 %v4619_v34  ;;  %v5772_v29 = vld [vmem:[%s10384_s1 + $0x5f0] ss:$8 sps:$4 sm:$0xff]  }
 0x437   :  { %v3302_v33 = vpop.f32.mrf.mxu1  ;;  %3607 = vmatpush1.bf16.msra.mxu0 %v5770_v28 }
 0x438   :  { %3636 = vmatpush1.bf16.msra.mxu1 %v8859_v63  ;;  %3608 = vmatprep.subr.bf16.mxu0 %v5771_v16  ;;  %v5774_v63 = vld [vmem:[%s10384_s1 + $0x5e0] ss:$8 sps:$4 sm:$0xff]  }
 0x439   :  { %v3303_v39 = vpop.f32.mrf.mxu1  ;;  %3637 = vmatprep.subr.bf16.mxu1 %v8866_v5  ;;  %v5775_v5 = vld [vmem:[%s10384_s1 + $0x5d4] ss:$8 sps:$4 sm:$0xff]   ;;  %v5802_v16 = vld [vmem:[%s10384_s1 + $0x700] ss:$8 sps:$4 sm:$0xff]  }
 0x43a   :  { %v5801_v39 = vld [vmem:[%s10384_s1 + $0x704] ss:$8 sps:$4 sm:$0xff]  }
 0x43b   :  { %3609 = vmatpush2.bf16.msra.mxu0 %v5772_v29 }
 0x43c   :  { %3638 = vmatpush1.bf16.msra.mxu1 %v8875_v37  ;;  %3610 = vmatprep.subr.bf16.mxu0 %v5773_v9  ;;  %v5776_v37 = vld [vmem:[%s10384_s1 + $0x5d0] ss:$8 sps:$4 sm:$0xff]  }
 0x43d   :  { %3639 = vmatprep.subr.bf16.mxu1 %v8882_v2  ;;  %v5777_v2 = vld [vmem:[%s10384_s1 + $0x5c4] ss:$8 sps:$4 sm:$0xff]   ;;  %v11131_v9 = vld [vmem:[#allocation12_spill] sm:$0xff] }
 0x43f   :  { %3611 = vmatpush2.bf16.msra.mxu0 %v5774_v63  ;;  %v11140_v63 = vld [vmem:[#allocation25_spill] sm:$0xff] }
 0x440   :  { %3640 = vmatpush1.bf16.msra.mxu1 %v8889_v41  ;;  %3612 = vmatprep.subr.bf16.mxu0 %v5775_v5  ;;  %v5778_v41 = vld [vmem:[%s10384_s1 + $0x5c0] ss:$8 sps:$4 sm:$0xff]   ;;  %v11141_v5 = vld [vmem:[#allocation49_spill] sm:$0xff] }
 0x441   :  { %3641 = vmatprep.subr.bf16.mxu1 %v8896_v4  ;;  %v5779_v4 = vld [vmem:[%s10384_s1 + $0x5b4] ss:$8 sps:$4 sm:$0xff]  }
 0x443   :  { %3613 = vmatpush2.bf16.msra.mxu0 %v5776_v37  ;;  %v11142_v37 = vld [vmem:[#allocation5_spill] sm:$0xff] }
 0x444   :  { %3642 = vmatpush1.bf16.msra.mxu1 %v8903_v6  ;;  %3614 = vmatprep.subr.bf16.mxu0 %v5777_v2  ;;  %v5780_v6 = vld [vmem:[%s10384_s1 + $0x5b0] ss:$8 sps:$4 sm:$0xff]  }
 0x445   :  { %3643 = vmatprep.subr.bf16.mxu1 %v8910_v8  ;;  %v5781_v8 = vld [vmem:[%s10384_s1 + $0x5a4] ss:$8 sps:$4 sm:$0xff]   ;;  %v11143_v2 = vld [vmem:[#allocation16_spill] sm:$0xff] }
 0x447   :  { %3615 = vmatpush2.bf16.msra.mxu0 %v5778_v41  ;;  %v11144_v41 = vld [vmem:[#allocation27_spill] sm:$0xff] }
 0x448   :  { %3644 = vmatpush1.bf16.msra.mxu1 %v8917_v10  ;;  %3616 = vmatprep.subr.bf16.mxu0 %v5779_v4  ;;  %v5782_v10 = vld [vmem:[%s10384_s1 + $0x5a0] ss:$8 sps:$4 sm:$0xff]  }
 0x449   :  { %3645 = vmatprep.subr.bf16.mxu1 %v8924_v12  ;;  %v5783_v12 = vld [vmem:[%s10384_s1 + $0x594] ss:$8 sps:$4 sm:$0xff]   ;;  %v11145_v4 = vld [vmem:[#allocation51_spill] sm:$0xff] }
 0x44b   :  { %3617 = vmatpush2.bf16.msra.mxu0 %v5780_v6  ;;  %v11146_v6 = vld [vmem:[#allocation6_spill] sm:$0xff] }
 0x44c   :  { %3646 = vmatpush1.bf16.msra.mxu1 %v8931_v14  ;;  %3618 = vmatprep.subr.bf16.mxu0 %v5781_v8  ;;  %v5784_v14 = vld [vmem:[%s10384_s1 + $0x590] ss:$8 sps:$4 sm:$0xff]  }
 0x44d   :  { %3647 = vmatprep.subr.bf16.mxu1 %v8938_v21  ;;  %v5785_v21 = vld [vmem:[%s10384_s1 + $0x584] ss:$8 sps:$4 sm:$0xff]   ;;  %v11147_v8 = vld [vmem:[#allocation17_spill] sm:$0xff] }
 0x44f   :  { %3619 = vmatpush2.bf16.msra.mxu0 %v5782_v10 }
 0x450   :  { %3648 = vmatpush1.bf16.msra.mxu1 %v8945_v45  ;;  %3620 = vmatprep.subr.bf16.mxu0 %v5783_v12  ;;  %v4616_v45 = vcombine.low %v9913_v52, %v9913_v52  ;;  %v11148_v12 = vld [vmem:[#allocation29_spill] sm:$0xff] }
 0x451   :  { %3649 = vmatprep.subr.bf16.mxu1 %v8952_v58  ;;  %v10097_v58 = vld [vmem:[%s10385_s0 + $0x11c] sm:$0xff] }
 0x452   :  { %v4620_v10 = vcombine.low %v10097_v58, %v10097_v58 }
 0x453   :  { %3621 = vmatpush2.bf16.msra.mxu0 %v5784_v14  ;;  %v11149_v14 = vld [vmem:[#allocation53_spill] sm:$0xff] }
 0x454   :  { %3650 = vmatpush2.bf16.msra.mxu1 %v8959_v24  ;;  %3622 = vmatprep.subr.bf16.mxu0 %v5785_v21  ;;  %v5787_v24 = vld [vmem:[%s10384_s1 + $0x774] ss:$8 sps:$4 sm:$0xff]   ;;  %v11150_v21 = vld [vmem:[#allocation18_spill] sm:$0xff] }
 0x455   :  { %3651 = vmatprep.subr.bf16.mxu1 %v8966_v62  ;;  %v4621_v62 = vcombine.high %v10097_v58, %v10097_v58 }
 0x457   :  { %3623 = vmatpush2.bf16.msra.mxu0 %v5786_v13 }
 0x458   :  { %3652 = vmatpush2.bf16.msra.mxu1 %v8978_v43  ;;  %3674 = vmatprep.subr.bf16.mxu0 %v5787_v24  ;;  %v5788_v43 = vld [vmem:[%s10384_s1 + $0x770] ss:$8 sps:$4 sm:$0xff]  }
 0x459   :  { %3653 = vmatprep.subr.bf16.mxu1 %v8990_v22 }
 0x45a   :  { %v3257_v52 = vpop.f32.mrf.mxu0  ;;  %3625 = vmatmul.mubr.bf16.vlgmr.msra.gmra.mxu0 %v4616_v45  ;;  %v11151_v45 = vld [vmem:[#allocation7_spill] sm:$0xff] }
 0x45b   :  { %v3258_v56 = vadd.f32 %v3257_v52, %v9942_v51  ;;  %3675 = vmatpush1.bf16.msra.mxu0 %v5788_v43  ;;  %3706 = vmatprep.mubr.bf16.mxu0 %v4621_v62  ;;  %v11152_v62 = vld [vmem:[#allocation55_spill] sm:$0xff] }
 0x45c   :  { %3654 = vmatpush2.bf16.msra.mxu1 %v9002_v1  ;;  %v3259_v22 = vpop.f32.mrf.mxu0  ;;  %3676 = vmatprep.subr.bf16.mxu0 %v5789_v49  ;;  %v11153_v52 = vld [vmem:[#allocation31_spill] sm:$0xff]  ;;  %v11156_v49 = vmov 0  }
 0x45d   :  { %3655 = vmatprep.subr.bf16.mxu1 %v9014_v18  ;;  %v3299_v34 = vadd.f32 %v10016_v53, %v3258_v56  ;;  %v3260_v7 = vadd.f32 %v3259_v22, %v9945_v11  ;;  %v11127_v18 = vmax.f32 %v8393_v15, %v8850_v17  ;;  %v5791_v11 = vld [vmem:[%s10384_s1 + $0x754] ss:$8 sps:$4 sm:$0xff]   ;;  %v5792_v15 = vld [vmem:[%s10384_s1 + $0x750] ss:$8 sps:$4 sm:$0xff]   ;;  %v5793_v17 = vld [vmem:[%s10384_s1 + $0x744] ss:$8 sps:$4 sm:$0xff]  }
 0x45e   :  { %v3261_v51 = vpop.f32.mrf.mxu0  ;;  %v11154_v43 = vld [vmem:[#allocation19_spill] sm:$0xff]  ;;  %v11155_v22 = vld [vmem:[#allocation8_spill] sm:$0xff] }
 0x45f   :  { %v3301_v1 = vadd.f32 %v10022_v40, %v3260_v7  ;;  %3677 = vmatpush1.bf16.msra.mxu0 %v5790_v57  ;;  %v10128_v33 = vmax.f32 %v11127_v18, %v3299_v34  ;;  %v11157_v7 = vld [vmem:[#allocation57_spill] sm:$0xff]  ;;  %v11159_v57 = vld [vmem:[#allocation20_spill] sm:$0xff] }
 0x460   :  { %3656 = vmatpush2.bf16.msra.mxu1 %v9026_v20  ;;  %v3262_v28 = vpop.f32.mrf.mxu0  ;;  %3678 = vmatprep.subr.bf16.mxu0 %v5791_v11  ;;  %v11128_v20 = vmax.f32 %v8397_v19, %v8854_v26  ;;  %v5794_v19 = vld [vmem:[%s10384_s1 + $0x740] ss:$8 sps:$4 sm:$0xff]   ;;  %v5795_v26 = vld [vmem:[%s10384_s1 + $0x734] ss:$8 sps:$4 sm:$0xff]  }
 0x461   :  { %3657 = vmatprep.subr.bf16.mxu1 %v9038_v30  ;;  %v5796_v30 = vld [vmem:[%s10384_s1 + $0x730] ss:$8 sps:$4 sm:$0xff]   ;;  %v11161_v28 = vld [vmem:[#allocation59_spill] sm:$0xff] }
 0x462   :  { %v10137_v53 = vmax.f32 %v11128_v20, %v3301_v1  ;;  %v11158_v51 = vld [vmem:[#allocation33_spill] sm:$0xff]  ;;  %v11162_v11 = vld [vmem:[#allocation35_spill] sm:$0xff] }
 0x463   :  { %3679 = vmatpush1.bf16.msra.mxu0 %v5792_v15  ;;  %v11160_v18 = vld [vmem:[#allocation9_spill] sm:$0xff] }
 0x464   :  { %3658 = vmatpush2.bf16.msra.mxu1 %v9050_v32  ;;  %3680 = vmatprep.subr.bf16.mxu0 %v5793_v17  ;;  %v5797_v32 = vld [vmem:[%s10384_s1 + $0x724] ss:$8 sps:$4 sm:$0xff]   ;;  %v11163_v20 = vld [vmem:[#allocation21_spill] sm:$0xff]  ;;  %v11165_v17 = vld [vmem:[#allocation24_spill] sm:$0xff] }
 0x465   :  { %3659 = vmatprep.subr.bf16.mxu1 %v9062_v36  ;;  %v4618_v36 = vcombine.low %v10000_v44, %v10000_v44  ;;  %v11164_v15 = vld [vmem:[#allocation37_spill] sm:$0xff] }
 0x467   :  { %3681 = vmatpush1.bf16.msra.mxu0 %v5794_v19  ;;  %v11166_v19 = vld [vmem:[#allocation10_spill] sm:$0xff] }
 0x468   :  { %3660 = vmatpush2.bf16.msra.mxu1 %v9074_v38  ;;  %3682 = vmatprep.subr.bf16.mxu0 %v5795_v26  ;;  %v10168_v38 = vld [vmem:[%s10385_s0 + $0x124] sm:$0xff] }
 0x469   :  { %3661 = vmatprep.subr.bf16.mxu1 %v9086_v42  ;;  %v5798_v42 = vld [vmem:[%s10384_s1 + $0x720] ss:$8 sps:$4 sm:$0xff]  }
 0x46a   :  { %v11167_v26 = vld [vmem:[#allocation63_spill] sm:$0xff] }
 0x46b   :  { %3683 = vmatpush1.bf16.msra.mxu0 %v5796_v30  ;;  %v11168_v30 = vld [vmem:[#allocation39_spill] sm:$0xff] }
 0x46c   :  { %3662 = vmatpush2.bf16.msra.mxu1 %v9098_v50  ;;  %3684 = vmatprep.subr.bf16.mxu0 %v5797_v32  ;;  %v5799_v50 = vld [vmem:[%s10384_s1 + $0x714] ss:$8 sps:$4 sm:$0xff]   ;;  %v11169_v32 = vld [vmem:[#allocation26_spill] sm:$0xff] }
 0x46d   :  { %3663 = vmatprep.subr.bf16.mxu1 %v9110_v3  ;;  %v4623_v3 = vcombine.high %v10168_v38, %v10168_v38 }
 0x46f   :  { %3685 = vmatpush1.bf16.msra.mxu0 %v5798_v42  ;;  %v11171_v42 = vld [vmem:[#allocation65_spill] sm:$0xff] }
 0x470   :  { %3664 = vmatpush2.bf16.msra.mxu1 %v9131_v54  ;;  %3686 = vmatprep.subr.bf16.mxu0 %v5799_v50  ;;  %v5800_v54 = vld [vmem:[%s10384_s1 + $0x710] ss:$8 sps:$4 sm:$0xff]   ;;  %v11172_v50 = vld [vmem:[#allocation43_spill] sm:$0xff] }
 0x471   :  { %3715 = vmatprep.subr.bf16.mxu1 %v9143_v46 }
 0x473   :  { %v3421_v44 = vpop.f32.mrf.mxu1  ;;  %3666 = vmatmul.mubr.bf16.vlgmr.msra.gmra.mxu1 %v4618_v36  ;;  %3687 = vmatpush1.bf16.msra.mxu0 %v5800_v54  ;;  %v11170_v36 = vld [vmem:[#allocation41_spill] sm:$0xff]  ;;  %v11173_v54 = vld [vmem:[#allocation28_spill] sm:$0xff] }
 0x474   :  { %3716 = vmatpush1.bf16.msra.mxu1 %v9159_v35  ;;  %3688 = vmatprep.subr.bf16.mxu0 %v5801_v39  ;;  %v5803_v35 = vld [vmem:[%s10384_s1 + $0x7f4] ss:$8 sps:$4 sm:$0xff]  }
 0x475   :  { %v3423_v40 = vpop.f32.mrf.mxu1  ;;  %3717 = vmatprep.subr.bf16.mxu1 %v9171_v59  ;;  %3747 = vmatprep.mubr.bf16.mxu1 %v4623_v3  ;;  %v5804_v59 = vld [vmem:[%s10384_s1 + $0x7f0] ss:$8 sps:$4 sm:$0xff]   ;;  %v4622_v3 = vcombine.low %v10168_v38, %v10168_v38 }
 0x477   :  { %v3425_v46 = vpop.f32.mrf.mxu1  ;;  %3689 = vmatpush1.bf16.msra.mxu0 %v5802_v16 }
 0x478   :  { %3718 = vmatpush1.bf16.msra.mxu1 %v9186_v61  ;;  %3690 = vmatprep.subr.bf16.mxu0 %v5803_v35  ;;  %v11129_v61 = vld [vmem:[#allocation11_spill] sm:$0xff] }
 0x479   :  { %v3426_v29 = vpop.f32.mrf.mxu1  ;;  %3719 = vmatprep.subr.bf16.mxu1 %v9198_v60  ;;  %v11130_v60 = vld [vmem:[#allocation2_spill] sm:$0xff] }
 0x47b   :  { %3691 = vmatpush2.bf16.msra.mxu0 %v5804_v59 }
 0x47c   :  { %3720 = vmatpush1.bf16.msra.mxu1 %v9210_v31  ;;  %3692 = vmatprep.subr.bf16.mxu0 %v8972_v0  ;;  %v11132_v31 = vld [vmem:[#allocation22_spill] sm:$0xff]  ;;  %v11133_v0 = vld [vmem:[#allocation13_spill] sm:$0xff] }
 0x47d   :  { %3721 = vmatprep.subr.bf16.mxu1 %v9222_v47  ;;  %v11134_v47 = vld [vmem:[#allocation3_spill] sm:$0xff] }
 0x47f   :  { %3693 = vmatpush2.bf16.msra.mxu0 %v8984_v23  ;;  %v11135_v23 = vld [vmem:[#allocation14_spill] sm:$0xff] }
 0x480   :  { %3722 = vmatpush1.bf16.msra.mxu1 %v9234_v48  ;;  %3694 = vmatprep.subr.bf16.mxu0 %v8996_v25  ;;  %v11136_v48 = vld [vmem:[#allocation23_spill] sm:$0xff] }
 0x481   :  { %3723 = vmatprep.subr.bf16.mxu1 %v9246_v55  ;;  %v11137_v25 = vld [vmem:[#allocation47_spill] sm:$0xff]  ;;  %v11138_v55 = vld [vmem:[#allocation4_spill] sm:$0xff] }
 0x483   :  { %3695 = vmatpush2.bf16.msra.mxu0 %v9008_v27  ;;  %v11139_v27 = vld [vmem:[#allocation15_spill] sm:$0xff] }
 0x484   :  { %3724 = vmatpush1.bf16.msra.mxu1 %v11129_v61  ;;  %3696 = vmatprep.subr.bf16.mxu0 %v11130_v60 }
 0x485   :  { %3725 = vmatprep.subr.bf16.mxu1 %v11131_v9 }
 0x487   :  { %3697 = vmatpush2.bf16.msra.mxu0 %v11132_v31 }
 0x488   :  { %3726 = vmatpush1.bf16.msra.mxu1 %v11133_v0  ;;  %3698 = vmatprep.subr.bf16.mxu0 %v11134_v47  ;;  %v5264_v47 = vld [vmem:[%s10386_s3 + $0x78] sm:$0xff]  }
 0x489   :  { %3727 = vmatprep.subr.bf16.mxu1 %v11135_v23  ;;  %v5265_v23 = vld [vmem:[%s10386_s3 + $0x38] sm:$0xff]  }
 0x48b   :  { %3699 = vmatpush2.bf16.msra.mxu0 %v11136_v48  ;;  %v5266_v48 = vld [vmem:[%s10386_s3 + $0x70] sm:$0xff]  }
 0x48c   :  { %3728 = vmatpush1.bf16.msra.mxu1 %v11137_v25  ;;  %3700 = vmatprep.subr.bf16.mxu0 %v11138_v55  ;;  %v5267_v25 = vld [vmem:[%s10386_s3 + $0x30] sm:$0xff]   ;;  %v5268_v55 = vld [vmem:[%s10386_s3 + $0x68] sm:$0xff]  }
 0x48d   :  { %3729 = vmatprep.subr.bf16.mxu1 %v11139_v27  ;;  %v5269_v27 = vld [vmem:[%s10386_s3 + $0x28] sm:$0xff]  }
 0x48f   :  { %3701 = vmatpush2.bf16.msra.mxu0 %v11140_v63  ;;  %v5270_v63 = vld [vmem:[%s10386_s3 + $0x60] sm:$0xff]  }
 0x490   :  { %3730 = vmatpush1.bf16.msra.mxu1 %v11141_v5  ;;  %3702 = vmatprep.subr.bf16.mxu0 %v11142_v37  ;;  %v5271_v5 = vld [vmem:[%s10386_s3 + $0x20] sm:$0xff]   ;;  %v5272_v37 = vld [vmem:[%s10386_s3 + $0x58] sm:$0xff]  }
 0x491   :  { %3731 = vmatprep.subr.bf16.mxu1 %v11143_v2  ;;  %v5273_v2 = vld [vmem:[%s10386_s3 + $0x18] sm:$0xff]  }
 0x493   :  { %3703 = vmatpush2.bf16.msra.mxu0 %v11144_v41 }
 0x494   :  { %3732 = vmatpush2.bf16.msra.mxu1 %v11145_v4  ;;  %3704 = vmatprep.subr.bf16.mxu0 %v11146_v6 }
 0x495   :  { %3733 = vmatprep.subr.bf16.mxu1 %v11147_v8  ;;  %v5274_v8 = vld [vmem:[%s10386_s3 + $0x50] sm:$0xff]  }
 0x497   :  { %3705 = vmatpush2.bf16.msra.mxu0 %v11148_v12  ;;  %v5275_v12 = vld [vmem:[%s10386_s3 + $0x10] sm:$0xff]  }
 0x498   :  { %3734 = vmatpush2.bf16.msra.mxu1 %v11149_v14  ;;  %3760 = vmatprep.subr.bf16.mxu0 %v11151_v45  ;;  %v5276_v45 = vld [vmem:[%s10386_s3 + $0x48] sm:$0xff]  }
 0x499   :  { %3735 = vmatprep.subr.bf16.mxu1 %v11150_v21 }
 0x49a   :  { %v3462_v13 = vpop.f32.mrf.mxu0  ;;  %3707 = vmatmul.mubr.bf16.vlgmr.msra.gmra.mxu0 %v4620_v10 }
 0x49b   :  { %v3463_v24 = vadd.f32 %v3462_v13, %v3421_v44  ;;  %3761 = vmatpush1.bf16.msra.mxu0 %v11153_v52  ;;  %3788 = vmatprep.mubr.bf16.mxu0 %v11156_v49  ;;  %v5263_v44 = vld [vmem:[%s10385_s0 + $0x12c] ss:$0 sps:$4 sm:$0xff]   ;;  %v5806_v52 = vmov 0.0   ;;  %v5283_v49 = vld [vmem:[%s10387_s5 + $0x20] sm:$0xff]  }
 0x49c   :  { %3736 = vmatpush2.bf16.msra.mxu1 %v11152_v62  ;;  %v3464_v56 = vpop.f32.mrf.mxu0  ;;  %3762 = vmatprep.subr.bf16.mxu0 %v11155_v22  ;;  %v5277_v13 = vld [vmem:[%s10386_s3 + $0x8] sm:$0xff]   ;;  %v5279_v62 = vld [vmem:[%s10386_s3] sm:$0xff]   ;;  %v5281_v22 = vld [vmem:[%s10387_s5 + $0x30] sm:$0xff]  }
 0x49d   :  { %3737 = vmatprep.subr.bf16.mxu1 %v11154_v43  ;;  %v3465_v58 = vadd.f32 %v3464_v56, %v3423_v40  ;;  %v11174_v40 = vld [vmem:[#allocation45_spill] sm:$0xff] }
 0x49e   :  { %v3466_v34 = vpop.f32.mrf.mxu0  ;;  %v5280_v56 = vld [vmem:[%s10387_s5 + $0x38] ss:$0 sps:$4 sm:$0xff]  }
 0x49f   :  { %3763 = vmatpush1.bf16.msra.mxu0 %v11158_v51  ;;  %v4067_v43 = vsel %vm4065_vm1, %v5280_v56, 0  ;;  %v5284_v34 = vld [vmem:[%s10387_s5 + $0x18] sm:$0xff]  }
 0x4a0   :  { %3738 = vmatpush2.bf16.msra.mxu1 %v11157_v7  ;;  %v3467_v1 = vpop.f32.mrf.mxu0  ;;  %3764 = vmatprep.subr.bf16.mxu0 %v11160_v18 }
 0x4a1   :  { %3739 = vmatprep.subr.bf16.mxu1 %v11159_v57 }
 0x4a3   :  { %3765 = vmatpush1.bf16.msra.mxu0 %v11162_v11 }
 0x4a4   :  { %3740 = vmatpush2.bf16.msra.mxu1 %v11161_v28  ;;  %3766 = vmatprep.subr.bf16.mxu0 %v11164_v15 }
 0x4a5   :  { %3741 = vmatprep.subr.bf16.mxu1 %v11163_v20 }
 0x4a7   :  { %3767 = vmatpush1.bf16.msra.mxu0 %v11166_v19 }
 0x4a8   :  { %3742 = vmatpush2.bf16.msra.mxu1 %v11165_v17  ;;  %3768 = vmatprep.subr.bf16.mxu0 %v11168_v30 }
 0x4a9   :  { %3743 = vmatprep.subr.bf16.mxu1 %v11167_v26 }
 0x4ab   :  { %3769 = vmatpush1.bf16.msra.mxu0 %v11170_v36  ;;  %v3801_v36 = vlaneseq }
 0x4ac   :  { %3744 = vmatpush2.bf16.msra.mxu1 %v11169_v32  ;;  %3770 = vmatprep.subr.bf16.mxu0 %v11172_v50 }
 0x4ad   :  { %3745 = vmatprep.subr.bf16.mxu1 %v11171_v42  ;;  %v3802_v42 = vshrl.u32 %v3801_v36, 7 }
 0x4af   :  { %3771 = vmatpush1.bf16.msra.mxu0 %v11174_v40 }
 0x4b0   :  { %3746 = vmatpush2.bf16.msra.mxu1 %v11173_v54  ;;  %4661 = vmatprep.subr.bf16.mxu0 %v5264_v47  ;;  %v3803_v54 = vsub.s32 0, %v3802_v42 }
 0x4b1   :  { %4699 = vmatprep.subr.bf16.mxu1 %v5806_v52 }
 0x4b2   :  { %4625 = vmatmul.mubr.msk.bf16.vlgmr.msra.gmra.mxu0 %vm1909_vm0, %v5263_v44 }
 0x4b3   :  { %v3503_v39 = vpop.f32.mrf.mxu1  ;;  %3748 = vmatmul.mubr.bf16.vlgmr.msra.gmra.mxu1 %v4622_v3  ;;  %4662 = vmatpush3.bf16.msra.mxu0 %v5265_v23 }
 0x4b4   :  { %v3504_v46 = vadd.f32 %v3503_v39, %v3463_v24  ;;  %4663 = vmatprep.subr.bf16.mxu0 %v5266_v48  ;;  %v5278_v24 = vld [vmem:[%s10386_s3 + $0x40] sm:$0xff]   ;;  %4700 = vmatpush3.bf16.msra.mxu1 %v4067_v43 }
 0x4b5   :  { %v3505_v16 = vpop.f32.mrf.mxu1  ;;  %4701 = vmatprep.subr.bf16.mxu1 %v5806_v52  ;;  %4715 = vmatprep.mubr.msk.bf16.mxu1 %vm5807_vm2, %v5806_v52 }
 0x4b6   :  { %v3506_v29 = vadd.f32 %v3505_v16, %v3465_v58  ;;  %v5282_v58 = vld [vmem:[%s10387_s5 + $0x28] sm:$0xff]  }
 0x4b7   :  { %v3507_v35 = vpop.f32.mrf.mxu1  ;;  %4664 = vmatpush3.bf16.msra.mxu0 %v5267_v25 }
 0x4b8   :  { %4665 = vmatprep.subr.bf16.mxu0 %v5268_v55  ;;  %4702 = vmatpush3.bf16.msra.mxu1 %v5281_v22  ;;  %v3807_v35 = vsub.s32 1, %v3802_v42 }
 0x4b9   :  { %v3508_v59 = vpop.f32.mrf.mxu1  ;;  %4703 = vmatprep.subr.bf16.mxu1 %v5806_v52 }
 0x4bb   :  { %4666 = vmatpush3.bf16.msra.mxu0 %v5269_v27 }
 0x4bc   :  { %4667 = vmatprep.subr.bf16.mxu0 %v5270_v63  ;;  %4704 = vmatpush3.bf16.msra.mxu1 %v5282_v58 }
 0x4bd   :  { %4705 = vmatprep.subr.bf16.mxu1 %v5806_v52 }
 0x4bf   :  { %4668 = vmatpush3.bf16.msra.mxu0 %v5271_v5 }
 0x4c0   :  { %4669 = vmatprep.subr.bf16.mxu0 %v5272_v37  ;;  %4706 = vmatpush3.bf16.msra.mxu1 %v5283_v49 }
 0x4c1   :  { %4707 = vmatprep.subr.bf16.mxu1 %v5806_v52 }
 0x4c3   :  { %4670 = vmatpush3.bf16.msra.mxu0 %v5273_v2 }
 0x4c4   :  { %4671 = vmatprep.subr.bf16.mxu0 %v5274_v8  ;;  %4708 = vmatpush3.bf16.msra.mxu1 %v5284_v34  ;;  %v5288_v8 = vld [vmem:[%s10389_s7 + $0x28] ss:$0 sps:$4 sm:$0x33]  }
 0x4c5   :  { %4709 = vmatprep.subr.bf16.mxu1 %v5806_v52  ;;  %v5292_v34 = vld [vmem:[%s10389_s7 + $0x8] sm:$0xff]  }
 0x4c7   :  { %4672 = vmatpush3.bf16.msra.mxu0 %v5275_v12  ;;  %v5289_v12 = vld [vmem:[%s10389_s7 + $0x20] sm:$0xff]  }
 0x4c8   :  { %4673 = vmatprep.subr.bf16.mxu0 %v5276_v45 }
 0x4cb   :  { %4674 = vmatpush3.bf16.msra.mxu0 %v5277_v13  ;;  %v4626_v13 = vld [vmem:[%s10390_s4] ss:$0 sm:$0xff] }
 0x4cc   :  { %4675 = vmatprep.subr.bf16.mxu0 %v5278_v24 }
 0x4cf   :  { %4676 = vmatpush3.bf16.msra.mxu0 %v5279_v62 }
 0x4d0   :  { %4719 = vmatprep.subr.bf16.mxu0 %v5806_v52 }
 0x4da   :  { %v3544_v61 = vpop.f32.mrf.mxu0 }
 0x4db   :  { %v3545_v60 = vadd.f32 %v3544_v61, %v3504_v46  ;;  %v3799_v46 = vld [vmem:[%s10388_s2] sm:$0x3] }
 0x4dc   :  { %v3546_v38 = vpop.f32.mrf.mxu0  ;;  %v3808_v48 = vrot.slane %v3799_v46, %v3807_v35 }
 0x4dd   :  { %v3547_v9 = vadd.f32 %v3546_v38, %v3506_v29  ;;  %v3804_v38 = vrot.slane %v3799_v46, %v3803_v54 }
 0x4de   :  { %v3548_v31 = vpop.f32.mrf.mxu0 }
 0x4e0   :  { %v3549_v0 = vpop.f32.mrf.mxu0 }
 0x4f3   :  { %v3585_v41 = vpop.f32.mrf.mxu1 }
 0x4f4   :  { %v3586_v4 = vadd.f32 %v3585_v41, %v3545_v60 }
 0x4f5   :  { %v3587_v6 = vpop.f32.mrf.mxu1 }
 0x4f6   :  { %v3588_v10 = vadd.f32 %v3587_v6, %v3547_v9  ;;  %v5285_v6 = vld [vmem:[%s10387_s5 + $0x10] sm:$0xff]  }
 0x4f7   :  { %v3589_v14 = vpop.f32.mrf.mxu1  ;;  %4710 = vmatpush3.bf16.msra.mxu1 %v5285_v6 }
 0x4f8   :  { %4711 = vmatprep.subr.bf16.mxu1 %v5806_v52  ;;  %v5290_v14 = vld [vmem:[%s10389_s7 + $0x18] sm:$0xff]  }
 0x4f9   :  { %v3590_v21 = vpop.f32.mrf.mxu1 }
 0x4fa   :  { %v5291_v21 = vld [vmem:[%s10389_s7 + $0x10] sm:$0xff]  }
 0x51a   :  { %v3626_v7 = vpop.f32.mrf.mxu0 }
 0x51b   :  { %v3627_v51 = vadd.f32 %v3626_v7, %v3586_v4  ;;  %v5293_v7 = vld [vmem:[%s10389_s7] sm:$0xff]  }
 0x51c   :  { %v3628_v1 = vpop.f32.mrf.mxu0 }
 0x51d   :  { %v3629_v57 = vadd.f32 %v3628_v1, %v3588_v10  ;;  %v4168_v10 = vsel %vm4166_vm3, %v5288_v8, 0 }
 0x51e   :  { %v3630_v18 = vpop.f32.mrf.mxu0 }
 0x520   :  { %v3631_v28 = vpop.f32.mrf.mxu0 }
 0x533   :  { %v3667_v11 = vpop.f32.mrf.mxu1 }
 0x534   :  { %v3668_v50 = vadd.f32 %v3667_v11, %v3627_v51  ;;  %v4643_v51 = vld [vmem:[%s10391_s6] ss:$0 sm:$0xff] }
 0x535   :  { %v3669_v20 = vpop.f32.mrf.mxu1 }
 0x536   :  { %v3670_v3 = vadd.f32 %v3669_v20, %v3629_v57 }
 0x537   :  { %v3671_v15 = vpop.f32.mrf.mxu1 }
 0x539   :  { %v3672_v17 = vpop.f32.mrf.mxu1 }
 0x55a   :  { %v3708_v19 = vpop.f32.mrf.mxu0 }
 0x55b   :  { %v3709_v44 = vadd.f32 %v3708_v19, %v3668_v50 }
 0x55c   :  { %v3710_v26 = vpop.f32.mrf.mxu0 }
 0x55d   :  { %v3711_v16 = vadd.f32 %v3710_v26, %v3670_v3 }
 0x55e   :  { %v3712_v30 = vpop.f32.mrf.mxu0 }
 0x560   :  { %v3713_v32 = vpop.f32.mrf.mxu0 }
 0x572   :  { %v3790_v39 = vpop.f32.mrf.mxu0 }
 0x573   :  { %v3749_v40 = vpop.f32.mrf.mxu1 }
 0x574   :  { %v3750_v29 = vadd.f32 %v3749_v40, %v3709_v44  ;;  %v3792_v61 = vpop.f32.mrf.mxu0 }
 0x575   :  { %v3751_v59 = vpop.f32.mrf.mxu1 }
 0x576   :  { %v3791_v60 = vadd.f32 %v3790_v39, %v3750_v29  ;;  %v3752_v9 = vadd.f32 %v3751_v59, %v3711_v16  ;;  %v3794_v0 = vpop.f32.mrf.mxu0 }
 0x577   :  { %v3753_v31 = vpop.f32.mrf.mxu1 }
 0x578   :  { %v3797_v47 = vmax.f32 %v10128_v33, %v3791_v60  ;;  %v3793_v23 = vadd.f32 %v3792_v61, %v3752_v9  ;;  %v3795_v55 = vpop.f32.mrf.mxu0  ;;  %v5286_v33 = vld [vmem:[%s10387_s5 + $0x8] sm:$0xff]  }
 0x579   :  { %v3754_v25 = vpop.f32.mrf.mxu1  ;;  %4712 = vmatpush3.bf16.msra.mxu1 %v5286_v33 }
 0x57a   :  { %v3811_v27 = vadd.f32 %v3804_v38, %v3797_v47  ;;  %v3798_v63 = vmax.f32 %v10137_v53, %v3793_v23  ;;  %4713 = vmatprep.subr.bf16.mxu1 %v5806_v52  ;;  %v5287_v53 = vld [vmem:[%s10387_s5] sm:$0xff]  }
 0x57c   :  { %v3812_v5 = vadd.f32 %v3808_v48, %v3798_v63  ;;  %v3813_v37 = vmax.f32 %v3811_v27, 0.0 }
 0x57d   :  { %4714 = vmatpush3.bf16.msra.mxu1 %v5287_v53 }
 0x57e   :  { %v3814_v2 = vmax.f32 %v3812_v5, 0.0  ;;  %v3815_v4 = vpack.c.bf16 %v3813_v37, %v3813_v37 }
 0x580   :  { %v3816_v41 = vpack.c.bf16 %v3814_v2, %v3814_v2 }
 0x582   :  { %3984 = vmatprep.mubr.bf16.mxu0 %v3816_v41 }
 0x583   :  { %3985 = vmatmul.mubr.bf16.vlgmr.msra.gmra.mxu0 %v3815_v4 }
 0x584   :  { %4731 = vmatprep.mubr.msk.bf16.mxu0 %vm5807_vm2, %v5806_v52  ;;  %4720 = vmatpush3.bf16.msra.mxu0 %v4168_v10 }
 0x585   :  { %4721 = vmatprep.subr.bf16.mxu0 %v5806_v52 }
 0x588   :  { %4722 = vmatpush3.bf16.msra.mxu0 %v5289_v12 }
 0x589   :  { %4723 = vmatprep.subr.bf16.mxu0 %v5806_v52 }
 0x58c   :  { %4724 = vmatpush3.bf16.msra.mxu0 %v5290_v14 }
 0x58d   :  { %4725 = vmatprep.subr.bf16.mxu0 %v5806_v52 }
 0x590   :  { %4726 = vmatpush3.bf16.msra.mxu0 %v5291_v21 }
 0x591   :  { %4727 = vmatprep.subr.bf16.mxu0 %v5806_v52 }
 0x594   :  { %4728 = vmatpush3.bf16.msra.mxu0 %v5292_v34 }
 0x595   :  { %4729 = vmatprep.subr.bf16.mxu0 %v5806_v52  ;;  %v4653_v52 = vld [vmem:[%s10392_s8] ss:$0 sm:$0xff] }
 0x598   :  { %4730 = vmatpush3.bf16.msra.mxu0 %v5293_v7 }
 0x643   :  { %v4677_v45 = vpop.f32.mrf.mxu0 }
 0x645   :  { %v4678_v24 = vpop.f32.mrf.mxu0 }
 0x646   :  { %v4679_v62 = vadd.f32 %v4678_v24, %v4677_v45 }
 0x647   :  { %v4680_v56 = vpop.f32.mrf.mxu0 }
 0x648   :  { %v3987_v43 = vadd.f32 %v4679_v62, %v4626_v13 }
 0x649   :  { %v4681_v22 = vpop.f32.mrf.mxu0 }
 0x64a   :  { %v3992_v58 = vmax.f32 %v3987_v43, 0.0 }
 0x64c   :  { %v3993_v49 = vpack.c.bf16 %v3992_v58, %v3992_v58 }
 0x64e   :  { %4716 = vmatmul.mubr.msk.bf16.vlgmr.msra.gmra.mxu1 %vm4061_vm4, %v3993_v49 }
 0x70e   :  { %v4103_v1 = vpop.f32.mrf.mxu1 }
 0x70f   :  { %v4104_v57 = vadd.f32 %v4643_v51, %v4103_v1 }
 0x710   :  { %v4717_v18 = vpop.f32.mrf.mxu1 }
 0x711   :  { %v4109_v28 = vmax.f32 %v4104_v57, 0.0 }
 0x712   :  { %v4106_v11 = vpop.f32.mrf.mxu1 }
 0x713   :  { %v4110_v20 = vpack.c.bf16 %v4109_v28, %v4109_v28 }
 0x714   :  { %v4718_v15 = vpop.f32.mrf.mxu1 }
 0x715   :  { %4732 = vmatmul.mubr.msk.bf16.vlgmr.msra.gmra.mxu0 %vm4162_vm5, %v4110_v20 }
 0x7d5   :  { %v4204_v17 = vpop.f32.mrf.mxu0 }
 0x7d6   :  { %v4205_v19 = vadd.f32 %v4653_v52, %v4204_v17 }
 0x7d7   :  { %v4733_v26 = vpop.f32.mrf.mxu0 }
 0x7d8   :  { %4211 = vst.msk [vmem:[%s10393_s9] sm:$0xff] %vm4210_vm6, %v4205_v19 }
 0x7d9   :  { %v4207_v30 = vpop.f32.mrf.mxu0 }
 0x7db   :  { %v4734_v32 = vpop.f32.mrf.mxu0 }

</bundles_post_ra>
